<compile_context>
chip_gen: v6e
topology: v6e:2x2x1
jax: 0.10.0
libtpu: 0.0.40
codegen_flags: <defaults>
</compile_context>

<pallas_src>
import math

import jax
import jax.numpy as jnp
from jax.experimental import pallas as pl
from jax.experimental.pallas import tpu as pltpu


_BRANCH_KEYS = ("in_w", "in_b", "wqkv", "bqkv", "wo", "bo", "ln1g", "ln1b",
                "w1", "b1", "w2", "b2", "ln2g", "ln2b", "fng", "fnb")


# ----------------------------------------------------------------------------
# In-kernel helpers
# ----------------------------------------------------------------------------
def _mm(a, b):
    """2-D MXU matmul, bf16 operands, f32 accumulation."""
    return jnp.dot(a.astype(jnp.bfloat16), b.astype(jnp.bfloat16),
                   preferred_element_type=jnp.float32)


def _bmm(eq, a, b):
    """Batched (3-D) MXU einsum, bf16 operands, f32 accumulation."""
    return jnp.einsum(eq, a.astype(jnp.bfloat16), b.astype(jnp.bfloat16),
                      preferred_element_type=jnp.float32)


def _gelu_tanh(x):
    # TODO(synk): PyTorch 'gelu' is the exact erf GELU; erf has no clean Mosaic
    # lowering, so the tanh approximation is used (max abs deviation ~1e-3).
    return 0.5 * x * (1.0 + jnp.tanh(0.7978845608028654 * (x + 0.044715 * x * x * x)))


def _layernorm(x, g, b, eps=1e-5):
    mu = jnp.mean(x, axis=-1, keepdims=True)
    var = jnp.mean((x - mu) ** 2, axis=-1, keepdims=True)
    return (x - mu) * jax.lax.rsqrt(var + eps) * g + b


def _encoder_branch(x, p, nh, L, B, S):
    """Input Linear+ReLU -> L post-norm encoder layers -> final LN -> seq mean.

    x: (B*S, F_in) f32 values.  p: dict of weight values (stacked over layers).
    Returns (B, H) f32.
    """
    H = p["in_w"].shape[-1]
    hd = H // nh
    scale = 1.0 / math.sqrt(hd)

    # input projection + ReLU
    x = jnp.maximum(_mm(x, p["in_w"]) + p["in_b"], 0.0)              # (BS, H)

    for l in range(L):                                               # static unroll
        # ---- multi-head self-attention (fused QKV projection) ----
        qkv = _mm(x, p["wqkv"][l]) + p["bqkv"][l]                    # (BS, 3H)
        q = (qkv[:, :H] * scale).reshape(B, S, H)
        k = qkv[:, H:2 * H].reshape(B, S, H)
        v = qkv[:, 2 * H:].reshape(B, S, H)

        wo = p["wo"][l]
        attn = None
        for h in range(nh):                                          # static unroll
            sl = slice(h * hd, (h + 1) * hd)
            s = _bmm('bqd,bkd->bqk', q[:, :, sl], k[:, :, sl])       # (B, S, S)
            s = s - jnp.max(s, axis=-1, keepdims=True)
            e = jnp.exp(s)
            e = e * pl.reciprocal(jnp.sum(e, axis=-1, keepdims=True), approx=True)
            head = _bmm('bqk,bkd->bqd', e, v[:, :, sl])              # (B, S, hd)
            # fold this head straight through its row-block of W_o (no concat)
            contrib = _mm(head.reshape(B * S, hd), wo[sl, :])        # (BS, H)
            attn = contrib if attn is None else attn + contrib
        attn = attn + p["bo"][l]

        # ---- residual + LayerNorm 1 (post-norm, PyTorch norm_first=False) ----
        y = _layernorm(x + attn, p["ln1g"][l], p["ln1b"][l])

        # ---- feed-forward: linear1 -> GELU -> linear2 ----
        h1 = _gelu_tanh(_mm(y, p["w1"][l]) + p["b1"][l])
        h2 = _mm(h1, p["w2"][l]) + p["b2"][l]

        # ---- residual + LayerNorm 2 ----
        x = _layernorm(y + h2, p["ln2g"][l], p["ln2b"][l])

    # final nn.TransformerEncoder norm, then mean over the sequence dim
    x = _layernorm(x, p["fng"], p["fnb"])                            # (BS, H)
    return jnp.mean(x.reshape(B, S, H), axis=1)                      # (B, H)


# ----------------------------------------------------------------------------
# Fused kernel
# ----------------------------------------------------------------------------
def make_fused_kernel(B, S, L, nh_gaze, nh_me):
    n_branch = len(_BRANCH_KEYS)

    def kernel(*refs):
        other_ref, candi_ref = refs[0], refs[1]
        g_refs = refs[2:2 + n_branch]
        m_refs = refs[2 + n_branch:2 + 2 * n_branch]
        clf_w_ref = refs[2 + 2 * n_branch]
        clf_b_ref = refs[3 + 2 * n_branch]
        out_ref = refs[4 + 2 * n_branch]

        gp = {kk: r[...] for kk, r in zip(_BRANCH_KEYS, g_refs)}
        mp = {kk: r[...] for kk, r in zip(_BRANCH_KEYS, m_refs)}

        other_mean = _encoder_branch(other_ref[...], gp, nh_gaze, L, B, S)  # (B, Hg)
        me_mean = _encoder_branch(candi_ref[...], mp, nh_me, L, B, S)       # (B, Hm)

        # classifier: mean-pooled concat -> Linear -> Sigmoid.  The lane concat
        # is avoided by splitting the classifier weight into its two row blocks.
        hg = other_mean.shape[-1]
        clf_w = clf_w_ref[...]
        logits = (_mm(other_mean, clf_w[:hg, :]) + _mm(me_mean, clf_w[hg:, :])
                  + clf_b_ref[...])
        out_ref[...] = jax.nn.sigmoid(logits)

    return kernel


def _full_spec(shape):
    n = len(shape)
    return pl.BlockSpec(shape, lambda i, _n=n: (0,) * _n)


def att_me_other_forward(talk, candi, right, middle, left, params):
    del talk  # unused by the reference forward
    B, S, _ = right.shape
    L = params["layer_num"]
    nh_g = params["head_gaze"]
    nh_m = params["head_me"]
    out_dim = params["clf_w"].shape[-1]

    # tiny wrapper-side concat/reshape (layout plumbing only)
    other = jnp.concatenate([right, middle, left], axis=2).reshape(B * S, -1)
    candi2 = candi.reshape(B * S, -1)

    args = ([other, candi2]
            + [params["gaze"][k] for k in _BRANCH_KEYS]
            + [params["me"][k] for k in _BRANCH_KEYS]
            + [params["clf_w"], params["clf_b"]])

    return pl.pallas_call(
        make_fused_kernel(B, S, L, nh_g, nh_m),
        out_shape=jax.ShapeDtypeStruct((B, out_dim), jnp.float32),
        grid=(1,),
        in_specs=[_full_spec(a.shape) for a in args],
        out_specs=_full_spec((B, out_dim)),
        compiler_params=pltpu.CompilerParams(dimension_semantics=("arbitrary",)),
    )(*args)


# ----------------------------------------------------------------------------
# Parameter init (deterministic, synthetic)
# ----------------------------------------------------------------------------
def init_params(key, me_gaze_fea, me_gaze_hidden, gaze_fea, gaze_hidden,
                layer_num, head_gaze, head_me, out_dim):
    keys = iter(jax.random.split(key, 32))

    def nrm(shape, scale=0.1):
        return scale * jax.random.normal(next(keys), shape, dtype=jnp.float32)

    def branch(f_in, H, L):
        return {
            "in_w": nrm((f_in, H)), "in_b": jnp.zeros((1, H), jnp.float32),
            "wqkv": nrm((L, H, 3 * H)), "bqkv": jnp.zeros((L, 1, 3 * H), jnp.float32),
            "wo": nrm((L, H, H)), "bo": jnp.zeros((L, 1, H), jnp.float32),
            "ln1g": jnp.ones((L, 1, H), jnp.float32),
            "ln1b": jnp.zeros((L, 1, H), jnp.float32),
            "w1": nrm((L, H, H)), "b1": jnp.zeros((L, 1, H), jnp.float32),
            "w2": nrm((L, H, H)), "b2": jnp.zeros((L, 1, H), jnp.float32),
            "ln2g": jnp.ones((L, 1, H), jnp.float32),
            "ln2b": jnp.zeros((L, 1, H), jnp.float32),
            "fng": jnp.ones((1, H), jnp.float32),
            "fnb": jnp.zeros((1, H), jnp.float32),
        }

    return {
        "layer_num": layer_num,
        "head_gaze": head_gaze,
        "head_me": head_me,
        "gaze": branch(gaze_fea * 3, gaze_hidden, layer_num),
        "me": branch(me_gaze_fea, me_gaze_hidden, layer_num),
        "clf_w": nrm((gaze_hidden + me_gaze_hidden, out_dim)),
        "clf_b": jnp.zeros((1, out_dim), jnp.float32),
    }


if __name__ == "__main__":
    B, S = 2, 8
    me_gaze_fea, me_gaze_hidden = 6, 32
    gaze_fea, gaze_hidden = 4, 32
    layer_num, head_gaze, head_me, out_dim = 2, 4, 4, 8

    key = jax.random.PRNGKey(0)
    kp, kd = jax.random.split(key)
    params = init_params(kp, me_gaze_fea, me_gaze_hidden, gaze_fea, gaze_hidden,
                         layer_num, head_gaze, head_me, out_dim)

    dk = jax.random.split(kd, 5)
    talk = jax.random.normal(dk[0], (B, S, 1), jnp.float32)       # unused in forward
    candi = jax.random.normal(dk[1], (B, S, me_gaze_fea), jnp.float32)
    right = jax.random.normal(dk[2], (B, S, gaze_fea), jnp.float32)
    middle = jax.random.normal(dk[3], (B, S, gaze_fea), jnp.float32)
    left = jax.random.normal(dk[4], (B, S, gaze_fea), jnp.float32)

    out = att_me_other_forward(talk, candi, right, middle, left, params)
    out = jax.block_until_ready(out)
    assert out.shape == (B, out_dim) and bool(jnp.all(jnp.isfinite(out)))
    print("KERNEL_OK")
</pallas_src>

<mosaic_0001>
module attributes {stable_mosaic.version = 11 : i64} {
  func.func @kernel(%arg0: i32, %arg1: memref<16x12xf32, #tpu.memory_space<vmem>>, %arg2: memref<16x6xf32, #tpu.memory_space<vmem>>, %arg3: memref<12x32xf32, #tpu.memory_space<vmem>>, %arg4: memref<1x32xf32, #tpu.memory_space<vmem>>, %arg5: memref<2x32x96xf32, #tpu.memory_space<vmem>>, %arg6: memref<2x1x96xf32, #tpu.memory_space<vmem>>, %arg7: memref<2x32x32xf32, #tpu.memory_space<vmem>>, %arg8: memref<2x1x32xf32, #tpu.memory_space<vmem>>, %arg9: memref<2x1x32xf32, #tpu.memory_space<vmem>>, %arg10: memref<2x1x32xf32, #tpu.memory_space<vmem>>, %arg11: memref<2x32x32xf32, #tpu.memory_space<vmem>>, %arg12: memref<2x1x32xf32, #tpu.memory_space<vmem>>, %arg13: memref<2x32x32xf32, #tpu.memory_space<vmem>>, %arg14: memref<2x1x32xf32, #tpu.memory_space<vmem>>, %arg15: memref<2x1x32xf32, #tpu.memory_space<vmem>>, %arg16: memref<2x1x32xf32, #tpu.memory_space<vmem>>, %arg17: memref<1x32xf32, #tpu.memory_space<vmem>>, %arg18: memref<1x32xf32, #tpu.memory_space<vmem>>, %arg19: memref<6x32xf32, #tpu.memory_space<vmem>>, %arg20: memref<1x32xf32, #tpu.memory_space<vmem>>, %arg21: memref<2x32x96xf32, #tpu.memory_space<vmem>>, %arg22: memref<2x1x96xf32, #tpu.memory_space<vmem>>, %arg23: memref<2x32x32xf32, #tpu.memory_space<vmem>>, %arg24: memref<2x1x32xf32, #tpu.memory_space<vmem>>, %arg25: memref<2x1x32xf32, #tpu.memory_space<vmem>>, %arg26: memref<2x1x32xf32, #tpu.memory_space<vmem>>, %arg27: memref<2x32x32xf32, #tpu.memory_space<vmem>>, %arg28: memref<2x1x32xf32, #tpu.memory_space<vmem>>, %arg29: memref<2x32x32xf32, #tpu.memory_space<vmem>>, %arg30: memref<2x1x32xf32, #tpu.memory_space<vmem>>, %arg31: memref<2x1x32xf32, #tpu.memory_space<vmem>>, %arg32: memref<2x1x32xf32, #tpu.memory_space<vmem>>, %arg33: memref<1x32xf32, #tpu.memory_space<vmem>>, %arg34: memref<1x32xf32, #tpu.memory_space<vmem>>, %arg35: memref<64x8xf32, #tpu.memory_space<vmem>>, %arg36: memref<1x8xf32, #tpu.memory_space<vmem>>, %arg37: memref<2x8xf32, #tpu.memory_space<vmem>>) attributes {dimension_semantics = [#tpu.dimension_semantics<arbitrary>], iteration_bounds = array<i64: 1>, scalar_prefetch = 0 : i64, scratch_operands = 0 : i64, tpu.core_type = #tpu.core_type<tc>, window_params = [{pipeline_mode = #tpu.pipeline_mode<synchronous>, transform_indices = @transform_0, window_bounds = array<i64: 16, 12>}, {pipeline_mode = #tpu.pipeline_mode<synchronous>, transform_indices = @transform_1, window_bounds = array<i64: 16, 6>}, {pipeline_mode = #tpu.pipeline_mode<synchronous>, transform_indices = @transform_2, window_bounds = array<i64: 12, 32>}, {pipeline_mode = #tpu.pipeline_mode<synchronous>, transform_indices = @transform_3, window_bounds = array<i64: 1, 32>}, {pipeline_mode = #tpu.pipeline_mode<synchronous>, transform_indices = @transform_4, window_bounds = array<i64: 2, 32, 96>}, {pipeline_mode = #tpu.pipeline_mode<synchronous>, transform_indices = @transform_5, window_bounds = array<i64: 2, 1, 96>}, {pipeline_mode = #tpu.pipeline_mode<synchronous>, transform_indices = @transform_6, window_bounds = array<i64: 2, 32, 32>}, {pipeline_mode = #tpu.pipeline_mode<synchronous>, transform_indices = @transform_7, window_bounds = array<i64: 2, 1, 32>}, {pipeline_mode = #tpu.pipeline_mode<synchronous>, transform_indices = @transform_8, window_bounds = array<i64: 2, 1, 32>}, {pipeline_mode = #tpu.pipeline_mode<synchronous>, transform_indices = @transform_9, window_bounds = array<i64: 2, 1, 32>}, {pipeline_mode = #tpu.pipeline_mode<synchronous>, transform_indices = @transform_10, window_bounds = array<i64: 2, 32, 32>}, {pipeline_mode = #tpu.pipeline_mode<synchronous>, transform_indices = @transform_11, window_bounds = array<i64: 2, 1, 32>}, {pipeline_mode = #tpu.pipeline_mode<synchronous>, transform_indices = @transform_12, window_bounds = array<i64: 2, 32, 32>}, {pipeline_mode = #tpu.pipeline_mode<synchronous>, transform_indices = @transform_13, window_bounds = array<i64: 2, 1, 32>}, {pipeline_mode = #tpu.pipeline_mode<synchronous>, transform_indices = @transform_14, window_bounds = array<i64: 2, 1, 32>}, {pipeline_mode = #tpu.pipeline_mode<synchronous>, transform_indices = @transform_15, window_bounds = array<i64: 2, 1, 32>}, {pipeline_mode = #tpu.pipeline_mode<synchronous>, transform_indices = @transform_16, window_bounds = array<i64: 1, 32>}, {pipeline_mode = #tpu.pipeline_mode<synchronous>, transform_indices = @transform_17, window_bounds = array<i64: 1, 32>}, {pipeline_mode = #tpu.pipeline_mode<synchronous>, transform_indices = @transform_18, window_bounds = array<i64: 6, 32>}, {pipeline_mode = #tpu.pipeline_mode<synchronous>, transform_indices = @transform_19, window_bounds = array<i64: 1, 32>}, {pipeline_mode = #tpu.pipeline_mode<synchronous>, transform_indices = @transform_20, window_bounds = array<i64: 2, 32, 96>}, {pipeline_mode = #tpu.pipeline_mode<synchronous>, transform_indices = @transform_21, window_bounds = array<i64: 2, 1, 96>}, {pipeline_mode = #tpu.pipeline_mode<synchronous>, transform_indices = @transform_22, window_bounds = array<i64: 2, 32, 32>}, {pipeline_mode = #tpu.pipeline_mode<synchronous>, transform_indices = @transform_23, window_bounds = array<i64: 2, 1, 32>}, {pipeline_mode = #tpu.pipeline_mode<synchronous>, transform_indices = @transform_24, window_bounds = array<i64: 2, 1, 32>}, {pipeline_mode = #tpu.pipeline_mode<synchronous>, transform_indices = @transform_25, window_bounds = array<i64: 2, 1, 32>}, {pipeline_mode = #tpu.pipeline_mode<synchronous>, transform_indices = @transform_26, window_bounds = array<i64: 2, 32, 32>}, {pipeline_mode = #tpu.pipeline_mode<synchronous>, transform_indices = @transform_27, window_bounds = array<i64: 2, 1, 32>}, {pipeline_mode = #tpu.pipeline_mode<synchronous>, transform_indices = @transform_28, window_bounds = array<i64: 2, 32, 32>}, {pipeline_mode = #tpu.pipeline_mode<synchronous>, transform_indices = @transform_29, window_bounds = array<i64: 2, 1, 32>}, {pipeline_mode = #tpu.pipeline_mode<synchronous>, transform_indices = @transform_30, window_bounds = array<i64: 2, 1, 32>}, {pipeline_mode = #tpu.pipeline_mode<synchronous>, transform_indices = @transform_31, window_bounds = array<i64: 2, 1, 32>}, {pipeline_mode = #tpu.pipeline_mode<synchronous>, transform_indices = @transform_32, window_bounds = array<i64: 1, 32>}, {pipeline_mode = #tpu.pipeline_mode<synchronous>, transform_indices = @transform_33, window_bounds = array<i64: 1, 32>}, {pipeline_mode = #tpu.pipeline_mode<synchronous>, transform_indices = @transform_34, window_bounds = array<i64: 64, 8>}, {pipeline_mode = #tpu.pipeline_mode<synchronous>, transform_indices = @transform_35, window_bounds = array<i64: 1, 8>}, {pipeline_mode = #tpu.pipeline_mode<synchronous>, transform_indices = @transform_36, window_bounds = array<i64: 2, 8>}]} {
    %c0 = arith.constant 0 : index
    %c0_0 = arith.constant 0 : index
    %0 = vector.load %arg3[%c0, %c0_0] : memref<12x32xf32, #tpu.memory_space<vmem>>, vector<12x32xf32>
    %c0_1 = arith.constant 0 : index
    %c0_2 = arith.constant 0 : index
    %1 = vector.load %arg4[%c0_1, %c0_2] : memref<1x32xf32, #tpu.memory_space<vmem>>, vector<1x32xf32>
    %c0_3 = arith.constant 0 : index
    %c0_4 = arith.constant 0 : index
    %c0_5 = arith.constant 0 : index
    %2 = vector.load %arg5[%c0_3, %c0_4, %c0_5] : memref<2x32x96xf32, #tpu.memory_space<vmem>>, vector<2x32x96xf32>
    %c0_6 = arith.constant 0 : index
    %c0_7 = arith.constant 0 : index
    %c0_8 = arith.constant 0 : index
    %3 = vector.load %arg6[%c0_6, %c0_7, %c0_8] : memref<2x1x96xf32, #tpu.memory_space<vmem>>, vector<2x1x96xf32>
    %c0_9 = arith.constant 0 : index
    %c0_10 = arith.constant 0 : index
    %c0_11 = arith.constant 0 : index
    %4 = vector.load %arg7[%c0_9, %c0_10, %c0_11] : memref<2x32x32xf32, #tpu.memory_space<vmem>>, vector<2x32x32xf32>
    %c0_12 = arith.constant 0 : index
    %c0_13 = arith.constant 0 : index
    %c0_14 = arith.constant 0 : index
    %5 = vector.load %arg8[%c0_12, %c0_13, %c0_14] : memref<2x1x32xf32, #tpu.memory_space<vmem>>, vector<2x1x32xf32>
    %c0_15 = arith.constant 0 : index
    %c0_16 = arith.constant 0 : index
    %c0_17 = arith.constant 0 : index
    %6 = vector.load %arg9[%c0_15, %c0_16, %c0_17] : memref<2x1x32xf32, #tpu.memory_space<vmem>>, vector<2x1x32xf32>
    %c0_18 = arith.constant 0 : index
    %c0_19 = arith.constant 0 : index
    %c0_20 = arith.constant 0 : index
    %7 = vector.load %arg10[%c0_18, %c0_19, %c0_20] : memref<2x1x32xf32, #tpu.memory_space<vmem>>, vector<2x1x32xf32>
    %c0_21 = arith.constant 0 : index
    %c0_22 = arith.constant 0 : index
    %c0_23 = arith.constant 0 : index
    %8 = vector.load %arg11[%c0_21, %c0_22, %c0_23] : memref<2x32x32xf32, #tpu.memory_space<vmem>>, vector<2x32x32xf32>
    %c0_24 = arith.constant 0 : index
    %c0_25 = arith.constant 0 : index
    %c0_26 = arith.constant 0 : index
    %9 = vector.load %arg12[%c0_24, %c0_25, %c0_26] : memref<2x1x32xf32, #tpu.memory_space<vmem>>, vector<2x1x32xf32>
    %c0_27 = arith.constant 0 : index
    %c0_28 = arith.constant 0 : index
    %c0_29 = arith.constant 0 : index
    %10 = vector.load %arg13[%c0_27, %c0_28, %c0_29] : memref<2x32x32xf32, #tpu.memory_space<vmem>>, vector<2x32x32xf32>
    %c0_30 = arith.constant 0 : index
    %c0_31 = arith.constant 0 : index
    %c0_32 = arith.constant 0 : index
    %11 = vector.load %arg14[%c0_30, %c0_31, %c0_32] : memref<2x1x32xf32, #tpu.memory_space<vmem>>, vector<2x1x32xf32>
    %c0_33 = arith.constant 0 : index
    %c0_34 = arith.constant 0 : index
    %c0_35 = arith.constant 0 : index
    %12 = vector.load %arg15[%c0_33, %c0_34, %c0_35] : memref<2x1x32xf32, #tpu.memory_space<vmem>>, vector<2x1x32xf32>
    %c0_36 = arith.constant 0 : index
    %c0_37 = arith.constant 0 : index
    %c0_38 = arith.constant 0 : index
    %13 = vector.load %arg16[%c0_36, %c0_37, %c0_38] : memref<2x1x32xf32, #tpu.memory_space<vmem>>, vector<2x1x32xf32>
    %c0_39 = arith.constant 0 : index
    %c0_40 = arith.constant 0 : index
    %14 = vector.load %arg17[%c0_39, %c0_40] : memref<1x32xf32, #tpu.memory_space<vmem>>, vector<1x32xf32>
    %c0_41 = arith.constant 0 : index
    %c0_42 = arith.constant 0 : index
    %15 = vector.load %arg18[%c0_41, %c0_42] : memref<1x32xf32, #tpu.memory_space<vmem>>, vector<1x32xf32>
    %c0_43 = arith.constant 0 : index
    %c0_44 = arith.constant 0 : index
    %16 = vector.load %arg19[%c0_43, %c0_44] : memref<6x32xf32, #tpu.memory_space<vmem>>, vector<6x32xf32>
    %c0_45 = arith.constant 0 : index
    %c0_46 = arith.constant 0 : index
    %17 = vector.load %arg20[%c0_45, %c0_46] : memref<1x32xf32, #tpu.memory_space<vmem>>, vector<1x32xf32>
    %c0_47 = arith.constant 0 : index
    %c0_48 = arith.constant 0 : index
    %c0_49 = arith.constant 0 : index
    %18 = vector.load %arg21[%c0_47, %c0_48, %c0_49] : memref<2x32x96xf32, #tpu.memory_space<vmem>>, vector<2x32x96xf32>
    %c0_50 = arith.constant 0 : index
    %c0_51 = arith.constant 0 : index
    %c0_52 = arith.constant 0 : index
    %19 = vector.load %arg22[%c0_50, %c0_51, %c0_52] : memref<2x1x96xf32, #tpu.memory_space<vmem>>, vector<2x1x96xf32>
    %c0_53 = arith.constant 0 : index
    %c0_54 = arith.constant 0 : index
    %c0_55 = arith.constant 0 : index
    %20 = vector.load %arg23[%c0_53, %c0_54, %c0_55] : memref<2x32x32xf32, #tpu.memory_space<vmem>>, vector<2x32x32xf32>
    %c0_56 = arith.constant 0 : index
    %c0_57 = arith.constant 0 : index
    %c0_58 = arith.constant 0 : index
    %21 = vector.load %arg24[%c0_56, %c0_57, %c0_58] : memref<2x1x32xf32, #tpu.memory_space<vmem>>, vector<2x1x32xf32>
    %c0_59 = arith.constant 0 : index
    %c0_60 = arith.constant 0 : index
    %c0_61 = arith.constant 0 : index
    %22 = vector.load %arg25[%c0_59, %c0_60, %c0_61] : memref<2x1x32xf32, #tpu.memory_space<vmem>>, vector<2x1x32xf32>
    %c0_62 = arith.constant 0 : index
    %c0_63 = arith.constant 0 : index
    %c0_64 = arith.constant 0 : index
    %23 = vector.load %arg26[%c0_62, %c0_63, %c0_64] : memref<2x1x32xf32, #tpu.memory_space<vmem>>, vector<2x1x32xf32>
    %c0_65 = arith.constant 0 : index
    %c0_66 = arith.constant 0 : index
    %c0_67 = arith.constant 0 : index
    %24 = vector.load %arg27[%c0_65, %c0_66, %c0_67] : memref<2x32x32xf32, #tpu.memory_space<vmem>>, vector<2x32x32xf32>
    %c0_68 = arith.constant 0 : index
    %c0_69 = arith.constant 0 : index
    %c0_70 = arith.constant 0 : index
    %25 = vector.load %arg28[%c0_68, %c0_69, %c0_70] : memref<2x1x32xf32, #tpu.memory_space<vmem>>, vector<2x1x32xf32>
    %c0_71 = arith.constant 0 : index
    %c0_72 = arith.constant 0 : index
    %c0_73 = arith.constant 0 : index
    %26 = vector.load %arg29[%c0_71, %c0_72, %c0_73] : memref<2x32x32xf32, #tpu.memory_space<vmem>>, vector<2x32x32xf32>
    %c0_74 = arith.constant 0 : index
    %c0_75 = arith.constant 0 : index
    %c0_76 = arith.constant 0 : index
    %27 = vector.load %arg30[%c0_74, %c0_75, %c0_76] : memref<2x1x32xf32, #tpu.memory_space<vmem>>, vector<2x1x32xf32>
    %c0_77 = arith.constant 0 : index
    %c0_78 = arith.constant 0 : index
    %c0_79 = arith.constant 0 : index
    %28 = vector.load %arg31[%c0_77, %c0_78, %c0_79] : memref<2x1x32xf32, #tpu.memory_space<vmem>>, vector<2x1x32xf32>
    %c0_80 = arith.constant 0 : index
    %c0_81 = arith.constant 0 : index
    %c0_82 = arith.constant 0 : index
    %29 = vector.load %arg32[%c0_80, %c0_81, %c0_82] : memref<2x1x32xf32, #tpu.memory_space<vmem>>, vector<2x1x32xf32>
    %c0_83 = arith.constant 0 : index
    %c0_84 = arith.constant 0 : index
    %30 = vector.load %arg33[%c0_83, %c0_84] : memref<1x32xf32, #tpu.memory_space<vmem>>, vector<1x32xf32>
    %c0_85 = arith.constant 0 : index
    %c0_86 = arith.constant 0 : index
    %31 = vector.load %arg34[%c0_85, %c0_86] : memref<1x32xf32, #tpu.memory_space<vmem>>, vector<1x32xf32>
    %c0_87 = arith.constant 0 : index
    %c0_88 = arith.constant 0 : index
    %32 = vector.load %arg1[%c0_87, %c0_88] : memref<16x12xf32, #tpu.memory_space<vmem>>, vector<16x12xf32>
    %33 = arith.truncf %32 : vector<16x12xf32> to vector<16x12xbf16>
    %34 = arith.truncf %0 : vector<12x32xf32> to vector<12x32xbf16>
    %cst = arith.constant dense<0.000000e+00> : vector<16x32xf32>
    %35 = tpu.matmul %33, %34, %cst {dimension_numbers = #tpu.dot_dimension_numbers<[1], [0], [0], [1], [0, 0, 1, 1], [], []>} : vector<16x12xbf16>, vector<12x32xbf16>, vector<16x32xf32> -> vector<16x32xf32>
    %36 = vector.broadcast %1 : vector<1x32xf32> to vector<16x32xf32>
    %37 = arith.addf %35, %36 : vector<16x32xf32>
    %cst_89 = arith.constant 0.000000e+00 : f32
    %38 = vector.broadcast %cst_89 : f32 to vector<16x32xf32>
    %39 = arith.maximumf %37, %38 : vector<16x32xf32>
    %40 = vector.extract_strided_slice %2 {offsets = [0, 0, 0], sizes = [1, 32, 96], strides = [1, 1, 1]} : vector<2x32x96xf32> to vector<1x32x96xf32>
    %41 = vector.shape_cast %40 : vector<1x32x96xf32> to vector<32x96xf32>
    %42 = arith.truncf %39 : vector<16x32xf32> to vector<16x32xbf16>
    %43 = arith.truncf %41 : vector<32x96xf32> to vector<32x96xbf16>
    %cst_90 = arith.constant dense<0.000000e+00> : vector<16x96xf32>
    %44 = tpu.matmul %42, %43, %cst_90 {dimension_numbers = #tpu.dot_dimension_numbers<[1], [0], [0], [1], [0, 0, 1, 1], [], []>} : vector<16x32xbf16>, vector<32x96xbf16>, vector<16x96xf32> -> vector<16x96xf32>
    %45 = vector.extract_strided_slice %3 {offsets = [0, 0, 0], sizes = [1, 1, 96], strides = [1, 1, 1]} : vector<2x1x96xf32> to vector<1x1x96xf32>
    %46 = vector.shape_cast %45 : vector<1x1x96xf32> to vector<1x96xf32>
    %47 = vector.broadcast %46 : vector<1x96xf32> to vector<16x96xf32>
    %48 = arith.addf %44, %47 : vector<16x96xf32>
    %49 = vector.extract_strided_slice %48 {offsets = [0, 0], sizes = [16, 32], strides = [1, 1]} : vector<16x96xf32> to vector<16x32xf32>
    %cst_91 = arith.constant 0.353553385 : f32
    %50 = vector.broadcast %cst_91 : f32 to vector<16x32xf32>
    %51 = arith.mulf %49, %50 : vector<16x32xf32>
    %52 = vector.shape_cast %51 : vector<16x32xf32> to vector<2x8x32xf32>
    %53 = vector.extract_strided_slice %48 {offsets = [0, 32], sizes = [16, 32], strides = [1, 1]} : vector<16x96xf32> to vector<16x32xf32>
    %54 = vector.shape_cast %53 : vector<16x32xf32> to vector<2x8x32xf32>
    %55 = vector.extract_strided_slice %48 {offsets = [0, 64], sizes = [16, 32], strides = [1, 1]} : vector<16x96xf32> to vector<16x32xf32>
    %56 = vector.shape_cast %55 : vector<16x32xf32> to vector<2x8x32xf32>
    %57 = vector.extract_strided_slice %4 {offsets = [0, 0, 0], sizes = [1, 32, 32], strides = [1, 1, 1]} : vector<2x32x32xf32> to vector<1x32x32xf32>
    %58 = vector.shape_cast %57 : vector<1x32x32xf32> to vector<32x32xf32>
    %59 = vector.extract_strided_slice %52 {offsets = [0, 0, 0], sizes = [2, 8, 8], strides = [1, 1, 1]} : vector<2x8x32xf32> to vector<2x8x8xf32>
    %60 = vector.extract_strided_slice %54 {offsets = [0, 0, 0], sizes = [2, 8, 8], strides = [1, 1, 1]} : vector<2x8x32xf32> to vector<2x8x8xf32>
    %61 = arith.truncf %59 : vector<2x8x8xf32> to vector<2x8x8xbf16>
    %62 = arith.truncf %60 : vector<2x8x8xf32> to vector<2x8x8xbf16>
    "tpu.trace_start"() <{level = 10 : i32, message = "bqd,bkd->bqk"}> : () -> ()
    %cst_92 = arith.constant dense<0.000000e+00> : vector<2x8x8xf32>
    %63 = tpu.matmul %61, %62, %cst_92 {dimension_numbers = #tpu.dot_dimension_numbers<[2], [2], [1], [1], [0, 0, 0, 1, 1, 1], [0], [0]>} : vector<2x8x8xbf16>, vector<2x8x8xbf16>, vector<2x8x8xf32> -> vector<2x8x8xf32>
    "tpu.trace_stop"() : () -> ()
    %cst_93 = arith.constant dense<0xFF800000> : vector<2x8xf32>
    %64 = vector.multi_reduction <maximumf>, %63, %cst_93 [2] : vector<2x8x8xf32> to vector<2x8xf32>
    %65 = vector.shape_cast %64 : vector<2x8xf32> to vector<2x8x1xf32>
    %66 = vector.broadcast %65 : vector<2x8x1xf32> to vector<2x8x8xf32>
    %67 = arith.subf %63, %66 : vector<2x8x8xf32>
    %68 = math.exp %67 : vector<2x8x8xf32>
    %cst_94 = arith.constant dense<0.000000e+00> : vector<2x8xf32>
    %69 = vector.multi_reduction <add>, %68, %cst_94 [2] : vector<2x8x8xf32> to vector<2x8xf32>
    %70 = vector.shape_cast %69 : vector<2x8xf32> to vector<2x8x1xf32>
    %71 = tpu.reciprocal %70 {approx = true} : vector<2x8x1xf32> -> vector<2x8x1xf32>
    %72 = vector.broadcast %71 : vector<2x8x1xf32> to vector<2x8x8xf32>
    %73 = arith.mulf %68, %72 : vector<2x8x8xf32>
    %74 = vector.extract_strided_slice %56 {offsets = [0, 0, 0], sizes = [2, 8, 8], strides = [1, 1, 1]} : vector<2x8x32xf32> to vector<2x8x8xf32>
    %75 = arith.truncf %73 : vector<2x8x8xf32> to vector<2x8x8xbf16>
    %76 = arith.truncf %74 : vector<2x8x8xf32> to vector<2x8x8xbf16>
    "tpu.trace_start"() <{level = 10 : i32, message = "bqk,bkd->bqd"}> : () -> ()
    %cst_95 = arith.constant dense<0.000000e+00> : vector<2x8x8xf32>
    %77 = tpu.matmul %75, %76, %cst_95 {dimension_numbers = #tpu.dot_dimension_numbers<[2], [1], [1], [2], [0, 0, 0, 1, 1, 2], [0], [0]>} : vector<2x8x8xbf16>, vector<2x8x8xbf16>, vector<2x8x8xf32> -> vector<2x8x8xf32>
    "tpu.trace_stop"() : () -> ()
    %78 = vector.shape_cast %77 : vector<2x8x8xf32> to vector<16x8xf32>
    %79 = vector.extract_strided_slice %58 {offsets = [0, 0], sizes = [8, 32], strides = [1, 1]} : vector<32x32xf32> to vector<8x32xf32>
    %80 = arith.truncf %78 : vector<16x8xf32> to vector<16x8xbf16>
    %81 = arith.truncf %79 : vector<8x32xf32> to vector<8x32xbf16>
    %cst_96 = arith.constant dense<0.000000e+00> : vector<16x32xf32>
    %82 = tpu.matmul %80, %81, %cst_96 {dimension_numbers = #tpu.dot_dimension_numbers<[1], [0], [0], [1], [0, 0, 1, 1], [], []>} : vector<16x8xbf16>, vector<8x32xbf16>, vector<16x32xf32> -> vector<16x32xf32>
    %83 = vector.extract_strided_slice %52 {offsets = [0, 0, 8], sizes = [2, 8, 8], strides = [1, 1, 1]} : vector<2x8x32xf32> to vector<2x8x8xf32>
    %84 = vector.extract_strided_slice %54 {offsets = [0, 0, 8], sizes = [2, 8, 8], strides = [1, 1, 1]} : vector<2x8x32xf32> to vector<2x8x8xf32>
    %85 = arith.truncf %83 : vector<2x8x8xf32> to vector<2x8x8xbf16>
    %86 = arith.truncf %84 : vector<2x8x8xf32> to vector<2x8x8xbf16>
    "tpu.trace_start"() <{level = 10 : i32, message = "bqd,bkd->bqk"}> : () -> ()
    %cst_97 = arith.constant dense<0.000000e+00> : vector<2x8x8xf32>
    %87 = tpu.matmul %85, %86, %cst_97 {dimension_numbers = #tpu.dot_dimension_numbers<[2], [2], [1], [1], [0, 0, 0, 1, 1, 1], [0], [0]>} : vector<2x8x8xbf16>, vector<2x8x8xbf16>, vector<2x8x8xf32> -> vector<2x8x8xf32>
    "tpu.trace_stop"() : () -> ()
    %cst_98 = arith.constant dense<0xFF800000> : vector<2x8xf32>
    %88 = vector.multi_reduction <maximumf>, %87, %cst_98 [2] : vector<2x8x8xf32> to vector<2x8xf32>
    %89 = vector.shape_cast %88 : vector<2x8xf32> to vector<2x8x1xf32>
    %90 = vector.broadcast %89 : vector<2x8x1xf32> to vector<2x8x8xf32>
    %91 = arith.subf %87, %90 : vector<2x8x8xf32>
    %92 = math.exp %91 : vector<2x8x8xf32>
    %cst_99 = arith.constant dense<0.000000e+00> : vector<2x8xf32>
    %93 = vector.multi_reduction <add>, %92, %cst_99 [2] : vector<2x8x8xf32> to vector<2x8xf32>
    %94 = vector.shape_cast %93 : vector<2x8xf32> to vector<2x8x1xf32>
    %95 = tpu.reciprocal %94 {approx = true} : vector<2x8x1xf32> -> vector<2x8x1xf32>
    %96 = vector.broadcast %95 : vector<2x8x1xf32> to vector<2x8x8xf32>
    %97 = arith.mulf %92, %96 : vector<2x8x8xf32>
    %98 = vector.extract_strided_slice %56 {offsets = [0, 0, 8], sizes = [2, 8, 8], strides = [1, 1, 1]} : vector<2x8x32xf32> to vector<2x8x8xf32>
    %99 = arith.truncf %97 : vector<2x8x8xf32> to vector<2x8x8xbf16>
    %100 = arith.truncf %98 : vector<2x8x8xf32> to vector<2x8x8xbf16>
    "tpu.trace_start"() <{level = 10 : i32, message = "bqk,bkd->bqd"}> : () -> ()
    %cst_100 = arith.constant dense<0.000000e+00> : vector<2x8x8xf32>
    %101 = tpu.matmul %99, %100, %cst_100 {dimension_numbers = #tpu.dot_dimension_numbers<[2], [1], [1], [2], [0, 0, 0, 1, 1, 2], [0], [0]>} : vector<2x8x8xbf16>, vector<2x8x8xbf16>, vector<2x8x8xf32> -> vector<2x8x8xf32>
    "tpu.trace_stop"() : () -> ()
    %102 = vector.shape_cast %101 : vector<2x8x8xf32> to vector<16x8xf32>
    %103 = vector.extract_strided_slice %58 {offsets = [8, 0], sizes = [8, 32], strides = [1, 1]} : vector<32x32xf32> to vector<8x32xf32>
    %104 = arith.truncf %102 : vector<16x8xf32> to vector<16x8xbf16>
    %105 = arith.truncf %103 : vector<8x32xf32> to vector<8x32xbf16>
    %cst_101 = arith.constant dense<0.000000e+00> : vector<16x32xf32>
    %106 = tpu.matmul %104, %105, %cst_101 {dimension_numbers = #tpu.dot_dimension_numbers<[1], [0], [0], [1], [0, 0, 1, 1], [], []>} : vector<16x8xbf16>, vector<8x32xbf16>, vector<16x32xf32> -> vector<16x32xf32>
    %107 = arith.addf %82, %106 : vector<16x32xf32>
    %108 = vector.extract_strided_slice %52 {offsets = [0, 0, 16], sizes = [2, 8, 8], strides = [1, 1, 1]} : vector<2x8x32xf32> to vector<2x8x8xf32>
    %109 = vector.extract_strided_slice %54 {offsets = [0, 0, 16], sizes = [2, 8, 8], strides = [1, 1, 1]} : vector<2x8x32xf32> to vector<2x8x8xf32>
    %110 = arith.truncf %108 : vector<2x8x8xf32> to vector<2x8x8xbf16>
    %111 = arith.truncf %109 : vector<2x8x8xf32> to vector<2x8x8xbf16>
    "tpu.trace_start"() <{level = 10 : i32, message = "bqd,bkd->bqk"}> : () -> ()
    %cst_102 = arith.constant dense<0.000000e+00> : vector<2x8x8xf32>
    %112 = tpu.matmul %110, %111, %cst_102 {dimension_numbers = #tpu.dot_dimension_numbers<[2], [2], [1], [1], [0, 0, 0, 1, 1, 1], [0], [0]>} : vector<2x8x8xbf16>, vector<2x8x8xbf16>, vector<2x8x8xf32> -> vector<2x8x8xf32>
    "tpu.trace_stop"() : () -> ()
    %cst_103 = arith.constant dense<0xFF800000> : vector<2x8xf32>
    %113 = vector.multi_reduction <maximumf>, %112, %cst_103 [2] : vector<2x8x8xf32> to vector<2x8xf32>
    %114 = vector.shape_cast %113 : vector<2x8xf32> to vector<2x8x1xf32>
    %115 = vector.broadcast %114 : vector<2x8x1xf32> to vector<2x8x8xf32>
    %116 = arith.subf %112, %115 : vector<2x8x8xf32>
    %117 = math.exp %116 : vector<2x8x8xf32>
    %cst_104 = arith.constant dense<0.000000e+00> : vector<2x8xf32>
    %118 = vector.multi_reduction <add>, %117, %cst_104 [2] : vector<2x8x8xf32> to vector<2x8xf32>
    %119 = vector.shape_cast %118 : vector<2x8xf32> to vector<2x8x1xf32>
    %120 = tpu.reciprocal %119 {approx = true} : vector<2x8x1xf32> -> vector<2x8x1xf32>
    %121 = vector.broadcast %120 : vector<2x8x1xf32> to vector<2x8x8xf32>
    %122 = arith.mulf %117, %121 : vector<2x8x8xf32>
    %123 = vector.extract_strided_slice %56 {offsets = [0, 0, 16], sizes = [2, 8, 8], strides = [1, 1, 1]} : vector<2x8x32xf32> to vector<2x8x8xf32>
    %124 = arith.truncf %122 : vector<2x8x8xf32> to vector<2x8x8xbf16>
    %125 = arith.truncf %123 : vector<2x8x8xf32> to vector<2x8x8xbf16>
    "tpu.trace_start"() <{level = 10 : i32, message = "bqk,bkd->bqd"}> : () -> ()
    %cst_105 = arith.constant dense<0.000000e+00> : vector<2x8x8xf32>
    %126 = tpu.matmul %124, %125, %cst_105 {dimension_numbers = #tpu.dot_dimension_numbers<[2], [1], [1], [2], [0, 0, 0, 1, 1, 2], [0], [0]>} : vector<2x8x8xbf16>, vector<2x8x8xbf16>, vector<2x8x8xf32> -> vector<2x8x8xf32>
    "tpu.trace_stop"() : () -> ()
    %127 = vector.shape_cast %126 : vector<2x8x8xf32> to vector<16x8xf32>
    %128 = vector.extract_strided_slice %58 {offsets = [16, 0], sizes = [8, 32], strides = [1, 1]} : vector<32x32xf32> to vector<8x32xf32>
    %129 = arith.truncf %127 : vector<16x8xf32> to vector<16x8xbf16>
    %130 = arith.truncf %128 : vector<8x32xf32> to vector<8x32xbf16>
    %cst_106 = arith.constant dense<0.000000e+00> : vector<16x32xf32>
    %131 = tpu.matmul %129, %130, %cst_106 {dimension_numbers = #tpu.dot_dimension_numbers<[1], [0], [0], [1], [0, 0, 1, 1], [], []>} : vector<16x8xbf16>, vector<8x32xbf16>, vector<16x32xf32> -> vector<16x32xf32>
    %132 = arith.addf %107, %131 : vector<16x32xf32>
    %133 = vector.extract_strided_slice %52 {offsets = [0, 0, 24], sizes = [2, 8, 8], strides = [1, 1, 1]} : vector<2x8x32xf32> to vector<2x8x8xf32>
    %134 = vector.extract_strided_slice %54 {offsets = [0, 0, 24], sizes = [2, 8, 8], strides = [1, 1, 1]} : vector<2x8x32xf32> to vector<2x8x8xf32>
    %135 = arith.truncf %133 : vector<2x8x8xf32> to vector<2x8x8xbf16>
    %136 = arith.truncf %134 : vector<2x8x8xf32> to vector<2x8x8xbf16>
    "tpu.trace_start"() <{level = 10 : i32, message = "bqd,bkd->bqk"}> : () -> ()
    %cst_107 = arith.constant dense<0.000000e+00> : vector<2x8x8xf32>
    %137 = tpu.matmul %135, %136, %cst_107 {dimension_numbers = #tpu.dot_dimension_numbers<[2], [2], [1], [1], [0, 0, 0, 1, 1, 1], [0], [0]>} : vector<2x8x8xbf16>, vector<2x8x8xbf16>, vector<2x8x8xf32> -> vector<2x8x8xf32>
    "tpu.trace_stop"() : () -> ()
    %cst_108 = arith.constant dense<0xFF800000> : vector<2x8xf32>
    %138 = vector.multi_reduction <maximumf>, %137, %cst_108 [2] : vector<2x8x8xf32> to vector<2x8xf32>
    %139 = vector.shape_cast %138 : vector<2x8xf32> to vector<2x8x1xf32>
    %140 = vector.broadcast %139 : vector<2x8x1xf32> to vector<2x8x8xf32>
    %141 = arith.subf %137, %140 : vector<2x8x8xf32>
    %142 = math.exp %141 : vector<2x8x8xf32>
    %cst_109 = arith.constant dense<0.000000e+00> : vector<2x8xf32>
    %143 = vector.multi_reduction <add>, %142, %cst_109 [2] : vector<2x8x8xf32> to vector<2x8xf32>
    %144 = vector.shape_cast %143 : vector<2x8xf32> to vector<2x8x1xf32>
    %145 = tpu.reciprocal %144 {approx = true} : vector<2x8x1xf32> -> vector<2x8x1xf32>
    %146 = vector.broadcast %145 : vector<2x8x1xf32> to vector<2x8x8xf32>
    %147 = arith.mulf %142, %146 : vector<2x8x8xf32>
    %148 = vector.extract_strided_slice %56 {offsets = [0, 0, 24], sizes = [2, 8, 8], strides = [1, 1, 1]} : vector<2x8x32xf32> to vector<2x8x8xf32>
    %149 = arith.truncf %147 : vector<2x8x8xf32> to vector<2x8x8xbf16>
    %150 = arith.truncf %148 : vector<2x8x8xf32> to vector<2x8x8xbf16>
    "tpu.trace_start"() <{level = 10 : i32, message = "bqk,bkd->bqd"}> : () -> ()
    %cst_110 = arith.constant dense<0.000000e+00> : vector<2x8x8xf32>
    %151 = tpu.matmul %149, %150, %cst_110 {dimension_numbers = #tpu.dot_dimension_numbers<[2], [1], [1], [2], [0, 0, 0, 1, 1, 2], [0], [0]>} : vector<2x8x8xbf16>, vector<2x8x8xbf16>, vector<2x8x8xf32> -> vector<2x8x8xf32>
    "tpu.trace_stop"() : () -> ()
    %152 = vector.shape_cast %151 : vector<2x8x8xf32> to vector<16x8xf32>
    %153 = vector.extract_strided_slice %58 {offsets = [24, 0], sizes = [8, 32], strides = [1, 1]} : vector<32x32xf32> to vector<8x32xf32>
    %154 = arith.truncf %152 : vector<16x8xf32> to vector<16x8xbf16>
    %155 = arith.truncf %153 : vector<8x32xf32> to vector<8x32xbf16>
    %cst_111 = arith.constant dense<0.000000e+00> : vector<16x32xf32>
    %156 = tpu.matmul %154, %155, %cst_111 {dimension_numbers = #tpu.dot_dimension_numbers<[1], [0], [0], [1], [0, 0, 1, 1], [], []>} : vector<16x8xbf16>, vector<8x32xbf16>, vector<16x32xf32> -> vector<16x32xf32>
    %157 = arith.addf %132, %156 : vector<16x32xf32>
    %158 = vector.extract_strided_slice %5 {offsets = [0, 0, 0], sizes = [1, 1, 32], strides = [1, 1, 1]} : vector<2x1x32xf32> to vector<1x1x32xf32>
    %159 = vector.shape_cast %158 : vector<1x1x32xf32> to vector<1x32xf32>
    %160 = vector.broadcast %159 : vector<1x32xf32> to vector<16x32xf32>
    %161 = arith.addf %157, %160 : vector<16x32xf32>
    %162 = arith.addf %39, %161 : vector<16x32xf32>
    %163 = vector.extract_strided_slice %6 {offsets = [0, 0, 0], sizes = [1, 1, 32], strides = [1, 1, 1]} : vector<2x1x32xf32> to vector<1x1x32xf32>
    %164 = vector.shape_cast %163 : vector<1x1x32xf32> to vector<1x32xf32>
    %165 = vector.extract_strided_slice %7 {offsets = [0, 0, 0], sizes = [1, 1, 32], strides = [1, 1, 1]} : vector<2x1x32xf32> to vector<1x1x32xf32>
    %166 = vector.shape_cast %165 : vector<1x1x32xf32> to vector<1x32xf32>
    %cst_112 = arith.constant dense<0.000000e+00> : vector<16xf32>
    %167 = vector.multi_reduction <add>, %162, %cst_112 [1] : vector<16x32xf32> to vector<16xf32>
    %168 = vector.shape_cast %167 : vector<16xf32> to vector<16x1xf32>
    %cst_113 = arith.constant 3.200000e+01 : f32
    %169 = vector.broadcast %cst_113 : f32 to vector<16x1xf32>
    %170 = arith.divf %168, %169 : vector<16x1xf32>
    %171 = vector.broadcast %170 : vector<16x1xf32> to vector<16x32xf32>
    %172 = arith.subf %162, %171 : vector<16x32xf32>
    %173 = arith.mulf %172, %172 : vector<16x32xf32>
    %cst_114 = arith.constant dense<0.000000e+00> : vector<16xf32>
    %174 = vector.multi_reduction <add>, %173, %cst_114 [1] : vector<16x32xf32> to vector<16xf32>
    %175 = vector.shape_cast %174 : vector<16xf32> to vector<16x1xf32>
    %cst_115 = arith.constant 3.200000e+01 : f32
    %176 = vector.broadcast %cst_115 : f32 to vector<16x1xf32>
    %177 = arith.divf %175, %176 : vector<16x1xf32>
    %178 = vector.broadcast %170 : vector<16x1xf32> to vector<16x32xf32>
    %179 = arith.subf %162, %178 : vector<16x32xf32>
    %cst_116 = arith.constant 9.99999974E-6 : f32
    %180 = vector.broadcast %cst_116 : f32 to vector<16x1xf32>
    %181 = arith.addf %177, %180 : vector<16x1xf32>
    %182 = math.rsqrt %181 : vector<16x1xf32>
    %183 = vector.broadcast %182 : vector<16x1xf32> to vector<16x32xf32>
    %184 = arith.mulf %179, %183 : vector<16x32xf32>
    %185 = vector.broadcast %164 : vector<1x32xf32> to vector<16x32xf32>
    %186 = arith.mulf %184, %185 : vector<16x32xf32>
    %187 = vector.broadcast %166 : vector<1x32xf32> to vector<16x32xf32>
    %188 = arith.addf %186, %187 : vector<16x32xf32>
    %189 = vector.extract_strided_slice %8 {offsets = [0, 0, 0], sizes = [1, 32, 32], strides = [1, 1, 1]} : vector<2x32x32xf32> to vector<1x32x32xf32>
    %190 = vector.shape_cast %189 : vector<1x32x32xf32> to vector<32x32xf32>
    %191 = arith.truncf %188 : vector<16x32xf32> to vector<16x32xbf16>
    %192 = arith.truncf %190 : vector<32x32xf32> to vector<32x32xbf16>
    %cst_117 = arith.constant dense<0.000000e+00> : vector<16x32xf32>
    %193 = tpu.matmul %191, %192, %cst_117 {dimension_numbers = #tpu.dot_dimension_numbers<[1], [0], [0], [1], [0, 0, 1, 1], [], []>} : vector<16x32xbf16>, vector<32x32xbf16>, vector<16x32xf32> -> vector<16x32xf32>
    %194 = vector.extract_strided_slice %9 {offsets = [0, 0, 0], sizes = [1, 1, 32], strides = [1, 1, 1]} : vector<2x1x32xf32> to vector<1x1x32xf32>
    %195 = vector.shape_cast %194 : vector<1x1x32xf32> to vector<1x32xf32>
    %196 = vector.broadcast %195 : vector<1x32xf32> to vector<16x32xf32>
    %197 = arith.addf %193, %196 : vector<16x32xf32>
    %cst_118 = arith.constant 5.000000e-01 : f32
    %198 = vector.broadcast %cst_118 : f32 to vector<16x32xf32>
    %199 = arith.mulf %198, %197 : vector<16x32xf32>
    %cst_119 = arith.constant 4.471500e-02 : f32
    %200 = vector.broadcast %cst_119 : f32 to vector<16x32xf32>
    %201 = arith.mulf %200, %197 : vector<16x32xf32>
    %202 = arith.mulf %201, %197 : vector<16x32xf32>
    %203 = arith.mulf %202, %197 : vector<16x32xf32>
    %204 = arith.addf %197, %203 : vector<16x32xf32>
    %cst_120 = arith.constant 0.797884583 : f32
    %205 = vector.broadcast %cst_120 : f32 to vector<16x32xf32>
    %206 = arith.mulf %205, %204 : vector<16x32xf32>
    %207 = math.tanh %206 : vector<16x32xf32>
    %cst_121 = arith.constant 1.000000e+00 : f32
    %208 = vector.broadcast %cst_121 : f32 to vector<16x32xf32>
    %209 = arith.addf %208, %207 : vector<16x32xf32>
    %210 = arith.mulf %199, %209 : vector<16x32xf32>
    %211 = vector.extract_strided_slice %10 {offsets = [0, 0, 0], sizes = [1, 32, 32], strides = [1, 1, 1]} : vector<2x32x32xf32> to vector<1x32x32xf32>
    %212 = vector.shape_cast %211 : vector<1x32x32xf32> to vector<32x32xf32>
    %213 = arith.truncf %210 : vector<16x32xf32> to vector<16x32xbf16>
    %214 = arith.truncf %212 : vector<32x32xf32> to vector<32x32xbf16>
    %cst_122 = arith.constant dense<0.000000e+00> : vector<16x32xf32>
    %215 = tpu.matmul %213, %214, %cst_122 {dimension_numbers = #tpu.dot_dimension_numbers<[1], [0], [0], [1], [0, 0, 1, 1], [], []>} : vector<16x32xbf16>, vector<32x32xbf16>, vector<16x32xf32> -> vector<16x32xf32>
    %216 = vector.extract_strided_slice %11 {offsets = [0, 0, 0], sizes = [1, 1, 32], strides = [1, 1, 1]} : vector<2x1x32xf32> to vector<1x1x32xf32>
    %217 = vector.shape_cast %216 : vector<1x1x32xf32> to vector<1x32xf32>
    %218 = vector.broadcast %217 : vector<1x32xf32> to vector<16x32xf32>
    %219 = arith.addf %215, %218 : vector<16x32xf32>
    %220 = arith.addf %188, %219 : vector<16x32xf32>
    %221 = vector.extract_strided_slice %12 {offsets = [0, 0, 0], sizes = [1, 1, 32], strides = [1, 1, 1]} : vector<2x1x32xf32> to vector<1x1x32xf32>
    %222 = vector.shape_cast %221 : vector<1x1x32xf32> to vector<1x32xf32>
    %223 = vector.extract_strided_slice %13 {offsets = [0, 0, 0], sizes = [1, 1, 32], strides = [1, 1, 1]} : vector<2x1x32xf32> to vector<1x1x32xf32>
    %224 = vector.shape_cast %223 : vector<1x1x32xf32> to vector<1x32xf32>
    %cst_123 = arith.constant dense<0.000000e+00> : vector<16xf32>
    %225 = vector.multi_reduction <add>, %220, %cst_123 [1] : vector<16x32xf32> to vector<16xf32>
    %226 = vector.shape_cast %225 : vector<16xf32> to vector<16x1xf32>
    %cst_124 = arith.constant 3.200000e+01 : f32
    %227 = vector.broadcast %cst_124 : f32 to vector<16x1xf32>
    %228 = arith.divf %226, %227 : vector<16x1xf32>
    %229 = vector.broadcast %228 : vector<16x1xf32> to vector<16x32xf32>
    %230 = arith.subf %220, %229 : vector<16x32xf32>
    %231 = arith.mulf %230, %230 : vector<16x32xf32>
    %cst_125 = arith.constant dense<0.000000e+00> : vector<16xf32>
    %232 = vector.multi_reduction <add>, %231, %cst_125 [1] : vector<16x32xf32> to vector<16xf32>
    %233 = vector.shape_cast %232 : vector<16xf32> to vector<16x1xf32>
    %cst_126 = arith.constant 3.200000e+01 : f32
    %234 = vector.broadcast %cst_126 : f32 to vector<16x1xf32>
    %235 = arith.divf %233, %234 : vector<16x1xf32>
    %236 = vector.broadcast %228 : vector<16x1xf32> to vector<16x32xf32>
    %237 = arith.subf %220, %236 : vector<16x32xf32>
    %cst_127 = arith.constant 9.99999974E-6 : f32
    %238 = vector.broadcast %cst_127 : f32 to vector<16x1xf32>
    %239 = arith.addf %235, %238 : vector<16x1xf32>
    %240 = math.rsqrt %239 : vector<16x1xf32>
    %241 = vector.broadcast %240 : vector<16x1xf32> to vector<16x32xf32>
    %242 = arith.mulf %237, %241 : vector<16x32xf32>
    %243 = vector.broadcast %222 : vector<1x32xf32> to vector<16x32xf32>
    %244 = arith.mulf %242, %243 : vector<16x32xf32>
    %245 = vector.broadcast %224 : vector<1x32xf32> to vector<16x32xf32>
    %246 = arith.addf %244, %245 : vector<16x32xf32>
    %247 = vector.extract_strided_slice %2 {offsets = [1, 0, 0], sizes = [1, 32, 96], strides = [1, 1, 1]} : vector<2x32x96xf32> to vector<1x32x96xf32>
    %248 = vector.shape_cast %247 : vector<1x32x96xf32> to vector<32x96xf32>
    %249 = arith.truncf %246 : vector<16x32xf32> to vector<16x32xbf16>
    %250 = arith.truncf %248 : vector<32x96xf32> to vector<32x96xbf16>
    %cst_128 = arith.constant dense<0.000000e+00> : vector<16x96xf32>
    %251 = tpu.matmul %249, %250, %cst_128 {dimension_numbers = #tpu.dot_dimension_numbers<[1], [0], [0], [1], [0, 0, 1, 1], [], []>} : vector<16x32xbf16>, vector<32x96xbf16>, vector<16x96xf32> -> vector<16x96xf32>
    %252 = vector.extract_strided_slice %3 {offsets = [1, 0, 0], sizes = [1, 1, 96], strides = [1, 1, 1]} : vector<2x1x96xf32> to vector<1x1x96xf32>
    %253 = vector.shape_cast %252 : vector<1x1x96xf32> to vector<1x96xf32>
    %254 = vector.broadcast %253 : vector<1x96xf32> to vector<16x96xf32>
    %255 = arith.addf %251, %254 : vector<16x96xf32>
    %256 = vector.extract_strided_slice %255 {offsets = [0, 0], sizes = [16, 32], strides = [1, 1]} : vector<16x96xf32> to vector<16x32xf32>
    %cst_129 = arith.constant 0.353553385 : f32
    %257 = vector.broadcast %cst_129 : f32 to vector<16x32xf32>
    %258 = arith.mulf %256, %257 : vector<16x32xf32>
    %259 = vector.shape_cast %258 : vector<16x32xf32> to vector<2x8x32xf32>
    %260 = vector.extract_strided_slice %255 {offsets = [0, 32], sizes = [16, 32], strides = [1, 1]} : vector<16x96xf32> to vector<16x32xf32>
    %261 = vector.shape_cast %260 : vector<16x32xf32> to vector<2x8x32xf32>
    %262 = vector.extract_strided_slice %255 {offsets = [0, 64], sizes = [16, 32], strides = [1, 1]} : vector<16x96xf32> to vector<16x32xf32>
    %263 = vector.shape_cast %262 : vector<16x32xf32> to vector<2x8x32xf32>
    %264 = vector.extract_strided_slice %4 {offsets = [1, 0, 0], sizes = [1, 32, 32], strides = [1, 1, 1]} : vector<2x32x32xf32> to vector<1x32x32xf32>
    %265 = vector.shape_cast %264 : vector<1x32x32xf32> to vector<32x32xf32>
    %266 = vector.extract_strided_slice %259 {offsets = [0, 0, 0], sizes = [2, 8, 8], strides = [1, 1, 1]} : vector<2x8x32xf32> to vector<2x8x8xf32>
    %267 = vector.extract_strided_slice %261 {offsets = [0, 0, 0], sizes = [2, 8, 8], strides = [1, 1, 1]} : vector<2x8x32xf32> to vector<2x8x8xf32>
    %268 = arith.truncf %266 : vector<2x8x8xf32> to vector<2x8x8xbf16>
    %269 = arith.truncf %267 : vector<2x8x8xf32> to vector<2x8x8xbf16>
    "tpu.trace_start"() <{level = 10 : i32, message = "bqd,bkd->bqk"}> : () -> ()
    %cst_130 = arith.constant dense<0.000000e+00> : vector<2x8x8xf32>
    %270 = tpu.matmul %268, %269, %cst_130 {dimension_numbers = #tpu.dot_dimension_numbers<[2], [2], [1], [1], [0, 0, 0, 1, 1, 1], [0], [0]>} : vector<2x8x8xbf16>, vector<2x8x8xbf16>, vector<2x8x8xf32> -> vector<2x8x8xf32>
    "tpu.trace_stop"() : () -> ()
    %cst_131 = arith.constant dense<0xFF800000> : vector<2x8xf32>
    %271 = vector.multi_reduction <maximumf>, %270, %cst_131 [2] : vector<2x8x8xf32> to vector<2x8xf32>
    %272 = vector.shape_cast %271 : vector<2x8xf32> to vector<2x8x1xf32>
    %273 = vector.broadcast %272 : vector<2x8x1xf32> to vector<2x8x8xf32>
    %274 = arith.subf %270, %273 : vector<2x8x8xf32>
    %275 = math.exp %274 : vector<2x8x8xf32>
    %cst_132 = arith.constant dense<0.000000e+00> : vector<2x8xf32>
    %276 = vector.multi_reduction <add>, %275, %cst_132 [2] : vector<2x8x8xf32> to vector<2x8xf32>
    %277 = vector.shape_cast %276 : vector<2x8xf32> to vector<2x8x1xf32>
    %278 = tpu.reciprocal %277 {approx = true} : vector<2x8x1xf32> -> vector<2x8x1xf32>
    %279 = vector.broadcast %278 : vector<2x8x1xf32> to vector<2x8x8xf32>
    %280 = arith.mulf %275, %279 : vector<2x8x8xf32>
    %281 = vector.extract_strided_slice %263 {offsets = [0, 0, 0], sizes = [2, 8, 8], strides = [1, 1, 1]} : vector<2x8x32xf32> to vector<2x8x8xf32>
    %282 = arith.truncf %280 : vector<2x8x8xf32> to vector<2x8x8xbf16>
    %283 = arith.truncf %281 : vector<2x8x8xf32> to vector<2x8x8xbf16>
    "tpu.trace_start"() <{level = 10 : i32, message = "bqk,bkd->bqd"}> : () -> ()
    %cst_133 = arith.constant dense<0.000000e+00> : vector<2x8x8xf32>
    %284 = tpu.matmul %282, %283, %cst_133 {dimension_numbers = #tpu.dot_dimension_numbers<[2], [1], [1], [2], [0, 0, 0, 1, 1, 2], [0], [0]>} : vector<2x8x8xbf16>, vector<2x8x8xbf16>, vector<2x8x8xf32> -> vector<2x8x8xf32>
    "tpu.trace_stop"() : () -> ()
    %285 = vector.shape_cast %284 : vector<2x8x8xf32> to vector<16x8xf32>
    %286 = vector.extract_strided_slice %265 {offsets = [0, 0], sizes = [8, 32], strides = [1, 1]} : vector<32x32xf32> to vector<8x32xf32>
    %287 = arith.truncf %285 : vector<16x8xf32> to vector<16x8xbf16>
    %288 = arith.truncf %286 : vector<8x32xf32> to vector<8x32xbf16>
    %cst_134 = arith.constant dense<0.000000e+00> : vector<16x32xf32>
    %289 = tpu.matmul %287, %288, %cst_134 {dimension_numbers = #tpu.dot_dimension_numbers<[1], [0], [0], [1], [0, 0, 1, 1], [], []>} : vector<16x8xbf16>, vector<8x32xbf16>, vector<16x32xf32> -> vector<16x32xf32>
    %290 = vector.extract_strided_slice %259 {offsets = [0, 0, 8], sizes = [2, 8, 8], strides = [1, 1, 1]} : vector<2x8x32xf32> to vector<2x8x8xf32>
    %291 = vector.extract_strided_slice %261 {offsets = [0, 0, 8], sizes = [2, 8, 8], strides = [1, 1, 1]} : vector<2x8x32xf32> to vector<2x8x8xf32>
    %292 = arith.truncf %290 : vector<2x8x8xf32> to vector<2x8x8xbf16>
    %293 = arith.truncf %291 : vector<2x8x8xf32> to vector<2x8x8xbf16>
    "tpu.trace_start"() <{level = 10 : i32, message = "bqd,bkd->bqk"}> : () -> ()
    %cst_135 = arith.constant dense<0.000000e+00> : vector<2x8x8xf32>
    %294 = tpu.matmul %292, %293, %cst_135 {dimension_numbers = #tpu.dot_dimension_numbers<[2], [2], [1], [1], [0, 0, 0, 1, 1, 1], [0], [0]>} : vector<2x8x8xbf16>, vector<2x8x8xbf16>, vector<2x8x8xf32> -> vector<2x8x8xf32>
    "tpu.trace_stop"() : () -> ()
    %cst_136 = arith.constant dense<0xFF800000> : vector<2x8xf32>
    %295 = vector.multi_reduction <maximumf>, %294, %cst_136 [2] : vector<2x8x8xf32> to vector<2x8xf32>
    %296 = vector.shape_cast %295 : vector<2x8xf32> to vector<2x8x1xf32>
    %297 = vector.broadcast %296 : vector<2x8x1xf32> to vector<2x8x8xf32>
    %298 = arith.subf %294, %297 : vector<2x8x8xf32>
    %299 = math.exp %298 : vector<2x8x8xf32>
    %cst_137 = arith.constant dense<0.000000e+00> : vector<2x8xf32>
    %300 = vector.multi_reduction <add>, %299, %cst_137 [2] : vector<2x8x8xf32> to vector<2x8xf32>
    %301 = vector.shape_cast %300 : vector<2x8xf32> to vector<2x8x1xf32>
    %302 = tpu.reciprocal %301 {approx = true} : vector<2x8x1xf32> -> vector<2x8x1xf32>
    %303 = vector.broadcast %302 : vector<2x8x1xf32> to vector<2x8x8xf32>
    %304 = arith.mulf %299, %303 : vector<2x8x8xf32>
    %305 = vector.extract_strided_slice %263 {offsets = [0, 0, 8], sizes = [2, 8, 8], strides = [1, 1, 1]} : vector<2x8x32xf32> to vector<2x8x8xf32>
    %306 = arith.truncf %304 : vector<2x8x8xf32> to vector<2x8x8xbf16>
    %307 = arith.truncf %305 : vector<2x8x8xf32> to vector<2x8x8xbf16>
    "tpu.trace_start"() <{level = 10 : i32, message = "bqk,bkd->bqd"}> : () -> ()
    %cst_138 = arith.constant dense<0.000000e+00> : vector<2x8x8xf32>
    %308 = tpu.matmul %306, %307, %cst_138 {dimension_numbers = #tpu.dot_dimension_numbers<[2], [1], [1], [2], [0, 0, 0, 1, 1, 2], [0], [0]>} : vector<2x8x8xbf16>, vector<2x8x8xbf16>, vector<2x8x8xf32> -> vector<2x8x8xf32>
    "tpu.trace_stop"() : () -> ()
    %309 = vector.shape_cast %308 : vector<2x8x8xf32> to vector<16x8xf32>
    %310 = vector.extract_strided_slice %265 {offsets = [8, 0], sizes = [8, 32], strides = [1, 1]} : vector<32x32xf32> to vector<8x32xf32>
    %311 = arith.truncf %309 : vector<16x8xf32> to vector<16x8xbf16>
    %312 = arith.truncf %310 : vector<8x32xf32> to vector<8x32xbf16>
    %cst_139 = arith.constant dense<0.000000e+00> : vector<16x32xf32>
    %313 = tpu.matmul %311, %312, %cst_139 {dimension_numbers = #tpu.dot_dimension_numbers<[1], [0], [0], [1], [0, 0, 1, 1], [], []>} : vector<16x8xbf16>, vector<8x32xbf16>, vector<16x32xf32> -> vector<16x32xf32>
    %314 = arith.addf %289, %313 : vector<16x32xf32>
    %315 = vector.extract_strided_slice %259 {offsets = [0, 0, 16], sizes = [2, 8, 8], strides = [1, 1, 1]} : vector<2x8x32xf32> to vector<2x8x8xf32>
    %316 = vector.extract_strided_slice %261 {offsets = [0, 0, 16], sizes = [2, 8, 8], strides = [1, 1, 1]} : vector<2x8x32xf32> to vector<2x8x8xf32>
    %317 = arith.truncf %315 : vector<2x8x8xf32> to vector<2x8x8xbf16>
    %318 = arith.truncf %316 : vector<2x8x8xf32> to vector<2x8x8xbf16>
    "tpu.trace_start"() <{level = 10 : i32, message = "bqd,bkd->bqk"}> : () -> ()
    %cst_140 = arith.constant dense<0.000000e+00> : vector<2x8x8xf32>
    %319 = tpu.matmul %317, %318, %cst_140 {dimension_numbers = #tpu.dot_dimension_numbers<[2], [2], [1], [1], [0, 0, 0, 1, 1, 1], [0], [0]>} : vector<2x8x8xbf16>, vector<2x8x8xbf16>, vector<2x8x8xf32> -> vector<2x8x8xf32>
    "tpu.trace_stop"() : () -> ()
    %cst_141 = arith.constant dense<0xFF800000> : vector<2x8xf32>
    %320 = vector.multi_reduction <maximumf>, %319, %cst_141 [2] : vector<2x8x8xf32> to vector<2x8xf32>
    %321 = vector.shape_cast %320 : vector<2x8xf32> to vector<2x8x1xf32>
    %322 = vector.broadcast %321 : vector<2x8x1xf32> to vector<2x8x8xf32>
    %323 = arith.subf %319, %322 : vector<2x8x8xf32>
    %324 = math.exp %323 : vector<2x8x8xf32>
    %cst_142 = arith.constant dense<0.000000e+00> : vector<2x8xf32>
    %325 = vector.multi_reduction <add>, %324, %cst_142 [2] : vector<2x8x8xf32> to vector<2x8xf32>
    %326 = vector.shape_cast %325 : vector<2x8xf32> to vector<2x8x1xf32>
    %327 = tpu.reciprocal %326 {approx = true} : vector<2x8x1xf32> -> vector<2x8x1xf32>
    %328 = vector.broadcast %327 : vector<2x8x1xf32> to vector<2x8x8xf32>
    %329 = arith.mulf %324, %328 : vector<2x8x8xf32>
    %330 = vector.extract_strided_slice %263 {offsets = [0, 0, 16], sizes = [2, 8, 8], strides = [1, 1, 1]} : vector<2x8x32xf32> to vector<2x8x8xf32>
    %331 = arith.truncf %329 : vector<2x8x8xf32> to vector<2x8x8xbf16>
    %332 = arith.truncf %330 : vector<2x8x8xf32> to vector<2x8x8xbf16>
    "tpu.trace_start"() <{level = 10 : i32, message = "bqk,bkd->bqd"}> : () -> ()
    %cst_143 = arith.constant dense<0.000000e+00> : vector<2x8x8xf32>
    %333 = tpu.matmul %331, %332, %cst_143 {dimension_numbers = #tpu.dot_dimension_numbers<[2], [1], [1], [2], [0, 0, 0, 1, 1, 2], [0], [0]>} : vector<2x8x8xbf16>, vector<2x8x8xbf16>, vector<2x8x8xf32> -> vector<2x8x8xf32>
    "tpu.trace_stop"() : () -> ()
    %334 = vector.shape_cast %333 : vector<2x8x8xf32> to vector<16x8xf32>
    %335 = vector.extract_strided_slice %265 {offsets = [16, 0], sizes = [8, 32], strides = [1, 1]} : vector<32x32xf32> to vector<8x32xf32>
    %336 = arith.truncf %334 : vector<16x8xf32> to vector<16x8xbf16>
    %337 = arith.truncf %335 : vector<8x32xf32> to vector<8x32xbf16>
    %cst_144 = arith.constant dense<0.000000e+00> : vector<16x32xf32>
    %338 = tpu.matmul %336, %337, %cst_144 {dimension_numbers = #tpu.dot_dimension_numbers<[1], [0], [0], [1], [0, 0, 1, 1], [], []>} : vector<16x8xbf16>, vector<8x32xbf16>, vector<16x32xf32> -> vector<16x32xf32>
    %339 = arith.addf %314, %338 : vector<16x32xf32>
    %340 = vector.extract_strided_slice %259 {offsets = [0, 0, 24], sizes = [2, 8, 8], strides = [1, 1, 1]} : vector<2x8x32xf32> to vector<2x8x8xf32>
    %341 = vector.extract_strided_slice %261 {offsets = [0, 0, 24], sizes = [2, 8, 8], strides = [1, 1, 1]} : vector<2x8x32xf32> to vector<2x8x8xf32>
    %342 = arith.truncf %340 : vector<2x8x8xf32> to vector<2x8x8xbf16>
    %343 = arith.truncf %341 : vector<2x8x8xf32> to vector<2x8x8xbf16>
    "tpu.trace_start"() <{level = 10 : i32, message = "bqd,bkd->bqk"}> : () -> ()
    %cst_145 = arith.constant dense<0.000000e+00> : vector<2x8x8xf32>
    %344 = tpu.matmul %342, %343, %cst_145 {dimension_numbers = #tpu.dot_dimension_numbers<[2], [2], [1], [1], [0, 0, 0, 1, 1, 1], [0], [0]>} : vector<2x8x8xbf16>, vector<2x8x8xbf16>, vector<2x8x8xf32> -> vector<2x8x8xf32>
    "tpu.trace_stop"() : () -> ()
    %cst_146 = arith.constant dense<0xFF800000> : vector<2x8xf32>
    %345 = vector.multi_reduction <maximumf>, %344, %cst_146 [2] : vector<2x8x8xf32> to vector<2x8xf32>
    %346 = vector.shape_cast %345 : vector<2x8xf32> to vector<2x8x1xf32>
    %347 = vector.broadcast %346 : vector<2x8x1xf32> to vector<2x8x8xf32>
    %348 = arith.subf %344, %347 : vector<2x8x8xf32>
    %349 = math.exp %348 : vector<2x8x8xf32>
    %cst_147 = arith.constant dense<0.000000e+00> : vector<2x8xf32>
    %350 = vector.multi_reduction <add>, %349, %cst_147 [2] : vector<2x8x8xf32> to vector<2x8xf32>
    %351 = vector.shape_cast %350 : vector<2x8xf32> to vector<2x8x1xf32>
    %352 = tpu.reciprocal %351 {approx = true} : vector<2x8x1xf32> -> vector<2x8x1xf32>
    %353 = vector.broadcast %352 : vector<2x8x1xf32> to vector<2x8x8xf32>
    %354 = arith.mulf %349, %353 : vector<2x8x8xf32>
    %355 = vector.extract_strided_slice %263 {offsets = [0, 0, 24], sizes = [2, 8, 8], strides = [1, 1, 1]} : vector<2x8x32xf32> to vector<2x8x8xf32>
    %356 = arith.truncf %354 : vector<2x8x8xf32> to vector<2x8x8xbf16>
    %357 = arith.truncf %355 : vector<2x8x8xf32> to vector<2x8x8xbf16>
    "tpu.trace_start"() <{level = 10 : i32, message = "bqk,bkd->bqd"}> : () -> ()
    %cst_148 = arith.constant dense<0.000000e+00> : vector<2x8x8xf32>
    %358 = tpu.matmul %356, %357, %cst_148 {dimension_numbers = #tpu.dot_dimension_numbers<[2], [1], [1], [2], [0, 0, 0, 1, 1, 2], [0], [0]>} : vector<2x8x8xbf16>, vector<2x8x8xbf16>, vector<2x8x8xf32> -> vector<2x8x8xf32>
    "tpu.trace_stop"() : () -> ()
    %359 = vector.shape_cast %358 : vector<2x8x8xf32> to vector<16x8xf32>
    %360 = vector.extract_strided_slice %265 {offsets = [24, 0], sizes = [8, 32], strides = [1, 1]} : vector<32x32xf32> to vector<8x32xf32>
    %361 = arith.truncf %359 : vector<16x8xf32> to vector<16x8xbf16>
    %362 = arith.truncf %360 : vector<8x32xf32> to vector<8x32xbf16>
    %cst_149 = arith.constant dense<0.000000e+00> : vector<16x32xf32>
    %363 = tpu.matmul %361, %362, %cst_149 {dimension_numbers = #tpu.dot_dimension_numbers<[1], [0], [0], [1], [0, 0, 1, 1], [], []>} : vector<16x8xbf16>, vector<8x32xbf16>, vector<16x32xf32> -> vector<16x32xf32>
    %364 = arith.addf %339, %363 : vector<16x32xf32>
    %365 = vector.extract_strided_slice %5 {offsets = [1, 0, 0], sizes = [1, 1, 32], strides = [1, 1, 1]} : vector<2x1x32xf32> to vector<1x1x32xf32>
    %366 = vector.shape_cast %365 : vector<1x1x32xf32> to vector<1x32xf32>
    %367 = vector.broadcast %366 : vector<1x32xf32> to vector<16x32xf32>
    %368 = arith.addf %364, %367 : vector<16x32xf32>
    %369 = arith.addf %246, %368 : vector<16x32xf32>
    %370 = vector.extract_strided_slice %6 {offsets = [1, 0, 0], sizes = [1, 1, 32], strides = [1, 1, 1]} : vector<2x1x32xf32> to vector<1x1x32xf32>
    %371 = vector.shape_cast %370 : vector<1x1x32xf32> to vector<1x32xf32>
    %372 = vector.extract_strided_slice %7 {offsets = [1, 0, 0], sizes = [1, 1, 32], strides = [1, 1, 1]} : vector<2x1x32xf32> to vector<1x1x32xf32>
    %373 = vector.shape_cast %372 : vector<1x1x32xf32> to vector<1x32xf32>
    %cst_150 = arith.constant dense<0.000000e+00> : vector<16xf32>
    %374 = vector.multi_reduction <add>, %369, %cst_150 [1] : vector<16x32xf32> to vector<16xf32>
    %375 = vector.shape_cast %374 : vector<16xf32> to vector<16x1xf32>
    %cst_151 = arith.constant 3.200000e+01 : f32
    %376 = vector.broadcast %cst_151 : f32 to vector<16x1xf32>
    %377 = arith.divf %375, %376 : vector<16x1xf32>
    %378 = vector.broadcast %377 : vector<16x1xf32> to vector<16x32xf32>
    %379 = arith.subf %369, %378 : vector<16x32xf32>
    %380 = arith.mulf %379, %379 : vector<16x32xf32>
    %cst_152 = arith.constant dense<0.000000e+00> : vector<16xf32>
    %381 = vector.multi_reduction <add>, %380, %cst_152 [1] : vector<16x32xf32> to vector<16xf32>
    %382 = vector.shape_cast %381 : vector<16xf32> to vector<16x1xf32>
    %cst_153 = arith.constant 3.200000e+01 : f32
    %383 = vector.broadcast %cst_153 : f32 to vector<16x1xf32>
    %384 = arith.divf %382, %383 : vector<16x1xf32>
    %385 = vector.broadcast %377 : vector<16x1xf32> to vector<16x32xf32>
    %386 = arith.subf %369, %385 : vector<16x32xf32>
    %cst_154 = arith.constant 9.99999974E-6 : f32
    %387 = vector.broadcast %cst_154 : f32 to vector<16x1xf32>
    %388 = arith.addf %384, %387 : vector<16x1xf32>
    %389 = math.rsqrt %388 : vector<16x1xf32>
    %390 = vector.broadcast %389 : vector<16x1xf32> to vector<16x32xf32>
    %391 = arith.mulf %386, %390 : vector<16x32xf32>
    %392 = vector.broadcast %371 : vector<1x32xf32> to vector<16x32xf32>
    %393 = arith.mulf %391, %392 : vector<16x32xf32>
    %394 = vector.broadcast %373 : vector<1x32xf32> to vector<16x32xf32>
    %395 = arith.addf %393, %394 : vector<16x32xf32>
    %396 = vector.extract_strided_slice %8 {offsets = [1, 0, 0], sizes = [1, 32, 32], strides = [1, 1, 1]} : vector<2x32x32xf32> to vector<1x32x32xf32>
    %397 = vector.shape_cast %396 : vector<1x32x32xf32> to vector<32x32xf32>
    %398 = arith.truncf %395 : vector<16x32xf32> to vector<16x32xbf16>
    %399 = arith.truncf %397 : vector<32x32xf32> to vector<32x32xbf16>
    %cst_155 = arith.constant dense<0.000000e+00> : vector<16x32xf32>
    %400 = tpu.matmul %398, %399, %cst_155 {dimension_numbers = #tpu.dot_dimension_numbers<[1], [0], [0], [1], [0, 0, 1, 1], [], []>} : vector<16x32xbf16>, vector<32x32xbf16>, vector<16x32xf32> -> vector<16x32xf32>
    %401 = vector.extract_strided_slice %9 {offsets = [1, 0, 0], sizes = [1, 1, 32], strides = [1, 1, 1]} : vector<2x1x32xf32> to vector<1x1x32xf32>
    %402 = vector.shape_cast %401 : vector<1x1x32xf32> to vector<1x32xf32>
    %403 = vector.broadcast %402 : vector<1x32xf32> to vector<16x32xf32>
    %404 = arith.addf %400, %403 : vector<16x32xf32>
    %cst_156 = arith.constant 5.000000e-01 : f32
    %405 = vector.broadcast %cst_156 : f32 to vector<16x32xf32>
    %406 = arith.mulf %405, %404 : vector<16x32xf32>
    %cst_157 = arith.constant 4.471500e-02 : f32
    %407 = vector.broadcast %cst_157 : f32 to vector<16x32xf32>
    %408 = arith.mulf %407, %404 : vector<16x32xf32>
    %409 = arith.mulf %408, %404 : vector<16x32xf32>
    %410 = arith.mulf %409, %404 : vector<16x32xf32>
    %411 = arith.addf %404, %410 : vector<16x32xf32>
    %cst_158 = arith.constant 0.797884583 : f32
    %412 = vector.broadcast %cst_158 : f32 to vector<16x32xf32>
    %413 = arith.mulf %412, %411 : vector<16x32xf32>
    %414 = math.tanh %413 : vector<16x32xf32>
    %cst_159 = arith.constant 1.000000e+00 : f32
    %415 = vector.broadcast %cst_159 : f32 to vector<16x32xf32>
    %416 = arith.addf %415, %414 : vector<16x32xf32>
    %417 = arith.mulf %406, %416 : vector<16x32xf32>
    %418 = vector.extract_strided_slice %10 {offsets = [1, 0, 0], sizes = [1, 32, 32], strides = [1, 1, 1]} : vector<2x32x32xf32> to vector<1x32x32xf32>
    %419 = vector.shape_cast %418 : vector<1x32x32xf32> to vector<32x32xf32>
    %420 = arith.truncf %417 : vector<16x32xf32> to vector<16x32xbf16>
    %421 = arith.truncf %419 : vector<32x32xf32> to vector<32x32xbf16>
    %cst_160 = arith.constant dense<0.000000e+00> : vector<16x32xf32>
    %422 = tpu.matmul %420, %421, %cst_160 {dimension_numbers = #tpu.dot_dimension_numbers<[1], [0], [0], [1], [0, 0, 1, 1], [], []>} : vector<16x32xbf16>, vector<32x32xbf16>, vector<16x32xf32> -> vector<16x32xf32>
    %423 = vector.extract_strided_slice %11 {offsets = [1, 0, 0], sizes = [1, 1, 32], strides = [1, 1, 1]} : vector<2x1x32xf32> to vector<1x1x32xf32>
    %424 = vector.shape_cast %423 : vector<1x1x32xf32> to vector<1x32xf32>
    %425 = vector.broadcast %424 : vector<1x32xf32> to vector<16x32xf32>
    %426 = arith.addf %422, %425 : vector<16x32xf32>
    %427 = arith.addf %395, %426 : vector<16x32xf32>
    %428 = vector.extract_strided_slice %12 {offsets = [1, 0, 0], sizes = [1, 1, 32], strides = [1, 1, 1]} : vector<2x1x32xf32> to vector<1x1x32xf32>
    %429 = vector.shape_cast %428 : vector<1x1x32xf32> to vector<1x32xf32>
    %430 = vector.extract_strided_slice %13 {offsets = [1, 0, 0], sizes = [1, 1, 32], strides = [1, 1, 1]} : vector<2x1x32xf32> to vector<1x1x32xf32>
    %431 = vector.shape_cast %430 : vector<1x1x32xf32> to vector<1x32xf32>
    %cst_161 = arith.constant dense<0.000000e+00> : vector<16xf32>
    %432 = vector.multi_reduction <add>, %427, %cst_161 [1] : vector<16x32xf32> to vector<16xf32>
    %433 = vector.shape_cast %432 : vector<16xf32> to vector<16x1xf32>
    %cst_162 = arith.constant 3.200000e+01 : f32
    %434 = vector.broadcast %cst_162 : f32 to vector<16x1xf32>
    %435 = arith.divf %433, %434 : vector<16x1xf32>
    %436 = vector.broadcast %435 : vector<16x1xf32> to vector<16x32xf32>
    %437 = arith.subf %427, %436 : vector<16x32xf32>
    %438 = arith.mulf %437, %437 : vector<16x32xf32>
    %cst_163 = arith.constant dense<0.000000e+00> : vector<16xf32>
    %439 = vector.multi_reduction <add>, %438, %cst_163 [1] : vector<16x32xf32> to vector<16xf32>
    %440 = vector.shape_cast %439 : vector<16xf32> to vector<16x1xf32>
    %cst_164 = arith.constant 3.200000e+01 : f32
    %441 = vector.broadcast %cst_164 : f32 to vector<16x1xf32>
    %442 = arith.divf %440, %441 : vector<16x1xf32>
    %443 = vector.broadcast %435 : vector<16x1xf32> to vector<16x32xf32>
    %444 = arith.subf %427, %443 : vector<16x32xf32>
    %cst_165 = arith.constant 9.99999974E-6 : f32
    %445 = vector.broadcast %cst_165 : f32 to vector<16x1xf32>
    %446 = arith.addf %442, %445 : vector<16x1xf32>
    %447 = math.rsqrt %446 : vector<16x1xf32>
    %448 = vector.broadcast %447 : vector<16x1xf32> to vector<16x32xf32>
    %449 = arith.mulf %444, %448 : vector<16x32xf32>
    %450 = vector.broadcast %429 : vector<1x32xf32> to vector<16x32xf32>
    %451 = arith.mulf %449, %450 : vector<16x32xf32>
    %452 = vector.broadcast %431 : vector<1x32xf32> to vector<16x32xf32>
    %453 = arith.addf %451, %452 : vector<16x32xf32>
    %cst_166 = arith.constant dense<0.000000e+00> : vector<16xf32>
    %454 = vector.multi_reduction <add>, %453, %cst_166 [1] : vector<16x32xf32> to vector<16xf32>
    %455 = vector.shape_cast %454 : vector<16xf32> to vector<16x1xf32>
    %cst_167 = arith.constant 3.200000e+01 : f32
    %456 = vector.broadcast %cst_167 : f32 to vector<16x1xf32>
    %457 = arith.divf %455, %456 : vector<16x1xf32>
    %458 = vector.broadcast %457 : vector<16x1xf32> to vector<16x32xf32>
    %459 = arith.subf %453, %458 : vector<16x32xf32>
    %460 = arith.mulf %459, %459 : vector<16x32xf32>
    %cst_168 = arith.constant dense<0.000000e+00> : vector<16xf32>
    %461 = vector.multi_reduction <add>, %460, %cst_168 [1] : vector<16x32xf32> to vector<16xf32>
    %462 = vector.shape_cast %461 : vector<16xf32> to vector<16x1xf32>
    %cst_169 = arith.constant 3.200000e+01 : f32
    %463 = vector.broadcast %cst_169 : f32 to vector<16x1xf32>
    %464 = arith.divf %462, %463 : vector<16x1xf32>
    %465 = vector.broadcast %457 : vector<16x1xf32> to vector<16x32xf32>
    %466 = arith.subf %453, %465 : vector<16x32xf32>
    %cst_170 = arith.constant 9.99999974E-6 : f32
    %467 = vector.broadcast %cst_170 : f32 to vector<16x1xf32>
    %468 = arith.addf %464, %467 : vector<16x1xf32>
    %469 = math.rsqrt %468 : vector<16x1xf32>
    %470 = vector.broadcast %469 : vector<16x1xf32> to vector<16x32xf32>
    %471 = arith.mulf %466, %470 : vector<16x32xf32>
    %472 = vector.broadcast %14 : vector<1x32xf32> to vector<16x32xf32>
    %473 = arith.mulf %471, %472 : vector<16x32xf32>
    %474 = vector.broadcast %15 : vector<1x32xf32> to vector<16x32xf32>
    %475 = arith.addf %473, %474 : vector<16x32xf32>
    %476 = vector.shape_cast %475 : vector<16x32xf32> to vector<2x8x32xf32>
    %cst_171 = arith.constant dense<0.000000e+00> : vector<2x32xf32>
    %477 = vector.multi_reduction <add>, %476, %cst_171 [1] : vector<2x8x32xf32> to vector<2x32xf32>
    %cst_172 = arith.constant 8.000000e+00 : f32
    %478 = vector.broadcast %cst_172 : f32 to vector<2x32xf32>
    %479 = arith.divf %477, %478 : vector<2x32xf32>
    %c0_173 = arith.constant 0 : index
    %c0_174 = arith.constant 0 : index
    %480 = vector.load %arg2[%c0_173, %c0_174] : memref<16x6xf32, #tpu.memory_space<vmem>>, vector<16x6xf32>
    %481 = arith.truncf %480 : vector<16x6xf32> to vector<16x6xbf16>
    %482 = arith.truncf %16 : vector<6x32xf32> to vector<6x32xbf16>
    %cst_175 = arith.constant dense<0.000000e+00> : vector<16x32xf32>
    %483 = tpu.matmul %481, %482, %cst_175 {dimension_numbers = #tpu.dot_dimension_numbers<[1], [0], [0], [1], [0, 0, 1, 1], [], []>} : vector<16x6xbf16>, vector<6x32xbf16>, vector<16x32xf32> -> vector<16x32xf32>
    %484 = vector.broadcast %17 : vector<1x32xf32> to vector<16x32xf32>
    %485 = arith.addf %483, %484 : vector<16x32xf32>
    %cst_176 = arith.constant 0.000000e+00 : f32
    %486 = vector.broadcast %cst_176 : f32 to vector<16x32xf32>
    %487 = arith.maximumf %485, %486 : vector<16x32xf32>
    %488 = vector.extract_strided_slice %18 {offsets = [0, 0, 0], sizes = [1, 32, 96], strides = [1, 1, 1]} : vector<2x32x96xf32> to vector<1x32x96xf32>
    %489 = vector.shape_cast %488 : vector<1x32x96xf32> to vector<32x96xf32>
    %490 = arith.truncf %487 : vector<16x32xf32> to vector<16x32xbf16>
    %491 = arith.truncf %489 : vector<32x96xf32> to vector<32x96xbf16>
    %cst_177 = arith.constant dense<0.000000e+00> : vector<16x96xf32>
    %492 = tpu.matmul %490, %491, %cst_177 {dimension_numbers = #tpu.dot_dimension_numbers<[1], [0], [0], [1], [0, 0, 1, 1], [], []>} : vector<16x32xbf16>, vector<32x96xbf16>, vector<16x96xf32> -> vector<16x96xf32>
    %493 = vector.extract_strided_slice %19 {offsets = [0, 0, 0], sizes = [1, 1, 96], strides = [1, 1, 1]} : vector<2x1x96xf32> to vector<1x1x96xf32>
    %494 = vector.shape_cast %493 : vector<1x1x96xf32> to vector<1x96xf32>
    %495 = vector.broadcast %494 : vector<1x96xf32> to vector<16x96xf32>
    %496 = arith.addf %492, %495 : vector<16x96xf32>
    %497 = vector.extract_strided_slice %496 {offsets = [0, 0], sizes = [16, 32], strides = [1, 1]} : vector<16x96xf32> to vector<16x32xf32>
    %cst_178 = arith.constant 0.353553385 : f32
    %498 = vector.broadcast %cst_178 : f32 to vector<16x32xf32>
    %499 = arith.mulf %497, %498 : vector<16x32xf32>
    %500 = vector.shape_cast %499 : vector<16x32xf32> to vector<2x8x32xf32>
    %501 = vector.extract_strided_slice %496 {offsets = [0, 32], sizes = [16, 32], strides = [1, 1]} : vector<16x96xf32> to vector<16x32xf32>
    %502 = vector.shape_cast %501 : vector<16x32xf32> to vector<2x8x32xf32>
    %503 = vector.extract_strided_slice %496 {offsets = [0, 64], sizes = [16, 32], strides = [1, 1]} : vector<16x96xf32> to vector<16x32xf32>
    %504 = vector.shape_cast %503 : vector<16x32xf32> to vector<2x8x32xf32>
    %505 = vector.extract_strided_slice %20 {offsets = [0, 0, 0], sizes = [1, 32, 32], strides = [1, 1, 1]} : vector<2x32x32xf32> to vector<1x32x32xf32>
    %506 = vector.shape_cast %505 : vector<1x32x32xf32> to vector<32x32xf32>
    %507 = vector.extract_strided_slice %500 {offsets = [0, 0, 0], sizes = [2, 8, 8], strides = [1, 1, 1]} : vector<2x8x32xf32> to vector<2x8x8xf32>
    %508 = vector.extract_strided_slice %502 {offsets = [0, 0, 0], sizes = [2, 8, 8], strides = [1, 1, 1]} : vector<2x8x32xf32> to vector<2x8x8xf32>
    %509 = arith.truncf %507 : vector<2x8x8xf32> to vector<2x8x8xbf16>
    %510 = arith.truncf %508 : vector<2x8x8xf32> to vector<2x8x8xbf16>
    "tpu.trace_start"() <{level = 10 : i32, message = "bqd,bkd->bqk"}> : () -> ()
    %cst_179 = arith.constant dense<0.000000e+00> : vector<2x8x8xf32>
    %511 = tpu.matmul %509, %510, %cst_179 {dimension_numbers = #tpu.dot_dimension_numbers<[2], [2], [1], [1], [0, 0, 0, 1, 1, 1], [0], [0]>} : vector<2x8x8xbf16>, vector<2x8x8xbf16>, vector<2x8x8xf32> -> vector<2x8x8xf32>
    "tpu.trace_stop"() : () -> ()
    %cst_180 = arith.constant dense<0xFF800000> : vector<2x8xf32>
    %512 = vector.multi_reduction <maximumf>, %511, %cst_180 [2] : vector<2x8x8xf32> to vector<2x8xf32>
    %513 = vector.shape_cast %512 : vector<2x8xf32> to vector<2x8x1xf32>
    %514 = vector.broadcast %513 : vector<2x8x1xf32> to vector<2x8x8xf32>
    %515 = arith.subf %511, %514 : vector<2x8x8xf32>
    %516 = math.exp %515 : vector<2x8x8xf32>
    %cst_181 = arith.constant dense<0.000000e+00> : vector<2x8xf32>
    %517 = vector.multi_reduction <add>, %516, %cst_181 [2] : vector<2x8x8xf32> to vector<2x8xf32>
    %518 = vector.shape_cast %517 : vector<2x8xf32> to vector<2x8x1xf32>
    %519 = tpu.reciprocal %518 {approx = true} : vector<2x8x1xf32> -> vector<2x8x1xf32>
    %520 = vector.broadcast %519 : vector<2x8x1xf32> to vector<2x8x8xf32>
    %521 = arith.mulf %516, %520 : vector<2x8x8xf32>
    %522 = vector.extract_strided_slice %504 {offsets = [0, 0, 0], sizes = [2, 8, 8], strides = [1, 1, 1]} : vector<2x8x32xf32> to vector<2x8x8xf32>
    %523 = arith.truncf %521 : vector<2x8x8xf32> to vector<2x8x8xbf16>
    %524 = arith.truncf %522 : vector<2x8x8xf32> to vector<2x8x8xbf16>
    "tpu.trace_start"() <{level = 10 : i32, message = "bqk,bkd->bqd"}> : () -> ()
    %cst_182 = arith.constant dense<0.000000e+00> : vector<2x8x8xf32>
    %525 = tpu.matmul %523, %524, %cst_182 {dimension_numbers = #tpu.dot_dimension_numbers<[2], [1], [1], [2], [0, 0, 0, 1, 1, 2], [0], [0]>} : vector<2x8x8xbf16>, vector<2x8x8xbf16>, vector<2x8x8xf32> -> vector<2x8x8xf32>
    "tpu.trace_stop"() : () -> ()
    %526 = vector.shape_cast %525 : vector<2x8x8xf32> to vector<16x8xf32>
    %527 = vector.extract_strided_slice %506 {offsets = [0, 0], sizes = [8, 32], strides = [1, 1]} : vector<32x32xf32> to vector<8x32xf32>
    %528 = arith.truncf %526 : vector<16x8xf32> to vector<16x8xbf16>
    %529 = arith.truncf %527 : vector<8x32xf32> to vector<8x32xbf16>
    %cst_183 = arith.constant dense<0.000000e+00> : vector<16x32xf32>
    %530 = tpu.matmul %528, %529, %cst_183 {dimension_numbers = #tpu.dot_dimension_numbers<[1], [0], [0], [1], [0, 0, 1, 1], [], []>} : vector<16x8xbf16>, vector<8x32xbf16>, vector<16x32xf32> -> vector<16x32xf32>
    %531 = vector.extract_strided_slice %500 {offsets = [0, 0, 8], sizes = [2, 8, 8], strides = [1, 1, 1]} : vector<2x8x32xf32> to vector<2x8x8xf32>
    %532 = vector.extract_strided_slice %502 {offsets = [0, 0, 8], sizes = [2, 8, 8], strides = [1, 1, 1]} : vector<2x8x32xf32> to vector<2x8x8xf32>
    %533 = arith.truncf %531 : vector<2x8x8xf32> to vector<2x8x8xbf16>
    %534 = arith.truncf %532 : vector<2x8x8xf32> to vector<2x8x8xbf16>
    "tpu.trace_start"() <{level = 10 : i32, message = "bqd,bkd->bqk"}> : () -> ()
    %cst_184 = arith.constant dense<0.000000e+00> : vector<2x8x8xf32>
    %535 = tpu.matmul %533, %534, %cst_184 {dimension_numbers = #tpu.dot_dimension_numbers<[2], [2], [1], [1], [0, 0, 0, 1, 1, 1], [0], [0]>} : vector<2x8x8xbf16>, vector<2x8x8xbf16>, vector<2x8x8xf32> -> vector<2x8x8xf32>
    "tpu.trace_stop"() : () -> ()
    %cst_185 = arith.constant dense<0xFF800000> : vector<2x8xf32>
    %536 = vector.multi_reduction <maximumf>, %535, %cst_185 [2] : vector<2x8x8xf32> to vector<2x8xf32>
    %537 = vector.shape_cast %536 : vector<2x8xf32> to vector<2x8x1xf32>
    %538 = vector.broadcast %537 : vector<2x8x1xf32> to vector<2x8x8xf32>
    %539 = arith.subf %535, %538 : vector<2x8x8xf32>
    %540 = math.exp %539 : vector<2x8x8xf32>
    %cst_186 = arith.constant dense<0.000000e+00> : vector<2x8xf32>
    %541 = vector.multi_reduction <add>, %540, %cst_186 [2] : vector<2x8x8xf32> to vector<2x8xf32>
    %542 = vector.shape_cast %541 : vector<2x8xf32> to vector<2x8x1xf32>
    %543 = tpu.reciprocal %542 {approx = true} : vector<2x8x1xf32> -> vector<2x8x1xf32>
    %544 = vector.broadcast %543 : vector<2x8x1xf32> to vector<2x8x8xf32>
    %545 = arith.mulf %540, %544 : vector<2x8x8xf32>
    %546 = vector.extract_strided_slice %504 {offsets = [0, 0, 8], sizes = [2, 8, 8], strides = [1, 1, 1]} : vector<2x8x32xf32> to vector<2x8x8xf32>
    %547 = arith.truncf %545 : vector<2x8x8xf32> to vector<2x8x8xbf16>
    %548 = arith.truncf %546 : vector<2x8x8xf32> to vector<2x8x8xbf16>
    "tpu.trace_start"() <{level = 10 : i32, message = "bqk,bkd->bqd"}> : () -> ()
    %cst_187 = arith.constant dense<0.000000e+00> : vector<2x8x8xf32>
    %549 = tpu.matmul %547, %548, %cst_187 {dimension_numbers = #tpu.dot_dimension_numbers<[2], [1], [1], [2], [0, 0, 0, 1, 1, 2], [0], [0]>} : vector<2x8x8xbf16>, vector<2x8x8xbf16>, vector<2x8x8xf32> -> vector<2x8x8xf32>
    "tpu.trace_stop"() : () -> ()
    %550 = vector.shape_cast %549 : vector<2x8x8xf32> to vector<16x8xf32>
    %551 = vector.extract_strided_slice %506 {offsets = [8, 0], sizes = [8, 32], strides = [1, 1]} : vector<32x32xf32> to vector<8x32xf32>
    %552 = arith.truncf %550 : vector<16x8xf32> to vector<16x8xbf16>
    %553 = arith.truncf %551 : vector<8x32xf32> to vector<8x32xbf16>
    %cst_188 = arith.constant dense<0.000000e+00> : vector<16x32xf32>
    %554 = tpu.matmul %552, %553, %cst_188 {dimension_numbers = #tpu.dot_dimension_numbers<[1], [0], [0], [1], [0, 0, 1, 1], [], []>} : vector<16x8xbf16>, vector<8x32xbf16>, vector<16x32xf32> -> vector<16x32xf32>
    %555 = arith.addf %530, %554 : vector<16x32xf32>
    %556 = vector.extract_strided_slice %500 {offsets = [0, 0, 16], sizes = [2, 8, 8], strides = [1, 1, 1]} : vector<2x8x32xf32> to vector<2x8x8xf32>
    %557 = vector.extract_strided_slice %502 {offsets = [0, 0, 16], sizes = [2, 8, 8], strides = [1, 1, 1]} : vector<2x8x32xf32> to vector<2x8x8xf32>
    %558 = arith.truncf %556 : vector<2x8x8xf32> to vector<2x8x8xbf16>
    %559 = arith.truncf %557 : vector<2x8x8xf32> to vector<2x8x8xbf16>
    "tpu.trace_start"() <{level = 10 : i32, message = "bqd,bkd->bqk"}> : () -> ()
    %cst_189 = arith.constant dense<0.000000e+00> : vector<2x8x8xf32>
    %560 = tpu.matmul %558, %559, %cst_189 {dimension_numbers = #tpu.dot_dimension_numbers<[2], [2], [1], [1], [0, 0, 0, 1, 1, 1], [0], [0]>} : vector<2x8x8xbf16>, vector<2x8x8xbf16>, vector<2x8x8xf32> -> vector<2x8x8xf32>
    "tpu.trace_stop"() : () -> ()
    %cst_190 = arith.constant dense<0xFF800000> : vector<2x8xf32>
    %561 = vector.multi_reduction <maximumf>, %560, %cst_190 [2] : vector<2x8x8xf32> to vector<2x8xf32>
    %562 = vector.shape_cast %561 : vector<2x8xf32> to vector<2x8x1xf32>
    %563 = vector.broadcast %562 : vector<2x8x1xf32> to vector<2x8x8xf32>
    %564 = arith.subf %560, %563 : vector<2x8x8xf32>
    %565 = math.exp %564 : vector<2x8x8xf32>
    %cst_191 = arith.constant dense<0.000000e+00> : vector<2x8xf32>
    %566 = vector.multi_reduction <add>, %565, %cst_191 [2] : vector<2x8x8xf32> to vector<2x8xf32>
    %567 = vector.shape_cast %566 : vector<2x8xf32> to vector<2x8x1xf32>
    %568 = tpu.reciprocal %567 {approx = true} : vector<2x8x1xf32> -> vector<2x8x1xf32>
    %569 = vector.broadcast %568 : vector<2x8x1xf32> to vector<2x8x8xf32>
    %570 = arith.mulf %565, %569 : vector<2x8x8xf32>
    %571 = vector.extract_strided_slice %504 {offsets = [0, 0, 16], sizes = [2, 8, 8], strides = [1, 1, 1]} : vector<2x8x32xf32> to vector<2x8x8xf32>
    %572 = arith.truncf %570 : vector<2x8x8xf32> to vector<2x8x8xbf16>
    %573 = arith.truncf %571 : vector<2x8x8xf32> to vector<2x8x8xbf16>
    "tpu.trace_start"() <{level = 10 : i32, message = "bqk,bkd->bqd"}> : () -> ()
    %cst_192 = arith.constant dense<0.000000e+00> : vector<2x8x8xf32>
    %574 = tpu.matmul %572, %573, %cst_192 {dimension_numbers = #tpu.dot_dimension_numbers<[2], [1], [1], [2], [0, 0, 0, 1, 1, 2], [0], [0]>} : vector<2x8x8xbf16>, vector<2x8x8xbf16>, vector<2x8x8xf32> -> vector<2x8x8xf32>
    "tpu.trace_stop"() : () -> ()
    %575 = vector.shape_cast %574 : vector<2x8x8xf32> to vector<16x8xf32>
    %576 = vector.extract_strided_slice %506 {offsets = [16, 0], sizes = [8, 32], strides = [1, 1]} : vector<32x32xf32> to vector<8x32xf32>
    %577 = arith.truncf %575 : vector<16x8xf32> to vector<16x8xbf16>
    %578 = arith.truncf %576 : vector<8x32xf32> to vector<8x32xbf16>
    %cst_193 = arith.constant dense<0.000000e+00> : vector<16x32xf32>
    %579 = tpu.matmul %577, %578, %cst_193 {dimension_numbers = #tpu.dot_dimension_numbers<[1], [0], [0], [1], [0, 0, 1, 1], [], []>} : vector<16x8xbf16>, vector<8x32xbf16>, vector<16x32xf32> -> vector<16x32xf32>
    %580 = arith.addf %555, %579 : vector<16x32xf32>
    %581 = vector.extract_strided_slice %500 {offsets = [0, 0, 24], sizes = [2, 8, 8], strides = [1, 1, 1]} : vector<2x8x32xf32> to vector<2x8x8xf32>
    %582 = vector.extract_strided_slice %502 {offsets = [0, 0, 24], sizes = [2, 8, 8], strides = [1, 1, 1]} : vector<2x8x32xf32> to vector<2x8x8xf32>
    %583 = arith.truncf %581 : vector<2x8x8xf32> to vector<2x8x8xbf16>
    %584 = arith.truncf %582 : vector<2x8x8xf32> to vector<2x8x8xbf16>
    "tpu.trace_start"() <{level = 10 : i32, message = "bqd,bkd->bqk"}> : () -> ()
    %cst_194 = arith.constant dense<0.000000e+00> : vector<2x8x8xf32>
    %585 = tpu.matmul %583, %584, %cst_194 {dimension_numbers = #tpu.dot_dimension_numbers<[2], [2], [1], [1], [0, 0, 0, 1, 1, 1], [0], [0]>} : vector<2x8x8xbf16>, vector<2x8x8xbf16>, vector<2x8x8xf32> -> vector<2x8x8xf32>
    "tpu.trace_stop"() : () -> ()
    %cst_195 = arith.constant dense<0xFF800000> : vector<2x8xf32>
    %586 = vector.multi_reduction <maximumf>, %585, %cst_195 [2] : vector<2x8x8xf32> to vector<2x8xf32>
    %587 = vector.shape_cast %586 : vector<2x8xf32> to vector<2x8x1xf32>
    %588 = vector.broadcast %587 : vector<2x8x1xf32> to vector<2x8x8xf32>
    %589 = arith.subf %585, %588 : vector<2x8x8xf32>
    %590 = math.exp %589 : vector<2x8x8xf32>
    %cst_196 = arith.constant dense<0.000000e+00> : vector<2x8xf32>
    %591 = vector.multi_reduction <add>, %590, %cst_196 [2] : vector<2x8x8xf32> to vector<2x8xf32>
    %592 = vector.shape_cast %591 : vector<2x8xf32> to vector<2x8x1xf32>
    %593 = tpu.reciprocal %592 {approx = true} : vector<2x8x1xf32> -> vector<2x8x1xf32>
    %594 = vector.broadcast %593 : vector<2x8x1xf32> to vector<2x8x8xf32>
    %595 = arith.mulf %590, %594 : vector<2x8x8xf32>
    %596 = vector.extract_strided_slice %504 {offsets = [0, 0, 24], sizes = [2, 8, 8], strides = [1, 1, 1]} : vector<2x8x32xf32> to vector<2x8x8xf32>
    %597 = arith.truncf %595 : vector<2x8x8xf32> to vector<2x8x8xbf16>
    %598 = arith.truncf %596 : vector<2x8x8xf32> to vector<2x8x8xbf16>
    "tpu.trace_start"() <{level = 10 : i32, message = "bqk,bkd->bqd"}> : () -> ()
    %cst_197 = arith.constant dense<0.000000e+00> : vector<2x8x8xf32>
    %599 = tpu.matmul %597, %598, %cst_197 {dimension_numbers = #tpu.dot_dimension_numbers<[2], [1], [1], [2], [0, 0, 0, 1, 1, 2], [0], [0]>} : vector<2x8x8xbf16>, vector<2x8x8xbf16>, vector<2x8x8xf32> -> vector<2x8x8xf32>
    "tpu.trace_stop"() : () -> ()
    %600 = vector.shape_cast %599 : vector<2x8x8xf32> to vector<16x8xf32>
    %601 = vector.extract_strided_slice %506 {offsets = [24, 0], sizes = [8, 32], strides = [1, 1]} : vector<32x32xf32> to vector<8x32xf32>
    %602 = arith.truncf %600 : vector<16x8xf32> to vector<16x8xbf16>
    %603 = arith.truncf %601 : vector<8x32xf32> to vector<8x32xbf16>
    %cst_198 = arith.constant dense<0.000000e+00> : vector<16x32xf32>
    %604 = tpu.matmul %602, %603, %cst_198 {dimension_numbers = #tpu.dot_dimension_numbers<[1], [0], [0], [1], [0, 0, 1, 1], [], []>} : vector<16x8xbf16>, vector<8x32xbf16>, vector<16x32xf32> -> vector<16x32xf32>
    %605 = arith.addf %580, %604 : vector<16x32xf32>
    %606 = vector.extract_strided_slice %21 {offsets = [0, 0, 0], sizes = [1, 1, 32], strides = [1, 1, 1]} : vector<2x1x32xf32> to vector<1x1x32xf32>
    %607 = vector.shape_cast %606 : vector<1x1x32xf32> to vector<1x32xf32>
    %608 = vector.broadcast %607 : vector<1x32xf32> to vector<16x32xf32>
    %609 = arith.addf %605, %608 : vector<16x32xf32>
    %610 = arith.addf %487, %609 : vector<16x32xf32>
    %611 = vector.extract_strided_slice %22 {offsets = [0, 0, 0], sizes = [1, 1, 32], strides = [1, 1, 1]} : vector<2x1x32xf32> to vector<1x1x32xf32>
    %612 = vector.shape_cast %611 : vector<1x1x32xf32> to vector<1x32xf32>
    %613 = vector.extract_strided_slice %23 {offsets = [0, 0, 0], sizes = [1, 1, 32], strides = [1, 1, 1]} : vector<2x1x32xf32> to vector<1x1x32xf32>
    %614 = vector.shape_cast %613 : vector<1x1x32xf32> to vector<1x32xf32>
    %cst_199 = arith.constant dense<0.000000e+00> : vector<16xf32>
    %615 = vector.multi_reduction <add>, %610, %cst_199 [1] : vector<16x32xf32> to vector<16xf32>
    %616 = vector.shape_cast %615 : vector<16xf32> to vector<16x1xf32>
    %cst_200 = arith.constant 3.200000e+01 : f32
    %617 = vector.broadcast %cst_200 : f32 to vector<16x1xf32>
    %618 = arith.divf %616, %617 : vector<16x1xf32>
    %619 = vector.broadcast %618 : vector<16x1xf32> to vector<16x32xf32>
    %620 = arith.subf %610, %619 : vector<16x32xf32>
    %621 = arith.mulf %620, %620 : vector<16x32xf32>
    %cst_201 = arith.constant dense<0.000000e+00> : vector<16xf32>
    %622 = vector.multi_reduction <add>, %621, %cst_201 [1] : vector<16x32xf32> to vector<16xf32>
    %623 = vector.shape_cast %622 : vector<16xf32> to vector<16x1xf32>
    %cst_202 = arith.constant 3.200000e+01 : f32
    %624 = vector.broadcast %cst_202 : f32 to vector<16x1xf32>
    %625 = arith.divf %623, %624 : vector<16x1xf32>
    %626 = vector.broadcast %618 : vector<16x1xf32> to vector<16x32xf32>
    %627 = arith.subf %610, %626 : vector<16x32xf32>
    %cst_203 = arith.constant 9.99999974E-6 : f32
    %628 = vector.broadcast %cst_203 : f32 to vector<16x1xf32>
    %629 = arith.addf %625, %628 : vector<16x1xf32>
    %630 = math.rsqrt %629 : vector<16x1xf32>
    %631 = vector.broadcast %630 : vector<16x1xf32> to vector<16x32xf32>
    %632 = arith.mulf %627, %631 : vector<16x32xf32>
    %633 = vector.broadcast %612 : vector<1x32xf32> to vector<16x32xf32>
    %634 = arith.mulf %632, %633 : vector<16x32xf32>
    %635 = vector.broadcast %614 : vector<1x32xf32> to vector<16x32xf32>
    %636 = arith.addf %634, %635 : vector<16x32xf32>
    %637 = vector.extract_strided_slice %24 {offsets = [0, 0, 0], sizes = [1, 32, 32], strides = [1, 1, 1]} : vector<2x32x32xf32> to vector<1x32x32xf32>
    %638 = vector.shape_cast %637 : vector<1x32x32xf32> to vector<32x32xf32>
    %639 = arith.truncf %636 : vector<16x32xf32> to vector<16x32xbf16>
    %640 = arith.truncf %638 : vector<32x32xf32> to vector<32x32xbf16>
    %cst_204 = arith.constant dense<0.000000e+00> : vector<16x32xf32>
    %641 = tpu.matmul %639, %640, %cst_204 {dimension_numbers = #tpu.dot_dimension_numbers<[1], [0], [0], [1], [0, 0, 1, 1], [], []>} : vector<16x32xbf16>, vector<32x32xbf16>, vector<16x32xf32> -> vector<16x32xf32>
    %642 = vector.extract_strided_slice %25 {offsets = [0, 0, 0], sizes = [1, 1, 32], strides = [1, 1, 1]} : vector<2x1x32xf32> to vector<1x1x32xf32>
    %643 = vector.shape_cast %642 : vector<1x1x32xf32> to vector<1x32xf32>
    %644 = vector.broadcast %643 : vector<1x32xf32> to vector<16x32xf32>
    %645 = arith.addf %641, %644 : vector<16x32xf32>
    %cst_205 = arith.constant 5.000000e-01 : f32
    %646 = vector.broadcast %cst_205 : f32 to vector<16x32xf32>
    %647 = arith.mulf %646, %645 : vector<16x32xf32>
    %cst_206 = arith.constant 4.471500e-02 : f32
    %648 = vector.broadcast %cst_206 : f32 to vector<16x32xf32>
    %649 = arith.mulf %648, %645 : vector<16x32xf32>
    %650 = arith.mulf %649, %645 : vector<16x32xf32>
    %651 = arith.mulf %650, %645 : vector<16x32xf32>
    %652 = arith.addf %645, %651 : vector<16x32xf32>
    %cst_207 = arith.constant 0.797884583 : f32
    %653 = vector.broadcast %cst_207 : f32 to vector<16x32xf32>
    %654 = arith.mulf %653, %652 : vector<16x32xf32>
    %655 = math.tanh %654 : vector<16x32xf32>
    %cst_208 = arith.constant 1.000000e+00 : f32
    %656 = vector.broadcast %cst_208 : f32 to vector<16x32xf32>
    %657 = arith.addf %656, %655 : vector<16x32xf32>
    %658 = arith.mulf %647, %657 : vector<16x32xf32>
    %659 = vector.extract_strided_slice %26 {offsets = [0, 0, 0], sizes = [1, 32, 32], strides = [1, 1, 1]} : vector<2x32x32xf32> to vector<1x32x32xf32>
    %660 = vector.shape_cast %659 : vector<1x32x32xf32> to vector<32x32xf32>
    %661 = arith.truncf %658 : vector<16x32xf32> to vector<16x32xbf16>
    %662 = arith.truncf %660 : vector<32x32xf32> to vector<32x32xbf16>
    %cst_209 = arith.constant dense<0.000000e+00> : vector<16x32xf32>
    %663 = tpu.matmul %661, %662, %cst_209 {dimension_numbers = #tpu.dot_dimension_numbers<[1], [0], [0], [1], [0, 0, 1, 1], [], []>} : vector<16x32xbf16>, vector<32x32xbf16>, vector<16x32xf32> -> vector<16x32xf32>
    %664 = vector.extract_strided_slice %27 {offsets = [0, 0, 0], sizes = [1, 1, 32], strides = [1, 1, 1]} : vector<2x1x32xf32> to vector<1x1x32xf32>
    %665 = vector.shape_cast %664 : vector<1x1x32xf32> to vector<1x32xf32>
    %666 = vector.broadcast %665 : vector<1x32xf32> to vector<16x32xf32>
    %667 = arith.addf %663, %666 : vector<16x32xf32>
    %668 = arith.addf %636, %667 : vector<16x32xf32>
    %669 = vector.extract_strided_slice %28 {offsets = [0, 0, 0], sizes = [1, 1, 32], strides = [1, 1, 1]} : vector<2x1x32xf32> to vector<1x1x32xf32>
    %670 = vector.shape_cast %669 : vector<1x1x32xf32> to vector<1x32xf32>
    %671 = vector.extract_strided_slice %29 {offsets = [0, 0, 0], sizes = [1, 1, 32], strides = [1, 1, 1]} : vector<2x1x32xf32> to vector<1x1x32xf32>
    %672 = vector.shape_cast %671 : vector<1x1x32xf32> to vector<1x32xf32>
    %cst_210 = arith.constant dense<0.000000e+00> : vector<16xf32>
    %673 = vector.multi_reduction <add>, %668, %cst_210 [1] : vector<16x32xf32> to vector<16xf32>
    %674 = vector.shape_cast %673 : vector<16xf32> to vector<16x1xf32>
    %cst_211 = arith.constant 3.200000e+01 : f32
    %675 = vector.broadcast %cst_211 : f32 to vector<16x1xf32>
    %676 = arith.divf %674, %675 : vector<16x1xf32>
    %677 = vector.broadcast %676 : vector<16x1xf32> to vector<16x32xf32>
    %678 = arith.subf %668, %677 : vector<16x32xf32>
    %679 = arith.mulf %678, %678 : vector<16x32xf32>
    %cst_212 = arith.constant dense<0.000000e+00> : vector<16xf32>
    %680 = vector.multi_reduction <add>, %679, %cst_212 [1] : vector<16x32xf32> to vector<16xf32>
    %681 = vector.shape_cast %680 : vector<16xf32> to vector<16x1xf32>
    %cst_213 = arith.constant 3.200000e+01 : f32
    %682 = vector.broadcast %cst_213 : f32 to vector<16x1xf32>
    %683 = arith.divf %681, %682 : vector<16x1xf32>
    %684 = vector.broadcast %676 : vector<16x1xf32> to vector<16x32xf32>
    %685 = arith.subf %668, %684 : vector<16x32xf32>
    %cst_214 = arith.constant 9.99999974E-6 : f32
    %686 = vector.broadcast %cst_214 : f32 to vector<16x1xf32>
    %687 = arith.addf %683, %686 : vector<16x1xf32>
    %688 = math.rsqrt %687 : vector<16x1xf32>
    %689 = vector.broadcast %688 : vector<16x1xf32> to vector<16x32xf32>
    %690 = arith.mulf %685, %689 : vector<16x32xf32>
    %691 = vector.broadcast %670 : vector<1x32xf32> to vector<16x32xf32>
    %692 = arith.mulf %690, %691 : vector<16x32xf32>
    %693 = vector.broadcast %672 : vector<1x32xf32> to vector<16x32xf32>
    %694 = arith.addf %692, %693 : vector<16x32xf32>
    %695 = vector.extract_strided_slice %18 {offsets = [1, 0, 0], sizes = [1, 32, 96], strides = [1, 1, 1]} : vector<2x32x96xf32> to vector<1x32x96xf32>
    %696 = vector.shape_cast %695 : vector<1x32x96xf32> to vector<32x96xf32>
    %697 = arith.truncf %694 : vector<16x32xf32> to vector<16x32xbf16>
    %698 = arith.truncf %696 : vector<32x96xf32> to vector<32x96xbf16>
    %cst_215 = arith.constant dense<0.000000e+00> : vector<16x96xf32>
    %699 = tpu.matmul %697, %698, %cst_215 {dimension_numbers = #tpu.dot_dimension_numbers<[1], [0], [0], [1], [0, 0, 1, 1], [], []>} : vector<16x32xbf16>, vector<32x96xbf16>, vector<16x96xf32> -> vector<16x96xf32>
    %700 = vector.extract_strided_slice %19 {offsets = [1, 0, 0], sizes = [1, 1, 96], strides = [1, 1, 1]} : vector<2x1x96xf32> to vector<1x1x96xf32>
    %701 = vector.shape_cast %700 : vector<1x1x96xf32> to vector<1x96xf32>
    %702 = vector.broadcast %701 : vector<1x96xf32> to vector<16x96xf32>
    %703 = arith.addf %699, %702 : vector<16x96xf32>
    %704 = vector.extract_strided_slice %703 {offsets = [0, 0], sizes = [16, 32], strides = [1, 1]} : vector<16x96xf32> to vector<16x32xf32>
    %cst_216 = arith.constant 0.353553385 : f32
    %705 = vector.broadcast %cst_216 : f32 to vector<16x32xf32>
    %706 = arith.mulf %704, %705 : vector<16x32xf32>
    %707 = vector.shape_cast %706 : vector<16x32xf32> to vector<2x8x32xf32>
    %708 = vector.extract_strided_slice %703 {offsets = [0, 32], sizes = [16, 32], strides = [1, 1]} : vector<16x96xf32> to vector<16x32xf32>
    %709 = vector.shape_cast %708 : vector<16x32xf32> to vector<2x8x32xf32>
    %710 = vector.extract_strided_slice %703 {offsets = [0, 64], sizes = [16, 32], strides = [1, 1]} : vector<16x96xf32> to vector<16x32xf32>
    %711 = vector.shape_cast %710 : vector<16x32xf32> to vector<2x8x32xf32>
    %712 = vector.extract_strided_slice %20 {offsets = [1, 0, 0], sizes = [1, 32, 32], strides = [1, 1, 1]} : vector<2x32x32xf32> to vector<1x32x32xf32>
    %713 = vector.shape_cast %712 : vector<1x32x32xf32> to vector<32x32xf32>
    %714 = vector.extract_strided_slice %707 {offsets = [0, 0, 0], sizes = [2, 8, 8], strides = [1, 1, 1]} : vector<2x8x32xf32> to vector<2x8x8xf32>
    %715 = vector.extract_strided_slice %709 {offsets = [0, 0, 0], sizes = [2, 8, 8], strides = [1, 1, 1]} : vector<2x8x32xf32> to vector<2x8x8xf32>
    %716 = arith.truncf %714 : vector<2x8x8xf32> to vector<2x8x8xbf16>
    %717 = arith.truncf %715 : vector<2x8x8xf32> to vector<2x8x8xbf16>
    "tpu.trace_start"() <{level = 10 : i32, message = "bqd,bkd->bqk"}> : () -> ()
    %cst_217 = arith.constant dense<0.000000e+00> : vector<2x8x8xf32>
    %718 = tpu.matmul %716, %717, %cst_217 {dimension_numbers = #tpu.dot_dimension_numbers<[2], [2], [1], [1], [0, 0, 0, 1, 1, 1], [0], [0]>} : vector<2x8x8xbf16>, vector<2x8x8xbf16>, vector<2x8x8xf32> -> vector<2x8x8xf32>
    "tpu.trace_stop"() : () -> ()
    %cst_218 = arith.constant dense<0xFF800000> : vector<2x8xf32>
    %719 = vector.multi_reduction <maximumf>, %718, %cst_218 [2] : vector<2x8x8xf32> to vector<2x8xf32>
    %720 = vector.shape_cast %719 : vector<2x8xf32> to vector<2x8x1xf32>
    %721 = vector.broadcast %720 : vector<2x8x1xf32> to vector<2x8x8xf32>
    %722 = arith.subf %718, %721 : vector<2x8x8xf32>
    %723 = math.exp %722 : vector<2x8x8xf32>
    %cst_219 = arith.constant dense<0.000000e+00> : vector<2x8xf32>
    %724 = vector.multi_reduction <add>, %723, %cst_219 [2] : vector<2x8x8xf32> to vector<2x8xf32>
    %725 = vector.shape_cast %724 : vector<2x8xf32> to vector<2x8x1xf32>
    %726 = tpu.reciprocal %725 {approx = true} : vector<2x8x1xf32> -> vector<2x8x1xf32>
    %727 = vector.broadcast %726 : vector<2x8x1xf32> to vector<2x8x8xf32>
    %728 = arith.mulf %723, %727 : vector<2x8x8xf32>
    %729 = vector.extract_strided_slice %711 {offsets = [0, 0, 0], sizes = [2, 8, 8], strides = [1, 1, 1]} : vector<2x8x32xf32> to vector<2x8x8xf32>
    %730 = arith.truncf %728 : vector<2x8x8xf32> to vector<2x8x8xbf16>
    %731 = arith.truncf %729 : vector<2x8x8xf32> to vector<2x8x8xbf16>
    "tpu.trace_start"() <{level = 10 : i32, message = "bqk,bkd->bqd"}> : () -> ()
    %cst_220 = arith.constant dense<0.000000e+00> : vector<2x8x8xf32>
    %732 = tpu.matmul %730, %731, %cst_220 {dimension_numbers = #tpu.dot_dimension_numbers<[2], [1], [1], [2], [0, 0, 0, 1, 1, 2], [0], [0]>} : vector<2x8x8xbf16>, vector<2x8x8xbf16>, vector<2x8x8xf32> -> vector<2x8x8xf32>
    "tpu.trace_stop"() : () -> ()
    %733 = vector.shape_cast %732 : vector<2x8x8xf32> to vector<16x8xf32>
    %734 = vector.extract_strided_slice %713 {offsets = [0, 0], sizes = [8, 32], strides = [1, 1]} : vector<32x32xf32> to vector<8x32xf32>
    %735 = arith.truncf %733 : vector<16x8xf32> to vector<16x8xbf16>
    %736 = arith.truncf %734 : vector<8x32xf32> to vector<8x32xbf16>
    %cst_221 = arith.constant dense<0.000000e+00> : vector<16x32xf32>
    %737 = tpu.matmul %735, %736, %cst_221 {dimension_numbers = #tpu.dot_dimension_numbers<[1], [0], [0], [1], [0, 0, 1, 1], [], []>} : vector<16x8xbf16>, vector<8x32xbf16>, vector<16x32xf32> -> vector<16x32xf32>
    %738 = vector.extract_strided_slice %707 {offsets = [0, 0, 8], sizes = [2, 8, 8], strides = [1, 1, 1]} : vector<2x8x32xf32> to vector<2x8x8xf32>
    %739 = vector.extract_strided_slice %709 {offsets = [0, 0, 8], sizes = [2, 8, 8], strides = [1, 1, 1]} : vector<2x8x32xf32> to vector<2x8x8xf32>
    %740 = arith.truncf %738 : vector<2x8x8xf32> to vector<2x8x8xbf16>
    %741 = arith.truncf %739 : vector<2x8x8xf32> to vector<2x8x8xbf16>
    "tpu.trace_start"() <{level = 10 : i32, message = "bqd,bkd->bqk"}> : () -> ()
    %cst_222 = arith.constant dense<0.000000e+00> : vector<2x8x8xf32>
    %742 = tpu.matmul %740, %741, %cst_222 {dimension_numbers = #tpu.dot_dimension_numbers<[2], [2], [1], [1], [0, 0, 0, 1, 1, 1], [0], [0]>} : vector<2x8x8xbf16>, vector<2x8x8xbf16>, vector<2x8x8xf32> -> vector<2x8x8xf32>
    "tpu.trace_stop"() : () -> ()
    %cst_223 = arith.constant dense<0xFF800000> : vector<2x8xf32>
    %743 = vector.multi_reduction <maximumf>, %742, %cst_223 [2] : vector<2x8x8xf32> to vector<2x8xf32>
    %744 = vector.shape_cast %743 : vector<2x8xf32> to vector<2x8x1xf32>
    %745 = vector.broadcast %744 : vector<2x8x1xf32> to vector<2x8x8xf32>
    %746 = arith.subf %742, %745 : vector<2x8x8xf32>
    %747 = math.exp %746 : vector<2x8x8xf32>
    %cst_224 = arith.constant dense<0.000000e+00> : vector<2x8xf32>
    %748 = vector.multi_reduction <add>, %747, %cst_224 [2] : vector<2x8x8xf32> to vector<2x8xf32>
    %749 = vector.shape_cast %748 : vector<2x8xf32> to vector<2x8x1xf32>
    %750 = tpu.reciprocal %749 {approx = true} : vector<2x8x1xf32> -> vector<2x8x1xf32>
    %751 = vector.broadcast %750 : vector<2x8x1xf32> to vector<2x8x8xf32>
    %752 = arith.mulf %747, %751 : vector<2x8x8xf32>
    %753 = vector.extract_strided_slice %711 {offsets = [0, 0, 8], sizes = [2, 8, 8], strides = [1, 1, 1]} : vector<2x8x32xf32> to vector<2x8x8xf32>
    %754 = arith.truncf %752 : vector<2x8x8xf32> to vector<2x8x8xbf16>
    %755 = arith.truncf %753 : vector<2x8x8xf32> to vector<2x8x8xbf16>
    "tpu.trace_start"() <{level = 10 : i32, message = "bqk,bkd->bqd"}> : () -> ()
    %cst_225 = arith.constant dense<0.000000e+00> : vector<2x8x8xf32>
    %756 = tpu.matmul %754, %755, %cst_225 {dimension_numbers = #tpu.dot_dimension_numbers<[2], [1], [1], [2], [0, 0, 0, 1, 1, 2], [0], [0]>} : vector<2x8x8xbf16>, vector<2x8x8xbf16>, vector<2x8x8xf32> -> vector<2x8x8xf32>
    "tpu.trace_stop"() : () -> ()
    %757 = vector.shape_cast %756 : vector<2x8x8xf32> to vector<16x8xf32>
    %758 = vector.extract_strided_slice %713 {offsets = [8, 0], sizes = [8, 32], strides = [1, 1]} : vector<32x32xf32> to vector<8x32xf32>
    %759 = arith.truncf %757 : vector<16x8xf32> to vector<16x8xbf16>
    %760 = arith.truncf %758 : vector<8x32xf32> to vector<8x32xbf16>
    %cst_226 = arith.constant dense<0.000000e+00> : vector<16x32xf32>
    %761 = tpu.matmul %759, %760, %cst_226 {dimension_numbers = #tpu.dot_dimension_numbers<[1], [0], [0], [1], [0, 0, 1, 1], [], []>} : vector<16x8xbf16>, vector<8x32xbf16>, vector<16x32xf32> -> vector<16x32xf32>
    %762 = arith.addf %737, %761 : vector<16x32xf32>
    %763 = vector.extract_strided_slice %707 {offsets = [0, 0, 16], sizes = [2, 8, 8], strides = [1, 1, 1]} : vector<2x8x32xf32> to vector<2x8x8xf32>
    %764 = vector.extract_strided_slice %709 {offsets = [0, 0, 16], sizes = [2, 8, 8], strides = [1, 1, 1]} : vector<2x8x32xf32> to vector<2x8x8xf32>
    %765 = arith.truncf %763 : vector<2x8x8xf32> to vector<2x8x8xbf16>
    %766 = arith.truncf %764 : vector<2x8x8xf32> to vector<2x8x8xbf16>
    "tpu.trace_start"() <{level = 10 : i32, message = "bqd,bkd->bqk"}> : () -> ()
    %cst_227 = arith.constant dense<0.000000e+00> : vector<2x8x8xf32>
    %767 = tpu.matmul %765, %766, %cst_227 {dimension_numbers = #tpu.dot_dimension_numbers<[2], [2], [1], [1], [0, 0, 0, 1, 1, 1], [0], [0]>} : vector<2x8x8xbf16>, vector<2x8x8xbf16>, vector<2x8x8xf32> -> vector<2x8x8xf32>
    "tpu.trace_stop"() : () -> ()
    %cst_228 = arith.constant dense<0xFF800000> : vector<2x8xf32>
    %768 = vector.multi_reduction <maximumf>, %767, %cst_228 [2] : vector<2x8x8xf32> to vector<2x8xf32>
    %769 = vector.shape_cast %768 : vector<2x8xf32> to vector<2x8x1xf32>
    %770 = vector.broadcast %769 : vector<2x8x1xf32> to vector<2x8x8xf32>
    %771 = arith.subf %767, %770 : vector<2x8x8xf32>
    %772 = math.exp %771 : vector<2x8x8xf32>
    %cst_229 = arith.constant dense<0.000000e+00> : vector<2x8xf32>
    %773 = vector.multi_reduction <add>, %772, %cst_229 [2] : vector<2x8x8xf32> to vector<2x8xf32>
    %774 = vector.shape_cast %773 : vector<2x8xf32> to vector<2x8x1xf32>
    %775 = tpu.reciprocal %774 {approx = true} : vector<2x8x1xf32> -> vector<2x8x1xf32>
    %776 = vector.broadcast %775 : vector<2x8x1xf32> to vector<2x8x8xf32>
    %777 = arith.mulf %772, %776 : vector<2x8x8xf32>
    %778 = vector.extract_strided_slice %711 {offsets = [0, 0, 16], sizes = [2, 8, 8], strides = [1, 1, 1]} : vector<2x8x32xf32> to vector<2x8x8xf32>
    %779 = arith.truncf %777 : vector<2x8x8xf32> to vector<2x8x8xbf16>
    %780 = arith.truncf %778 : vector<2x8x8xf32> to vector<2x8x8xbf16>
    "tpu.trace_start"() <{level = 10 : i32, message = "bqk,bkd->bqd"}> : () -> ()
    %cst_230 = arith.constant dense<0.000000e+00> : vector<2x8x8xf32>
    %781 = tpu.matmul %779, %780, %cst_230 {dimension_numbers = #tpu.dot_dimension_numbers<[2], [1], [1], [2], [0, 0, 0, 1, 1, 2], [0], [0]>} : vector<2x8x8xbf16>, vector<2x8x8xbf16>, vector<2x8x8xf32> -> vector<2x8x8xf32>
    "tpu.trace_stop"() : () -> ()
    %782 = vector.shape_cast %781 : vector<2x8x8xf32> to vector<16x8xf32>
    %783 = vector.extract_strided_slice %713 {offsets = [16, 0], sizes = [8, 32], strides = [1, 1]} : vector<32x32xf32> to vector<8x32xf32>
    %784 = arith.truncf %782 : vector<16x8xf32> to vector<16x8xbf16>
    %785 = arith.truncf %783 : vector<8x32xf32> to vector<8x32xbf16>
    %cst_231 = arith.constant dense<0.000000e+00> : vector<16x32xf32>
    %786 = tpu.matmul %784, %785, %cst_231 {dimension_numbers = #tpu.dot_dimension_numbers<[1], [0], [0], [1], [0, 0, 1, 1], [], []>} : vector<16x8xbf16>, vector<8x32xbf16>, vector<16x32xf32> -> vector<16x32xf32>
    %787 = arith.addf %762, %786 : vector<16x32xf32>
    %788 = vector.extract_strided_slice %707 {offsets = [0, 0, 24], sizes = [2, 8, 8], strides = [1, 1, 1]} : vector<2x8x32xf32> to vector<2x8x8xf32>
    %789 = vector.extract_strided_slice %709 {offsets = [0, 0, 24], sizes = [2, 8, 8], strides = [1, 1, 1]} : vector<2x8x32xf32> to vector<2x8x8xf32>
    %790 = arith.truncf %788 : vector<2x8x8xf32> to vector<2x8x8xbf16>
    %791 = arith.truncf %789 : vector<2x8x8xf32> to vector<2x8x8xbf16>
    "tpu.trace_start"() <{level = 10 : i32, message = "bqd,bkd->bqk"}> : () -> ()
    %cst_232 = arith.constant dense<0.000000e+00> : vector<2x8x8xf32>
    %792 = tpu.matmul %790, %791, %cst_232 {dimension_numbers = #tpu.dot_dimension_numbers<[2], [2], [1], [1], [0, 0, 0, 1, 1, 1], [0], [0]>} : vector<2x8x8xbf16>, vector<2x8x8xbf16>, vector<2x8x8xf32> -> vector<2x8x8xf32>
    "tpu.trace_stop"() : () -> ()
    %cst_233 = arith.constant dense<0xFF800000> : vector<2x8xf32>
    %793 = vector.multi_reduction <maximumf>, %792, %cst_233 [2] : vector<2x8x8xf32> to vector<2x8xf32>
    %794 = vector.shape_cast %793 : vector<2x8xf32> to vector<2x8x1xf32>
    %795 = vector.broadcast %794 : vector<2x8x1xf32> to vector<2x8x8xf32>
    %796 = arith.subf %792, %795 : vector<2x8x8xf32>
    %797 = math.exp %796 : vector<2x8x8xf32>
    %cst_234 = arith.constant dense<0.000000e+00> : vector<2x8xf32>
    %798 = vector.multi_reduction <add>, %797, %cst_234 [2] : vector<2x8x8xf32> to vector<2x8xf32>
    %799 = vector.shape_cast %798 : vector<2x8xf32> to vector<2x8x1xf32>
    %800 = tpu.reciprocal %799 {approx = true} : vector<2x8x1xf32> -> vector<2x8x1xf32>
    %801 = vector.broadcast %800 : vector<2x8x1xf32> to vector<2x8x8xf32>
    %802 = arith.mulf %797, %801 : vector<2x8x8xf32>
    %803 = vector.extract_strided_slice %711 {offsets = [0, 0, 24], sizes = [2, 8, 8], strides = [1, 1, 1]} : vector<2x8x32xf32> to vector<2x8x8xf32>
    %804 = arith.truncf %802 : vector<2x8x8xf32> to vector<2x8x8xbf16>
    %805 = arith.truncf %803 : vector<2x8x8xf32> to vector<2x8x8xbf16>
    "tpu.trace_start"() <{level = 10 : i32, message = "bqk,bkd->bqd"}> : () -> ()
    %cst_235 = arith.constant dense<0.000000e+00> : vector<2x8x8xf32>
    %806 = tpu.matmul %804, %805, %cst_235 {dimension_numbers = #tpu.dot_dimension_numbers<[2], [1], [1], [2], [0, 0, 0, 1, 1, 2], [0], [0]>} : vector<2x8x8xbf16>, vector<2x8x8xbf16>, vector<2x8x8xf32> -> vector<2x8x8xf32>
    "tpu.trace_stop"() : () -> ()
    %807 = vector.shape_cast %806 : vector<2x8x8xf32> to vector<16x8xf32>
    %808 = vector.extract_strided_slice %713 {offsets = [24, 0], sizes = [8, 32], strides = [1, 1]} : vector<32x32xf32> to vector<8x32xf32>
    %809 = arith.truncf %807 : vector<16x8xf32> to vector<16x8xbf16>
    %810 = arith.truncf %808 : vector<8x32xf32> to vector<8x32xbf16>
    %cst_236 = arith.constant dense<0.000000e+00> : vector<16x32xf32>
    %811 = tpu.matmul %809, %810, %cst_236 {dimension_numbers = #tpu.dot_dimension_numbers<[1], [0], [0], [1], [0, 0, 1, 1], [], []>} : vector<16x8xbf16>, vector<8x32xbf16>, vector<16x32xf32> -> vector<16x32xf32>
    %812 = arith.addf %787, %811 : vector<16x32xf32>
    %813 = vector.extract_strided_slice %21 {offsets = [1, 0, 0], sizes = [1, 1, 32], strides = [1, 1, 1]} : vector<2x1x32xf32> to vector<1x1x32xf32>
    %814 = vector.shape_cast %813 : vector<1x1x32xf32> to vector<1x32xf32>
    %815 = vector.broadcast %814 : vector<1x32xf32> to vector<16x32xf32>
    %816 = arith.addf %812, %815 : vector<16x32xf32>
    %817 = arith.addf %694, %816 : vector<16x32xf32>
    %818 = vector.extract_strided_slice %22 {offsets = [1, 0, 0], sizes = [1, 1, 32], strides = [1, 1, 1]} : vector<2x1x32xf32> to vector<1x1x32xf32>
    %819 = vector.shape_cast %818 : vector<1x1x32xf32> to vector<1x32xf32>
    %820 = vector.extract_strided_slice %23 {offsets = [1, 0, 0], sizes = [1, 1, 32], strides = [1, 1, 1]} : vector<2x1x32xf32> to vector<1x1x32xf32>
    %821 = vector.shape_cast %820 : vector<1x1x32xf32> to vector<1x32xf32>
    %cst_237 = arith.constant dense<0.000000e+00> : vector<16xf32>
    %822 = vector.multi_reduction <add>, %817, %cst_237 [1] : vector<16x32xf32> to vector<16xf32>
    %823 = vector.shape_cast %822 : vector<16xf32> to vector<16x1xf32>
    %cst_238 = arith.constant 3.200000e+01 : f32
    %824 = vector.broadcast %cst_238 : f32 to vector<16x1xf32>
    %825 = arith.divf %823, %824 : vector<16x1xf32>
    %826 = vector.broadcast %825 : vector<16x1xf32> to vector<16x32xf32>
    %827 = arith.subf %817, %826 : vector<16x32xf32>
    %828 = arith.mulf %827, %827 : vector<16x32xf32>
    %cst_239 = arith.constant dense<0.000000e+00> : vector<16xf32>
    %829 = vector.multi_reduction <add>, %828, %cst_239 [1] : vector<16x32xf32> to vector<16xf32>
    %830 = vector.shape_cast %829 : vector<16xf32> to vector<16x1xf32>
    %cst_240 = arith.constant 3.200000e+01 : f32
    %831 = vector.broadcast %cst_240 : f32 to vector<16x1xf32>
    %832 = arith.divf %830, %831 : vector<16x1xf32>
    %833 = vector.broadcast %825 : vector<16x1xf32> to vector<16x32xf32>
    %834 = arith.subf %817, %833 : vector<16x32xf32>
    %cst_241 = arith.constant 9.99999974E-6 : f32
    %835 = vector.broadcast %cst_241 : f32 to vector<16x1xf32>
    %836 = arith.addf %832, %835 : vector<16x1xf32>
    %837 = math.rsqrt %836 : vector<16x1xf32>
    %838 = vector.broadcast %837 : vector<16x1xf32> to vector<16x32xf32>
    %839 = arith.mulf %834, %838 : vector<16x32xf32>
    %840 = vector.broadcast %819 : vector<1x32xf32> to vector<16x32xf32>
    %841 = arith.mulf %839, %840 : vector<16x32xf32>
    %842 = vector.broadcast %821 : vector<1x32xf32> to vector<16x32xf32>
    %843 = arith.addf %841, %842 : vector<16x32xf32>
    %844 = vector.extract_strided_slice %24 {offsets = [1, 0, 0], sizes = [1, 32, 32], strides = [1, 1, 1]} : vector<2x32x32xf32> to vector<1x32x32xf32>
    %845 = vector.shape_cast %844 : vector<1x32x32xf32> to vector<32x32xf32>
    %846 = arith.truncf %843 : vector<16x32xf32> to vector<16x32xbf16>
    %847 = arith.truncf %845 : vector<32x32xf32> to vector<32x32xbf16>
    %cst_242 = arith.constant dense<0.000000e+00> : vector<16x32xf32>
    %848 = tpu.matmul %846, %847, %cst_242 {dimension_numbers = #tpu.dot_dimension_numbers<[1], [0], [0], [1], [0, 0, 1, 1], [], []>} : vector<16x32xbf16>, vector<32x32xbf16>, vector<16x32xf32> -> vector<16x32xf32>
    %849 = vector.extract_strided_slice %25 {offsets = [1, 0, 0], sizes = [1, 1, 32], strides = [1, 1, 1]} : vector<2x1x32xf32> to vector<1x1x32xf32>
    %850 = vector.shape_cast %849 : vector<1x1x32xf32> to vector<1x32xf32>
    %851 = vector.broadcast %850 : vector<1x32xf32> to vector<16x32xf32>
    %852 = arith.addf %848, %851 : vector<16x32xf32>
    %cst_243 = arith.constant 5.000000e-01 : f32
    %853 = vector.broadcast %cst_243 : f32 to vector<16x32xf32>
    %854 = arith.mulf %853, %852 : vector<16x32xf32>
    %cst_244 = arith.constant 4.471500e-02 : f32
    %855 = vector.broadcast %cst_244 : f32 to vector<16x32xf32>
    %856 = arith.mulf %855, %852 : vector<16x32xf32>
    %857 = arith.mulf %856, %852 : vector<16x32xf32>
    %858 = arith.mulf %857, %852 : vector<16x32xf32>
    %859 = arith.addf %852, %858 : vector<16x32xf32>
    %cst_245 = arith.constant 0.797884583 : f32
    %860 = vector.broadcast %cst_245 : f32 to vector<16x32xf32>
    %861 = arith.mulf %860, %859 : vector<16x32xf32>
    %862 = math.tanh %861 : vector<16x32xf32>
    %cst_246 = arith.constant 1.000000e+00 : f32
    %863 = vector.broadcast %cst_246 : f32 to vector<16x32xf32>
    %864 = arith.addf %863, %862 : vector<16x32xf32>
    %865 = arith.mulf %854, %864 : vector<16x32xf32>
    %866 = vector.extract_strided_slice %26 {offsets = [1, 0, 0], sizes = [1, 32, 32], strides = [1, 1, 1]} : vector<2x32x32xf32> to vector<1x32x32xf32>
    %867 = vector.shape_cast %866 : vector<1x32x32xf32> to vector<32x32xf32>
    %868 = arith.truncf %865 : vector<16x32xf32> to vector<16x32xbf16>
    %869 = arith.truncf %867 : vector<32x32xf32> to vector<32x32xbf16>
    %cst_247 = arith.constant dense<0.000000e+00> : vector<16x32xf32>
    %870 = tpu.matmul %868, %869, %cst_247 {dimension_numbers = #tpu.dot_dimension_numbers<[1], [0], [0], [1], [0, 0, 1, 1], [], []>} : vector<16x32xbf16>, vector<32x32xbf16>, vector<16x32xf32> -> vector<16x32xf32>
    %871 = vector.extract_strided_slice %27 {offsets = [1, 0, 0], sizes = [1, 1, 32], strides = [1, 1, 1]} : vector<2x1x32xf32> to vector<1x1x32xf32>
    %872 = vector.shape_cast %871 : vector<1x1x32xf32> to vector<1x32xf32>
    %873 = vector.broadcast %872 : vector<1x32xf32> to vector<16x32xf32>
    %874 = arith.addf %870, %873 : vector<16x32xf32>
    %875 = arith.addf %843, %874 : vector<16x32xf32>
    %876 = vector.extract_strided_slice %28 {offsets = [1, 0, 0], sizes = [1, 1, 32], strides = [1, 1, 1]} : vector<2x1x32xf32> to vector<1x1x32xf32>
    %877 = vector.shape_cast %876 : vector<1x1x32xf32> to vector<1x32xf32>
    %878 = vector.extract_strided_slice %29 {offsets = [1, 0, 0], sizes = [1, 1, 32], strides = [1, 1, 1]} : vector<2x1x32xf32> to vector<1x1x32xf32>
    %879 = vector.shape_cast %878 : vector<1x1x32xf32> to vector<1x32xf32>
    %cst_248 = arith.constant dense<0.000000e+00> : vector<16xf32>
    %880 = vector.multi_reduction <add>, %875, %cst_248 [1] : vector<16x32xf32> to vector<16xf32>
    %881 = vector.shape_cast %880 : vector<16xf32> to vector<16x1xf32>
    %cst_249 = arith.constant 3.200000e+01 : f32
    %882 = vector.broadcast %cst_249 : f32 to vector<16x1xf32>
    %883 = arith.divf %881, %882 : vector<16x1xf32>
    %884 = vector.broadcast %883 : vector<16x1xf32> to vector<16x32xf32>
    %885 = arith.subf %875, %884 : vector<16x32xf32>
    %886 = arith.mulf %885, %885 : vector<16x32xf32>
    %cst_250 = arith.constant dense<0.000000e+00> : vector<16xf32>
    %887 = vector.multi_reduction <add>, %886, %cst_250 [1] : vector<16x32xf32> to vector<16xf32>
    %888 = vector.shape_cast %887 : vector<16xf32> to vector<16x1xf32>
    %cst_251 = arith.constant 3.200000e+01 : f32
    %889 = vector.broadcast %cst_251 : f32 to vector<16x1xf32>
    %890 = arith.divf %888, %889 : vector<16x1xf32>
    %891 = vector.broadcast %883 : vector<16x1xf32> to vector<16x32xf32>
    %892 = arith.subf %875, %891 : vector<16x32xf32>
    %cst_252 = arith.constant 9.99999974E-6 : f32
    %893 = vector.broadcast %cst_252 : f32 to vector<16x1xf32>
    %894 = arith.addf %890, %893 : vector<16x1xf32>
    %895 = math.rsqrt %894 : vector<16x1xf32>
    %896 = vector.broadcast %895 : vector<16x1xf32> to vector<16x32xf32>
    %897 = arith.mulf %892, %896 : vector<16x32xf32>
    %898 = vector.broadcast %877 : vector<1x32xf32> to vector<16x32xf32>
    %899 = arith.mulf %897, %898 : vector<16x32xf32>
    %900 = vector.broadcast %879 : vector<1x32xf32> to vector<16x32xf32>
    %901 = arith.addf %899, %900 : vector<16x32xf32>
    %cst_253 = arith.constant dense<0.000000e+00> : vector<16xf32>
    %902 = vector.multi_reduction <add>, %901, %cst_253 [1] : vector<16x32xf32> to vector<16xf32>
    %903 = vector.shape_cast %902 : vector<16xf32> to vector<16x1xf32>
    %cst_254 = arith.constant 3.200000e+01 : f32
    %904 = vector.broadcast %cst_254 : f32 to vector<16x1xf32>
    %905 = arith.divf %903, %904 : vector<16x1xf32>
    %906 = vector.broadcast %905 : vector<16x1xf32> to vector<16x32xf32>
    %907 = arith.subf %901, %906 : vector<16x32xf32>
    %908 = arith.mulf %907, %907 : vector<16x32xf32>
    %cst_255 = arith.constant dense<0.000000e+00> : vector<16xf32>
    %909 = vector.multi_reduction <add>, %908, %cst_255 [1] : vector<16x32xf32> to vector<16xf32>
    %910 = vector.shape_cast %909 : vector<16xf32> to vector<16x1xf32>
    %cst_256 = arith.constant 3.200000e+01 : f32
    %911 = vector.broadcast %cst_256 : f32 to vector<16x1xf32>
    %912 = arith.divf %910, %911 : vector<16x1xf32>
    %913 = vector.broadcast %905 : vector<16x1xf32> to vector<16x32xf32>
    %914 = arith.subf %901, %913 : vector<16x32xf32>
    %cst_257 = arith.constant 9.99999974E-6 : f32
    %915 = vector.broadcast %cst_257 : f32 to vector<16x1xf32>
    %916 = arith.addf %912, %915 : vector<16x1xf32>
    %917 = math.rsqrt %916 : vector<16x1xf32>
    %918 = vector.broadcast %917 : vector<16x1xf32> to vector<16x32xf32>
    %919 = arith.mulf %914, %918 : vector<16x32xf32>
    %920 = vector.broadcast %30 : vector<1x32xf32> to vector<16x32xf32>
    %921 = arith.mulf %919, %920 : vector<16x32xf32>
    %922 = vector.broadcast %31 : vector<1x32xf32> to vector<16x32xf32>
    %923 = arith.addf %921, %922 : vector<16x32xf32>
    %924 = vector.shape_cast %923 : vector<16x32xf32> to vector<2x8x32xf32>
    %cst_258 = arith.constant dense<0.000000e+00> : vector<2x32xf32>
    %925 = vector.multi_reduction <add>, %924, %cst_258 [1] : vector<2x8x32xf32> to vector<2x32xf32>
    %cst_259 = arith.constant 8.000000e+00 : f32
    %926 = vector.broadcast %cst_259 : f32 to vector<2x32xf32>
    %927 = arith.divf %925, %926 : vector<2x32xf32>
    %c0_260 = arith.constant 0 : index
    %c0_261 = arith.constant 0 : index
    %928 = vector.load %arg35[%c0_260, %c0_261] : memref<64x8xf32, #tpu.memory_space<vmem>>, vector<64x8xf32>
    %929 = vector.extract_strided_slice %928 {offsets = [0, 0], sizes = [32, 8], strides = [1, 1]} : vector<64x8xf32> to vector<32x8xf32>
    %930 = arith.truncf %479 : vector<2x32xf32> to vector<2x32xbf16>
    %931 = arith.truncf %929 : vector<32x8xf32> to vector<32x8xbf16>
    %cst_262 = arith.constant dense<0.000000e+00> : vector<2x8xf32>
    %932 = tpu.matmul %930, %931, %cst_262 {dimension_numbers = #tpu.dot_dimension_numbers<[1], [0], [0], [1], [0, 0, 1, 1], [], []>} : vector<2x32xbf16>, vector<32x8xbf16>, vector<2x8xf32> -> vector<2x8xf32>
    %933 = vector.extract_strided_slice %928 {offsets = [32, 0], sizes = [32, 8], strides = [1, 1]} : vector<64x8xf32> to vector<32x8xf32>
    %934 = arith.truncf %927 : vector<2x32xf32> to vector<2x32xbf16>
    %935 = arith.truncf %933 : vector<32x8xf32> to vector<32x8xbf16>
    %cst_263 = arith.constant dense<0.000000e+00> : vector<2x8xf32>
    %936 = tpu.matmul %934, %935, %cst_263 {dimension_numbers = #tpu.dot_dimension_numbers<[1], [0], [0], [1], [0, 0, 1, 1], [], []>} : vector<2x32xbf16>, vector<32x8xbf16>, vector<2x8xf32> -> vector<2x8xf32>
    %937 = arith.addf %932, %936 : vector<2x8xf32>
    %c0_264 = arith.constant 0 : index
    %c0_265 = arith.constant 0 : index
    %938 = vector.load %arg36[%c0_264, %c0_265] : memref<1x8xf32, #tpu.memory_space<vmem>>, vector<1x8xf32>
    %939 = vector.broadcast %938 : vector<1x8xf32> to vector<2x8xf32>
    %940 = arith.addf %937, %939 : vector<2x8xf32>
    %941 = arith.negf %940 : vector<2x8xf32>
    %942 = math.exp %941 : vector<2x8xf32>
    %cst_266 = arith.constant 1.000000e+00 : f32
    %943 = vector.broadcast %cst_266 : f32 to vector<2x8xf32>
    %944 = arith.addf %943, %942 : vector<2x8xf32>
    %945 = arith.divf %943, %944 : vector<2x8xf32>
    %c0_267 = arith.constant 0 : index
    %c0_268 = arith.constant 0 : index
    %946 = vector.load %arg37[%c0_267, %c0_268] : memref<2x8xf32, #tpu.memory_space<vmem>>, vector<2x8xf32>
    tpu.vector_store %arg37[%c0_267, %c0_268], %945 {strides = array<i32>} : memref<2x8xf32, #tpu.memory_space<vmem>>, vector<2x8xf32>,
    return
  }
  func.func @transform_0(%arg0: i32) -> (i32, i32) {
    %c0_i32 = arith.constant 0 : i32
    %c0_i32_0 = arith.constant 0 : i32
    %c0_i32_1 = arith.constant 0 : i32
    return %c0_i32, %c0_i32_0 : i32, i32
  }
  func.func @transform_1(%arg0: i32) -> (i32, i32) {
    %c0_i32 = arith.constant 0 : i32
    %c0_i32_0 = arith.constant 0 : i32
    %c0_i32_1 = arith.constant 0 : i32
    return %c0_i32, %c0_i32_0 : i32, i32
  }
  func.func @transform_2(%arg0: i32) -> (i32, i32) {
    %c0_i32 = arith.constant 0 : i32
    %c0_i32_0 = arith.constant 0 : i32
    %c0_i32_1 = arith.constant 0 : i32
    return %c0_i32, %c0_i32_0 : i32, i32
  }
  func.func @transform_3(%arg0: i32) -> (i32, i32) {
    %c0_i32 = arith.constant 0 : i32
    %c0_i32_0 = arith.constant 0 : i32
    %c0_i32_1 = arith.constant 0 : i32
    return %c0_i32, %c0_i32_0 : i32, i32
  }
  func.func @transform_4(%arg0: i32) -> (i32, i32, i32) {
    %c0_i32 = arith.constant 0 : i32
    %c0_i32_0 = arith.constant 0 : i32
    %c0_i32_1 = arith.constant 0 : i32
    %c0_i32_2 = arith.constant 0 : i32
    return %c0_i32, %c0_i32_0, %c0_i32_1 : i32, i32, i32
  }
  func.func @transform_5(%arg0: i32) -> (i32, i32, i32) {
    %c0_i32 = arith.constant 0 : i32
    %c0_i32_0 = arith.constant 0 : i32
    %c0_i32_1 = arith.constant 0 : i32
    %c0_i32_2 = arith.constant 0 : i32
    return %c0_i32, %c0_i32_0, %c0_i32_1 : i32, i32, i32
  }
  func.func @transform_6(%arg0: i32) -> (i32, i32, i32) {
    %c0_i32 = arith.constant 0 : i32
    %c0_i32_0 = arith.constant 0 : i32
    %c0_i32_1 = arith.constant 0 : i32
    %c0_i32_2 = arith.constant 0 : i32
    return %c0_i32, %c0_i32_0, %c0_i32_1 : i32, i32, i32
  }
  func.func @transform_7(%arg0: i32) -> (i32, i32, i32) {
    %c0_i32 = arith.constant 0 : i32
    %c0_i32_0 = arith.constant 0 : i32
    %c0_i32_1 = arith.constant 0 : i32
    %c0_i32_2 = arith.constant 0 : i32
    return %c0_i32, %c0_i32_0, %c0_i32_1 : i32, i32, i32
  }
  func.func @transform_8(%arg0: i32) -> (i32, i32, i32) {
    %c0_i32 = arith.constant 0 : i32
    %c0_i32_0 = arith.constant 0 : i32
    %c0_i32_1 = arith.constant 0 : i32
    %c0_i32_2 = arith.constant 0 : i32
    return %c0_i32, %c0_i32_0, %c0_i32_1 : i32, i32, i32
  }
  func.func @transform_9(%arg0: i32) -> (i32, i32, i32) {
    %c0_i32 = arith.constant 0 : i32
    %c0_i32_0 = arith.constant 0 : i32
    %c0_i32_1 = arith.constant 0 : i32
    %c0_i32_2 = arith.constant 0 : i32
    return %c0_i32, %c0_i32_0, %c0_i32_1 : i32, i32, i32
  }
  func.func @transform_10(%arg0: i32) -> (i32, i32, i32) {
    %c0_i32 = arith.constant 0 : i32
    %c0_i32_0 = arith.constant 0 : i32
    %c0_i32_1 = arith.constant 0 : i32
    %c0_i32_2 = arith.constant 0 : i32
    return %c0_i32, %c0_i32_0, %c0_i32_1 : i32, i32, i32
  }
  func.func @transform_11(%arg0: i32) -> (i32, i32, i32) {
    %c0_i32 = arith.constant 0 : i32
    %c0_i32_0 = arith.constant 0 : i32
    %c0_i32_1 = arith.constant 0 : i32
    %c0_i32_2 = arith.constant 0 : i32
    return %c0_i32, %c0_i32_0, %c0_i32_1 : i32, i32, i32
  }
  func.func @transform_12(%arg0: i32) -> (i32, i32, i32) {
    %c0_i32 = arith.constant 0 : i32
    %c0_i32_0 = arith.constant 0 : i32
    %c0_i32_1 = arith.constant 0 : i32
    %c0_i32_2 = arith.constant 0 : i32
    return %c0_i32, %c0_i32_0, %c0_i32_1 : i32, i32, i32
  }
  func.func @transform_13(%arg0: i32) -> (i32, i32, i32) {
    %c0_i32 = arith.constant 0 : i32
    %c0_i32_0 = arith.constant 0 : i32
    %c0_i32_1 = arith.constant 0 : i32
    %c0_i32_2 = arith.constant 0 : i32
    return %c0_i32, %c0_i32_0, %c0_i32_1 : i32, i32, i32
  }
  func.func @transform_14(%arg0: i32) -> (i32, i32, i32) {
    %c0_i32 = arith.constant 0 : i32
    %c0_i32_0 = arith.constant 0 : i32
    %c0_i32_1 = arith.constant 0 : i32
    %c0_i32_2 = arith.constant 0 : i32
    return %c0_i32, %c0_i32_0, %c0_i32_1 : i32, i32, i32
  }
  func.func @transform_15(%arg0: i32) -> (i32, i32, i32) {
    %c0_i32 = arith.constant 0 : i32
    %c0_i32_0 = arith.constant 0 : i32
    %c0_i32_1 = arith.constant 0 : i32
    %c0_i32_2 = arith.constant 0 : i32
    return %c0_i32, %c0_i32_0, %c0_i32_1 : i32, i32, i32
  }
  func.func @transform_16(%arg0: i32) -> (i32, i32) {
    %c0_i32 = arith.constant 0 : i32
    %c0_i32_0 = arith.constant 0 : i32
    %c0_i32_1 = arith.constant 0 : i32
    return %c0_i32, %c0_i32_0 : i32, i32
  }
  func.func @transform_17(%arg0: i32) -> (i32, i32) {
    %c0_i32 = arith.constant 0 : i32
    %c0_i32_0 = arith.constant 0 : i32
    %c0_i32_1 = arith.constant 0 : i32
    return %c0_i32, %c0_i32_0 : i32, i32
  }
  func.func @transform_18(%arg0: i32) -> (i32, i32) {
    %c0_i32 = arith.constant 0 : i32
    %c0_i32_0 = arith.constant 0 : i32
    %c0_i32_1 = arith.constant 0 : i32
    return %c0_i32, %c0_i32_0 : i32, i32
  }
  func.func @transform_19(%arg0: i32) -> (i32, i32) {
    %c0_i32 = arith.constant 0 : i32
    %c0_i32_0 = arith.constant 0 : i32
    %c0_i32_1 = arith.constant 0 : i32
    return %c0_i32, %c0_i32_0 : i32, i32
  }
  func.func @transform_20(%arg0: i32) -> (i32, i32, i32) {
    %c0_i32 = arith.constant 0 : i32
    %c0_i32_0 = arith.constant 0 : i32
    %c0_i32_1 = arith.constant 0 : i32
    %c0_i32_2 = arith.constant 0 : i32
    return %c0_i32, %c0_i32_0, %c0_i32_1 : i32, i32, i32
  }
  func.func @transform_21(%arg0: i32) -> (i32, i32, i32) {
    %c0_i32 = arith.constant 0 : i32
    %c0_i32_0 = arith.constant 0 : i32
    %c0_i32_1 = arith.constant 0 : i32
    %c0_i32_2 = arith.constant 0 : i32
    return %c0_i32, %c0_i32_0, %c0_i32_1 : i32, i32, i32
  }
  func.func @transform_22(%arg0: i32) -> (i32, i32, i32) {
    %c0_i32 = arith.constant 0 : i32
    %c0_i32_0 = arith.constant 0 : i32
    %c0_i32_1 = arith.constant 0 : i32
    %c0_i32_2 = arith.constant 0 : i32
    return %c0_i32, %c0_i32_0, %c0_i32_1 : i32, i32, i32
  }
  func.func @transform_23(%arg0: i32) -> (i32, i32, i32) {
    %c0_i32 = arith.constant 0 : i32
    %c0_i32_0 = arith.constant 0 : i32
    %c0_i32_1 = arith.constant 0 : i32
    %c0_i32_2 = arith.constant 0 : i32
    return %c0_i32, %c0_i32_0, %c0_i32_1 : i32, i32, i32
  }
  func.func @transform_24(%arg0: i32) -> (i32, i32, i32) {
    %c0_i32 = arith.constant 0 : i32
    %c0_i32_0 = arith.constant 0 : i32
    %c0_i32_1 = arith.constant 0 : i32
    %c0_i32_2 = arith.constant 0 : i32
    return %c0_i32, %c0_i32_0, %c0_i32_1 : i32, i32, i32
  }
  func.func @transform_25(%arg0: i32) -> (i32, i32, i32) {
    %c0_i32 = arith.constant 0 : i32
    %c0_i32_0 = arith.constant 0 : i32
    %c0_i32_1 = arith.constant 0 : i32
    %c0_i32_2 = arith.constant 0 : i32
    return %c0_i32, %c0_i32_0, %c0_i32_1 : i32, i32, i32
  }
  func.func @transform_26(%arg0: i32) -> (i32, i32, i32) {
    %c0_i32 = arith.constant 0 : i32
    %c0_i32_0 = arith.constant 0 : i32
    %c0_i32_1 = arith.constant 0 : i32
    %c0_i32_2 = arith.constant 0 : i32
    return %c0_i32, %c0_i32_0, %c0_i32_1 : i32, i32, i32
  }
  func.func @transform_27(%arg0: i32) -> (i32, i32, i32) {
    %c0_i32 = arith.constant 0 : i32
    %c0_i32_0 = arith.constant 0 : i32
    %c0_i32_1 = arith.constant 0 : i32
    %c0_i32_2 = arith.constant 0 : i32
    return %c0_i32, %c0_i32_0, %c0_i32_1 : i32, i32, i32
  }
  func.func @transform_28(%arg0: i32) -> (i32, i32, i32) {
    %c0_i32 = arith.constant 0 : i32
    %c0_i32_0 = arith.constant 0 : i32
    %c0_i32_1 = arith.constant 0 : i32
    %c0_i32_2 = arith.constant 0 : i32
    return %c0_i32, %c0_i32_0, %c0_i32_1 : i32, i32, i32
  }
  func.func @transform_29(%arg0: i32) -> (i32, i32, i32) {
    %c0_i32 = arith.constant 0 : i32
    %c0_i32_0 = arith.constant 0 : i32
    %c0_i32_1 = arith.constant 0 : i32
    %c0_i32_2 = arith.constant 0 : i32
    return %c0_i32, %c0_i32_0, %c0_i32_1 : i32, i32, i32
  }
  func.func @transform_30(%arg0: i32) -> (i32, i32, i32) {
    %c0_i32 = arith.constant 0 : i32
    %c0_i32_0 = arith.constant 0 : i32
    %c0_i32_1 = arith.constant 0 : i32
    %c0_i32_2 = arith.constant 0 : i32
    return %c0_i32, %c0_i32_0, %c0_i32_1 : i32, i32, i32
  }
  func.func @transform_31(%arg0: i32) -> (i32, i32, i32) {
    %c0_i32 = arith.constant 0 : i32
    %c0_i32_0 = arith.constant 0 : i32
    %c0_i32_1 = arith.constant 0 : i32
    %c0_i32_2 = arith.constant 0 : i32
    return %c0_i32, %c0_i32_0, %c0_i32_1 : i32, i32, i32
  }
  func.func @transform_32(%arg0: i32) -> (i32, i32) {
    %c0_i32 = arith.constant 0 : i32
    %c0_i32_0 = arith.constant 0 : i32
    %c0_i32_1 = arith.constant 0 : i32
    return %c0_i32, %c0_i32_0 : i32, i32
  }
  func.func @transform_33(%arg0: i32) -> (i32, i32) {
    %c0_i32 = arith.constant 0 : i32
    %c0_i32_0 = arith.constant 0 : i32
    %c0_i32_1 = arith.constant 0 : i32
    return %c0_i32, %c0_i32_0 : i32, i32
  }
  func.func @transform_34(%arg0: i32) -> (i32, i32) {
    %c0_i32 = arith.constant 0 : i32
    %c0_i32_0 = arith.constant 0 : i32
    %c0_i32_1 = arith.constant 0 : i32
    return %c0_i32, %c0_i32_0 : i32, i32
  }
  func.func @transform_35(%arg0: i32) -> (i32, i32) {
    %c0_i32 = arith.constant 0 : i32
    %c0_i32_0 = arith.constant 0 : i32
    %c0_i32_1 = arith.constant 0 : i32
    return %c0_i32, %c0_i32_0 : i32, i32
  }
  func.func @transform_36(%arg0: i32) -> (i32, i32) {
    %c0_i32 = arith.constant 0 : i32
    %c0_i32_0 = arith.constant 0 : i32
    %c0_i32_1 = arith.constant 0 : i32
    return %c0_i32, %c0_i32_0 : i32, i32
  }
}

</mosaic_0001>

<bundles_post_ra>
// kernel: tpu_custom_call.1
= control target key start
LH: loop header
LB: loop body
LE: loop exit
PB: predicated region body
PF: predicated region fallthrough
CT: control target
= control target key end

     0   :  { %s8147_s6 = smov 1   ;;  %s8148_s10 = smov 2   ;;  %s9495_s0 = inlined_call_operand.smem [shape: u32[37], index: -1, kind: input, shape index: {}] }
   0x1   :  { %s8232_s5 = sld [smem:[%s9495_s0]]   ;;  %s8149_s14 = smov 3  }
   0x2   :  { %s8237_s9 = sld [smem:[%s9495_s0 + %s8147_s6]]   ;;  %s8150_s18 = smov 4  }
   0x3   :  { %s8242_s13 = sld [smem:[%s9495_s0 + %s8148_s10]]   ;;  %s8151_s22 = smov 5  }
   0x4   :  { %s8247_s17 = sld [smem:[%s9495_s0 + %s8149_s14]]   ;;  %s8152_s26 = smov 6  }
   0x5   :  { %s8252_s21 = sld [smem:[%s9495_s0 + %s8150_s18]]   ;;  %s8153_s30 = smov 7  }
   0x6   :  { %s8257_s25 = sld [smem:[%s9495_s0 + %s8151_s22]]   ;;  %s8154_s4 = smov 8  }
   0x7   :  { %s8262_s29 = sld [smem:[%s9495_s0 + %s8152_s26]]   ;;  %s8155_s10 = smov 9  }
   0x8   :  { %9505 = sst [smem:[#allocation52_spill]] %s8237_s9  ;;  %s8156_s15 = smov 10  }
   0x9   :  { %s8267_s3 = sld [smem:[%s9495_s0 + %s8153_s30]]   ;;  %s8157_s20 = smov 11  }
   0xa   :  { %s8272_s8 = sld [smem:[%s9495_s0 + %s8154_s4]]   ;;  %s8158_s26 = smov 12  }
   0xb   :  { %9506 = sst [smem:[#allocation53_spill]] %s8252_s21  ;;  %s8159_s1 = smov 13  }
   0xc   :  { %s8277_s14 = sld [smem:[%s9495_s0 + %s8155_s10]]   ;;  %s8160_s7 = smov 14  }
   0xd   :  { %s8282_s19 = sld [smem:[%s9495_s0 + %s8156_s15]]   ;;  %s8161_s15 = smov 15  }
   0xe   :  { %s8287_s24 = sld [smem:[%s9495_s0 + %s8157_s20]]   ;;  %s8162_s22 = smov 16  }
   0xf   :  { %s8292_s30 = sld [smem:[%s9495_s0 + %s8158_s26]]   ;;  %s8163_s28 = smov 17  }
  0x10   :  { %9507 = sst [smem:[#allocation54_spill]] %s8272_s8 }
  0x11   :  { %s8297_s6 = sld [smem:[%s9495_s0 + %s8159_s1]]  }
  0x12   :  { %s8302_s12 = sld [smem:[%s9495_s0 + %s8160_s7]]   ;;  %s8164_s7 = smov 18  }
  0x13   :  { %9508 = sst [smem:[#allocation55_spill]] %s8282_s19 }
  0x14   :  { %s8307_s20 = sld [smem:[%s9495_s0 + %s8161_s15]]   ;;  %s8165_s15 = smov 19  }
  0x15   :  { %9509 = sst [smem:[#allocation56_spill]] %s8292_s30 }
  0x16   :  { %s8312_s27 = sld [smem:[%s9495_s0 + %s8162_s22]]   ;;  %s8166_s22 = smov 20  }
  0x17   :  { %s8317_s4 = sld [smem:[%s9495_s0 + %s8163_s28]]   ;;  %s8167_s28 = smov 21  }
  0x18   :  { %9510 = sst [smem:[#allocation57_spill]] %s8302_s12 }
  0x19   :  { %s8322_s9 = sld [smem:[%s9495_s0 + %s8164_s7]]   ;;  %s8168_s7 = smov 22  }
  0x1a   :  { %s8327_s21 = sld [smem:[%s9495_s0 + %s8165_s15]]   ;;  %s8169_s15 = smov 23  }
  0x1b   :  { %s8337_s12 = sld [smem:[%s9495_s0 + %s8167_s28]]   ;;  %s8171_s28 = smov 25  }
  0x1c   :  { %9511 = sst [smem:[#allocation58_spill]] %s8312_s27 }
  0x1d   :  { %s8332_s27 = sld [smem:[%s9495_s0 + %s8166_s22]]   ;;  %s8170_s22 = smov 24  }
  0x1e   :  { %s8347_s30 = sld [smem:[%s9495_s0 + %s8169_s15]]   ;;  %s8173_s15 = smov 27  }
  0x1f   :  { %9512 = sst [smem:[#allocation59_spill]] %s8322_s9 }
  0x20   :  { %s8342_s9 = sld [smem:[%s9495_s0 + %s8168_s7]]   ;;  %s8172_s7 = smov 26  }
  0x21   :  { %9514 = sst [smem:[#allocation61_spill]] %s8337_s12 }
  0x22   :  { %s8357_s12 = sld [smem:[%s9495_s0 + %s8171_s28]]   ;;  %s8175_s28 = smov 29  }
  0x23   :  { %9513 = sst [smem:[#allocation60_spill]] %s8332_s27 }
  0x24   :  { %9515 = sst [smem:[#allocation62_spill]] %s8347_s30 }
  0x25   :  { %s8352_s27 = sld [smem:[%s9495_s0 + %s8170_s22]]   ;;  %s8174_s22 = smov 28  }
  0x26   :  { %s8362_s19 = sld [smem:[%s9495_s0 + %s8172_s7]]   ;;  %s8176_s7 = smov 30  }
  0x27   :  { %s8367_s30 = sld [smem:[%s9495_s0 + %s8173_s15]]   ;;  %s8177_s15 = smov 31  }
  0x28   :  { %9517 = sst [smem:[#allocation64_spill]] %s8357_s12 }
  0x29   :  { %s8377_s12 = sld [smem:[%s9495_s0 + %s8175_s28]]   ;;  %s8179_s28 = smov 33  }
  0x2a   :  { %s8382_s8 = sld [smem:[%s9495_s0 + %s8176_s7]]   ;;  %s8180_s7 = smov 34  }
  0x2b   :  { %9516 = sst [smem:[#allocation63_spill]] %s8352_s27 }
  0x2c   :  { %s8372_s27 = sld [smem:[%s9495_s0 + %s8174_s22]]   ;;  %s8178_s22 = smov 32  }
  0x2d   :  { %9518 = sst [smem:[#allocation65_spill]] %s8367_s30 }
  0x2e   :  { %s8387_s30 = sld [smem:[%s9495_s0 + %s8177_s15]]   ;;  %s8181_s15 = smov 35  }
  0x2f   :  { %9520 = sst [smem:[#allocation67_spill]] %s8377_s12 }
  0x30   :  { %9521 = sst [smem:[#allocation68_spill]] %s8382_s8 }
  0x31   :  { %s8397_s12 = sld [smem:[%s9495_s0 + %s8179_s28]]  }
  0x32   :  { %9519 = sst [smem:[#allocation66_spill]] %s8372_s27 }
  0x33   :  { %s8392_s27 = sld [smem:[%s9495_s0 + %s8178_s22]]   ;;  %s8182_s22 = smov 36  }
  0x34   :  { %9522 = sst [smem:[#allocation69_spill]] %s8387_s30 }
  0x35   :  { %s8402_s8 = sld [smem:[%s9495_s0 + %s8180_s7]]  }
  0x36   :  { %s8407_s30 = sld [smem:[%s9495_s0 + %s8181_s15]]  }
  0x39   :  { %9523 = sst [smem:[#allocation70_spill]] %s8392_s27 }
  0x3a   :  { %s8412_s27 = sld [smem:[%s9495_s0 + %s8182_s22]]  }
  0x3b   :  { %78 = vsyncpa [#allocation3], 0 }
  0x3c   :  { %79 = vsyncpa [#allocation6], 0 }
  0x3d   :  { %80 = vsyncpa [#allocation9], 0 }
  0x3e   :  { %81 = vsyncpa [#allocation12], 0 }
  0x3f   :  { %82 = vsyncpa [#allocation15], 0 }
  0x40   :  { %83 = vsyncpa [#allocation18], 0 }
  0x41   :  { %84 = vsyncpa [#allocation21], 0 }
  0x42   :  { %85 = vsyncpa [#allocation24], 0 }
  0x43   :  { %86 = vsyncpa [#allocation27], 0 }
  0x44   :  { %87 = vsyncpa [#allocation30], 0 }
  0x45   :  { %88 = vsyncpa [#allocation33], 0 }
  0x46   :  { %89 = vsyncpa [#allocation36], 0 }
  0x47   :  { %90 = vsyncpa [#allocation4], 0  ;;  %s8183_s28 = smov [#allocation5]   ;;  %s8184_s2 = smov [#allocation8]  }
  0x48   :  { %s110_s1 = sshll.u32 %s8183_s28, 4  ;;  %s134_s7 = sshll.u32 %s8184_s2, 4  ;;  %s111_s1 = int_to_ptr.vmem [resolvable:$true] %s110_s1  ;;  %s135_s7 = int_to_ptr.vmem [resolvable:$true] %s134_s7 }
  0x49   :  { %s7649_s0 = scalar_lea.vmem %s111_s1, 256  ;;  %p7654_p1 = scmp.lt.s32.totalorder %s111_s1, %s111_s1 }
  0x4a   :  { %p7650_p0 = scmp.ne.s32.totalorder %s111_s1, %s7649_s0  ;;  %p7655_p2 = scmp.lt.s32.totalorder %s7649_s0, %s7649_s0 }
  0x4c   :  { %p7656_p3 = por %p7655_p2, %p7654_p1 }
  0x4e   :  { %p7657_p4 = pnand %p7656_p3, %p7650_p0 }
  0x50   :  { %7660 = shalt.err (!%p7657_p4)
}
  0x51   :  { %s8185_s10 = smov 128   ;;  %s8186_s11 = smov 8  }
  0x52   :  { %116 = dma.hbm_to_vmem [thread:$0]  %s8242_s13, 256, %s111_s1, [#allocation6], %s8185_s10, %s8185_s10, %s8186_s11  }
  0x53   :  { %s7669_s15 = scalar_lea.vmem %s135_s7, 32  ;;  %p7674_p6 = scmp.lt.s32.totalorder %s135_s7, %s135_s7 }
  0x54   :  { %p7670_p5 = scmp.ne.s32.totalorder %s135_s7, %s7669_s15  ;;  %p7675_p7 = scmp.lt.s32.totalorder %s7669_s15, %s7669_s15 }
  0x56   :  { %p7676_p8 = por %p7675_p7, %p7674_p6 }
  0x58   :  { %p7677_p9 = pnand %p7676_p8, %p7670_p5 }
  0x5a   :  { %7680 = shalt.err (!%p7677_p9)
}
  0x5b   :  { %s8187_s16 = smov 16   ;;  %s8188_s18 = smov 1  }
  0x5c   :  { %140 = dma.hbm_to_vmem [thread:$0]  %s8257_s25, 32, %s135_s7, [#allocation9], %s8187_s16, %s8187_s16, %s8188_s18  }
  0x5d   :  { %s8189_s22 = smov [#allocation11]   ;;  %s8190_s26 = smov [#allocation14]  }
  0x5e   :  { %s158_s23 = sshll.u32 %s8189_s22, 4  ;;  %s182_s28 = sshll.u32 %s8190_s26, 4  ;;  %s159_s23 = int_to_ptr.vmem [resolvable:$true] %s158_s23  ;;  %s183_s28 = int_to_ptr.vmem [resolvable:$true] %s182_s28 }
  0x5f   :  { %s7689_s13 = scalar_lea.vmem %s159_s23, 32  ;;  %p7694_p11 = scmp.lt.s32.totalorder %s159_s23, %s159_s23 }
  0x60   :  { %p7690_p10 = scmp.ne.s32.totalorder %s159_s23, %s7689_s13  ;;  %p7695_p12 = scmp.lt.s32.totalorder %s7689_s13, %s7689_s13 }
  0x62   :  { %p7696_p13 = por %p7695_p12, %p7694_p11 }
  0x64   :  { %p7697_p0 = pnand %p7696_p13, %p7690_p10 }
  0x66   :  { %7700 = shalt.err (!%p7697_p0)
}
  0x67   :  { %164 = dma.hbm_to_vmem [thread:$0]  %s8267_s3, 32, %s159_s23, [#allocation12], %s8187_s16, %s8187_s16, %s8188_s18  }
  0x68   :  { %s7709_s1 = scalar_lea.vmem %s183_s28, 32  ;;  %p7714_p2 = scmp.lt.s32.totalorder %s183_s28, %s183_s28 }
  0x69   :  { %p7710_p1 = scmp.ne.s32.totalorder %s183_s28, %s7709_s1  ;;  %p7715_p3 = scmp.lt.s32.totalorder %s7709_s1, %s7709_s1 }
  0x6b   :  { %p7716_p4 = por %p7715_p3, %p7714_p2 }
  0x6d   :  { %p7717_p5 = pnand %p7716_p4, %p7710_p1 }
  0x6f   :  { %7720 = shalt.err (!%p7717_p5)
}
  0x70   :  { %188 = dma.hbm_to_vmem [thread:$0]  %s8277_s14, 32, %s183_s28, [#allocation15], %s8187_s16, %s8187_s16, %s8188_s18  }
  0x71   :  { %s8191_s25 = smov [#allocation17]   ;;  %s8192_s7 = smov [#allocation20]  }
  0x72   :  { %s206_s2 = sshll.u32 %s8191_s25, 4  ;;  %s230_s0 = sshll.u32 %s8192_s7, 4  ;;  %s207_s2 = int_to_ptr.vmem [resolvable:$true] %s206_s2  ;;  %s231_s0 = int_to_ptr.vmem [resolvable:$true] %s230_s0 }
  0x73   :  { %s7729_s15 = scalar_lea.vmem %s207_s2, 32  ;;  %p7734_p7 = scmp.lt.s32.totalorder %s207_s2, %s207_s2 }
  0x74   :  { %p7730_p6 = scmp.ne.s32.totalorder %s207_s2, %s7729_s15  ;;  %p7735_p8 = scmp.lt.s32.totalorder %s7729_s15, %s7729_s15 }
  0x76   :  { %p7736_p9 = por %p7735_p8, %p7734_p7 }
  0x78   :  { %p7737_p10 = pnand %p7736_p9, %p7730_p6 }
  0x7a   :  { %7740 = shalt.err (!%p7737_p10)
}
  0x7b   :  { %212 = dma.hbm_to_vmem [thread:$0]  %s8287_s24, 32, %s207_s2, [#allocation18], %s8187_s16, %s8187_s16, %s8188_s18  }
  0x7c   :  { %s7749_s3 = scalar_lea.vmem %s231_s0, 32  ;;  %p7754_p12 = scmp.lt.s32.totalorder %s231_s0, %s231_s0 }
  0x7d   :  { %p7750_p11 = scmp.ne.s32.totalorder %s231_s0, %s7749_s3  ;;  %p7755_p13 = scmp.lt.s32.totalorder %s7749_s3, %s7749_s3 }
  0x7f   :  { %p7756_p0 = por %p7755_p13, %p7754_p12 }
  0x81   :  { %p7757_p1 = pnand %p7756_p0, %p7750_p11 }
  0x83   :  { %7760 = shalt.err (!%p7757_p1)
}
  0x84   :  { %236 = dma.hbm_to_vmem [thread:$0]  %s8297_s6, 32, %s231_s0, [#allocation21], %s8187_s16, %s8187_s16, %s8188_s18  }
  0x85   :  { %s8193_s14 = smov [#allocation23]   ;;  %s8194_s23 = smov [#allocation26]  }
  0x86   :  { %s254_s22 = sshll.u32 %s8193_s14, 4  ;;  %s277_s26 = sshll.u32 %s8194_s23, 4  ;;  %s255_s22 = int_to_ptr.vmem [resolvable:$true] %s254_s22  ;;  %s278_s26 = int_to_ptr.vmem [resolvable:$true] %s277_s26 }
  0x87   :  { %s7769_s28 = scalar_lea.vmem %s255_s22, 32  ;;  %p7774_p3 = scmp.lt.s32.totalorder %s255_s22, %s255_s22 }
  0x88   :  { %p7770_p2 = scmp.ne.s32.totalorder %s255_s22, %s7769_s28  ;;  %p7775_p4 = scmp.lt.s32.totalorder %s7769_s28, %s7769_s28 }
  0x8a   :  { %p7776_p5 = por %p7775_p4, %p7774_p3 }
  0x8c   :  { %p7777_p6 = pnand %p7776_p5, %p7770_p2 }
  0x8e   :  { %7780 = shalt.err (!%p7777_p6)
}
  0x8f   :  { %260 = dma.hbm_to_vmem [thread:$0]  %s8307_s20, 32, %s255_s22, [#allocation24], %s8187_s16, %s8187_s16, %s8188_s18  }
  0x90   :  { %s7789_s24 = scalar_lea.vmem %s278_s26, 16  ;;  %s7793_s6 = scalar_lea.vmem %s278_s26, 32 }
  0x91   :  { %p7790_p7 = scmp.ne.s32.totalorder %s278_s26, %s7789_s24  ;;  %p7794_p8 = scmp.lt.s32.totalorder %s278_s26, %s278_s26 }
  0x92   :  { %p7795_p9 = scmp.lt.s32.totalorder %s7793_s6, %s7789_s24 }
  0x94   :  { %p7796_p10 = por %p7795_p9, %p7794_p8 }
  0x96   :  { %p7797_p11 = pnand %p7796_p10, %p7790_p7 }
  0x98   :  { %7800 = shalt.err (!%p7797_p11)
}
  0x99   :  { %280 = dma.hbm_to_vmem [thread:$0]  %s8317_s4, 16, %s278_s26, [#allocation27]  }
  0x9a   :  { %s8195_s13 = smov [#allocation29]   ;;  %s8196_s25 = smov [#allocation32]  }
  0x9b   :  { %s297_s1 = sshll.u32 %s8195_s13, 4  ;;  %s320_s2 = sshll.u32 %s8196_s25, 4  ;;  %s298_s1 = int_to_ptr.vmem [resolvable:$true] %s297_s1  ;;  %s321_s2 = int_to_ptr.vmem [resolvable:$true] %s320_s2 }
  0x9c   :  { %s7809_s7 = scalar_lea.vmem %s298_s1, 16  ;;  %s7813_s0 = scalar_lea.vmem %s298_s1, 32 }
  0x9d   :  { %p7810_p12 = scmp.ne.s32.totalorder %s298_s1, %s7809_s7  ;;  %p7814_p13 = scmp.lt.s32.totalorder %s298_s1, %s298_s1 }
  0x9e   :  { %p7815_p0 = scmp.lt.s32.totalorder %s7813_s0, %s7809_s7 }
  0xa0   :  { %p7816_p1 = por %p7815_p0, %p7814_p13 }
  0xa2   :  { %p7817_p2 = pnand %p7816_p1, %p7810_p12 }
  0xa4   :  { %7820 = shalt.err (!%p7817_p2)
}
  0xa5   :  { %300 = dma.hbm_to_vmem [thread:$0]  %s8327_s21, 16, %s298_s1, [#allocation30]  }
  0xa6   :  { %s7829_s20 = scalar_lea.vmem %s321_s2, 1024  ;;  %p7834_p4 = scmp.lt.s32.totalorder %s321_s2, %s321_s2 }
  0xa7   :  { %p7830_p3 = scmp.ne.s32.totalorder %s321_s2, %s7829_s20  ;;  %p7835_p5 = scmp.lt.s32.totalorder %s7829_s20, %s7829_s20 }
  0xa9   :  { %p7836_p6 = por %p7835_p5, %p7834_p4 }
  0xab   :  { %p7837_p7 = pnand %p7836_p6, %p7830_p3 }
  0xad   :  { %7840 = shalt.err (!%p7837_p7)
}
  0xae   :  { %326 = dma.hbm_to_vmem [thread:$0]  %s8342_s9, 1024, %s321_s2, [#allocation33], %s8185_s10, %s8185_s10, %s8186_s11  }
  0xaf   :  { %s8197_s4 = smov [#allocation35]   ;;  %s8198_s3 = smov [#allocation2]  }
  0xb0   :  { %s348_s15 = sshll.u32 %s8197_s4, 4  ;;  %s96_s14 = sshll.u32 %s8198_s3, 4  ;;  %s349_s15 = int_to_ptr.vmem [resolvable:$true] %s348_s15  ;;  %s97_s14 = int_to_ptr.vmem [resolvable:$true] %s96_s14 }
  0xb1   :  { %s7849_s22 = scalar_lea.vmem %s349_s15, 1024  ;;  %p7854_p9 = scmp.lt.s32.totalorder %s349_s15, %s349_s15 }
  0xb2   :  { %p7850_p8 = scmp.ne.s32.totalorder %s349_s15, %s7849_s22  ;;  %p7855_p10 = scmp.lt.s32.totalorder %s7849_s22, %s7849_s22 }
  0xb4   :  { %p7856_p11 = por %p7855_p10, %p7854_p9 }
  0xb6   :  { %p7857_p12 = pnand %p7856_p11, %p7850_p8 }
  0xb8   :  { %7860 = shalt.err (!%p7857_p12)
}
  0xb9   :  { %354 = dma.hbm_to_vmem [thread:$0]  %s8362_s19, 1024, %s349_s15, [#allocation36], %s8185_s10, %s8185_s10, %s8186_s11  }
  0xba   :  { %s7869_s21 = scalar_lea.vmem %s97_s14, 256  ;;  %p7874_p0 = scmp.lt.s32.totalorder %s97_s14, %s97_s14 }
  0xbb   :  { %p7870_p13 = scmp.ne.s32.totalorder %s97_s14, %s7869_s21  ;;  %p7875_p1 = scmp.lt.s32.totalorder %s7869_s21, %s7869_s21 }
  0xbd   :  { %p7876_p2 = por %p7875_p1, %p7874_p0 }
  0xbf   :  { %p7877_p3 = pnand %p7876_p2, %p7870_p13 }
  0xc1   :  { %7880 = shalt.err (!%p7877_p3)
}
  0xc2   :  { %102 = dma.hbm_to_vmem [thread:$0]  %s8232_s5, 256, %s97_s14, [#allocation3], %s8185_s10, %s8185_s10, %s8186_s11  }
  0xc3   :  { %s8199_s9 = smov [#allocation7]   ;;  %s8200_s26 = smov [#allocation10]  }
  0xc4   :  { %s123_s23 = sshll.u32 %s8199_s9, 4  ;;  %s146_s28 = sshll.u32 %s8200_s26, 4  ;;  %s124_s23 = int_to_ptr.vmem [resolvable:$true] %s123_s23  ;;  %s147_s28 = int_to_ptr.vmem [resolvable:$true] %s146_s28 }
  0xc5   :  { %s7889_s24 = scalar_lea.vmem %s124_s23, 16  ;;  %s7893_s19 = scalar_lea.vmem %s124_s23, 32 }
  0xc6   :  { %p7890_p4 = scmp.ne.s32.totalorder %s124_s23, %s7889_s24  ;;  %p7894_p5 = scmp.lt.s32.totalorder %s124_s23, %s124_s23 }
  0xc7   :  { %p7895_p6 = scmp.lt.s32.totalorder %s7893_s19, %s7889_s24 }
  0xc9   :  { %p7896_p7 = por %p7895_p6, %p7894_p5 }
  0xcb   :  { %p7897_p8 = pnand %p7896_p7, %p7890_p4 }
  0xcd   :  { %7900 = shalt.err (!%p7897_p8)
}
  0xce   :  { %126 = dma.hbm_to_vmem [thread:$0]  %s8247_s17, 16, %s124_s23, [#allocation6]  }
  0xcf   :  { %s7909_s6 = scalar_lea.vmem %s147_s28, 1024  ;;  %p7914_p10 = scmp.lt.s32.totalorder %s147_s28, %s147_s28 }
  0xd0   :  { %p7910_p9 = scmp.ne.s32.totalorder %s147_s28, %s7909_s6  ;;  %p7915_p11 = scmp.lt.s32.totalorder %s7909_s6, %s7909_s6 }
  0xd2   :  { %p7916_p12 = por %p7915_p11, %p7914_p10 }
  0xd4   :  { %p7917_p13 = pnand %p7916_p12, %p7910_p9 }
  0xd6   :  { %7920 = shalt.err (!%p7917_p13)
}
  0xd7   :  { %152 = dma.hbm_to_vmem [thread:$0]  %s8262_s29, 1024, %s147_s28, [#allocation9], %s8185_s10, %s8185_s10, %s8186_s11  }
  0xd8   :  { %s8201_s5 = smov [#allocation13]   ;;  %s8202_s1 = smov [#allocation16]  }
  0xd9   :  { %s170_s13 = sshll.u32 %s8201_s5, 4  ;;  %s194_s25 = sshll.u32 %s8202_s1, 4  ;;  %s171_s13 = int_to_ptr.vmem [resolvable:$true] %s170_s13  ;;  %s195_s25 = int_to_ptr.vmem [resolvable:$true] %s194_s25 }
  0xda   :  { %s7929_s2 = scalar_lea.vmem %s171_s13, 32  ;;  %p7934_p1 = scmp.lt.s32.totalorder %s171_s13, %s171_s13 }
  0xdb   :  { %p7930_p0 = scmp.ne.s32.totalorder %s171_s13, %s7929_s2  ;;  %p7935_p2 = scmp.lt.s32.totalorder %s7929_s2, %s7929_s2 }
  0xdd   :  { %p7936_p3 = por %p7935_p2, %p7934_p1 }
  0xdf   :  { %p7937_p4 = pnand %p7936_p3, %p7930_p0 }
  0xe1   :  { %7940 = shalt.err (!%p7937_p4)
}
  0xe2   :  { %s9524_s17 = sld [smem:[#allocation54_spill]]  ;;  %s7949_s7 = scalar_lea.vmem %s195_s25, 1024 }
  0xe3   :  { %p7950_p5 = scmp.ne.s32.totalorder %s195_s25, %s7949_s7  ;;  %p7954_p6 = scmp.lt.s32.totalorder %s195_s25, %s195_s25 }
  0xe4   :  { %p7955_p7 = scmp.lt.s32.totalorder %s7949_s7, %s7949_s7 }
  0xe6   :  { %p7956_p8 = por %p7955_p7, %p7954_p6 }
  0xe8   :  { %176 = dma.hbm_to_vmem [thread:$0]  %s9524_s17, 32, %s171_s13, [#allocation12], %s8187_s16, %s8187_s16, %s8188_s18  }
  0xe9   :  { %p7957_p9 = pnand %p7956_p8, %p7950_p5 }
  0xeb   :  { %7960 = shalt.err (!%p7957_p9)
}
  0xec   :  { %s9525_s29 = sld [smem:[#allocation55_spill]]  ;;  %s8203_s0 = smov [#allocation19]  }
  0xed   :  { %s218_s20 = sshll.u32 %s8203_s0, 4  ;;  %s8204_s4 = smov [#allocation22]   ;;  %s219_s20 = int_to_ptr.vmem [resolvable:$true] %s218_s20 }
  0xee   :  { %s242_s15 = sshll.u32 %s8204_s4, 4  ;;  %s7969_s3 = scalar_lea.vmem %s219_s20, 1024  ;;  %s243_s15 = int_to_ptr.vmem [resolvable:$true] %s242_s15 }
  0xef   :  { %p7970_p10 = scmp.ne.s32.totalorder %s219_s20, %s7969_s3  ;;  %p7974_p11 = scmp.lt.s32.totalorder %s219_s20, %s219_s20 }
  0xf0   :  { %p7975_p12 = scmp.lt.s32.totalorder %s7969_s3, %s7969_s3 }
  0xf2   :  { %200 = dma.hbm_to_vmem [thread:$0]  %s9525_s29, 1024, %s195_s25, [#allocation15], %s8185_s10, %s8185_s10, %s8186_s11  }
  0xf3   :  { %p7976_p13 = por %p7975_p12, %p7974_p11 }
  0xf5   :  { %p7977_p0 = pnand %p7976_p13, %p7970_p10 }
  0xf7   :  { %7980 = shalt.err (!%p7977_p0)
}
  0xf8   :  { %s9526_s14 = sld [smem:[#allocation56_spill]]  ;;  %s7989_s22 = scalar_lea.vmem %s243_s15, 32 }
  0xf9   :  { %p7990_p1 = scmp.ne.s32.totalorder %s243_s15, %s7989_s22  ;;  %p7994_p2 = scmp.lt.s32.totalorder %s243_s15, %s243_s15 }
  0xfa   :  { %p7995_p3 = scmp.lt.s32.totalorder %s7989_s22, %s7989_s22 }
  0xfc   :  { %p7996_p4 = por %p7995_p3, %p7994_p2 }
  0xfe   :  { %224 = dma.hbm_to_vmem [thread:$0]  %s9526_s14, 1024, %s219_s20, [#allocation18], %s8185_s10, %s8185_s10, %s8186_s11  }
  0xff   :  { %p7997_p5 = pnand %p7996_p4, %p7990_p1 }
 0x101   :  { %8000 = shalt.err (!%p7997_p5)
}
 0x102   :  { %s9527_s21 = sld [smem:[#allocation57_spill]]  ;;  %s8205_s9 = smov [#allocation25]  }
 0x103   :  { %s267_s23 = sshll.u32 %s8205_s9, 4  ;;  %s8206_s26 = smov [#allocation28]   ;;  %s268_s23 = int_to_ptr.vmem [resolvable:$true] %s267_s23 }
 0x104   :  { %s287_s28 = sshll.u32 %s8206_s26, 4  ;;  %s8009_s24 = scalar_lea.vmem %s268_s23, 16  ;;  %s288_s28 = int_to_ptr.vmem [resolvable:$true] %s287_s28 }
 0x105   :  { %p8010_p6 = scmp.ne.s32.totalorder %s268_s23, %s8009_s24  ;;  %s8013_s19 = scalar_lea.vmem %s268_s23, 32 }
 0x106   :  { %p8014_p7 = scmp.lt.s32.totalorder %s268_s23, %s268_s23  ;;  %p8015_p8 = scmp.lt.s32.totalorder %s8013_s19, %s8009_s24 }
 0x108   :  { %248 = dma.hbm_to_vmem [thread:$0]  %s9527_s21, 32, %s243_s15, [#allocation21], %s8187_s16, %s8187_s16, %s8188_s18  }
 0x109   :  { %p8016_p9 = por %p8015_p8, %p8014_p7 }
 0x10b   :  { %p8017_p10 = pnand %p8016_p9, %p8010_p6 }
 0x10d   :  { %8020 = shalt.err (!%p8017_p10)
}
 0x10e   :  { %s9528_s6 = sld [smem:[#allocation58_spill]]  ;;  %s8029_s5 = scalar_lea.vmem %s288_s28, 128 }
 0x10f   :  { %p8030_p11 = scmp.ne.s32.totalorder %s288_s28, %s8029_s5  ;;  %p8034_p12 = scmp.lt.s32.totalorder %s288_s28, %s288_s28 }
 0x110   :  { %p8035_p13 = scmp.lt.s32.totalorder %s8029_s5, %s8029_s5 }
 0x112   :  { %p8036_p0 = por %p8035_p13, %p8034_p12 }
 0x114   :  { %270 = dma.hbm_to_vmem [thread:$0]  %s9528_s6, 16, %s268_s23, [#allocation24]  }
 0x115   :  { %p8037_p1 = pnand %p8036_p0, %p8030_p11 }
 0x117   :  { %8040 = shalt.err (!%p8037_p1)
}
 0x118   :  { %s9529_s13 = sld [smem:[#allocation59_spill]]  ;;  %s8207_s1 = smov [#allocation31]  }
 0x119   :  { %s308_s25 = sshll.u32 %s8207_s1, 4  ;;  %s8208_s2 = smov [#allocation34]   ;;  %s309_s25 = int_to_ptr.vmem [resolvable:$true] %s308_s25 }
 0x11a   :  { %s334_s17 = sshll.u32 %s8208_s2, 4  ;;  %s8049_s7 = scalar_lea.vmem %s309_s25, 32  ;;  %s335_s17 = int_to_ptr.vmem [resolvable:$true] %s334_s17 }
 0x11b   :  { %p8050_p2 = scmp.ne.s32.totalorder %s309_s25, %s8049_s7  ;;  %p8054_p3 = scmp.lt.s32.totalorder %s309_s25, %s309_s25 }
 0x11c   :  { %p8055_p4 = scmp.lt.s32.totalorder %s8049_s7, %s8049_s7 }
 0x11e   :  { %290 = dma.hbm_to_vmem [thread:$0]  %s9529_s13, 128, %s288_s28, [#allocation27]  }
 0x11f   :  { %p8056_p5 = por %p8055_p4, %p8054_p3 }
 0x121   :  { %p8057_p6 = pnand %p8056_p5, %p8050_p2 }
 0x123   :  { %8060 = shalt.err (!%p8057_p6)
}
 0x124   :  { %s9530_s29 = sld [smem:[#allocation61_spill]]  ;;  %s8069_s0 = scalar_lea.vmem %s335_s17, 32 }
 0x125   :  { %p8070_p7 = scmp.ne.s32.totalorder %s335_s17, %s8069_s0  ;;  %p8074_p8 = scmp.lt.s32.totalorder %s335_s17, %s335_s17 }
 0x126   :  { %p8075_p9 = scmp.lt.s32.totalorder %s8069_s0, %s8069_s0 }
 0x128   :  { %p8076_p10 = por %p8075_p9, %p8074_p8 }
 0x12a   :  { %314 = dma.hbm_to_vmem [thread:$0]  %s9530_s29, 32, %s309_s25, [#allocation30], %s8187_s16, %s8187_s16, %s8188_s18  }
 0x12b   :  { %p8077_p11 = pnand %p8076_p10, %p8070_p7 }
 0x12d   :  { %8080 = shalt.err (!%p8077_p11)
}
 0x12e   :  { %s9531_s20 = sld [smem:[#allocation63_spill]]  ;;  %s8209_s4 = smov [#allocation37]  }
 0x12f   :  { %s362_s15 = sshll.u32 %s8209_s4, 4  ;;  %s363_s15 = int_to_ptr.vmem [resolvable:$true] %s362_s15 }
 0x130   :  { %s8089_s3 = scalar_lea.vmem %s363_s15, 1024  ;;  %p8094_p13 = scmp.lt.s32.totalorder %s363_s15, %s363_s15 }
 0x131   :  { %p8090_p12 = scmp.ne.s32.totalorder %s363_s15, %s8089_s3  ;;  %p8095_p0 = scmp.lt.s32.totalorder %s8089_s3, %s8089_s3 }
 0x133   :  { %p8096_p1 = por %p8095_p0, %p8094_p13 }
 0x134   :  { %340 = dma.hbm_to_vmem [thread:$0]  %s9531_s20, 32, %s335_s17, [#allocation33], %s8187_s16, %s8187_s16, %s8188_s18  }
 0x135   :  { %p8097_p2 = pnand %p8096_p1, %p8090_p12 }
 0x137   :  { %8100 = shalt.err (!%p8097_p2)
}
 0x138   :  { %s9532_s14 = sld [smem:[#allocation66_spill]] }
 0x13e   :  { %368 = dma.hbm_to_vmem [thread:$0]  %s9532_s14, 1024, %s363_s15, [#allocation36], %s8185_s10, %s8185_s10, %s8186_s11  }
 0x13f   :  { %8121 = dma.done.wait [#allocation3], 256  }
 0x140   :  { %8122 = vsyncadd [#allocation3], 4294967040 }
 0x141   :  { %8123 = dma.done.wait [#allocation6], 272  }
 0x142   :  { %8124 = vsyncadd [#allocation6], 4294967024 }
 0x143   :  { %8125 = dma.done.wait [#allocation9], 1056  }
 0x144   :  { %8126 = vsyncadd [#allocation9], 4294966240 }
 0x145   :  { %8127 = dma.done.wait [#allocation12], 64  }
 0x146   :  { %8128 = vsyncadd [#allocation12], 4294967232 }
 0x147   :  { %8129 = dma.done.wait [#allocation15], 1056  }
 0x148   :  { %8130 = vsyncadd [#allocation15], 4294966240 }
 0x149   :  { %8131 = dma.done.wait [#allocation18], 1056  }
 0x14a   :  { %8132 = vsyncadd [#allocation18], 4294966240 }
 0x14b   :  { %8133 = dma.done.wait [#allocation21], 64  }
 0x14c   :  { %8134 = vsyncadd [#allocation21], 4294967232 }
 0x14d   :  { %8135 = dma.done.wait [#allocation24], 48  }
 0x14e   :  { %8136 = vsyncadd [#allocation24], 4294967248 }
 0x14f   :  { %8137 = dma.done.wait [#allocation27], 144  }
 0x150   :  { %8138 = vsyncadd [#allocation27], 4294967152 }
 0x151   :  { %8139 = dma.done.wait [#allocation30], 48  }
 0x152   :  { %8140 = vsyncadd [#allocation30], 4294967248 }
 0x153   :  { %8141 = dma.done.wait [#allocation33], 1056  }
 0x154   :  { %8142 = vsyncadd [#allocation33], 4294966240 }
 0x155   :  { %8143 = dma.done.wait [#allocation36], 2048  }
 0x156   :  { %8144 = vsyncadd [#allocation36], 4294965248  ;;  %v8210_v0 = vmov 0.0   ;;  %vm8211_vm0 = vmmov 0   ;;  %s9533_s10 = sld [smem:[#allocation53_spill]]  ;;  %v453_v1 = vld [vmem:[#allocation5] sm:$0xff] }
 0x157   :  { %6772 = vmatprep.subr.bf16.mxu0 %v8210_v0  ;;  %6774 = vmatprep.mubr.msk.bf16.mxu0 %vm8211_vm0, %v8210_v0  ;;  %v454_v2 = vld [vmem:[#allocation5 + $0x8] sm:$0xf]  ;;  %vm572_vm1 = vcmask 1045504   ;;  %v558_v3 = vld [vmem:[#allocation2] sm:$0xff]  ;;  %v559_v5 = vld [vmem:[#allocation2 + $0x8] sm:$0xff]  ;;  %vm568_vm2 = vcmask 97280  }
 0x158   :  { %6778 = vmatprep.subr.bf16.mxu1 %v8210_v0  ;;  %6782 = vmatprep.mubr.msk.bf16.mxu1 %vm8211_vm0, %v8210_v0  ;;  %v561_v4 = vpack.c.bf16 %v454_v2, %v453_v1  ;;  %v560_v7 = vpack.c.bf16 %v559_v5, %v558_v3  ;;  %v6430_v14 = vld [vmem:[#allocation7] ss:$0 sm:$0xff]  ;;  %vm628_vm3 = vcmask 261120   ;;  %v6432_v24 = vld [vmem:[#allocation8] ss:$0 sm:$0xff]  ;;  %s8212_s11 = smov 96  }
 0x159   :  { %vm682_vm4 = vcmask 64512   ;;  %s8213_s16 = smov 64   ;;  %s8214_s18 = smov 88   ;;  %vm807_vm5 = vcmask 1043456   ;;  %vm3414_vm6 = vcmask 1042432   ;;  %vm3410_vm7 = vcmask 48128  }
 0x15a   :  { %v574_v6 = vsel %vm572_vm1, %v561_v4, 0  ;;  %s8215_s22 = smov 120   ;;  %s8216_s21 = smov 56   ;;  %vm6257_vm8 = vcmask 1041409   ;;  %vm6366_vm9 = vcmask 58368  }
 0x15b   :  { %6773 = vmatpush3.bf16.msra.mxu0 %v574_v6  ;;  %s8217_s9 = smov 112   ;;  %s8218_s23 = smov 80  }
 0x15c   :  { %6786 = vmatprep.subr.bf16.mxu0 %v8210_v0  ;;  %v458_v8 = vld [vmem:[%s9533_s10 + $0x10] sm:$0xff]  ;;  %v459_v9 = vld [vmem:[%s9533_s10 + $0x18] sm:$0xff]  ;;  %v456_v11 = vld [vmem:[%s9533_s10] sm:$0xff]  ;;  %s8219_s26 = smov 48   ;;  %s8220_s28 = smov 72  }
 0x15d   :  { %v621_v10 = vpack.c.bf16 %v459_v9, %v458_v8  ;;  %v457_v12 = vld [vmem:[%s9533_s10 + $0x8] sm:$0xff]  ;;  %s8221_s24 = smov 104   ;;  %s8222_s19 = smov 40  }
 0x15e   :  { %6775 = vmatmul.mubr.msk.bf16.vlgmr.msra.gmra.mxu0 %vm568_vm2, %v560_v7  ;;  %v620_v13 = vpack.c.bf16 %v457_v12, %v456_v11  ;;  %s9534_s6 = sld [smem:[#allocation52_spill]] }
 0x15f   :  { %6788 = vmatprep.mubr.msk.bf16.mxu0 %vm8211_vm0, %v8210_v0  ;;  %6779 = vmatpush3.bf16.msra.mxu1 %v621_v10  ;;  %s9535_s5 = sld [smem:[#allocation60_spill]] }
 0x160   :  { %6780 = vmatprep.subr.bf16.mxu1 %v8210_v0  ;;  %s9536_s13 = sld [smem:[#allocation62_spill]] }
 0x161   :  { %s9537_s1 = sld [smem:[#allocation64_spill]] }
 0x162   :  { %s9538_s25 = sld [smem:[#allocation65_spill]] }
 0x163   :  { %6781 = vmatpush3.bf16.msra.mxu1 %v620_v13  ;;  %s9539_s2 = sld [smem:[#allocation67_spill]] }
 0x164   :  { %6792 = vmatprep.subr.bf16.mxu1 %v8210_v0  ;;  %s9540_s17 = sld [smem:[#allocation68_spill]] }
 0x165   :  { %s9541_s7 = sld [smem:[#allocation69_spill]] }
 0x166   :  { %s9542_s29 = sld [smem:[#allocation70_spill]] }
 0x21e   :  { %v610_v15 = vpop.f32.mrf.mxu0 }
 0x21f   :  { %v8506_v17 = vadd.f32 %v6430_v14, %v610_v15 }
 0x220   :  { %v6776_v16 = vpop.f32.mrf.mxu0 }
 0x221   :  { %v617_v21 = vmax.f32 %v8506_v17, 0.0 }
 0x222   :  { %v613_v18 = vpop.f32.mrf.mxu0 }
 0x223   :  { %v8508_v19 = vadd.f32 %v6430_v14, %v613_v18 }
 0x224   :  { %v6777_v20 = vpop.f32.mrf.mxu0 }
 0x225   :  { %v618_v22 = vmax.f32 %v8508_v19, 0.0  ;;  %v483_v19 = vld [vmem:[#allocation16 + $0x18] sm:$0xff] }
 0x227   :  { %v619_v23 = vpack.c.bf16 %v618_v22, %v617_v21 }
 0x229   :  { %6783 = vmatmul.mubr.msk.bf16.vlgmr.msra.gmra.mxu1 %vm628_vm3, %v619_v23 }
 0x22a   :  { %6794 = vmatprep.mubr.msk.bf16.mxu1 %vm8211_vm0, %v8210_v0 }
 0x2e9   :  { %v666_v25 = vpop.f32.mrf.mxu1 }
 0x2ea   :  { %v667_v26 = vadd.f32 %v6432_v24, %v666_v25 }
 0x2eb   :  { %v6784_v27 = vpop.f32.mrf.mxu1 }
 0x2ec   :  { %v8519_v28 = vpack.c.bf16 %v667_v26, %v667_v26  ;;  %v673_v35 = vmul.f32 0.35355338, %v667_v26 }
 0x2ed   :  { %v669_v29 = vpop.f32.mrf.mxu1 }
 0x2ee   :  { %v670_v30 = vadd.f32 %v6432_v24, %v669_v29  ;;  %680 = vrot.lane.b32.xlu0 %v8519_v28, %s8212_s11  ;;  %v8530_v38 = vpack.c.bf16 %v673_v35, %v673_v35 }
 0x2ef   :  { %v6785_v31 = vpop.f32.mrf.mxu1 }
 0x2f0   :  { %v8523_v32 = vpack.c.bf16 %v670_v30, %v670_v30  ;;  %v674_v39 = vmul.f32 0.35355338, %v670_v30 }
 0x2f2   :  { %730 = vrot.lane.b32.xlu0 %v8523_v32, %s8212_s11  ;;  %v8537_v40 = vpack.c.bf16 %v674_v39, %v674_v39 }
 0x360   :  { %v681_v33 = vpop.permute.xlu0 %680 }
 0x361   :  { %v687_v34 = vsel %vm682_vm4, %v681_v33, 0 }
 0x362   :  { %6787 = vmatpush3.bf16.xpose.msra.mxu0 %v687_v34 }
 0x363   :  { %6798 = vmatprep.subr.bf16.mxu0 %v8210_v0 }
 0x364   :  { %v731_v36 = vpop.permute.xlu0 %730 }
 0x365   :  { %v736_v37 = vsel %vm682_vm4, %v731_v36, 0 }
 0x366   :  { %6793 = vmatpush3.bf16.xpose.msra.mxu1 %v736_v37 }
 0x367   :  { %6804 = vmatprep.subr.bf16.mxu1 %v8210_v0 }
 0x369   :  { %6789 = vmatmul.mubr.msk.bf16.vlgmr.msra.gmra.mxu0 %vm682_vm4, %v8530_v38 }
 0x36a   :  { %6800 = vmatprep.mubr.msk.bf16.mxu0 %vm8211_vm0, %v8210_v0 }
 0x36d   :  { %6795 = vmatmul.mubr.msk.bf16.vlgmr.msra.gmra.mxu1 %vm682_vm4, %v8537_v40 }
 0x36e   :  { %6806 = vmatprep.mubr.msk.bf16.mxu1 %vm8211_vm0, %v8210_v0 }
 0x429   :  { %v723_v41 = vpop.f32.mrf.mxu0 }
 0x42a   :  { %v778_v42 = vsel %vm682_vm4, %v723_v41, -inf }
 0x42b   :  { %779 = vmax.xlane.f32.xlu1 %v778_v42  ;;  %v6790_v43 = vpop.f32.mrf.mxu0 }
 0x42d   :  { %v726_v44 = vpop.f32.mrf.mxu0  ;;  %v772_v45 = vpop.f32.mrf.mxu1 }
 0x42e   :  { %v781_v46 = vsel %vm682_vm4, %v772_v45, -inf }
 0x42f   :  { %v6796_v47 = vpop.f32.mrf.mxu1  ;;  %782 = vmax.xlane.f32.xlu1 %v781_v46  ;;  %v6791_v48 = vpop.f32.mrf.mxu0 }
 0x431   :  { %v775_v49 = vpop.f32.mrf.mxu1 }
 0x433   :  { %v6797_v50 = vpop.f32.mrf.mxu1 }
 0x440   :  { %802 = vrot.lane.b32.xlu1 %v8519_v28, %s8213_s16 }
 0x444   :  { %851 = vrot.lane.b32.xlu1 %v8523_v32, %s8213_s16 }
 0x448   :  { %904 = vrot.lane.b32.xlu1 %v8519_v28, %s8214_s18 }
 0x4b4   :  { %v780_v51 = vpop.xlane.xlu1 %779 }
 0x4b5   :  { %v784_v52 = vsub.f32 %v723_v41, %v780_v51 }
 0x4b7   :  { %v786_v53 = vmul.f32 1.442695, %v784_v52 }
 0x4b8   :  { %v783_v54 = vpop.xlane.xlu1 %782 }
 0x4b9   :  { %7453 = vpow2.f32 %v786_v53  ;;  %v785_v55 = vsub.f32 %v772_v45, %v783_v54 }
 0x4bb   :  { %v788_v56 = vmul.f32 1.442695, %v785_v55 }
 0x4bc   :  { %v803_v57 = vpop.permute.xlu1 %802 }
 0x4bd   :  { %7455 = vpow2.f32 %v788_v56  ;;  %v809_v58 = vsel %vm807_vm5, %v803_v57, 0 }
 0x4be   :  { %6799 = vmatpush3.bf16.msra.mxu0 %v809_v58 }
 0x4bf   :  { %6810 = vmatprep.subr.bf16.mxu0 %v8210_v0 }
 0x4c0   :  { %v852_v59 = vpop.permute.xlu1 %851 }
 0x4c1   :  { %v857_v60 = vsel %vm807_vm5, %v852_v59, 0 }
 0x4c2   :  { %6805 = vmatpush3.bf16.msra.mxu1 %v857_v60  ;;  %v466_v60 = vld [vmem:[#allocation10] sm:$0xff] }
 0x4c3   :  { %6816 = vmatprep.subr.bf16.mxu1 %v8210_v0 }
 0x4c4   :  { %v905_v2 = vpop.permute.xlu1 %904 }
 0x4c5   :  { %v910_v9 = vsel %vm682_vm4, %v905_v2, 0 }
 0x4c6   :  { %v7454_v61 = vpop.eup %7453 }
 0x4c7   :  { %v790_v62 = vsel %vm682_vm4, %v7454_v61, 0.0 }
 0x4c8   :  { %791 = vadd.xlane.f32.xlu0 %v790_v62 }
 0x4ca   :  { %v7456_v63 = vpop.eup %7455 }
 0x4cb   :  { %v793_v1 = vsel %vm682_vm4, %v7456_v63, 0.0 }
 0x4cc   :  { %794 = vadd.xlane.f32.xlu1 %v793_v1 }
 0x4dd   :  { %955 = vrot.lane.b32.xlu1 %v8523_v32, %s8214_s18 }
 0x4de   :  { %902 = vrot.lane.b32.xlu0 %v8530_v38, %s8215_s22 }
 0x4e1   :  { %953 = vrot.lane.b32.xlu1 %v8537_v40, %s8215_s22 }
 0x551   :  { %v792_v3 = vpop.xlane.xlu0 %791 }
 0x552   :  { %7457 = vrcp.f32 %v792_v3 }
 0x555   :  { %v795_v4 = vpop.xlane.xlu1 %794  ;;  %v903_v14 = vpop.permute.xlu0 %902 }
 0x556   :  { %7459 = vrcp.f32 %v795_v4 }
 0x559   :  { %v956_v11 = vpop.permute.xlu1 %955 }
 0x55a   :  { %v961_v13 = vsel %vm682_vm4, %v956_v11, 0 }
 0x55d   :  { %v954_v15 = vpop.permute.xlu1 %953 }
 0x55f   :  { %v7458_v5 = vpop.eup %7457 }
 0x560   :  { %v798_v6 = vmul.f32 %v7458_v5, %v7454_v61 }
 0x562   :  { %v800_v7 = vpack.c.bf16 %v798_v6, %v798_v6 }
 0x563   :  { %v7460_v8 = vpop.eup %7459 }
 0x564   :  { %6801 = vmatmul.mubr.msk.bf16.vlgmr.msra.gmra.mxu0 %vm682_vm4, %v800_v7  ;;  %v799_v10 = vmul.f32 %v7460_v8, %v7456_v63  ;;  %v900_v63 = vpack.c.bf16 %v466_v60, %v466_v60 }
 0x565   :  { %6811 = vmatpush3.bf16.xpose.msra.mxu0 %v910_v9  ;;  %6812 = vmatprep.mubr.msk.bf16.mxu0 %vm8211_vm0, %v8210_v0  ;;  %v467_v9 = vld [vmem:[#allocation10 + $0x8] sm:$0xff] }
 0x566   :  { %v801_v12 = vpack.c.bf16 %v799_v10, %v799_v10  ;;  %6822 = vmatprep.subr.bf16.mxu0 %v8210_v0  ;;  %v1176_v4 = vsel %vm807_vm5, %v900_v63, 0  ;;  %v1124_v10 = vpack.c.bf16 %v467_v9, %v467_v9  ;;  %v468_v9 = vld [vmem:[#allocation10 + $0x10] sm:$0xff] }
 0x568   :  { %6807 = vmatmul.mubr.msk.bf16.vlgmr.msra.gmra.mxu1 %vm682_vm4, %v801_v12  ;;  %v1129_v11 = vsel %vm807_vm5, %v1124_v10, 0  ;;  %v1440_v10 = vpack.c.bf16 %v468_v9, %v468_v9 }
 0x569   :  { %6817 = vmatpush3.bf16.xpose.msra.mxu1 %v961_v13  ;;  %6818 = vmatprep.mubr.msk.bf16.mxu1 %vm8211_vm0, %v8210_v0 }
 0x56a   :  { %6828 = vmatprep.subr.bf16.mxu1 %v8210_v0 }
 0x56c   :  { %6813 = vmatmul.mubr.msk.bf16.vlgmr.msra.gmra.mxu0 %vm682_vm4, %v903_v14 }
 0x56d   :  { %6824 = vmatprep.mubr.msk.bf16.mxu0 %vm8211_vm0, %v8210_v0 }
 0x570   :  { %6819 = vmatmul.mubr.msk.bf16.vlgmr.msra.gmra.mxu1 %vm682_vm4, %v954_v15 }
 0x571   :  { %6830 = vmatprep.mubr.msk.bf16.mxu1 %vm8211_vm0, %v8210_v0 }
 0x624   :  { %v8579_v16 = vpop.f32.mrf.mxu0 }
 0x626   :  { %v6802_v18 = vpop.f32.mrf.mxu0 }
 0x628   :  { %v848_v20 = vpop.f32.mrf.mxu0  ;;  %v8581_v23 = vpop.f32.mrf.mxu1 }
 0x629   :  { %v899_v24 = vpack.c.bf16 %v8581_v23, %v8579_v16 }
 0x62a   :  { %v6803_v25 = vpop.f32.mrf.mxu0  ;;  %v6808_v26 = vpop.f32.mrf.mxu1 }
 0x62c   :  { %v896_v27 = vpop.f32.mrf.mxu1  ;;  %v946_v29 = vpop.f32.mrf.mxu0 }
 0x62d   :  { %v1003_v30 = vsel %vm682_vm4, %v946_v29, -inf }
 0x62e   :  { %v6809_v31 = vpop.f32.mrf.mxu1  ;;  %1004 = vmax.xlane.f32.xlu1 %v1003_v30  ;;  %v6814_v33 = vpop.f32.mrf.mxu0 }
 0x630   :  { %v949_v34 = vpop.f32.mrf.mxu0  ;;  %v997_v35 = vpop.f32.mrf.mxu1 }
 0x631   :  { %v1006_v36 = vsel %vm682_vm4, %v997_v35, -inf }
 0x632   :  { %1007 = vmax.xlane.f32.xlu0 %v1006_v36  ;;  %v6815_v37 = vpop.f32.mrf.mxu0  ;;  %v6820_v39 = vpop.f32.mrf.mxu1 }
 0x634   :  { %v1000_v41 = vpop.f32.mrf.mxu1 }
 0x636   :  { %v6821_v42 = vpop.f32.mrf.mxu1 }
 0x648   :  { %1075 = vrot.lane.b32.xlu0 %v8523_v32, %s8216_s21 }
 0x64c   :  { %1219 = vrot.lane.b32.xlu0 %v8530_v38, %s8217_s9 }
 0x6b7   :  { %v1005_v43 = vpop.xlane.xlu1 %1004 }
 0x6b8   :  { %v1009_v44 = vsub.f32 %v946_v29, %v1005_v43 }
 0x6ba   :  { %v1011_v45 = vmul.f32 1.442695, %v1009_v44 }
 0x6bb   :  { %v1008_v46 = vpop.xlane.xlu0 %1007 }
 0x6bc   :  { %7461 = vpow2.f32 %v1011_v45  ;;  %v1010_v47 = vsub.f32 %v997_v35, %v1008_v46 }
 0x6be   :  { %v1013_v48 = vmul.f32 1.442695, %v1010_v47 }
 0x6bf   :  { %v1076_v49 = vpop.permute.xlu0 %1075 }
 0x6c0   :  { %7463 = vpow2.f32 %v1013_v48  ;;  %v1081_v50 = vsel %vm807_vm5, %v1076_v49, 0 }
 0x6c1   :  { %6829 = vmatpush3.bf16.msra.mxu1 %v1081_v50 }
 0x6c2   :  { %6840 = vmatprep.subr.bf16.mxu1 %v8210_v0 }
 0x6c3   :  { %v1220_v27 = vpop.permute.xlu0 %1219 }
 0x6c9   :  { %v7462_v51 = vpop.eup %7461 }
 0x6ca   :  { %v1015_v52 = vsel %vm682_vm4, %v7462_v51, 0.0 }
 0x6cb   :  { %1016 = vadd.xlane.f32.xlu1 %v1015_v52 }
 0x6cd   :  { %v7464_v53 = vpop.eup %7463 }
 0x6ce   :  { %v1018_v54 = vsel %vm682_vm4, %v7464_v53, 0.0 }
 0x6cf   :  { %1019 = vadd.xlane.f32.xlu1 %v1018_v54 }
 0x6e0   :  { %1027 = vrot.lane.b32.xlu1 %v8519_v28, %s8216_s21 }
 0x6e4   :  { %1221 = vrot.lane.b32.xlu1 %v8519_v28, %s8218_s23 }
 0x6e8   :  { %1271 = vrot.lane.b32.xlu1 %v8523_v32, %s8218_s23 }
 0x6ec   :  { %1269 = vrot.lane.b32.xlu1 %v8537_v40, %s8217_s9 }
 0x754   :  { %v1017_v55 = vpop.xlane.xlu1 %1016 }
 0x755   :  { %7465 = vrcp.f32 %v1017_v55 }
 0x758   :  { %v1020_v56 = vpop.xlane.xlu1 %1019 }
 0x759   :  { %7467 = vrcp.f32 %v1020_v56 }
 0x75c   :  { %v1028_v57 = vpop.permute.xlu1 %1027 }
 0x75d   :  { %v1033_v58 = vsel %vm807_vm5, %v1028_v57, 0 }
 0x75e   :  { %6823 = vmatpush3.bf16.msra.mxu0 %v1033_v58 }
 0x75f   :  { %6834 = vmatprep.subr.bf16.mxu0 %v8210_v0 }
 0x760   :  { %v1222_v5 = vpop.permute.xlu1 %1221 }
 0x761   :  { %v1227_v23 = vsel %vm682_vm4, %v1222_v5, 0 }
 0x762   :  { %v7466_v59 = vpop.eup %7465 }
 0x763   :  { %v1023_v61 = vmul.f32 %v7466_v59, %v7462_v51 }
 0x764   :  { %v1272_v6 = vpop.permute.xlu1 %1271 }
 0x765   :  { %v1025_v62 = vpack.c.bf16 %v1023_v61, %v1023_v61  ;;  %v1277_v7 = vsel %vm682_vm4, %v1272_v6, 0 }
 0x766   :  { %v7468_v1 = vpop.eup %7467 }
 0x767   :  { %6825 = vmatmul.mubr.msk.bf16.vlgmr.msra.gmra.mxu0 %vm682_vm4, %v1025_v62  ;;  %v1024_v2 = vmul.f32 %v7468_v1, %v7464_v53 }
 0x768   :  { %6836 = vmatprep.mubr.msk.bf16.mxu0 %vm8211_vm0, %v8210_v0  ;;  %v1270_v8 = vpop.permute.xlu1 %1269  ;;  %6835 = vmatpush3.bf16.msra.mxu0 %v1129_v11  ;;  %v1445_v11 = vsel %vm807_vm5, %v1440_v10, 0 }
 0x769   :  { %v1026_v3 = vpack.c.bf16 %v1024_v2, %v1024_v2  ;;  %6846 = vmatprep.subr.bf16.mxu0 %v8210_v0 }
 0x76b   :  { %6831 = vmatmul.mubr.msk.bf16.vlgmr.msra.gmra.mxu1 %vm682_vm4, %v1026_v3 }
 0x76c   :  { %6841 = vmatpush3.bf16.msra.mxu1 %v1176_v4  ;;  %6842 = vmatprep.mubr.msk.bf16.mxu1 %vm8211_vm0, %v8210_v0 }
 0x76d   :  { %6852 = vmatprep.subr.bf16.mxu1 %v8210_v0 }
 0x773   :  { %6843 = vmatmul.mubr.msk.bf16.vlgmr.msra.gmra.mxu1 %vm682_vm4, %v899_v24 }
 0x774   :  { %6853 = vmatpush3.bf16.xpose.msra.mxu1 %v1277_v7  ;;  %6854 = vmatprep.mubr.msk.bf16.mxu1 %vm8211_vm0, %v8210_v0 }
 0x775   :  { %6864 = vmatprep.subr.bf16.mxu1 %v8210_v0 }
 0x77b   :  { %6855 = vmatmul.mubr.msk.bf16.vlgmr.msra.gmra.mxu1 %vm682_vm4, %v1270_v8 }
 0x77c   :  { %6866 = vmatprep.mubr.msk.bf16.mxu1 %vm8211_vm0, %v8210_v0 }
 0x827   :  { %v1069_v12 = vpop.f32.mrf.mxu0 }
 0x829   :  { %v6826_v13 = vpop.f32.mrf.mxu0 }
 0x82b   :  { %v1072_v14 = vpop.f32.mrf.mxu0  ;;  %v1117_v15 = vpop.f32.mrf.mxu1 }
 0x82c   :  { %v1123_v16 = vpack.c.bf16 %v1117_v15, %v1069_v12 }
 0x82d   :  { %v6827_v18 = vpop.f32.mrf.mxu0  ;;  %v6832_v20 = vpop.f32.mrf.mxu1 }
 0x82e   :  { %6837 = vmatmul.mubr.msk.bf16.vlgmr.msra.gmra.mxu0 %vm682_vm4, %v1123_v16 }
 0x82f   :  { %6847 = vmatpush3.bf16.xpose.msra.mxu0 %v1227_v23  ;;  %v1120_v24 = vpop.f32.mrf.mxu1  ;;  %6848 = vmatprep.mubr.msk.bf16.mxu0 %vm8211_vm0, %v8210_v0 }
 0x830   :  { %6858 = vmatprep.subr.bf16.mxu0 %v8210_v0 }
 0x831   :  { %v6833_v25 = vpop.f32.mrf.mxu1 }
 0x833   :  { %v8631_v26 = vpop.f32.mrf.mxu1 }
 0x835   :  { %v6844_v29 = vpop.f32.mrf.mxu1 }
 0x836   :  { %6849 = vmatmul.mubr.msk.bf16.vlgmr.msra.gmra.mxu0 %vm682_vm4, %v1220_v27 }
 0x837   :  { %v8634_v30 = vpop.f32.mrf.mxu1  ;;  %6860 = vmatprep.mubr.msk.bf16.mxu0 %vm8211_vm0, %v8210_v0 }
 0x839   :  { %v6845_v31 = vpop.f32.mrf.mxu1 }
 0x83b   :  { %v1313_v33 = vpop.f32.mrf.mxu1 }
 0x83c   :  { %v1322_v34 = vsel %vm682_vm4, %v1313_v33, -inf }
 0x83d   :  { %1323 = vmax.xlane.f32.xlu1 %v1322_v34  ;;  %v6856_v35 = vpop.f32.mrf.mxu1 }
 0x83f   :  { %v1316_v36 = vpop.f32.mrf.mxu1 }
 0x841   :  { %v6857_v37 = vpop.f32.mrf.mxu1 }
 0x84e   :  { %1343 = vrot.lane.b32.xlu1 %v8519_v28, %s8219_s26 }
 0x852   :  { %1492 = vrot.lane.b32.xlu1 %v8519_v28, %s8220_s28 }
 0x856   :  { %1542 = vrot.lane.b32.xlu1 %v8523_v32, %s8220_s28 }
 0x85a   :  { %1540 = vrot.lane.b32.xlu1 %v8537_v40, %s8221_s24 }
 0x8c6   :  { %v1324_v39 = vpop.xlane.xlu1 %1323 }
 0x8c7   :  { %v1326_v43 = vsub.f32 %v1313_v33, %v1324_v39 }
 0x8c9   :  { %v1329_v44 = vmul.f32 1.442695, %v1326_v43 }
 0x8ca   :  { %v1344_v41 = vpop.permute.xlu1 %1343 }
 0x8cb   :  { %v1349_v42 = vsel %vm807_vm5, %v1344_v41, 0  ;;  %7469 = vpow2.f32 %v1329_v44 }
 0x8cc   :  { %6859 = vmatpush3.bf16.msra.mxu0 %v1349_v42 }
 0x8cd   :  { %6870 = vmatprep.subr.bf16.mxu0 %v8210_v0 }
 0x8ce   :  { %v1493_v3 = vpop.permute.xlu1 %1492 }
 0x8cf   :  { %v1498_v5 = vsel %vm682_vm4, %v1493_v3, 0 }
 0x8d2   :  { %v1543_v18 = vpop.permute.xlu1 %1542 }
 0x8d3   :  { %v1548_v31 = vsel %vm682_vm4, %v1543_v18, 0  ;;  %v6454_v18 = vld [vmem:[#allocation11] ss:$0 sm:$0xff] }
 0x8d6   :  { %v1541_v36 = vpop.permute.xlu1 %1540 }
 0x8d8   :  { %v7470_v40 = vpop.eup %7469 }
 0x8d9   :  { %v1334_v53 = vsel %vm682_vm4, %v7470_v40, 0.0 }
 0x8ee   :  { %v8649_v45 = vpop.f32.mrf.mxu0 }
 0x8ef   :  { %v1213_v44 = vadd.f32 %v8631_v26, %v8649_v45 }
 0x8f0   :  { %v6838_v46 = vpop.f32.mrf.mxu0 }
 0x8f2   :  { %v8651_v47 = vpop.f32.mrf.mxu0 }
 0x8f4   :  { %v6839_v48 = vpop.f32.mrf.mxu0 }
 0x8f6   :  { %v1263_v49 = vpop.f32.mrf.mxu0 }
 0x8f7   :  { %v1319_v50 = vsel %vm682_vm4, %v1263_v49, -inf }
 0x8f8   :  { %1320 = vmax.xlane.f32.xlu0 %v1319_v50  ;;  %v6850_v51 = vpop.f32.mrf.mxu0  ;;  %v1216_v50 = vadd.f32 %v8634_v30, %v8651_v47 }
 0x8fa   :  { %v1266_v52 = vpop.f32.mrf.mxu0 }
 0x8fc   :  { %1335 = vadd.xlane.f32.xlu0 %v1334_v53  ;;  %v6851_v54 = vpop.f32.mrf.mxu0 }
 0x981   :  { %v1321_v55 = vpop.xlane.xlu0 %1320 }
 0x982   :  { %v1325_v56 = vsub.f32 %v1263_v49, %v1321_v55 }
 0x984   :  { %v1327_v57 = vmul.f32 1.442695, %v1325_v56 }
 0x985   :  { %v1336_v60 = vpop.xlane.xlu0 %1335 }
 0x986   :  { %7471 = vpow2.f32 %v1327_v57 }
 0x987   :  { %7473 = vrcp.f32 %v1336_v60 }
 0x993   :  { %v7472_v58 = vpop.eup %7471 }
 0x994   :  { %v1331_v59 = vsel %vm682_vm4, %v7472_v58, 0.0  ;;  %v7474_v61 = vpop.eup %7473 }
 0x995   :  { %1332 = vadd.xlane.f32.xlu0 %v1331_v59  ;;  %v1340_v63 = vmul.f32 %v7474_v61, %v7470_v40 }
 0x997   :  { %v1342_v4 = vpack.c.bf16 %v1340_v63, %v1340_v63 }
 0x9ab   :  { %1391 = vrot.lane.b32.xlu0 %v8523_v32, %s8219_s26 }
 0x9af   :  { %1490 = vrot.lane.b32.xlu0 %v8530_v38, %s8221_s24 }
 0xa1e   :  { %v1333_v62 = vpop.xlane.xlu0 %1332 }
 0xa1f   :  { %7475 = vrcp.f32 %v1333_v62 }
 0xa22   :  { %v1392_v1 = vpop.permute.xlu0 %1391 }
 0xa23   :  { %v1397_v2 = vsel %vm807_vm5, %v1392_v1, 0  ;;  %v469_v1 = vld [vmem:[#allocation10 + $0x18] sm:$0xff] }
 0xa24   :  { %6865 = vmatpush3.bf16.msra.mxu1 %v1397_v2  ;;  %v1711_v2 = vpack.c.bf16 %v469_v1, %v469_v1 }
 0xa25   :  { %6876 = vmatprep.subr.bf16.mxu1 %v8210_v0 }
 0xa26   :  { %v1491_v7 = vpop.permute.xlu0 %1490  ;;  %v1716_v3 = vsel %vm807_vm5, %v1711_v2, 0  ;;  %v492_v2 = vld [vmem:[#allocation19 + $0x10] sm:$0xff] }
 0xa27   :  { %6867 = vmatmul.mubr.msk.bf16.vlgmr.msra.gmra.mxu1 %vm682_vm4, %v1342_v4 }
 0xa28   :  { %6877 = vmatpush3.bf16.xpose.msra.mxu1 %v1498_v5  ;;  %6878 = vmatprep.mubr.msk.bf16.mxu1 %vm8211_vm0, %v8210_v0 }
 0xa29   :  { %6888 = vmatprep.subr.bf16.mxu1 %v8210_v0 }
 0xa2c   :  { %v7476_v38 = vpop.eup %7475 }
 0xa2d   :  { %v1339_v6 = vmul.f32 %v7476_v38, %v7472_v58 }
 0xa2f   :  { %6879 = vmatmul.mubr.msk.bf16.vlgmr.msra.gmra.mxu1 %vm682_vm4, %v1491_v7  ;;  %v1341_v8 = vpack.c.bf16 %v1339_v6, %v1339_v6 }
 0xa30   :  { %6890 = vmatprep.mubr.msk.bf16.mxu1 %vm8211_vm0, %v8210_v0 }
 0xa31   :  { %6861 = vmatmul.mubr.msk.bf16.vlgmr.msra.gmra.mxu0 %vm682_vm4, %v1341_v8 }
 0xa32   :  { %6872 = vmatprep.mubr.msk.bf16.mxu0 %vm8211_vm0, %v8210_v0  ;;  %6871 = vmatpush3.bf16.msra.mxu0 %v1445_v11 }
 0xa33   :  { %6882 = vmatprep.subr.bf16.mxu0 %v8210_v0 }
 0xae7   :  { %v1433_v12 = vpop.f32.mrf.mxu1 }
 0xae9   :  { %v6868_v13 = vpop.f32.mrf.mxu1 }
 0xaeb   :  { %v1436_v14 = vpop.f32.mrf.mxu1 }
 0xaed   :  { %v6869_v15 = vpop.f32.mrf.mxu1 }
 0xaef   :  { %v1534_v16 = vpop.f32.mrf.mxu1 }
 0xaf0   :  { %v1590_v20 = vsel %vm682_vm4, %v1534_v16, -inf }
 0xaf1   :  { %1591 = vmax.xlane.f32.xlu0 %v1590_v20  ;;  %v1385_v23 = vpop.f32.mrf.mxu0  ;;  %v6880_v24 = vpop.f32.mrf.mxu1 }
 0xaf2   :  { %v1439_v25 = vpack.c.bf16 %v1433_v12, %v1385_v23 }
 0xaf3   :  { %v6862_v27 = vpop.f32.mrf.mxu0  ;;  %v1537_v29 = vpop.f32.mrf.mxu1 }
 0xaf4   :  { %6873 = vmatmul.mubr.msk.bf16.vlgmr.msra.gmra.mxu0 %vm682_vm4, %v1439_v25 }
 0xaf5   :  { %6883 = vmatpush3.bf16.xpose.msra.mxu0 %v1548_v31  ;;  %v1388_v33 = vpop.f32.mrf.mxu0  ;;  %v6881_v34 = vpop.f32.mrf.mxu1  ;;  %6884 = vmatprep.mubr.msk.bf16.mxu0 %vm8211_vm0, %v8210_v0 }
 0xaf6   :  { %6894 = vmatprep.subr.bf16.mxu0 %v8210_v0 }
 0xaf7   :  { %v6863_v35 = vpop.f32.mrf.mxu0 }
 0xafc   :  { %6885 = vmatmul.mubr.msk.bf16.vlgmr.msra.gmra.mxu0 %vm682_vm4, %v1541_v36 }
 0xafd   :  { %6896 = vmatprep.mubr.msk.bf16.mxu0 %vm8211_vm0, %v8210_v0 }
 0xb7a   :  { %v1592_v37 = vpop.xlane.xlu0 %1591 }
 0xb7b   :  { %v1596_v39 = vsub.f32 %v1534_v16, %v1592_v37 }
 0xb7d   :  { %v1598_v41 = vmul.f32 1.442695, %v1596_v39 }
 0xb7f   :  { %7477 = vpow2.f32 %v1598_v41 }
 0xb8c   :  { %v7478_v42 = vpop.eup %7477 }
 0xb8d   :  { %v1602_v43 = vsel %vm682_vm4, %v7478_v42, 0.0 }
 0xb8e   :  { %1603 = vadd.xlane.f32.xlu0 %v1602_v43 }
 0xbb4   :  { %v1481_v46 = vpop.f32.mrf.mxu0 }
 0xbb5   :  { %v1488_v48 = vadd.f32 %v1481_v46, %v1213_v44 }
 0xbb6   :  { %v6874_v49 = vpop.f32.mrf.mxu0 }
 0xbb8   :  { %v1484_v40 = vpop.f32.mrf.mxu0 }
 0xbb9   :  { %v1489_v51 = vadd.f32 %v1484_v40, %v1216_v50  ;;  %v482_v50 = vld [vmem:[#allocation16 + $0x10] sm:$0xff]  ;;  %v480_v40 = vld [vmem:[#allocation16] sm:$0xff] }
 0xbba   :  { %v6875_v52 = vpop.f32.mrf.mxu0 }
 0xbbc   :  { %v1584_v53 = vpop.f32.mrf.mxu0 }
 0xbbd   :  { %v1593_v54 = vsel %vm682_vm4, %v1584_v53, -inf }
 0xbbe   :  { %1594 = vmax.xlane.f32.xlu1 %v1593_v54  ;;  %v6886_v55 = vpop.f32.mrf.mxu0 }
 0xbc0   :  { %v1587_v56 = vpop.f32.mrf.mxu0 }
 0xbc2   :  { %v6887_v57 = vpop.f32.mrf.mxu0 }
 0xbcf   :  { %1614 = vrot.lane.b32.xlu1 %v8519_v28, %s8222_s19 }
 0xc17   :  { %v1604_v26 = vpop.xlane.xlu0 %1603 }
 0xc18   :  { %7479 = vrcp.f32 %v1604_v26 }
 0xc25   :  { %v7480_v45 = vpop.eup %7479 }
 0xc26   :  { %v1610_v47 = vmul.f32 %v7480_v45, %v7478_v42 }
 0xc28   :  { %v1612_v62 = vpack.c.bf16 %v1610_v47, %v1610_v47 }
 0xc47   :  { %v1595_v58 = vpop.xlane.xlu1 %1594 }
 0xc48   :  { %v1597_v59 = vsub.f32 %v1584_v53, %v1595_v58 }
 0xc4a   :  { %v1600_v30 = vmul.f32 1.442695, %v1597_v59  ;;  %v6455_v59 = vld [vmem:[#allocation13] ss:$0 sm:$0xff] }
 0xc4b   :  { %v1615_v60 = vpop.permute.xlu1 %1614 }
 0xc4c   :  { %7481 = vpow2.f32 %v1600_v30  ;;  %v1620_v61 = vsel %vm807_vm5, %v1615_v60, 0 }
 0xc4d   :  { %6889 = vmatpush3.bf16.msra.mxu1 %v1620_v61  ;;  %v6456_v61 = vld [vmem:[#allocation14] ss:$0 sm:$0xff] }
 0xc4e   :  { %6900 = vmatprep.subr.bf16.mxu1 %v8210_v0 }
 0xc50   :  { %6891 = vmatmul.mubr.msk.bf16.vlgmr.msra.gmra.mxu1 %vm682_vm4, %v1612_v62 }
 0xc51   :  { %6902 = vmatprep.mubr.msk.bf16.mxu1 %vm8211_vm0, %v8210_v0  ;;  %6901 = vmatpush3.bf16.msra.mxu1 %v1716_v3  ;;  %v493_v3 = vld [vmem:[#allocation19 + $0x18] sm:$0xff] }
 0xc52   :  { %6914 = vmatprep.subr.bf16.mxu1 %v8210_v0 }
 0xc59   :  { %v7482_v28 = vpop.eup %7481 }
 0xc5a   :  { %v1605_v63 = vsel %vm682_vm4, %v7482_v28, 0.0 }
 0xc5b   :  { %1606 = vadd.xlane.f32.xlu0 %v1605_v63 }
 0xc71   :  { %1662 = vrot.lane.b32.xlu0 %v8523_v32, %s8222_s19 }
 0xce4   :  { %v1607_v4 = vpop.xlane.xlu0 %1606 }
 0xce5   :  { %7483 = vrcp.f32 %v1607_v4  ;;  %v490_v4 = vld [vmem:[#allocation19] sm:$0xff] }
 0xce8   :  { %v1663_v5 = vpop.permute.xlu0 %1662 }
 0xce9   :  { %v1668_v38 = vsel %vm807_vm5, %v1663_v5, 0  ;;  %v1887_v5 = vpack.c.bf16 %v493_v3, %v492_v2 }
 0xcea   :  { %6895 = vmatpush3.bf16.msra.mxu0 %v1668_v38  ;;  %v491_v38 = vld [vmem:[#allocation19 + $0x8] sm:$0xff] }
 0xceb   :  { %6906 = vmatprep.subr.bf16.mxu0 %v8210_v0 }
 0xcf2   :  { %v7484_v6 = vpop.eup %7483 }
 0xcf3   :  { %v1611_v7 = vmul.f32 %v7484_v6, %v7482_v28  ;;  %v1886_v6 = vpack.c.bf16 %v491_v38, %v490_v4  ;;  %v6461_v38 = vld [vmem:[#allocation22] ss:$0 sm:$0xff] }
 0xcf5   :  { %v1613_v8 = vpack.c.bf16 %v1611_v7, %v1611_v7  ;;  %v6457_v7 = vld [vmem:[#allocation17] ss:$0 sm:$0xff] }
 0xcf7   :  { %6897 = vmatmul.mubr.msk.bf16.vlgmr.msra.gmra.mxu0 %vm682_vm4, %v1613_v8 }
 0xcf8   :  { %6910 = vmatprep.mubr.msk.bf16.mxu0 %vm8211_vm0, %v8210_v0 }
 0xd10   :  { %v1656_v32 = vpop.f32.mrf.mxu1 }
 0xd12   :  { %v6892_v9 = vpop.f32.mrf.mxu1 }
 0xd14   :  { %v1659_v10 = vpop.f32.mrf.mxu1 }
 0xd16   :  { %v6893_v11 = vpop.f32.mrf.mxu1 }
 0xdb7   :  { %v1704_v12 = vpop.f32.mrf.mxu0 }
 0xdb8   :  { %v1710_v13 = vpack.c.bf16 %v1704_v12, %v1656_v32 }
 0xdb9   :  { %v6898_v14 = vpop.f32.mrf.mxu0 }
 0xdba   :  { %6903 = vmatmul.mubr.msk.bf16.vlgmr.msra.gmra.mxu1 %vm682_vm4, %v1710_v13 }
 0xdbb   :  { %v1707_v15 = vpop.f32.mrf.mxu0  ;;  %6918 = vmatprep.mubr.msk.bf16.mxu1 %vm8211_vm0, %v8210_v0  ;;  %6915 = vmatpush3.bf16.msra.mxu1 %v1887_v5 }
 0xdbc   :  { %6916 = vmatprep.subr.bf16.mxu1 %v8210_v0 }
 0xdbd   :  { %v6899_v16 = vpop.f32.mrf.mxu0 }
 0xdbf   :  { %6917 = vmatpush3.bf16.msra.mxu1 %v1886_v6 }
 0xdc0   :  { %6930 = vmatprep.subr.bf16.mxu1 %v8210_v0 }
 0xe7a   :  { %v1752_v20 = vpop.f32.mrf.mxu1 }
 0xe7b   :  { %v1759_v23 = vadd.f32 %v1752_v20, %v1488_v48 }
 0xe7c   :  { %v6904_v24 = vpop.f32.mrf.mxu1 }
 0xe7d   :  { %v1767_v25 = vadd.f32 %v6454_v18, %v1759_v23 }
 0xe7e   :  { %v1755_v27 = vpop.f32.mrf.mxu1 }
 0xe7f   :  { %v1760_v29 = vadd.f32 %v1755_v27, %v1489_v51  ;;  %v1769_v31 = vadd.f32 %v1767_v25, %v617_v21  ;;  %v481_v51 = vld [vmem:[#allocation16 + $0x8] sm:$0xff] }
 0xe80   :  { %v6905_v33 = vpop.f32.mrf.mxu1  ;;  %v1815_v52 = vpack.c.bf16 %v481_v51, %v480_v40 }
 0xe81   :  { %v1768_v34 = vadd.f32 %v6454_v18, %v1760_v29  ;;  %v1771_v35 = vsel %vm628_vm3, %v1769_v31, 0.0 }
 0xe82   :  { %1772 = vadd.xlane.f32.xlu1 %v1771_v35 }
 0xe83   :  { %v1770_v36 = vadd.f32 %v1768_v34, %v618_v22  ;;  %v1816_v22 = vpack.c.bf16 %v483_v19, %v482_v50 }
 0xe85   :  { %v1774_v37 = vsel %vm628_vm3, %v1770_v36, 0.0  ;;  %6907 = vmatpush3.bf16.msra.mxu0 %v1816_v22 }
 0xe86   :  { %1775 = vadd.xlane.f32.xlu0 %v1774_v37  ;;  %6908 = vmatprep.subr.bf16.mxu0 %v8210_v0 }
 0xe89   :  { %6909 = vmatpush3.bf16.msra.mxu0 %v1815_v52 }
 0xe8a   :  { %6922 = vmatprep.subr.bf16.mxu0 %v8210_v0 }
 0xf0b   :  { %v1773_v39 = vpop.xlane.xlu1 %1772 }
 0xf0c   :  { %v1778_v41 = vmul.f32 0.03125, %v1773_v39 }
 0xf0e   :  { %v1780_v42 = vsub.f32 %v1769_v31, %v1778_v41 }
 0xf0f   :  { %v1776_v43 = vpop.xlane.xlu0 %1775 }
 0xf10   :  { %v1779_v44 = vmul.f32 0.03125, %v1776_v43  ;;  %v1782_v46 = vmul.f32 %v1780_v42, %v1780_v42 }
 0xf12   :  { %v1781_v48 = vsub.f32 %v1770_v36, %v1779_v44  ;;  %v1784_v17 = vsel %vm628_vm3, %v1782_v46, 0.0 }
 0xf13   :  { %1785 = vadd.xlane.f32.xlu1 %v1784_v17 }
 0xf14   :  { %v1783_v21 = vmul.f32 %v1781_v48, %v1781_v48 }
 0xf16   :  { %v1787_v49 = vsel %vm628_vm3, %v1783_v21, 0.0 }
 0xf17   :  { %1788 = vadd.xlane.f32.xlu0 %v1787_v49 }
 0xf9c   :  { %v1786_v53 = vpop.xlane.xlu1 %1785 }
 0xf9d   :  { %v1790_v54 = vmul.f32 0.03125, %v1786_v53 }
 0xf9f   :  { %v1792_v55 = vadd.f32 1e-05, %v1790_v54 }
 0xfa0   :  { %v1789_v56 = vpop.xlane.xlu0 %1788 }
 0xfa1   :  { %7485 = vrsqrt.f32 %v1792_v55  ;;  %v1791_v57 = vmul.f32 0.03125, %v1789_v56 }
 0xfa3   :  { %v1793_v26 = vadd.f32 1e-05, %v1791_v57 }
 0xfa5   :  { %7487 = vrsqrt.f32 %v1793_v26 }
 0xfae   :  { %v7486_v45 = vpop.eup %7485 }
 0xfaf   :  { %v1796_v58 = vmul.f32 %v7486_v45, %v1780_v42  ;;  %v6459_v42 = vld [vmem:[#allocation20] ss:$0 sm:$0xff] }
 0xfb1   :  { %v1804_v60 = vmul.f32 %v6455_v59, %v1796_v58  ;;  %v462_v58 = vld [vmem:[%s9533_s10 + $0x30] sm:$0xff] }
 0xfb2   :  { %v7488_v30 = vpop.eup %7487 }
 0xfb3   :  { %v1797_v47 = vmul.f32 %v7488_v30, %v1781_v48  ;;  %v1812_v28 = vadd.f32 %v6456_v61, %v1804_v60  ;;  %v461_v60 = vld [vmem:[%s9533_s10 + $0x28] sm:$0xff] }
 0xfb5   :  { %v1805_v62 = vmul.f32 %v6455_v59, %v1797_v47  ;;  %v463_v59 = vld [vmem:[%s9533_s10 + $0x38] sm:$0xff]  ;;  %v460_v47 = vld [vmem:[%s9533_s10 + $0x20] sm:$0xff] }
 0xfb6   :  { %v1984_v30 = vpack.c.bf16 %v463_v59, %v462_v58 }
 0xfb7   :  { %v1813_v63 = vadd.f32 %v6456_v61, %v1805_v62  ;;  %v1983_v61 = vpack.c.bf16 %v461_v60, %v460_v47 }
 0xfb9   :  { %v1814_v1 = vpack.c.bf16 %v1813_v63, %v1812_v28 }
 0xfbb   :  { %6911 = vmatmul.mubr.msk.bf16.vlgmr.msra.gmra.mxu0 %vm628_vm3, %v1814_v1 }
 0xfbc   :  { %6926 = vmatprep.mubr.msk.bf16.mxu0 %vm8211_vm0, %v8210_v0  ;;  %6923 = vmatpush3.bf16.msra.mxu0 %v1984_v30 }
 0xfbd   :  { %6924 = vmatprep.subr.bf16.mxu0 %v8210_v0 }
 0xfc0   :  { %6925 = vmatpush3.bf16.msra.mxu0 %v1983_v61 }
 0xfc1   :  { %6936 = vmatprep.subr.bf16.mxu0 %v8210_v0 }
0x107b   :  { %v1860_v8 = vpop.f32.mrf.mxu0 }
0x107c   :  { %v1861_v32 = vadd.f32 %v6457_v7, %v1860_v8 }
0x107d   :  { %v6912_v9 = vpop.f32.mrf.mxu0 }
0x107e   :  { %v1869_v10 = vmul.f32 0.044715, %v1861_v32  ;;  %v1867_v34 = vmul.f32 0.5, %v1861_v32 }
0x107f   :  { %v1863_v11 = vpop.f32.mrf.mxu0 }
0x1080   :  { %v1871_v12 = vmul.f32 %v1869_v10, %v1861_v32  ;;  %v1864_v13 = vadd.f32 %v6457_v7, %v1863_v11 }
0x1081   :  { %v6913_v14 = vpop.f32.mrf.mxu0 }
0x1082   :  { %v1873_v15 = vmul.f32 %v1871_v12, %v1861_v32  ;;  %v1870_v16 = vmul.f32 0.044715, %v1864_v13  ;;  %v1868_v35 = vmul.f32 0.5, %v1864_v13 }
0x1084   :  { %v1875_v18 = vadd.f32 %v1873_v15, %v1861_v32  ;;  %v1872_v20 = vmul.f32 %v1870_v16, %v1864_v13  ;;  %v6462_v32 = vld [vmem:[#allocation23] ss:$0 sm:$0xff] }
0x1086   :  { %v1877_v23 = vmul.f32 0.7978846, %v1875_v18  ;;  %v1874_v24 = vmul.f32 %v1872_v20, %v1864_v13 }
0x1088   :  { %7489 = vtanh.f32 %v1877_v23  ;;  %v1876_v25 = vadd.f32 %v1874_v24, %v1864_v13  ;;  %v6463_v13 = vld [vmem:[#allocation8 + $0x1] ss:$0 sm:$0xff] }
0x108a   :  { %v1878_v27 = vmul.f32 0.7978846, %v1876_v25 }
0x108c   :  { %7491 = vtanh.f32 %v1878_v27 }
0x1095   :  { %v7490_v29 = vpop.eup %7489 }
0x1096   :  { %v1881_v31 = vadd.f32 1.0, %v7490_v29 }
0x1098   :  { %v1883_v37 = vmul.f32 %v1881_v31, %v1867_v34 }
0x1099   :  { %v7492_v33 = vpop.eup %7491 }
0x109a   :  { %v1882_v36 = vadd.f32 1.0, %v7492_v33 }
0x109c   :  { %v1884_v39 = vmul.f32 %v1882_v36, %v1868_v35 }
0x109e   :  { %v1885_v41 = vpack.c.bf16 %v1884_v39, %v1883_v37 }
0x10a0   :  { %6919 = vmatmul.mubr.msk.bf16.vlgmr.msra.gmra.mxu1 %vm628_vm3, %v1885_v41 }
0x10a1   :  { %6932 = vmatprep.mubr.msk.bf16.mxu1 %vm8211_vm0, %v8210_v0 }
0x1160   :  { %v1931_v43 = vpop.f32.mrf.mxu1 }
0x1161   :  { %v1932_v44 = vadd.f32 %v6459_v42, %v1931_v43 }
0x1162   :  { %v6920_v46 = vpop.f32.mrf.mxu1 }
0x1163   :  { %v1938_v48 = vadd.f32 %v1932_v44, %v1812_v28 }
0x1164   :  { %v1934_v17 = vpop.f32.mrf.mxu1 }
0x1165   :  { %v1935_v21 = vadd.f32 %v6459_v42, %v1934_v17  ;;  %v1940_v49 = vsel %vm628_vm3, %v1938_v48, 0.0 }
0x1166   :  { %1941 = vadd.xlane.f32.xlu1 %v1940_v49  ;;  %v6921_v50 = vpop.f32.mrf.mxu1 }
0x1167   :  { %v1939_v19 = vadd.f32 %v1935_v21, %v1813_v63 }
0x1169   :  { %v1943_v22 = vsel %vm628_vm3, %v1939_v19, 0.0 }
0x116a   :  { %1944 = vadd.xlane.f32.xlu0 %v1943_v22 }
0x11ef   :  { %v1942_v40 = vpop.xlane.xlu1 %1941 }
0x11f0   :  { %v1946_v51 = vmul.f32 0.03125, %v1942_v40 }
0x11f2   :  { %v1948_v52 = vsub.f32 %v1938_v48, %v1946_v51 }
0x11f3   :  { %v1945_v53 = vpop.xlane.xlu0 %1944 }
0x11f4   :  { %v1947_v54 = vmul.f32 0.03125, %v1945_v53  ;;  %v1950_v55 = vmul.f32 %v1948_v52, %v1948_v52 }
0x11f6   :  { %v1949_v56 = vsub.f32 %v1939_v19, %v1947_v54  ;;  %v1952_v57 = vsel %vm628_vm3, %v1950_v55, 0.0 }
0x11f7   :  { %1953 = vadd.xlane.f32.xlu1 %v1952_v57 }
0x11f8   :  { %v1951_v26 = vmul.f32 %v1949_v56, %v1949_v56 }
0x11fa   :  { %v1955_v45 = vsel %vm628_vm3, %v1951_v26, 0.0 }
0x11fb   :  { %1956 = vadd.xlane.f32.xlu0 %v1955_v45 }
0x1280   :  { %v1954_v62 = vpop.xlane.xlu1 %1953 }
0x1281   :  { %v1958_v28 = vmul.f32 0.03125, %v1954_v62 }
0x1283   :  { %v1960_v63 = vadd.f32 1e-05, %v1958_v28 }
0x1284   :  { %v1957_v1 = vpop.xlane.xlu0 %1956 }
0x1285   :  { %7493 = vrsqrt.f32 %v1960_v63  ;;  %v1959_v2 = vmul.f32 0.03125, %v1957_v1 }
0x1287   :  { %v1961_v3 = vadd.f32 1e-05, %v1959_v2 }
0x1289   :  { %7495 = vrsqrt.f32 %v1961_v3 }
0x1292   :  { %v7494_v4 = vpop.eup %7493 }
0x1293   :  { %v1964_v5 = vmul.f32 %v7494_v4, %v1948_v52 }
0x1295   :  { %v1972_v8 = vmul.f32 %v6461_v38, %v1964_v5 }
0x1296   :  { %v7496_v6 = vpop.eup %7495 }
0x1297   :  { %v1965_v7 = vmul.f32 %v7496_v6, %v1949_v56  ;;  %v8738_v10 = vadd.f32 %v6462_v32, %v1972_v8 }
0x1299   :  { %v1973_v9 = vmul.f32 %v6461_v38, %v1965_v7 }
0x129b   :  { %v8740_v11 = vadd.f32 %v6462_v32, %v1973_v9 }
0x129d   :  { %v1982_v12 = vpack.c.bf16 %v8740_v11, %v8738_v10 }
0x129f   :  { %6927 = vmatmul.mubr.msk.bf16.vlgmr.msra.gmra.mxu0 %vm628_vm3, %v1982_v12 }
0x12a0   :  { %6938 = vmatprep.mubr.msk.bf16.mxu0 %vm8211_vm0, %v8210_v0 }
0x135f   :  { %v2028_v14 = vpop.f32.mrf.mxu0 }
0x1360   :  { %v2029_v15 = vadd.f32 %v6463_v13, %v2028_v14 }
0x1361   :  { %v6928_v16 = vpop.f32.mrf.mxu0 }
0x1362   :  { %v8747_v18 = vpack.c.bf16 %v2029_v15, %v2029_v15  ;;  %v2035_v31 = vmul.f32 0.35355338, %v2029_v15 }
0x1363   :  { %v2031_v20 = vpop.f32.mrf.mxu0 }
0x1364   :  { %v2032_v23 = vadd.f32 %v6463_v13, %v2031_v20  ;;  %2042 = vrot.lane.b32.xlu1 %v8747_v18, %s8212_s11  ;;  %v8758_v35 = vpack.c.bf16 %v2035_v31, %v2035_v31 }
0x1365   :  { %v6929_v24 = vpop.f32.mrf.mxu0 }
0x1366   :  { %v8751_v25 = vpack.c.bf16 %v2032_v23, %v2032_v23  ;;  %v2036_v36 = vmul.f32 0.35355338, %v2032_v23 }
0x1368   :  { %2091 = vrot.lane.b32.xlu0 %v8751_v25, %s8212_s11  ;;  %v8765_v37 = vpack.c.bf16 %v2036_v36, %v2036_v36 }
0x13d6   :  { %v2043_v27 = vpop.permute.xlu1 %2042 }
0x13d7   :  { %v2048_v29 = vsel %vm682_vm4, %v2043_v27, 0 }
0x13d8   :  { %6931 = vmatpush3.bf16.xpose.msra.mxu1 %v2048_v29 }
0x13d9   :  { %6942 = vmatprep.subr.bf16.mxu1 %v8210_v0 }
0x13da   :  { %v2092_v33 = vpop.permute.xlu0 %2091 }
0x13db   :  { %v2097_v34 = vsel %vm682_vm4, %v2092_v33, 0 }
0x13dc   :  { %6937 = vmatpush3.bf16.xpose.msra.mxu0 %v2097_v34 }
0x13dd   :  { %6948 = vmatprep.subr.bf16.mxu0 %v8210_v0 }
0x13df   :  { %6933 = vmatmul.mubr.msk.bf16.vlgmr.msra.gmra.mxu1 %vm682_vm4, %v8758_v35 }
0x13e0   :  { %6944 = vmatprep.mubr.msk.bf16.mxu1 %vm8211_vm0, %v8210_v0 }
0x13e3   :  { %6939 = vmatmul.mubr.msk.bf16.vlgmr.msra.gmra.mxu0 %vm682_vm4, %v8765_v37 }
0x13e4   :  { %6950 = vmatprep.mubr.msk.bf16.mxu0 %vm8211_vm0, %v8210_v0 }
0x149f   :  { %v2084_v39 = vpop.f32.mrf.mxu1 }
0x14a0   :  { %v2139_v41 = vsel %vm682_vm4, %v2084_v39, -inf }
0x14a1   :  { %2140 = vmax.xlane.f32.xlu1 %v2139_v41  ;;  %v6934_v42 = vpop.f32.mrf.mxu1 }
0x14a3   :  { %v2087_v43 = vpop.f32.mrf.mxu1  ;;  %v2133_v44 = vpop.f32.mrf.mxu0 }
0x14a4   :  { %v2142_v46 = vsel %vm682_vm4, %v2133_v44, -inf }
0x14a5   :  { %v6935_v48 = vpop.f32.mrf.mxu1  ;;  %2143 = vmax.xlane.f32.xlu0 %v2142_v46  ;;  %v6940_v17 = vpop.f32.mrf.mxu0 }
0x14a7   :  { %v2136_v21 = vpop.f32.mrf.mxu0 }
0x14a9   :  { %v6941_v49 = vpop.f32.mrf.mxu0 }
0x14b2   :  { %2163 = vrot.lane.b32.xlu1 %v8747_v18, %s8213_s16 }
0x152a   :  { %v2141_v50 = vpop.xlane.xlu1 %2140 }
0x152b   :  { %v2145_v19 = vsub.f32 %v2084_v39, %v2141_v50 }
0x152d   :  { %v2147_v22 = vmul.f32 1.442695, %v2145_v19 }
0x152e   :  { %v2164_v40 = vpop.permute.xlu1 %2163  ;;  %v2144_v51 = vpop.xlane.xlu0 %2143 }
0x152f   :  { %7497 = vpow2.f32 %v2147_v22  ;;  %v2169_v52 = vsel %vm807_vm5, %v2164_v40, 0  ;;  %v2146_v53 = vsub.f32 %v2133_v44, %v2144_v51 }
0x1530   :  { %6943 = vmatpush3.bf16.msra.mxu1 %v2169_v52 }
0x1531   :  { %v2149_v54 = vmul.f32 1.442695, %v2146_v53  ;;  %6954 = vmatprep.subr.bf16.mxu1 %v8210_v0 }
0x1533   :  { %7499 = vpow2.f32 %v2149_v54  ;;  %v470_v54 = vld [vmem:[#allocation10 + $0x20] sm:$0xff] }
0x153c   :  { %v7498_v55 = vpop.eup %7497 }
0x153d   :  { %v2151_v56 = vsel %vm682_vm4, %v7498_v55, 0.0 }
0x153e   :  { %2152 = vadd.xlane.f32.xlu1 %v2151_v56 }
0x1540   :  { %v7500_v57 = vpop.eup %7499 }
0x1541   :  { %v2154_v26 = vsel %vm682_vm4, %v7500_v57, 0.0 }
0x1542   :  { %2155 = vadd.xlane.f32.xlu0 %v2154_v26 }
0x154f   :  { %2264 = vrot.lane.b32.xlu1 %v8747_v18, %s8214_s18 }
0x1553   :  { %2315 = vrot.lane.b32.xlu1 %v8751_v25, %s8214_s18 }
0x1557   :  { %2313 = vrot.lane.b32.xlu1 %v8765_v37, %s8215_s22 }
0x1558   :  { %2211 = vrot.lane.b32.xlu0 %v8751_v25, %s8213_s16 }
0x155c   :  { %2262 = vrot.lane.b32.xlu0 %v8758_v35, %s8215_s22 }
0x15c7   :  { %v2153_v45 = vpop.xlane.xlu1 %2152 }
0x15c8   :  { %7501 = vrcp.f32 %v2153_v45 }
0x15cb   :  { %v2156_v58 = vpop.xlane.xlu0 %2155  ;;  %v2265_v60 = vpop.permute.xlu1 %2264 }
0x15cc   :  { %7503 = vrcp.f32 %v2156_v58  ;;  %v2270_v63 = vsel %vm682_vm4, %v2265_v60, 0 }
0x15cf   :  { %v2212_v59 = vpop.permute.xlu0 %2211  ;;  %v2316_v2 = vpop.permute.xlu1 %2315 }
0x15d0   :  { %v2217_v30 = vsel %vm807_vm5, %v2212_v59, 0  ;;  %v2321_v4 = vsel %vm682_vm4, %v2316_v2, 0 }
0x15d1   :  { %6949 = vmatpush3.bf16.msra.mxu0 %v2217_v30 }
0x15d2   :  { %6960 = vmatprep.subr.bf16.mxu0 %v8210_v0 }
0x15d3   :  { %v2263_v5 = vpop.permute.xlu0 %2262  ;;  %v2314_v38 = vpop.permute.xlu1 %2313 }
0x15d5   :  { %v7502_v47 = vpop.eup %7501 }
0x15d6   :  { %v2159_v61 = vmul.f32 %v7502_v47, %v7498_v55 }
0x15d8   :  { %v2161_v62 = vpack.c.bf16 %v2159_v61, %v2159_v61 }
0x15d9   :  { %v7504_v28 = vpop.eup %7503 }
0x15da   :  { %6945 = vmatmul.mubr.msk.bf16.vlgmr.msra.gmra.mxu1 %vm682_vm4, %v2161_v62  ;;  %v2160_v1 = vmul.f32 %v7504_v28, %v7500_v57  ;;  %v2260_v57 = vpack.c.bf16 %v470_v54, %v470_v54  ;;  %v471_v62 = vld [vmem:[#allocation10 + $0x28] sm:$0xff] }
0x15db   :  { %6955 = vmatpush3.bf16.xpose.msra.mxu1 %v2270_v63  ;;  %6956 = vmatprep.mubr.msk.bf16.mxu1 %vm8211_vm0, %v8210_v0  ;;  %v2484_v28 = vpack.c.bf16 %v471_v62, %v471_v62 }
0x15dc   :  { %v2162_v3 = vpack.c.bf16 %v2160_v1, %v2160_v1  ;;  %6966 = vmatprep.subr.bf16.mxu1 %v8210_v0  ;;  %v2536_v59 = vsel %vm807_vm5, %v2260_v57, 0 }
0x15dd   :  { %v2489_v63 = vsel %vm807_vm5, %v2484_v28, 0 }
0x15de   :  { %6951 = vmatmul.mubr.msk.bf16.vlgmr.msra.gmra.mxu0 %vm682_vm4, %v2162_v3 }
0x15df   :  { %6961 = vmatpush3.bf16.xpose.msra.mxu0 %v2321_v4  ;;  %6962 = vmatprep.mubr.msk.bf16.mxu0 %vm8211_vm0, %v8210_v0 }
0x15e0   :  { %6972 = vmatprep.subr.bf16.mxu0 %v8210_v0 }
0x15e2   :  { %6957 = vmatmul.mubr.msk.bf16.vlgmr.msra.gmra.mxu1 %vm682_vm4, %v2263_v5 }
0x15e3   :  { %6968 = vmatprep.mubr.msk.bf16.mxu1 %vm8211_vm0, %v8210_v0 }
0x15e6   :  { %6963 = vmatmul.mubr.msk.bf16.vlgmr.msra.gmra.mxu0 %vm682_vm4, %v2314_v38 }
0x15e7   :  { %6974 = vmatprep.mubr.msk.bf16.mxu0 %vm8211_vm0, %v8210_v0 }
0x169a   :  { %v8807_v6 = vpop.f32.mrf.mxu1 }
0x169c   :  { %v6946_v7 = vpop.f32.mrf.mxu1 }
0x169e   :  { %v2208_v8 = vpop.f32.mrf.mxu1  ;;  %v8809_v32 = vpop.f32.mrf.mxu0 }
0x169f   :  { %v2259_v9 = vpack.c.bf16 %v8809_v32, %v8807_v6 }
0x16a0   :  { %v6947_v12 = vpop.f32.mrf.mxu1  ;;  %v6952_v13 = vpop.f32.mrf.mxu0 }
0x16a2   :  { %v2256_v14 = vpop.f32.mrf.mxu0  ;;  %v2306_v15 = vpop.f32.mrf.mxu1 }
0x16a3   :  { %v2363_v16 = vsel %vm682_vm4, %v2306_v15, -inf }
0x16a4   :  { %2364 = vmax.xlane.f32.xlu0 %v2363_v16  ;;  %v6953_v20 = vpop.f32.mrf.mxu0  ;;  %v6958_v23 = vpop.f32.mrf.mxu1 }
0x16a6   :  { %v2309_v24 = vpop.f32.mrf.mxu1  ;;  %v2357_v27 = vpop.f32.mrf.mxu0 }
0x16a7   :  { %v2366_v29 = vsel %vm682_vm4, %v2357_v27, -inf }
0x16a8   :  { %v6959_v31 = vpop.f32.mrf.mxu1  ;;  %2367 = vmax.xlane.f32.xlu1 %v2366_v29  ;;  %v6964_v33 = vpop.f32.mrf.mxu0 }
0x16aa   :  { %v2360_v34 = vpop.f32.mrf.mxu0 }
0x16ac   :  { %v6965_v36 = vpop.f32.mrf.mxu0 }
0x16b9   :  { %2387 = vrot.lane.b32.xlu1 %v8747_v18, %s8216_s21 }
0x16bd   :  { %2581 = vrot.lane.b32.xlu1 %v8747_v18, %s8218_s23 }
0x16c1   :  { %2631 = vrot.lane.b32.xlu1 %v8751_v25, %s8218_s23 }
0x16c5   :  { %2629 = vrot.lane.b32.xlu1 %v8765_v37, %s8217_s9 }
0x172d   :  { %v2365_v39 = vpop.xlane.xlu0 %2364 }
0x172e   :  { %v2369_v41 = vsub.f32 %v2306_v15, %v2365_v39 }
0x1730   :  { %v2371_v42 = vmul.f32 1.442695, %v2369_v41 }
0x1731   :  { %v2368_v43 = vpop.xlane.xlu1 %2367 }
0x1732   :  { %7505 = vpow2.f32 %v2371_v42  ;;  %v2370_v44 = vsub.f32 %v2357_v27, %v2368_v43 }
0x1734   :  { %v2373_v46 = vmul.f32 1.442695, %v2370_v44 }
0x1735   :  { %v2388_v48 = vpop.permute.xlu1 %2387 }
0x1736   :  { %7507 = vpow2.f32 %v2373_v46  ;;  %v2393_v17 = vsel %vm807_vm5, %v2388_v48, 0 }
0x1737   :  { %6967 = vmatpush3.bf16.msra.mxu1 %v2393_v17 }
0x1738   :  { %6978 = vmatprep.subr.bf16.mxu1 %v8210_v0 }
0x1739   :  { %v2582_v30 = vpop.permute.xlu1 %2581 }
0x173a   :  { %v2587_v7 = vsel %vm682_vm4, %v2582_v30, 0 }
0x173d   :  { %v2632_v47 = vpop.permute.xlu1 %2631 }
0x173e   :  { %v2637_v60 = vsel %vm682_vm4, %v2632_v47, 0 }
0x173f   :  { %v7506_v21 = vpop.eup %7505 }
0x1740   :  { %v2375_v49 = vsel %vm682_vm4, %v7506_v21, 0.0 }
0x1741   :  { %2376 = vadd.xlane.f32.xlu0 %v2375_v49  ;;  %v2630_v61 = vpop.permute.xlu1 %2629 }
0x1743   :  { %v7508_v50 = vpop.eup %7507 }
0x1744   :  { %v2378_v19 = vsel %vm682_vm4, %v7508_v50, 0.0 }
0x1745   :  { %2379 = vadd.xlane.f32.xlu0 %v2378_v19 }
0x175b   :  { %2435 = vrot.lane.b32.xlu0 %v8751_v25, %s8216_s21 }
0x175f   :  { %2579 = vrot.lane.b32.xlu0 %v8758_v35, %s8217_s9 }
0x17ca   :  { %v2377_v22 = vpop.xlane.xlu0 %2376 }
0x17cb   :  { %7509 = vrcp.f32 %v2377_v22 }
0x17ce   :  { %v2380_v40 = vpop.xlane.xlu0 %2379 }
0x17cf   :  { %7511 = vrcp.f32 %v2380_v40 }
0x17d2   :  { %v2436_v51 = vpop.permute.xlu0 %2435 }
0x17d3   :  { %v2441_v52 = vsel %vm807_vm5, %v2436_v51, 0 }
0x17d4   :  { %6973 = vmatpush3.bf16.msra.mxu0 %v2441_v52 }
0x17d5   :  { %6984 = vmatprep.subr.bf16.mxu0 %v8210_v0 }
0x17d6   :  { %v2580_v12 = vpop.permute.xlu0 %2579 }
0x17d8   :  { %v7510_v53 = vpop.eup %7509 }
0x17d9   :  { %v2383_v55 = vmul.f32 %v7510_v53, %v7506_v21 }
0x17db   :  { %v2385_v56 = vpack.c.bf16 %v2383_v55, %v2383_v55 }
0x17dc   :  { %v7512_v26 = vpop.eup %7511 }
0x17dd   :  { %6969 = vmatmul.mubr.msk.bf16.vlgmr.msra.gmra.mxu1 %vm682_vm4, %v2385_v56  ;;  %v2384_v45 = vmul.f32 %v7512_v26, %v7508_v50 }
0x17de   :  { %6980 = vmatprep.mubr.msk.bf16.mxu1 %vm8211_vm0, %v8210_v0  ;;  %6979 = vmatpush3.bf16.msra.mxu1 %v2489_v63 }
0x17df   :  { %v2386_v58 = vpack.c.bf16 %v2384_v45, %v2384_v45  ;;  %6990 = vmatprep.subr.bf16.mxu1 %v8210_v0 }
0x17e1   :  { %6975 = vmatmul.mubr.msk.bf16.vlgmr.msra.gmra.mxu0 %vm682_vm4, %v2386_v58 }
0x17e2   :  { %6985 = vmatpush3.bf16.msra.mxu0 %v2536_v59  ;;  %6986 = vmatprep.mubr.msk.bf16.mxu0 %vm8211_vm0, %v8210_v0 }
0x17e3   :  { %6996 = vmatprep.subr.bf16.mxu0 %v8210_v0 }
0x17e9   :  { %6987 = vmatmul.mubr.msk.bf16.vlgmr.msra.gmra.mxu0 %vm682_vm4, %v2259_v9 }
0x17ea   :  { %6997 = vmatpush3.bf16.xpose.msra.mxu0 %v2637_v60  ;;  %6998 = vmatprep.mubr.msk.bf16.mxu0 %vm8211_vm0, %v8210_v0  ;;  %v472_v60 = vld [vmem:[#allocation10 + $0x30] sm:$0xff] }
0x17eb   :  { %7008 = vmatprep.subr.bf16.mxu0 %v8210_v0 }
0x17f1   :  { %6999 = vmatmul.mubr.msk.bf16.vlgmr.msra.gmra.mxu0 %vm682_vm4, %v2630_v61  ;;  %v2800_v61 = vpack.c.bf16 %v472_v60, %v472_v60 }
0x17f2   :  { %7010 = vmatprep.mubr.msk.bf16.mxu0 %vm8211_vm0, %v8210_v0 }
0x17f3   :  { %v2805_v62 = vsel %vm807_vm5, %v2800_v61, 0 }
0x189d   :  { %v2429_v1 = vpop.f32.mrf.mxu1 }
0x189f   :  { %v6970_v2 = vpop.f32.mrf.mxu1 }
0x18a1   :  { %v2432_v3 = vpop.f32.mrf.mxu1  ;;  %v2477_v4 = vpop.f32.mrf.mxu0 }
0x18a2   :  { %v2483_v5 = vpack.c.bf16 %v2477_v4, %v2429_v1 }
0x18a3   :  { %v6971_v38 = vpop.f32.mrf.mxu1  ;;  %v6976_v6 = vpop.f32.mrf.mxu0 }
0x18a4   :  { %6981 = vmatmul.mubr.msk.bf16.vlgmr.msra.gmra.mxu1 %vm682_vm4, %v2483_v5 }
0x18a5   :  { %6991 = vmatpush3.bf16.xpose.msra.mxu1 %v2587_v7  ;;  %v2480_v8 = vpop.f32.mrf.mxu0  ;;  %6992 = vmatprep.mubr.msk.bf16.mxu1 %vm8211_vm0, %v8210_v0 }
0x18a6   :  { %7002 = vmatprep.subr.bf16.mxu1 %v8210_v0 }
0x18a7   :  { %v6977_v32 = vpop.f32.mrf.mxu0 }
0x18a9   :  { %v8859_v9 = vpop.f32.mrf.mxu0 }
0x18ab   :  { %v6988_v13 = vpop.f32.mrf.mxu0 }
0x18ac   :  { %6993 = vmatmul.mubr.msk.bf16.vlgmr.msra.gmra.mxu1 %vm682_vm4, %v2580_v12 }
0x18ad   :  { %v8862_v14 = vpop.f32.mrf.mxu0  ;;  %7004 = vmatprep.mubr.msk.bf16.mxu1 %vm8211_vm0, %v8210_v0 }
0x18af   :  { %v6989_v15 = vpop.f32.mrf.mxu0 }
0x18b1   :  { %v2673_v16 = vpop.f32.mrf.mxu0 }
0x18b2   :  { %v2682_v20 = vsel %vm682_vm4, %v2673_v16, -inf }
0x18b3   :  { %2683 = vmax.xlane.f32.xlu1 %v2682_v20  ;;  %v7000_v23 = vpop.f32.mrf.mxu0 }
0x18b5   :  { %v2676_v24 = vpop.f32.mrf.mxu0 }
0x18b7   :  { %v7001_v27 = vpop.f32.mrf.mxu0 }
0x18c4   :  { %2703 = vrot.lane.b32.xlu1 %v8747_v18, %s8219_s26 }
0x18c8   :  { %2852 = vrot.lane.b32.xlu1 %v8747_v18, %s8220_s28 }
0x18cc   :  { %2902 = vrot.lane.b32.xlu1 %v8751_v25, %s8220_s28 }
0x18d0   :  { %2900 = vrot.lane.b32.xlu1 %v8765_v37, %s8221_s24 }
0x193c   :  { %v2684_v29 = vpop.xlane.xlu1 %2683 }
0x193d   :  { %v2686_v34 = vsub.f32 %v2673_v16, %v2684_v29 }
0x193f   :  { %v2689_v36 = vmul.f32 1.442695, %v2686_v34 }
0x1940   :  { %v2704_v31 = vpop.permute.xlu1 %2703 }
0x1941   :  { %v2709_v33 = vsel %vm807_vm5, %v2704_v31, 0  ;;  %7513 = vpow2.f32 %v2689_v36 }
0x1942   :  { %7003 = vmatpush3.bf16.msra.mxu1 %v2709_v33 }
0x1943   :  { %7014 = vmatprep.subr.bf16.mxu1 %v8210_v0 }
0x1944   :  { %v2853_v26 = vpop.permute.xlu1 %2852 }
0x1945   :  { %v2858_v58 = vsel %vm682_vm4, %v2853_v26, 0 }
0x1948   :  { %v2903_v4 = vpop.permute.xlu1 %2902 }
0x1949   :  { %v2908_v12 = vsel %vm682_vm4, %v2903_v4, 0 }
0x194c   :  { %v2901_v20 = vpop.permute.xlu1 %2900 }
0x194e   :  { %v7514_v37 = vpop.eup %7513 }
0x194f   :  { %v2694_v21 = vsel %vm682_vm4, %v7514_v37, 0.0 }
0x1964   :  { %v8877_v39 = vpop.f32.mrf.mxu1 }
0x1965   :  { %v2573_v33 = vadd.f32 %v8859_v9, %v8877_v39 }
0x1966   :  { %v6982_v41 = vpop.f32.mrf.mxu1 }
0x1968   :  { %v8879_v42 = vpop.f32.mrf.mxu1 }
0x196a   :  { %v6983_v43 = vpop.f32.mrf.mxu1 }
0x196b   :  { %v2576_v43 = vadd.f32 %v8862_v14, %v8879_v42 }
0x196c   :  { %v2623_v44 = vpop.f32.mrf.mxu1 }
0x196d   :  { %v2679_v46 = vsel %vm682_vm4, %v2623_v44, -inf }
0x196e   :  { %2680 = vmax.xlane.f32.xlu0 %v2679_v46  ;;  %v6994_v48 = vpop.f32.mrf.mxu1 }
0x1970   :  { %v2626_v17 = vpop.f32.mrf.mxu1 }
0x1972   :  { %v6995_v49 = vpop.f32.mrf.mxu1  ;;  %2695 = vadd.xlane.f32.xlu0 %v2694_v21 }
0x19f7   :  { %v2681_v50 = vpop.xlane.xlu0 %2680 }
0x19f8   :  { %v2685_v19 = vsub.f32 %v2623_v44, %v2681_v50 }
0x19fa   :  { %v2687_v22 = vmul.f32 1.442695, %v2685_v19 }
0x19fb   :  { %v2696_v52 = vpop.xlane.xlu0 %2695 }
0x19fc   :  { %7515 = vpow2.f32 %v2687_v22 }
0x19fd   :  { %7517 = vrcp.f32 %v2696_v52 }
0x1a09   :  { %v7516_v40 = vpop.eup %7515 }
0x1a0a   :  { %v2691_v51 = vsel %vm682_vm4, %v7516_v40, 0.0  ;;  %v7518_v53 = vpop.eup %7517 }
0x1a0b   :  { %2692 = vadd.xlane.f32.xlu0 %v2691_v51  ;;  %v2700_v55 = vmul.f32 %v7518_v53, %v7514_v37 }
0x1a0d   :  { %v2702_v45 = vpack.c.bf16 %v2700_v55, %v2700_v55 }
0x1a21   :  { %2751 = vrot.lane.b32.xlu0 %v8751_v25, %s8219_s26 }
0x1a25   :  { %2850 = vrot.lane.b32.xlu0 %v8758_v35, %s8221_s24 }
0x1a94   :  { %v2693_v54 = vpop.xlane.xlu0 %2692 }
0x1a95   :  { %7519 = vrcp.f32 %v2693_v54  ;;  %v473_v54 = vld [vmem:[#allocation10 + $0x38] sm:$0xff] }
0x1a96   :  { %v3071_v55 = vpack.c.bf16 %v473_v54, %v473_v54 }
0x1a98   :  { %v2752_v56 = vpop.permute.xlu0 %2751 }
0x1a99   :  { %v2757_v57 = vsel %vm807_vm5, %v2752_v56, 0  ;;  %v3076_v56 = vsel %vm807_vm5, %v3071_v55, 0 }
0x1a9a   :  { %7009 = vmatpush3.bf16.msra.mxu0 %v2757_v57 }
0x1a9b   :  { %7020 = vmatprep.subr.bf16.mxu0 %v8210_v0 }
0x1a9c   :  { %v2851_v30 = vpop.permute.xlu0 %2850 }
0x1a9d   :  { %7011 = vmatmul.mubr.msk.bf16.vlgmr.msra.gmra.mxu0 %vm682_vm4, %v2702_v45 }
0x1a9e   :  { %7021 = vmatpush3.bf16.xpose.msra.mxu0 %v2858_v58  ;;  %7022 = vmatprep.mubr.msk.bf16.mxu0 %vm8211_vm0, %v8210_v0 }
0x1a9f   :  { %7032 = vmatprep.subr.bf16.mxu0 %v8210_v0 }
0x1aa2   :  { %v7520_v35 = vpop.eup %7519 }
0x1aa3   :  { %v2699_v59 = vmul.f32 %v7520_v35, %v7516_v40 }
0x1aa5   :  { %7023 = vmatmul.mubr.msk.bf16.vlgmr.msra.gmra.mxu0 %vm682_vm4, %v2851_v30  ;;  %v2701_v47 = vpack.c.bf16 %v2699_v59, %v2699_v59 }
0x1aa6   :  { %7034 = vmatprep.mubr.msk.bf16.mxu0 %vm8211_vm0, %v8210_v0 }
0x1aa7   :  { %7005 = vmatmul.mubr.msk.bf16.vlgmr.msra.gmra.mxu1 %vm682_vm4, %v2701_v47 }
0x1aa8   :  { %7016 = vmatprep.mubr.msk.bf16.mxu1 %vm8211_vm0, %v8210_v0  ;;  %7015 = vmatpush3.bf16.msra.mxu1 %v2805_v62 }
0x1aa9   :  { %7026 = vmatprep.subr.bf16.mxu1 %v8210_v0 }
0x1b5d   :  { %v2793_v28 = vpop.f32.mrf.mxu0 }
0x1b5f   :  { %v7012_v63 = vpop.f32.mrf.mxu0 }
0x1b61   :  { %v2796_v1 = vpop.f32.mrf.mxu0 }
0x1b63   :  { %v7013_v2 = vpop.f32.mrf.mxu0 }
0x1b64   :  { %v6485_v2 = vld [vmem:[#allocation11 + $0x1] ss:$0 sm:$0xff] }
0x1b65   :  { %v2894_v3 = vpop.f32.mrf.mxu0 }
0x1b66   :  { %v2950_v5 = vsel %vm682_vm4, %v2894_v3, -inf }
0x1b67   :  { %v2745_v38 = vpop.f32.mrf.mxu1  ;;  %2951 = vmax.xlane.f32.xlu0 %v2950_v5  ;;  %v7024_v6 = vpop.f32.mrf.mxu0 }
0x1b68   :  { %v2799_v7 = vpack.c.bf16 %v2793_v28, %v2745_v38 }
0x1b69   :  { %v7006_v8 = vpop.f32.mrf.mxu1  ;;  %v2897_v32 = vpop.f32.mrf.mxu0 }
0x1b6a   :  { %7017 = vmatmul.mubr.msk.bf16.vlgmr.msra.gmra.mxu1 %vm682_vm4, %v2799_v7 }
0x1b6b   :  { %7027 = vmatpush3.bf16.xpose.msra.mxu1 %v2908_v12  ;;  %v2748_v13 = vpop.f32.mrf.mxu1  ;;  %v7025_v15 = vpop.f32.mrf.mxu0  ;;  %7028 = vmatprep.mubr.msk.bf16.mxu1 %vm8211_vm0, %v8210_v0 }
0x1b6c   :  { %7038 = vmatprep.subr.bf16.mxu1 %v8210_v0 }
0x1b6d   :  { %v7007_v16 = vpop.f32.mrf.mxu1 }
0x1b72   :  { %7029 = vmatmul.mubr.msk.bf16.vlgmr.msra.gmra.mxu1 %vm682_vm4, %v2901_v20 }
0x1b73   :  { %7040 = vmatprep.mubr.msk.bf16.mxu1 %vm8211_vm0, %v8210_v0 }
0x1bf0   :  { %v2952_v23 = vpop.xlane.xlu0 %2951 }
0x1bf1   :  { %v2956_v24 = vsub.f32 %v2894_v3, %v2952_v23 }
0x1bf3   :  { %v2958_v27 = vmul.f32 1.442695, %v2956_v24 }
0x1bf5   :  { %7521 = vpow2.f32 %v2958_v27 }
0x1c02   :  { %v7522_v29 = vpop.eup %7521 }
0x1c03   :  { %v2962_v31 = vsel %vm682_vm4, %v7522_v29, 0.0 }
0x1c04   :  { %2963 = vadd.xlane.f32.xlu0 %v2962_v31 }
0x1c2a   :  { %v2841_v34 = vpop.f32.mrf.mxu1 }
0x1c2b   :  { %v2848_v36 = vadd.f32 %v2841_v34, %v2573_v33 }
0x1c2c   :  { %v7018_v41 = vpop.f32.mrf.mxu1 }
0x1c2d   :  { %v486_v41 = vld [vmem:[#allocation16 + $0x30] sm:$0xff] }
0x1c2e   :  { %v2844_v44 = vpop.f32.mrf.mxu1 }
0x1c2f   :  { %v2849_v46 = vadd.f32 %v2844_v44, %v2576_v43  ;;  %v487_v43 = vld [vmem:[#allocation16 + $0x38] sm:$0xff]  ;;  %v484_v44 = vld [vmem:[#allocation16 + $0x20] sm:$0xff] }
0x1c30   :  { %v7019_v37 = vpop.f32.mrf.mxu1 }
0x1c32   :  { %v2944_v48 = vpop.f32.mrf.mxu1 }
0x1c33   :  { %v2953_v17 = vsel %vm682_vm4, %v2944_v48, -inf }
0x1c34   :  { %2954 = vmax.xlane.f32.xlu1 %v2953_v17  ;;  %v7030_v21 = vpop.f32.mrf.mxu1 }
0x1c36   :  { %v2947_v49 = vpop.f32.mrf.mxu1 }
0x1c38   :  { %v7031_v50 = vpop.f32.mrf.mxu1 }
0x1c45   :  { %2974 = vrot.lane.b32.xlu1 %v8747_v18, %s8222_s19 }
0x1c8d   :  { %v2964_v9 = vpop.xlane.xlu0 %2963 }
0x1c8e   :  { %7523 = vrcp.f32 %v2964_v9 }
0x1c9b   :  { %v7524_v39 = vpop.eup %7523 }
0x1c9c   :  { %v2970_v14 = vmul.f32 %v7524_v39, %v7522_v29 }
0x1c9e   :  { %v2972_v52 = vpack.c.bf16 %v2970_v14, %v2970_v14  ;;  %v506_v14 = vld [vmem:[#allocation28] sm:$0x3f] }
0x1cbd   :  { %v2955_v19 = vpop.xlane.xlu1 %2954 }
0x1cbe   :  { %v2957_v22 = vsub.f32 %v2944_v48, %v2955_v19 }
0x1cc0   :  { %v2960_v40 = vmul.f32 1.442695, %v2957_v22  ;;  %v6486_v22 = vld [vmem:[#allocation13 + $0x1] ss:$0 sm:$0xff] }
0x1cc1   :  { %v2975_v42 = vpop.permute.xlu1 %2974 }
0x1cc2   :  { %7525 = vpow2.f32 %v2960_v40  ;;  %v2980_v51 = vsel %vm807_vm5, %v2975_v42, 0 }
0x1cc3   :  { %7033 = vmatpush3.bf16.msra.mxu0 %v2980_v51 }
0x1cc4   :  { %7044 = vmatprep.subr.bf16.mxu0 %v8210_v0 }
0x1cc6   :  { %7035 = vmatmul.mubr.msk.bf16.vlgmr.msra.gmra.mxu0 %vm682_vm4, %v2972_v52  ;;  %v6487_v52 = vld [vmem:[#allocation14 + $0x1] ss:$0 sm:$0xff] }
0x1cc7   :  { %7046 = vmatprep.mubr.msk.bf16.mxu0 %vm8211_vm0, %v8210_v0  ;;  %7045 = vmatpush3.bf16.msra.mxu0 %v3076_v56 }
0x1cc8   :  { %7058 = vmatprep.subr.bf16.mxu0 %v8210_v0 }
0x1ccf   :  { %v7526_v18 = vpop.eup %7525 }
0x1cd0   :  { %v2965_v53 = vsel %vm682_vm4, %v7526_v18, 0.0 }
0x1cd1   :  { %2966 = vadd.xlane.f32.xlu0 %v2965_v53  ;;  %v3403_v53 = vpack.c.bf16 %v506_v14, %v506_v14 }
0x1ce7   :  { %3022 = vrot.lane.b32.xlu0 %v8751_v25, %s8222_s19 }
0x1d5a   :  { %v2967_v57 = vpop.xlane.xlu0 %2966 }
0x1d5b   :  { %7527 = vrcp.f32 %v2967_v57  ;;  %v3416_v57 = vsel %vm3414_vm6, %v3403_v53, 0 }
0x1d5e   :  { %v3023_v26 = vpop.permute.xlu0 %3022 }
0x1d5f   :  { %v3028_v45 = vsel %vm807_vm5, %v3023_v26, 0  ;;  %v3400_v26 = vld [vmem:[%s9534_s6] sm:$0xff] }
0x1d60   :  { %7039 = vmatpush3.bf16.msra.mxu1 %v3028_v45  ;;  %v3401_v45 = vld [vmem:[%s9534_s6 + $0x8] sm:$0xff] }
0x1d61   :  { %7050 = vmatprep.subr.bf16.mxu1 %v8210_v0 }
0x1d68   :  { %v7528_v58 = vpop.eup %7527 }
0x1d69   :  { %v2971_v35 = vmul.f32 %v7528_v58, %v7526_v18  ;;  %v3402_v58 = vpack.c.bf16 %v3401_v45, %v3400_v26 }
0x1d6b   :  { %v2973_v59 = vpack.c.bf16 %v2971_v35, %v2971_v35  ;;  %v496_v35 = vld [vmem:[#allocation19 + $0x30] sm:$0xff] }
0x1d6d   :  { %7041 = vmatmul.mubr.msk.bf16.vlgmr.msra.gmra.mxu1 %vm682_vm4, %v2973_v59  ;;  %v497_v59 = vld [vmem:[#allocation19 + $0x38] sm:$0xff] }
0x1d6e   :  { %7054 = vmatprep.mubr.msk.bf16.mxu1 %vm8211_vm0, %v8210_v0 }
0x1d86   :  { %v3016_v25 = vpop.f32.mrf.mxu0 }
0x1d88   :  { %v7036_v30 = vpop.f32.mrf.mxu0 }
0x1d89   :  { %v494_v30 = vld [vmem:[#allocation19 + $0x20] sm:$0xff] }
0x1d8a   :  { %v3019_v47 = vpop.f32.mrf.mxu0 }
0x1d8b   :  { %v495_v47 = vld [vmem:[#allocation19 + $0x28] sm:$0xff] }
0x1d8c   :  { %v7037_v60 = vpop.f32.mrf.mxu0 }
0x1d8d   :  { %v3245_v60 = vpack.c.bf16 %v495_v47, %v494_v30 }
0x1e2d   :  { %v3064_v61 = vpop.f32.mrf.mxu1 }
0x1e2e   :  { %v3070_v62 = vpack.c.bf16 %v3064_v61, %v3016_v25  ;;  %v3246_v25 = vpack.c.bf16 %v497_v59, %v496_v35  ;;  %v6488_v61 = vld [vmem:[#allocation17 + $0x1] ss:$0 sm:$0xff] }
0x1e2f   :  { %v7042_v28 = vpop.f32.mrf.mxu1 }
0x1e30   :  { %7047 = vmatmul.mubr.msk.bf16.vlgmr.msra.gmra.mxu0 %vm682_vm4, %v3070_v62 }
0x1e31   :  { %v3067_v63 = vpop.f32.mrf.mxu1  ;;  %7062 = vmatprep.mubr.msk.bf16.mxu0 %vm8211_vm0, %v8210_v0  ;;  %7059 = vmatpush3.bf16.msra.mxu0 %v3246_v25 }
0x1e32   :  { %7060 = vmatprep.subr.bf16.mxu0 %v8210_v0 }
0x1e33   :  { %v7043_v1 = vpop.f32.mrf.mxu1 }
0x1e35   :  { %7061 = vmatpush3.bf16.msra.mxu0 %v3245_v60 }
0x1e36   :  { %7072 = vmatprep.subr.bf16.mxu0 %v8210_v0 }
0x1ef0   :  { %v3112_v3 = vpop.f32.mrf.mxu0 }
0x1ef1   :  { %v3119_v4 = vadd.f32 %v3112_v3, %v2848_v36 }
0x1ef2   :  { %v7048_v5 = vpop.f32.mrf.mxu0 }
0x1ef3   :  { %v3127_v38 = vadd.f32 %v6485_v2, %v3119_v4 }
0x1ef4   :  { %v3115_v6 = vpop.f32.mrf.mxu0 }
0x1ef5   :  { %v3120_v7 = vadd.f32 %v3115_v6, %v2849_v46  ;;  %v3129_v8 = vadd.f32 %v3127_v38, %v8738_v10  ;;  %v485_v46 = vld [vmem:[#allocation16 + $0x28] sm:$0xff] }
0x1ef6   :  { %v7049_v32 = vpop.f32.mrf.mxu0  ;;  %v3174_v37 = vpack.c.bf16 %v485_v46, %v484_v44 }
0x1ef7   :  { %v3128_v12 = vadd.f32 %v6485_v2, %v3120_v7  ;;  %v3131_v13 = vsel %vm628_vm3, %v3129_v8, 0.0 }
0x1ef8   :  { %3132 = vadd.xlane.f32.xlu1 %v3131_v13 }
0x1ef9   :  { %v3130_v15 = vadd.f32 %v3128_v12, %v8740_v11  ;;  %v3175_v11 = vpack.c.bf16 %v487_v43, %v486_v41  ;;  %v511_v41 = vld [vmem:[%s9535_s5 + $0x18] sm:$0xff] }
0x1efa   :  { %v6496_v43 = vld [vmem:[#allocation29] ss:$0 sm:$0xff] }
0x1efb   :  { %v3134_v16 = vsel %vm628_vm3, %v3130_v15, 0.0  ;;  %7051 = vmatpush3.bf16.msra.mxu1 %v3175_v11 }
0x1efc   :  { %3135 = vadd.xlane.f32.xlu0 %v3134_v16  ;;  %7052 = vmatprep.subr.bf16.mxu1 %v8210_v0 }
0x1eff   :  { %7053 = vmatpush3.bf16.msra.mxu1 %v3174_v37 }
0x1f00   :  { %7066 = vmatprep.subr.bf16.mxu1 %v8210_v0 }
0x1f81   :  { %v3133_v20 = vpop.xlane.xlu1 %3132 }
0x1f82   :  { %v3137_v23 = vmul.f32 0.03125, %v3133_v20 }
0x1f84   :  { %v3139_v24 = vsub.f32 %v3129_v8, %v3137_v23 }
0x1f85   :  { %v3136_v27 = vpop.xlane.xlu0 %3135 }
0x1f86   :  { %v3138_v29 = vmul.f32 0.03125, %v3136_v27  ;;  %v3141_v31 = vmul.f32 %v3139_v24, %v3139_v24 }
0x1f88   :  { %v3140_v33 = vsub.f32 %v3130_v15, %v3138_v29  ;;  %v3143_v34 = vsel %vm628_vm3, %v3141_v31, 0.0 }
0x1f89   :  { %3144 = vadd.xlane.f32.xlu1 %v3143_v34 }
0x1f8a   :  { %v3142_v10 = vmul.f32 %v3140_v33, %v3140_v33 }
0x1f8c   :  { %v3146_v36 = vsel %vm628_vm3, %v3142_v10, 0.0 }
0x1f8d   :  { %3147 = vadd.xlane.f32.xlu0 %v3146_v36  ;;  %v510_v36 = vld [vmem:[%s9535_s5 + $0x10] sm:$0xff] }
0x1f8e   :  { %v3463_v46 = vpack.c.bf16 %v511_v41, %v510_v36 }
0x2012   :  { %v3145_v48 = vpop.xlane.xlu1 %3144 }
0x2013   :  { %v3149_v17 = vmul.f32 0.03125, %v3145_v48 }
0x2015   :  { %v3151_v21 = vadd.f32 1e-05, %v3149_v17 }
0x2016   :  { %v3148_v49 = vpop.xlane.xlu0 %3147 }
0x2017   :  { %7529 = vrsqrt.f32 %v3151_v21  ;;  %v3150_v50 = vmul.f32 0.03125, %v3148_v49  ;;  %v508_v21 = vld [vmem:[%s9535_s5] sm:$0xff]  ;;  %v509_v49 = vld [vmem:[%s9535_s5 + $0x8] sm:$0xff] }
0x2019   :  { %v3152_v9 = vadd.f32 1e-05, %v3150_v50  ;;  %v3462_v50 = vpack.c.bf16 %v509_v49, %v508_v21 }
0x201b   :  { %7531 = vrsqrt.f32 %v3152_v9 }
0x2024   :  { %v7530_v39 = vpop.eup %7529 }
0x2025   :  { %v3155_v19 = vmul.f32 %v7530_v39, %v3139_v24 }
0x2027   :  { %v3163_v51 = vmul.f32 %v6486_v22, %v3155_v19 }
0x2028   :  { %v7532_v40 = vpop.eup %7531 }
0x2029   :  { %v3156_v42 = vmul.f32 %v7532_v40, %v3140_v33  ;;  %v8946_v54 = vadd.f32 %v6487_v52, %v3163_v51  ;;  %v6498_v51 = vld [vmem:[#allocation31] ss:$0 sm:$0xff] }
0x202b   :  { %v3164_v18 = vmul.f32 %v6486_v22, %v3156_v42 }
0x202d   :  { %v8948_v55 = vadd.f32 %v6487_v52, %v3164_v18 }
0x202f   :  { %v3173_v56 = vpack.c.bf16 %v8948_v55, %v8946_v54 }
0x2031   :  { %7055 = vmatmul.mubr.msk.bf16.vlgmr.msra.gmra.mxu1 %vm628_vm3, %v3173_v56 }
0x2032   :  { %7067 = vmatpush3.bf16.msra.mxu1 %v3416_v57  ;;  %7068 = vmatprep.mubr.msk.bf16.mxu1 %vm8211_vm0, %v8210_v0 }
0x2033   :  { %7080 = vmatprep.subr.bf16.mxu1 %v8210_v0 }
0x2039   :  { %7069 = vmatmul.mubr.msk.bf16.vlgmr.msra.gmra.mxu1 %vm3410_vm7, %v3402_v58 }
0x203a   :  { %7082 = vmatprep.mubr.msk.bf16.mxu1 %vm8211_vm0, %v8210_v0 }
0x20f1   :  { %v3219_v62 = vpop.f32.mrf.mxu1 }
0x20f2   :  { %v3220_v28 = vadd.f32 %v6488_v61, %v3219_v62 }
0x20f3   :  { %v7056_v63 = vpop.f32.mrf.mxu1 }
0x20f4   :  { %v3228_v1 = vmul.f32 0.044715, %v3220_v28  ;;  %v3226_v33 = vmul.f32 0.5, %v3220_v28 }
0x20f5   :  { %v3222_v2 = vpop.f32.mrf.mxu1 }
0x20f6   :  { %v3230_v3 = vmul.f32 %v3228_v1, %v3220_v28  ;;  %v3223_v4 = vadd.f32 %v6488_v61, %v3222_v2 }
0x20f7   :  { %v7057_v5 = vpop.f32.mrf.mxu1 }
0x20f8   :  { %v3232_v38 = vmul.f32 %v3230_v3, %v3220_v28  ;;  %v3229_v6 = vmul.f32 0.044715, %v3223_v4  ;;  %v3227_v34 = vmul.f32 0.5, %v3223_v4 }
0x20f9   :  { %v3452_v7 = vpop.f32.mrf.mxu1 }
0x20fa   :  { %v3234_v8 = vadd.f32 %v3232_v38, %v3220_v28  ;;  %v3231_v32 = vmul.f32 %v3229_v6, %v3223_v4  ;;  %v8964_v37 = vadd.f32 %v6496_v43, %v3452_v7 }
0x20fb   :  { %v7070_v12 = vpop.f32.mrf.mxu1 }
0x20fc   :  { %v3236_v13 = vmul.f32 0.7978846, %v3234_v8  ;;  %v3233_v15 = vmul.f32 %v3231_v32, %v3223_v4  ;;  %v3459_v9 = vmax.f32 %v8964_v37, 0.0 }
0x20fd   :  { %v3455_v16 = vpop.f32.mrf.mxu1 }
0x20fe   :  { %7533 = vtanh.f32 %v3236_v13  ;;  %v3235_v20 = vadd.f32 %v3233_v15, %v3223_v4  ;;  %v8966_v48 = vadd.f32 %v6496_v43, %v3455_v16 }
0x20ff   :  { %v7071_v23 = vpop.f32.mrf.mxu1 }
0x2100   :  { %v3237_v24 = vmul.f32 0.7978846, %v3235_v20  ;;  %v3460_v39 = vmax.f32 %v8966_v48, 0.0  ;;  %v535_v48 = vld [vmem:[#allocation35 + $0x18] sm:$0xff] }
0x2102   :  { %7535 = vtanh.f32 %v3237_v24  ;;  %v3461_v19 = vpack.c.bf16 %v3460_v39, %v3459_v9 }
0x210b   :  { %v7534_v27 = vpop.eup %7533 }
0x210c   :  { %v3240_v29 = vadd.f32 1.0, %v7534_v27 }
0x210e   :  { %v3242_v11 = vmul.f32 %v3240_v29, %v3226_v33 }
0x210f   :  { %v7536_v31 = vpop.eup %7535 }
0x2110   :  { %v3241_v10 = vadd.f32 1.0, %v7536_v31 }
0x2112   :  { %v3243_v44 = vmul.f32 %v3241_v10, %v3227_v34 }
0x2114   :  { %v3244_v17 = vpack.c.bf16 %v3243_v44, %v3242_v11 }
0x2116   :  { %7063 = vmatmul.mubr.msk.bf16.vlgmr.msra.gmra.mxu0 %vm628_vm3, %v3244_v17 }
0x2117   :  { %7073 = vmatpush3.bf16.msra.mxu0 %v3463_v46  ;;  %7076 = vmatprep.mubr.msk.bf16.mxu0 %vm8211_vm0, %v8210_v0 }
0x2118   :  { %7074 = vmatprep.subr.bf16.mxu0 %v8210_v0 }
0x211b   :  { %7075 = vmatpush3.bf16.msra.mxu0 %v3462_v50 }
0x211c   :  { %7086 = vmatprep.subr.bf16.mxu0 %v8210_v0 }
0x211e   :  { %7077 = vmatmul.mubr.msk.bf16.vlgmr.msra.gmra.mxu0 %vm628_vm3, %v3461_v19 }
0x211f   :  { %7088 = vmatprep.mubr.msk.bf16.mxu0 %vm8211_vm0, %v8210_v0 }
0x21d6   :  { %v8984_v22 = vpop.f32.mrf.mxu0 }
0x21d8   :  { %v7064_v40 = vpop.f32.mrf.mxu0 }
0x21da   :  { %v8986_v14 = vpop.f32.mrf.mxu0 }
0x21dc   :  { %v7065_v42 = vpop.f32.mrf.mxu0 }
0x21de   :  { %v3507_v52 = vpop.f32.mrf.mxu0 }
0x21df   :  { %v3508_v18 = vadd.f32 %v6498_v51, %v3507_v52 }
0x21e0   :  { %v7078_v53 = vpop.f32.mrf.mxu0 }
0x21e1   :  { %v8988_v56 = vpack.c.bf16 %v3508_v18, %v3508_v18  ;;  %v3514_v25 = vmul.f32 0.35355338, %v3508_v18 }
0x21e2   :  { %v3510_v57 = vpop.f32.mrf.mxu0 }
0x21e3   :  { %v3511_v26 = vadd.f32 %v6498_v51, %v3510_v57  ;;  %3521 = vrot.lane.b32.xlu1 %v8988_v56, %s8212_s11  ;;  %v8999_v60 = vpack.c.bf16 %v3514_v25, %v3514_v25 }
0x21e4   :  { %v7079_v45 = vpop.f32.mrf.mxu0 }
0x21e5   :  { %v8992_v58 = vpack.c.bf16 %v3511_v26, %v3511_v26  ;;  %v3515_v61 = vmul.f32 0.35355338, %v3511_v26 }
0x21e7   :  { %3570 = vrot.lane.b32.xlu0 %v8992_v58, %s8212_s11  ;;  %v9006_v62 = vpack.c.bf16 %v3515_v61, %v3515_v61 }
0x2255   :  { %v3522_v35 = vpop.permute.xlu1 %3521 }
0x2256   :  { %v3527_v59 = vsel %vm682_vm4, %v3522_v35, 0 }
0x2257   :  { %7081 = vmatpush3.bf16.xpose.msra.mxu1 %v3527_v59 }
0x2258   :  { %7092 = vmatprep.subr.bf16.mxu1 %v8210_v0 }
0x2259   :  { %v3571_v30 = vpop.permute.xlu0 %3570 }
0x225a   :  { %v3576_v47 = vsel %vm682_vm4, %v3571_v30, 0 }
0x225b   :  { %7087 = vmatpush3.bf16.xpose.msra.mxu0 %v3576_v47 }
0x225c   :  { %7098 = vmatprep.subr.bf16.mxu0 %v8210_v0 }
0x225e   :  { %7083 = vmatmul.mubr.msk.bf16.vlgmr.msra.gmra.mxu1 %vm682_vm4, %v8999_v60 }
0x225f   :  { %7094 = vmatprep.mubr.msk.bf16.mxu1 %vm8211_vm0, %v8210_v0 }
0x2262   :  { %7089 = vmatmul.mubr.msk.bf16.vlgmr.msra.gmra.mxu0 %vm682_vm4, %v9006_v62 }
0x2263   :  { %7100 = vmatprep.mubr.msk.bf16.mxu0 %vm8211_vm0, %v8210_v0 }
0x231e   :  { %v3563_v28 = vpop.f32.mrf.mxu1 }
0x231f   :  { %v3618_v63 = vsel %vm682_vm4, %v3563_v28, -inf }
0x2320   :  { %3619 = vmax.xlane.f32.xlu1 %v3618_v63  ;;  %v7084_v1 = vpop.f32.mrf.mxu1 }
0x2322   :  { %v3566_v2 = vpop.f32.mrf.mxu1  ;;  %v3612_v3 = vpop.f32.mrf.mxu0 }
0x2323   :  { %v3621_v4 = vsel %vm682_vm4, %v3612_v3, -inf }
0x2324   :  { %v7085_v5 = vpop.f32.mrf.mxu1  ;;  %3622 = vmax.xlane.f32.xlu0 %v3621_v4  ;;  %v7090_v38 = vpop.f32.mrf.mxu0 }
0x2326   :  { %v3615_v6 = vpop.f32.mrf.mxu0 }
0x2328   :  { %v7091_v7 = vpop.f32.mrf.mxu0 }
0x2331   :  { %3642 = vrot.lane.b32.xlu1 %v8988_v56, %s8213_s16 }
0x23a9   :  { %v3620_v8 = vpop.xlane.xlu1 %3619 }
0x23aa   :  { %v3624_v32 = vsub.f32 %v3563_v28, %v3620_v8 }
0x23ac   :  { %v3626_v12 = vmul.f32 1.442695, %v3624_v32 }
0x23ad   :  { %v3643_v13 = vpop.permute.xlu1 %3642  ;;  %v3623_v15 = vpop.xlane.xlu0 %3622 }
0x23ae   :  { %7537 = vpow2.f32 %v3626_v12  ;;  %v3648_v16 = vsel %vm807_vm5, %v3643_v13, 0  ;;  %v3625_v20 = vsub.f32 %v3612_v3, %v3623_v15 }
0x23af   :  { %7093 = vmatpush3.bf16.msra.mxu1 %v3648_v16 }
0x23b0   :  { %v3628_v23 = vmul.f32 1.442695, %v3625_v20  ;;  %7104 = vmatprep.subr.bf16.mxu1 %v8210_v0 }
0x23b2   :  { %7539 = vpow2.f32 %v3628_v23 }
0x23bb   :  { %v7538_v24 = vpop.eup %7537 }
0x23bc   :  { %v3630_v27 = vsel %vm682_vm4, %v7538_v24, 0.0 }
0x23bd   :  { %3631 = vadd.xlane.f32.xlu1 %v3630_v27 }
0x23bf   :  { %v7540_v29 = vpop.eup %7539 }
0x23c0   :  { %v3633_v31 = vsel %vm682_vm4, %v7540_v29, 0.0 }
0x23c1   :  { %3634 = vadd.xlane.f32.xlu0 %v3633_v31 }
0x23ce   :  { %3743 = vrot.lane.b32.xlu1 %v8988_v56, %s8214_s18 }
0x23d2   :  { %3794 = vrot.lane.b32.xlu1 %v8992_v58, %s8214_s18 }
0x23d6   :  { %3792 = vrot.lane.b32.xlu1 %v9006_v62, %s8215_s22 }
0x23d7   :  { %3690 = vrot.lane.b32.xlu0 %v8992_v58, %s8213_s16 }
0x23db   :  { %3741 = vrot.lane.b32.xlu0 %v8999_v60, %s8215_s22 }
0x2446   :  { %v3632_v33 = vpop.xlane.xlu1 %3631 }
0x2447   :  { %7541 = vrcp.f32 %v3632_v33 }
0x244a   :  { %v3635_v34 = vpop.xlane.xlu0 %3634  ;;  %v3744_v43 = vpop.permute.xlu1 %3743 }
0x244b   :  { %7543 = vrcp.f32 %v3635_v34  ;;  %v3749_v17 = vsel %vm682_vm4, %v3744_v43, 0  ;;  %v518_v34 = vld [vmem:[#allocation32] sm:$0xff] }
0x244e   :  { %v3691_v10 = vpop.permute.xlu0 %3690  ;;  %v3795_v49 = vpop.permute.xlu1 %3794 }
0x244f   :  { %v3696_v36 = vsel %vm807_vm5, %v3691_v10, 0  ;;  %v3800_v19 = vsel %vm682_vm4, %v3795_v49, 0 }
0x2450   :  { %7099 = vmatpush3.bf16.msra.mxu0 %v3696_v36 }
0x2451   :  { %7110 = vmatprep.subr.bf16.mxu0 %v8210_v0 }
0x2452   :  { %v3742_v40 = vpop.permute.xlu0 %3741  ;;  %v3793_v42 = vpop.permute.xlu1 %3792 }
0x2454   :  { %v7542_v41 = vpop.eup %7541 }
0x2455   :  { %v3638_v11 = vmul.f32 %v7542_v41, %v7538_v24  ;;  %v3739_v41 = vpack.c.bf16 %v518_v34, %v518_v34 }
0x2457   :  { %v3640_v44 = vpack.c.bf16 %v3638_v11, %v3638_v11 }
0x2458   :  { %v7544_v46 = vpop.eup %7543 }
0x2459   :  { %7095 = vmatmul.mubr.msk.bf16.vlgmr.msra.gmra.mxu1 %vm682_vm4, %v3640_v44  ;;  %v3639_v21 = vmul.f32 %v7544_v46, %v7540_v29  ;;  %v4015_v46 = vsel %vm807_vm5, %v3739_v41, 0 }
0x245a   :  { %7105 = vmatpush3.bf16.xpose.msra.mxu1 %v3749_v17  ;;  %7106 = vmatprep.mubr.msk.bf16.mxu1 %vm8211_vm0, %v8210_v0 }
0x245b   :  { %v3641_v50 = vpack.c.bf16 %v3639_v21, %v3639_v21  ;;  %7116 = vmatprep.subr.bf16.mxu1 %v8210_v0 }
0x245d   :  { %7101 = vmatmul.mubr.msk.bf16.vlgmr.msra.gmra.mxu0 %vm682_vm4, %v3641_v50 }
0x245e   :  { %7111 = vmatpush3.bf16.xpose.msra.mxu0 %v3800_v19  ;;  %7112 = vmatprep.mubr.msk.bf16.mxu0 %vm8211_vm0, %v8210_v0  ;;  %v519_v19 = vld [vmem:[#allocation32 + $0x8] sm:$0xff] }
0x245f   :  { %7122 = vmatprep.subr.bf16.mxu0 %v8210_v0 }
0x2461   :  { %7107 = vmatmul.mubr.msk.bf16.vlgmr.msra.gmra.mxu1 %vm682_vm4, %v3742_v40  ;;  %v3963_v40 = vpack.c.bf16 %v519_v19, %v519_v19 }
0x2462   :  { %7118 = vmatprep.mubr.msk.bf16.mxu1 %vm8211_vm0, %v8210_v0 }
0x2465   :  { %7113 = vmatmul.mubr.msk.bf16.vlgmr.msra.gmra.mxu0 %vm682_vm4, %v3793_v42  ;;  %v3968_v42 = vsel %vm807_vm5, %v3963_v40, 0 }
0x2466   :  { %7124 = vmatprep.mubr.msk.bf16.mxu0 %vm8211_vm0, %v8210_v0 }
0x2519   :  { %v9048_v51 = vpop.f32.mrf.mxu1 }
0x251b   :  { %v7096_v52 = vpop.f32.mrf.mxu1 }
0x251d   :  { %v3687_v18 = vpop.f32.mrf.mxu1  ;;  %v9050_v53 = vpop.f32.mrf.mxu0 }
0x251e   :  { %v3738_v57 = vpack.c.bf16 %v9050_v53, %v9048_v51 }
0x251f   :  { %v7097_v26 = vpop.f32.mrf.mxu1  ;;  %v7102_v45 = vpop.f32.mrf.mxu0 }
0x2521   :  { %v3735_v35 = vpop.f32.mrf.mxu0  ;;  %v3785_v59 = vpop.f32.mrf.mxu1 }
0x2522   :  { %v3842_v25 = vsel %vm682_vm4, %v3785_v59, -inf }
0x2523   :  { %3843 = vmax.xlane.f32.xlu0 %v3842_v25  ;;  %v7103_v30 = vpop.f32.mrf.mxu0  ;;  %v7108_v47 = vpop.f32.mrf.mxu1 }
0x2525   :  { %v3788_v61 = vpop.f32.mrf.mxu1  ;;  %v3836_v28 = vpop.f32.mrf.mxu0 }
0x2526   :  { %v3845_v63 = vsel %vm682_vm4, %v3836_v28, -inf }
0x2527   :  { %v7109_v1 = vpop.f32.mrf.mxu1  ;;  %3846 = vmax.xlane.f32.xlu1 %v3845_v63  ;;  %v7114_v2 = vpop.f32.mrf.mxu0 }
0x2529   :  { %v3839_v3 = vpop.f32.mrf.mxu0 }
0x252b   :  { %v7115_v4 = vpop.f32.mrf.mxu0 }
0x2538   :  { %3866 = vrot.lane.b32.xlu1 %v8988_v56, %s8216_s21 }
0x253c   :  { %4060 = vrot.lane.b32.xlu1 %v8988_v56, %s8218_s23 }
0x2540   :  { %4110 = vrot.lane.b32.xlu1 %v8992_v58, %s8218_s23 }
0x2544   :  { %4108 = vrot.lane.b32.xlu1 %v9006_v62, %s8217_s9 }
0x25ac   :  { %v3844_v5 = vpop.xlane.xlu0 %3843 }
0x25ad   :  { %v3848_v38 = vsub.f32 %v3785_v59, %v3844_v5 }
0x25af   :  { %v3850_v6 = vmul.f32 1.442695, %v3848_v38 }
0x25b0   :  { %v3847_v7 = vpop.xlane.xlu1 %3846 }
0x25b1   :  { %7545 = vpow2.f32 %v3850_v6  ;;  %v3849_v8 = vsub.f32 %v3836_v28, %v3847_v7 }
0x25b3   :  { %v3852_v32 = vmul.f32 1.442695, %v3849_v8 }
0x25b4   :  { %v3867_v12 = vpop.permute.xlu1 %3866 }
0x25b5   :  { %7547 = vpow2.f32 %v3852_v32  ;;  %v3872_v13 = vsel %vm807_vm5, %v3867_v12, 0 }
0x25b6   :  { %7117 = vmatpush3.bf16.msra.mxu1 %v3872_v13 }
0x25b7   :  { %7128 = vmatprep.subr.bf16.mxu1 %v8210_v0 }
0x25b8   :  { %v4061_v17 = vpop.permute.xlu1 %4060 }
0x25b9   :  { %v4066_v35 = vsel %vm682_vm4, %v4061_v17, 0 }
0x25bc   :  { %v4111_v21 = vpop.permute.xlu1 %4110 }
0x25bd   :  { %v4116_v49 = vsel %vm682_vm4, %v4111_v21, 0 }
0x25be   :  { %v7546_v15 = vpop.eup %7545 }
0x25bf   :  { %v3854_v16 = vsel %vm682_vm4, %v7546_v15, 0.0 }
0x25c0   :  { %3855 = vadd.xlane.f32.xlu0 %v3854_v16  ;;  %v4109_v50 = vpop.permute.xlu1 %4108 }
0x25c2   :  { %v7548_v20 = vpop.eup %7547 }
0x25c3   :  { %v3857_v23 = vsel %vm682_vm4, %v7548_v20, 0.0 }
0x25c4   :  { %3858 = vadd.xlane.f32.xlu0 %v3857_v23 }
0x25da   :  { %3914 = vrot.lane.b32.xlu0 %v8992_v58, %s8216_s21 }
0x25de   :  { %4058 = vrot.lane.b32.xlu0 %v8999_v60, %s8217_s9 }
0x2649   :  { %v3856_v24 = vpop.xlane.xlu0 %3855 }
0x264a   :  { %7549 = vrcp.f32 %v3856_v24 }
0x264d   :  { %v3859_v27 = vpop.xlane.xlu0 %3858 }
0x264e   :  { %7551 = vrcp.f32 %v3859_v27 }
0x2651   :  { %v3915_v29 = vpop.permute.xlu0 %3914 }
0x2652   :  { %v3920_v31 = vsel %vm807_vm5, %v3915_v29, 0 }
0x2653   :  { %7123 = vmatpush3.bf16.msra.mxu0 %v3920_v31 }
0x2654   :  { %7134 = vmatprep.subr.bf16.mxu0 %v8210_v0 }
0x2655   :  { %v4059_v47 = vpop.permute.xlu0 %4058 }
0x2657   :  { %v7550_v33 = vpop.eup %7549 }
0x2658   :  { %v3862_v10 = vmul.f32 %v7550_v33, %v7546_v15 }
0x265a   :  { %v3864_v36 = vpack.c.bf16 %v3862_v10, %v3862_v10 }
0x265b   :  { %v7552_v43 = vpop.eup %7551 }
0x265c   :  { %v3863_v11 = vmul.f32 %v7552_v43, %v7548_v20  ;;  %7119 = vmatmul.mubr.msk.bf16.vlgmr.msra.gmra.mxu1 %vm682_vm4, %v3864_v36 }
0x265d   :  { %7130 = vmatprep.mubr.msk.bf16.mxu1 %vm8211_vm0, %v8210_v0  ;;  %7129 = vmatpush3.bf16.msra.mxu1 %v3968_v42 }
0x265e   :  { %v3865_v44 = vpack.c.bf16 %v3863_v11, %v3863_v11  ;;  %7140 = vmatprep.subr.bf16.mxu1 %v8210_v0 }
0x2660   :  { %7125 = vmatmul.mubr.msk.bf16.vlgmr.msra.gmra.mxu0 %vm682_vm4, %v3865_v44 }
0x2661   :  { %7135 = vmatpush3.bf16.msra.mxu0 %v4015_v46  ;;  %7136 = vmatprep.mubr.msk.bf16.mxu0 %vm8211_vm0, %v8210_v0 }
0x2662   :  { %7146 = vmatprep.subr.bf16.mxu0 %v8210_v0 }
0x2668   :  { %7137 = vmatmul.mubr.msk.bf16.vlgmr.msra.gmra.mxu0 %vm682_vm4, %v3738_v57 }
0x2669   :  { %7147 = vmatpush3.bf16.xpose.msra.mxu0 %v4116_v49  ;;  %7148 = vmatprep.mubr.msk.bf16.mxu0 %vm8211_vm0, %v8210_v0 }
0x266a   :  { %7158 = vmatprep.subr.bf16.mxu0 %v8210_v0 }
0x2670   :  { %7149 = vmatmul.mubr.msk.bf16.vlgmr.msra.gmra.mxu0 %vm682_vm4, %v4109_v50 }
0x2671   :  { %7160 = vmatprep.mubr.msk.bf16.mxu0 %vm8211_vm0, %v8210_v0 }
0x271c   :  { %v3908_v51 = vpop.f32.mrf.mxu1 }
0x271e   :  { %v7120_v52 = vpop.f32.mrf.mxu1 }
0x271f   :  { %v520_v52 = vld [vmem:[#allocation32 + $0x10] sm:$0xff] }
0x2720   :  { %v3911_v18 = vpop.f32.mrf.mxu1  ;;  %v3956_v53 = vpop.f32.mrf.mxu0 }
0x2721   :  { %v3962_v57 = vpack.c.bf16 %v3956_v53, %v3908_v51  ;;  %v4279_v18 = vpack.c.bf16 %v520_v52, %v520_v52 }
0x2722   :  { %v7121_v26 = vpop.f32.mrf.mxu1  ;;  %v7126_v45 = vpop.f32.mrf.mxu0 }
0x2723   :  { %7131 = vmatmul.mubr.msk.bf16.vlgmr.msra.gmra.mxu1 %vm682_vm4, %v3962_v57  ;;  %v4284_v53 = vsel %vm807_vm5, %v4279_v18, 0 }
0x2724   :  { %7141 = vmatpush3.bf16.xpose.msra.mxu1 %v4066_v35  ;;  %v3959_v59 = vpop.f32.mrf.mxu0  ;;  %7142 = vmatprep.mubr.msk.bf16.mxu1 %vm8211_vm0, %v8210_v0 }
0x2725   :  { %7152 = vmatprep.subr.bf16.mxu1 %v8210_v0 }
0x2726   :  { %v7127_v25 = vpop.f32.mrf.mxu0 }
0x2728   :  { %v9100_v30 = vpop.f32.mrf.mxu0 }
0x272a   :  { %v7138_v61 = vpop.f32.mrf.mxu0 }
0x272b   :  { %7143 = vmatmul.mubr.msk.bf16.vlgmr.msra.gmra.mxu1 %vm682_vm4, %v4059_v47 }
0x272c   :  { %v9103_v28 = vpop.f32.mrf.mxu0  ;;  %7154 = vmatprep.mubr.msk.bf16.mxu1 %vm8211_vm0, %v8210_v0 }
0x272e   :  { %v7139_v63 = vpop.f32.mrf.mxu0 }
0x2730   :  { %v4152_v1 = vpop.f32.mrf.mxu0 }
0x2731   :  { %v4161_v2 = vsel %vm682_vm4, %v4152_v1, -inf }
0x2732   :  { %4162 = vmax.xlane.f32.xlu1 %v4161_v2  ;;  %v7150_v3 = vpop.f32.mrf.mxu0 }
0x2734   :  { %v4155_v4 = vpop.f32.mrf.mxu0 }
0x2736   :  { %v7151_v5 = vpop.f32.mrf.mxu0 }
0x2743   :  { %4182 = vrot.lane.b32.xlu1 %v8988_v56, %s8219_s26 }
0x2747   :  { %4331 = vrot.lane.b32.xlu1 %v8988_v56, %s8220_s28 }
0x274b   :  { %4381 = vrot.lane.b32.xlu1 %v8992_v58, %s8220_s28 }
0x274f   :  { %4379 = vrot.lane.b32.xlu1 %v9006_v62, %s8221_s24 }
0x27bb   :  { %v4163_v38 = vpop.xlane.xlu1 %4162 }
0x27bc   :  { %v4165_v8 = vsub.f32 %v4152_v1, %v4163_v38 }
0x27be   :  { %v4168_v32 = vmul.f32 1.442695, %v4165_v8 }
0x27bf   :  { %v4183_v6 = vpop.permute.xlu1 %4182 }
0x27c0   :  { %v4188_v7 = vsel %vm807_vm5, %v4183_v6, 0  ;;  %7553 = vpow2.f32 %v4168_v32 }
0x27c1   :  { %7153 = vmatpush3.bf16.msra.mxu1 %v4188_v7 }
0x27c2   :  { %7164 = vmatprep.subr.bf16.mxu1 %v8210_v0 }
0x27c3   :  { %v4332_v49 = vpop.permute.xlu1 %4331 }
0x27c4   :  { %v4337_v19 = vsel %vm682_vm4, %v4332_v49, 0 }
0x27c7   :  { %v4382_v25 = vpop.permute.xlu1 %4381 }
0x27c8   :  { %v4387_v4 = vsel %vm682_vm4, %v4382_v25, 0 }
0x27cb   :  { %v4380_v7 = vpop.permute.xlu1 %4379 }
0x27cd   :  { %v7554_v62 = vpop.eup %7553 }
0x27ce   :  { %v4173_v29 = vsel %vm682_vm4, %v7554_v62, 0.0 }
0x27e3   :  { %v9118_v12 = vpop.f32.mrf.mxu1 }
0x27e5   :  { %v7132_v13 = vpop.f32.mrf.mxu1 }
0x27e7   :  { %v9120_v15 = vpop.f32.mrf.mxu1 }
0x27e9   :  { %v7133_v16 = vpop.f32.mrf.mxu1 }
0x27eb   :  { %v4102_v20 = vpop.f32.mrf.mxu1 }
0x27ec   :  { %v4158_v23 = vsel %vm682_vm4, %v4102_v20, -inf }
0x27ed   :  { %4159 = vmax.xlane.f32.xlu0 %v4158_v23  ;;  %v7144_v24 = vpop.f32.mrf.mxu1  ;;  %v4052_v23 = vadd.f32 %v9100_v30, %v9118_v12 }
0x27ef   :  { %v4105_v27 = vpop.f32.mrf.mxu1 }
0x27f1   :  { %v7145_v31 = vpop.f32.mrf.mxu1  ;;  %4174 = vadd.xlane.f32.xlu0 %v4173_v29  ;;  %v4055_v29 = vadd.f32 %v9103_v28, %v9120_v15 }
0x2876   :  { %v4160_v33 = vpop.xlane.xlu0 %4159 }
0x2877   :  { %v4164_v34 = vsub.f32 %v4102_v20, %v4160_v33 }
0x2879   :  { %v4166_v10 = vmul.f32 1.442695, %v4164_v34 }
0x287a   :  { %v4175_v43 = vpop.xlane.xlu0 %4174 }
0x287b   :  { %7555 = vpow2.f32 %v4166_v10 }
0x287c   :  { %7557 = vrcp.f32 %v4175_v43 }
0x2888   :  { %v7556_v36 = vpop.eup %7555 }
0x2889   :  { %v4170_v41 = vsel %vm682_vm4, %v7556_v36, 0.0  ;;  %v7558_v11 = vpop.eup %7557 }
0x288a   :  { %4171 = vadd.xlane.f32.xlu0 %v4170_v41  ;;  %v4179_v46 = vmul.f32 %v7558_v11, %v7554_v62 }
0x288c   :  { %v4181_v50 = vpack.c.bf16 %v4179_v46, %v4179_v46 }
0x28a0   :  { %4230 = vrot.lane.b32.xlu0 %v8992_v58, %s8219_s26 }
0x28a4   :  { %4329 = vrot.lane.b32.xlu0 %v8999_v60, %s8221_s24 }
0x2913   :  { %v4172_v44 = vpop.xlane.xlu0 %4171 }
0x2914   :  { %7559 = vrcp.f32 %v4172_v44 }
0x2917   :  { %v4231_v17 = vpop.permute.xlu0 %4230 }
0x2918   :  { %v4236_v21 = vsel %vm807_vm5, %v4231_v17, 0 }
0x2919   :  { %7159 = vmatpush3.bf16.msra.mxu0 %v4236_v21 }
0x291a   :  { %7170 = vmatprep.subr.bf16.mxu0 %v8210_v0 }
0x291b   :  { %v4330_v42 = vpop.permute.xlu0 %4329 }
0x291c   :  { %7161 = vmatmul.mubr.msk.bf16.vlgmr.msra.gmra.mxu0 %vm682_vm4, %v4181_v50 }
0x291d   :  { %7171 = vmatpush3.bf16.xpose.msra.mxu0 %v4337_v19  ;;  %7172 = vmatprep.mubr.msk.bf16.mxu0 %vm8211_vm0, %v8210_v0  ;;  %v521_v19 = vld [vmem:[#allocation32 + $0x18] sm:$0xff] }
0x291e   :  { %7182 = vmatprep.subr.bf16.mxu0 %v8210_v0 }
0x2921   :  { %v7560_v60 = vpop.eup %7559 }
0x2922   :  { %v4178_v40 = vmul.f32 %v7560_v60, %v7556_v36  ;;  %v4550_v60 = vpack.c.bf16 %v521_v19, %v521_v19  ;;  %v6522_v19 = vld [vmem:[%s9537_s1] ss:$0 sm:$0xff] }
0x2924   :  { %v4180_v51 = vpack.c.bf16 %v4178_v40, %v4178_v40  ;;  %7173 = vmatmul.mubr.msk.bf16.vlgmr.msra.gmra.mxu0 %vm682_vm4, %v4330_v42  ;;  %v4555_v40 = vsel %vm807_vm5, %v4550_v60, 0 }
0x2925   :  { %7184 = vmatprep.mubr.msk.bf16.mxu0 %vm8211_vm0, %v8210_v0 }
0x2926   :  { %7155 = vmatmul.mubr.msk.bf16.vlgmr.msra.gmra.mxu1 %vm682_vm4, %v4180_v51 }
0x2927   :  { %7166 = vmatprep.mubr.msk.bf16.mxu1 %vm8211_vm0, %v8210_v0  ;;  %7165 = vmatpush3.bf16.msra.mxu1 %v4284_v53 }
0x2928   :  { %7176 = vmatprep.subr.bf16.mxu1 %v8210_v0 }
0x29dc   :  { %v4272_v57 = vpop.f32.mrf.mxu0 }
0x29de   :  { %v7162_v26 = vpop.f32.mrf.mxu0 }
0x29e0   :  { %v4275_v45 = vpop.f32.mrf.mxu0 }
0x29e2   :  { %v7163_v35 = vpop.f32.mrf.mxu0 }
0x29e4   :  { %v4373_v59 = vpop.f32.mrf.mxu0 }
0x29e5   :  { %v4429_v47 = vsel %vm682_vm4, %v4373_v59, -inf }
0x29e6   :  { %v4224_v61 = vpop.f32.mrf.mxu1  ;;  %4430 = vmax.xlane.f32.xlu0 %v4429_v47  ;;  %v7174_v63 = vpop.f32.mrf.mxu0 }
0x29e7   :  { %v4278_v1 = vpack.c.bf16 %v4272_v57, %v4224_v61 }
0x29e8   :  { %v7156_v2 = vpop.f32.mrf.mxu1  ;;  %v4376_v3 = vpop.f32.mrf.mxu0 }
0x29e9   :  { %7167 = vmatmul.mubr.msk.bf16.vlgmr.msra.gmra.mxu1 %vm682_vm4, %v4278_v1  ;;  %v6520_v1 = vld [vmem:[%s9536_s13] ss:$0 sm:$0xff] }
0x29ea   :  { %7177 = vmatpush3.bf16.xpose.msra.mxu1 %v4387_v4  ;;  %v4227_v5 = vpop.f32.mrf.mxu1  ;;  %v7175_v38 = vpop.f32.mrf.mxu0  ;;  %7178 = vmatprep.mubr.msk.bf16.mxu1 %vm8211_vm0, %v8210_v0 }
0x29eb   :  { %7188 = vmatprep.subr.bf16.mxu1 %v8210_v0 }
0x29ec   :  { %v7157_v6 = vpop.f32.mrf.mxu1 }
0x29f1   :  { %7179 = vmatmul.mubr.msk.bf16.vlgmr.msra.gmra.mxu1 %vm682_vm4, %v4380_v7 }
0x29f2   :  { %7190 = vmatprep.mubr.msk.bf16.mxu1 %vm8211_vm0, %v8210_v0 }
0x2a6f   :  { %v4431_v8 = vpop.xlane.xlu0 %4430 }
0x2a70   :  { %v4435_v32 = vsub.f32 %v4373_v59, %v4431_v8 }
0x2a72   :  { %v4437_v13 = vmul.f32 1.442695, %v4435_v32 }
0x2a74   :  { %7561 = vpow2.f32 %v4437_v13 }
0x2a81   :  { %v7562_v16 = vpop.eup %7561 }
0x2a82   :  { %v4441_v20 = vsel %vm682_vm4, %v7562_v16, 0.0 }
0x2a83   :  { %4442 = vadd.xlane.f32.xlu0 %v4441_v20 }
0x2aa9   :  { %v4320_v62 = vpop.f32.mrf.mxu1 }
0x2aaa   :  { %v4327_v24 = vadd.f32 %v4320_v62, %v4052_v23 }
0x2aab   :  { %v7168_v27 = vpop.f32.mrf.mxu1 }
0x2aad   :  { %v4323_v31 = vpop.f32.mrf.mxu1 }
0x2aae   :  { %v4328_v33 = vadd.f32 %v4323_v31, %v4055_v29 }
0x2aaf   :  { %v7169_v34 = vpop.f32.mrf.mxu1 }
0x2ab1   :  { %v4423_v10 = vpop.f32.mrf.mxu1 }
0x2ab2   :  { %v4432_v36 = vsel %vm682_vm4, %v4423_v10, -inf }
0x2ab3   :  { %4433 = vmax.xlane.f32.xlu1 %v4432_v36  ;;  %v7180_v41 = vpop.f32.mrf.mxu1  ;;  %v532_v36 = vld [vmem:[#allocation35] sm:$0xff] }
0x2ab4   :  { %v533_v41 = vld [vmem:[#allocation35 + $0x8] sm:$0xff] }
0x2ab5   :  { %v4426_v43 = vpop.f32.mrf.mxu1 }
0x2ab6   :  { %v4653_v43 = vpack.c.bf16 %v533_v41, %v532_v36 }
0x2ab7   :  { %v7181_v11 = vpop.f32.mrf.mxu1 }
0x2ac4   :  { %4453 = vrot.lane.b32.xlu1 %v8988_v56, %s8222_s19 }
0x2b0c   :  { %v4443_v30 = vpop.xlane.xlu0 %4442 }
0x2b0d   :  { %7563 = vrcp.f32 %v4443_v30 }
0x2b1a   :  { %v7564_v12 = vpop.eup %7563 }
0x2b1b   :  { %v4449_v17 = vmul.f32 %v7564_v12, %v7562_v16 }
0x2b1d   :  { %v4451_v49 = vpack.c.bf16 %v4449_v17, %v4449_v17 }
0x2b3c   :  { %v4434_v44 = vpop.xlane.xlu1 %4433 }
0x2b3d   :  { %v4436_v46 = vsub.f32 %v4423_v10, %v4434_v44  ;;  %v534_v10 = vld [vmem:[#allocation35 + $0x10] sm:$0xff] }
0x2b3f   :  { %v4439_v28 = vmul.f32 1.442695, %v4436_v46 }
0x2b40   :  { %v4454_v15 = vpop.permute.xlu1 %4453 }
0x2b41   :  { %7565 = vpow2.f32 %v4439_v28  ;;  %v4459_v21 = vsel %vm807_vm5, %v4454_v15, 0 }
0x2b42   :  { %7183 = vmatpush3.bf16.msra.mxu0 %v4459_v21  ;;  %v6521_v21 = vld [vmem:[#allocation34] ss:$0 sm:$0xff] }
0x2b43   :  { %7194 = vmatprep.subr.bf16.mxu0 %v8210_v0 }
0x2b45   :  { %7185 = vmatmul.mubr.msk.bf16.vlgmr.msra.gmra.mxu0 %vm682_vm4, %v4451_v49 }
0x2b46   :  { %7196 = vmatprep.mubr.msk.bf16.mxu0 %vm8211_vm0, %v8210_v0  ;;  %7195 = vmatpush3.bf16.msra.mxu0 %v4555_v40 }
0x2b47   :  { %7208 = vmatprep.subr.bf16.mxu0 %v8210_v0 }
0x2b4e   :  { %v7566_v56 = vpop.eup %7565 }
0x2b4f   :  { %v4444_v50 = vsel %vm682_vm4, %v7566_v56, 0.0 }
0x2b50   :  { %4445 = vadd.xlane.f32.xlu0 %v4444_v50 }
0x2b66   :  { %4501 = vrot.lane.b32.xlu0 %v8992_v58, %s8222_s19 }
0x2bd9   :  { %v4446_v42 = vpop.xlane.xlu0 %4445 }
0x2bda   :  { %7567 = vrcp.f32 %v4446_v42 }
0x2bdd   :  { %v4502_v51 = vpop.permute.xlu0 %4501 }
0x2bde   :  { %v4507_v52 = vsel %vm807_vm5, %v4502_v51, 0 }
0x2bdf   :  { %7189 = vmatpush3.bf16.msra.mxu1 %v4507_v52  ;;  %v544_v52 = vld [vmem:[#allocation37 + $0x10] sm:$0xff] }
0x2be0   :  { %7200 = vmatprep.subr.bf16.mxu1 %v8210_v0 }
0x2be7   :  { %v7568_v18 = vpop.eup %7567 }
0x2be8   :  { %v4450_v53 = vmul.f32 %v7568_v18, %v7566_v56  ;;  %v545_v18 = vld [vmem:[#allocation37 + $0x18] sm:$0xff] }
0x2bea   :  { %v4452_v57 = vpack.c.bf16 %v4450_v53, %v4450_v53  ;;  %v4725_v53 = vpack.c.bf16 %v545_v18, %v544_v52 }
0x2bec   :  { %7191 = vmatmul.mubr.msk.bf16.vlgmr.msra.gmra.mxu1 %vm682_vm4, %v4452_v57  ;;  %v542_v57 = vld [vmem:[#allocation37] sm:$0xff] }
0x2bed   :  { %7204 = vmatprep.mubr.msk.bf16.mxu1 %vm8211_vm0, %v8210_v0 }
0x2c05   :  { %v4495_v58 = vpop.f32.mrf.mxu0 }
0x2c07   :  { %v7186_v26 = vpop.f32.mrf.mxu0 }
0x2c09   :  { %v4498_v45 = vpop.f32.mrf.mxu0 }
0x2c0a   :  { %v6523_v45 = vld [vmem:[%s9538_s25] ss:$0 sm:$0xff] }
0x2c0b   :  { %v7187_v35 = vpop.f32.mrf.mxu0 }
0x2cac   :  { %v4543_v59 = vpop.f32.mrf.mxu1 }
0x2cad   :  { %v4549_v25 = vpack.c.bf16 %v4543_v59, %v4495_v58  ;;  %v543_v58 = vld [vmem:[#allocation37 + $0x8] sm:$0xff] }
0x2cae   :  { %v7192_v47 = vpop.f32.mrf.mxu1  ;;  %v4724_v26 = vpack.c.bf16 %v543_v58, %v542_v57 }
0x2caf   :  { %7197 = vmatmul.mubr.msk.bf16.vlgmr.msra.gmra.mxu0 %vm682_vm4, %v4549_v25 }
0x2cb0   :  { %v4546_v61 = vpop.f32.mrf.mxu1  ;;  %7212 = vmatprep.mubr.msk.bf16.mxu0 %vm8211_vm0, %v8210_v0  ;;  %7209 = vmatpush3.bf16.msra.mxu0 %v4725_v53 }
0x2cb1   :  { %7210 = vmatprep.subr.bf16.mxu0 %v8210_v0 }
0x2cb2   :  { %v7193_v63 = vpop.f32.mrf.mxu1 }
0x2cb4   :  { %7211 = vmatpush3.bf16.msra.mxu0 %v4724_v26 }
0x2cb5   :  { %7224 = vmatprep.subr.bf16.mxu0 %v8210_v0 }
0x2d6f   :  { %v4591_v2 = vpop.f32.mrf.mxu0 }
0x2d70   :  { %v4598_v3 = vadd.f32 %v4591_v2, %v4327_v24 }
0x2d71   :  { %v7198_v4 = vpop.f32.mrf.mxu0 }
0x2d72   :  { %v4606_v5 = vadd.f32 %v6520_v1, %v4598_v3 }
0x2d73   :  { %v4594_v38 = vpop.f32.mrf.mxu0 }
0x2d74   :  { %v4599_v6 = vadd.f32 %v4594_v38, %v4328_v33  ;;  %v4608_v7 = vadd.f32 %v4606_v5, %v3459_v9 }
0x2d75   :  { %v7199_v8 = vpop.f32.mrf.mxu0 }
0x2d76   :  { %v4607_v32 = vadd.f32 %v6520_v1, %v4599_v6  ;;  %v4610_v13 = vsel %vm628_vm3, %v4608_v7, 0.0 }
0x2d77   :  { %4611 = vadd.xlane.f32.xlu1 %v4610_v13 }
0x2d78   :  { %v4609_v16 = vadd.f32 %v4607_v32, %v3460_v39  ;;  %v4654_v39 = vpack.c.bf16 %v535_v48, %v534_v10 }
0x2d7a   :  { %v4613_v20 = vsel %vm628_vm3, %v4609_v16, 0.0  ;;  %7201 = vmatpush3.bf16.msra.mxu1 %v4654_v39 }
0x2d7b   :  { %4614 = vadd.xlane.f32.xlu0 %v4613_v20  ;;  %7202 = vmatprep.subr.bf16.mxu1 %v8210_v0 }
0x2d7e   :  { %7203 = vmatpush3.bf16.msra.mxu1 %v4653_v43 }
0x2d7f   :  { %7216 = vmatprep.subr.bf16.mxu1 %v8210_v0 }
0x2e00   :  { %v4612_v23 = vpop.xlane.xlu1 %4611 }
0x2e01   :  { %v4616_v62 = vmul.f32 0.03125, %v4612_v23 }
0x2e03   :  { %v4618_v24 = vsub.f32 %v4608_v7, %v4616_v62 }
0x2e04   :  { %v4615_v27 = vpop.xlane.xlu0 %4614 }
0x2e05   :  { %v4617_v29 = vmul.f32 0.03125, %v4615_v27  ;;  %v4620_v31 = vmul.f32 %v4618_v24, %v4618_v24 }
0x2e07   :  { %v4619_v33 = vsub.f32 %v4609_v16, %v4617_v29  ;;  %v4622_v37 = vsel %vm628_vm3, %v4620_v31, 0.0 }
0x2e08   :  { %4623 = vadd.xlane.f32.xlu1 %v4622_v37 }
0x2e09   :  { %v4621_v9 = vmul.f32 %v4619_v33, %v4619_v33 }
0x2e0b   :  { %v4625_v34 = vsel %vm628_vm3, %v4621_v9, 0.0 }
0x2e0c   :  { %4626 = vadd.xlane.f32.xlu0 %v4625_v34 }
0x2e91   :  { %v4624_v11 = vpop.xlane.xlu1 %4623 }
0x2e92   :  { %v4628_v30 = vmul.f32 0.03125, %v4624_v11 }
0x2e94   :  { %v4630_v12 = vadd.f32 1e-05, %v4628_v30 }
0x2e95   :  { %v4627_v44 = vpop.xlane.xlu0 %4626 }
0x2e96   :  { %7569 = vrsqrt.f32 %v4630_v12  ;;  %v4629_v46 = vmul.f32 0.03125, %v4627_v44 }
0x2e98   :  { %v4631_v17 = vadd.f32 1e-05, %v4629_v46 }
0x2e9a   :  { %7571 = vrsqrt.f32 %v4631_v17 }
0x2ea3   :  { %v7570_v28 = vpop.eup %7569 }
0x2ea4   :  { %v4634_v15 = vmul.f32 %v7570_v28, %v4618_v24 }
0x2ea6   :  { %v4642_v56 = vmul.f32 %v6521_v21, %v4634_v15 }
0x2ea7   :  { %v7572_v49 = vpop.eup %7571 }
0x2ea8   :  { %v4635_v50 = vmul.f32 %v7572_v49, %v4619_v33  ;;  %v4650_v40 = vadd.f32 %v6522_v19, %v4642_v56  ;;  %v6525_v33 = vld [vmem:[%s9539_s2] ss:$0 sm:$0xff] }
0x2eaa   :  { %v4643_v60 = vmul.f32 %v6521_v21, %v4635_v50  ;;  %v514_v50 = vld [vmem:[%s9535_s5 + $0x30] sm:$0xff] }
0x2eac   :  { %v4651_v42 = vadd.f32 %v6522_v19, %v4643_v60  ;;  %v515_v19 = vld [vmem:[%s9535_s5 + $0x38] sm:$0xff] }
0x2ead   :  { %v4822_v60 = vpack.c.bf16 %v515_v19, %v514_v50 }
0x2eae   :  { %v4652_v51 = vpack.c.bf16 %v4651_v42, %v4650_v40 }
0x2eb0   :  { %7205 = vmatmul.mubr.msk.bf16.vlgmr.msra.gmra.mxu1 %vm628_vm3, %v4652_v51 }
0x2eb1   :  { %7220 = vmatprep.mubr.msk.bf16.mxu1 %vm8211_vm0, %v8210_v0  ;;  %7217 = vmatpush3.bf16.msra.mxu1 %v4822_v60 }
0x2eb2   :  { %7218 = vmatprep.subr.bf16.mxu1 %v8210_v0 }
0x2f70   :  { %v4698_v35 = vpop.f32.mrf.mxu1 }
0x2f71   :  { %v4699_v59 = vadd.f32 %v6523_v45, %v4698_v35 }
0x2f72   :  { %v7206_v25 = vpop.f32.mrf.mxu1 }
0x2f73   :  { %v4707_v47 = vmul.f32 0.044715, %v4699_v59  ;;  %v4705_v23 = vmul.f32 0.5, %v4699_v59 }
0x2f74   :  { %v4701_v61 = vpop.f32.mrf.mxu1 }
0x2f75   :  { %v4709_v63 = vmul.f32 %v4707_v47, %v4699_v59  ;;  %v4702_v1 = vadd.f32 %v6523_v45, %v4701_v61 }
0x2f76   :  { %v7207_v2 = vpop.f32.mrf.mxu1 }
0x2f77   :  { %v4711_v3 = vmul.f32 %v4709_v63, %v4699_v59  ;;  %v4708_v4 = vmul.f32 0.044715, %v4702_v1  ;;  %v4706_v62 = vmul.f32 0.5, %v4702_v1  ;;  %v6528_v63 = vld [vmem:[%s9541_s7] ss:$0 sm:$0xff] }
0x2f79   :  { %v4713_v5 = vadd.f32 %v4711_v3, %v4699_v59  ;;  %v4710_v38 = vmul.f32 %v4708_v4, %v4702_v1  ;;  %v6527_v59 = vld [vmem:[%s9540_s17] ss:$0 sm:$0xff] }
0x2f7b   :  { %v4715_v6 = vmul.f32 0.7978846, %v4713_v5  ;;  %v4712_v7 = vmul.f32 %v4710_v38, %v4702_v1  ;;  %v6529_v5 = vld [vmem:[#allocation31 + $0x1] ss:$0 sm:$0xff] }
0x2f7d   :  { %7573 = vtanh.f32 %v4715_v6  ;;  %v4714_v8 = vadd.f32 %v4712_v7, %v4702_v1 }
0x2f7f   :  { %v4716_v32 = vmul.f32 0.7978846, %v4714_v8 }
0x2f81   :  { %7575 = vtanh.f32 %v4716_v32 }
0x2f8a   :  { %v7574_v13 = vpop.eup %7573 }
0x2f8b   :  { %v4719_v16 = vadd.f32 1.0, %v7574_v13 }
0x2f8d   :  { %v4721_v27 = vmul.f32 %v4719_v16, %v4705_v23 }
0x2f8e   :  { %v7576_v20 = vpop.eup %7575 }
0x2f8f   :  { %v4720_v24 = vadd.f32 1.0, %v7576_v20 }
0x2f91   :  { %v4722_v29 = vmul.f32 %v4720_v24, %v4706_v62 }
0x2f93   :  { %v4723_v31 = vpack.c.bf16 %v4722_v29, %v4721_v27 }
0x2f95   :  { %7213 = vmatmul.mubr.msk.bf16.vlgmr.msra.gmra.mxu0 %vm628_vm3, %v4723_v31 }
0x2f96   :  { %7226 = vmatprep.mubr.msk.bf16.mxu0 %vm8211_vm0, %v8210_v0 }
0x3055   :  { %v4769_v37 = vpop.f32.mrf.mxu0 }
0x3056   :  { %v4770_v9 = vadd.f32 %v6525_v33, %v4769_v37 }
0x3057   :  { %v7214_v34 = vpop.f32.mrf.mxu0 }
0x3058   :  { %v4776_v10 = vadd.f32 %v4770_v9, %v4650_v40  ;;  %v512_v40 = vld [vmem:[%s9535_s5 + $0x20] sm:$0xff] }
0x3059   :  { %v4772_v48 = vpop.f32.mrf.mxu0 }
0x305a   :  { %v4773_v39 = vadd.f32 %v6525_v33, %v4772_v48  ;;  %v4778_v36 = vsel %vm628_vm3, %v4776_v10, 0.0 }
0x305b   :  { %4779 = vadd.xlane.f32.xlu1 %v4778_v36  ;;  %v7215_v41 = vpop.f32.mrf.mxu0 }
0x305c   :  { %v4777_v43 = vadd.f32 %v4773_v39, %v4651_v42  ;;  %v513_v42 = vld [vmem:[%s9535_s5 + $0x28] sm:$0xff] }
0x305d   :  { %v4821_v51 = vpack.c.bf16 %v513_v42, %v512_v40 }
0x305e   :  { %v4781_v11 = vsel %vm628_vm3, %v4777_v43, 0.0 }
0x305f   :  { %4782 = vadd.xlane.f32.xlu0 %v4781_v11  ;;  %7219 = vmatpush3.bf16.msra.mxu1 %v4821_v51 }
0x3060   :  { %7230 = vmatprep.subr.bf16.mxu1 %v8210_v0 }
0x30e4   :  { %v4780_v30 = vpop.xlane.xlu1 %4779 }
0x30e5   :  { %v4784_v12 = vmul.f32 0.03125, %v4780_v30 }
0x30e7   :  { %v4786_v44 = vsub.f32 %v4776_v10, %v4784_v12 }
0x30e8   :  { %v4783_v46 = vpop.xlane.xlu0 %4782 }
0x30e9   :  { %v4785_v17 = vmul.f32 0.03125, %v4783_v46  ;;  %v4788_v28 = vmul.f32 %v4786_v44, %v4786_v44 }
0x30eb   :  { %v4787_v15 = vsub.f32 %v4777_v43, %v4785_v17  ;;  %v4790_v21 = vsel %vm628_vm3, %v4788_v28, 0.0 }
0x30ec   :  { %4791 = vadd.xlane.f32.xlu1 %v4790_v21 }
0x30ed   :  { %v4789_v49 = vmul.f32 %v4787_v15, %v4787_v15 }
0x30ef   :  { %v4793_v56 = vsel %vm628_vm3, %v4789_v49, 0.0 }
0x30f0   :  { %4794 = vadd.xlane.f32.xlu0 %v4793_v56 }
0x3175   :  { %v4792_v52 = vpop.xlane.xlu1 %4791 }
0x3176   :  { %v4796_v18 = vmul.f32 0.03125, %v4792_v52 }
0x3178   :  { %v4798_v53 = vadd.f32 1e-05, %v4796_v18 }
0x3179   :  { %v4795_v57 = vpop.xlane.xlu0 %4794 }
0x317a   :  { %7577 = vrsqrt.f32 %v4798_v53  ;;  %v4797_v58 = vmul.f32 0.03125, %v4795_v57 }
0x317c   :  { %v4799_v26 = vadd.f32 1e-05, %v4797_v58 }
0x317e   :  { %7579 = vrsqrt.f32 %v4799_v26 }
0x3187   :  { %v7578_v45 = vpop.eup %7577 }
0x3188   :  { %v4802_v35 = vmul.f32 %v7578_v45, %v4786_v44 }
0x318a   :  { %v4810_v47 = vmul.f32 %v6527_v59, %v4802_v35 }
0x318b   :  { %v7580_v25 = vpop.eup %7579 }
0x318c   :  { %v4803_v61 = vmul.f32 %v7580_v25, %v4787_v15  ;;  %v9213_v2 = vadd.f32 %v6528_v63, %v4810_v47 }
0x318e   :  { %v4811_v1 = vmul.f32 %v6527_v59, %v4803_v61 }
0x3190   :  { %v9215_v3 = vadd.f32 %v6528_v63, %v4811_v1 }
0x3192   :  { %v4820_v4 = vpack.c.bf16 %v9215_v3, %v9213_v2 }
0x3194   :  { %7221 = vmatmul.mubr.msk.bf16.vlgmr.msra.gmra.mxu1 %vm628_vm3, %v4820_v4 }
0x3195   :  { %7232 = vmatprep.mubr.msk.bf16.mxu1 %vm8211_vm0, %v8210_v0 }
0x3254   :  { %v4866_v38 = vpop.f32.mrf.mxu1 }
0x3255   :  { %v4867_v6 = vadd.f32 %v6529_v5, %v4866_v38 }
0x3256   :  { %v7222_v7 = vpop.f32.mrf.mxu1 }
0x3257   :  { %v9222_v8 = vpack.c.bf16 %v4867_v6, %v4867_v6  ;;  %v4873_v24 = vmul.f32 0.35355338, %v4867_v6 }
0x3258   :  { %v4869_v32 = vpop.f32.mrf.mxu1 }
0x3259   :  { %v4870_v13 = vadd.f32 %v6529_v5, %v4869_v32  ;;  %4880 = vrot.lane.b32.xlu1 %v9222_v8, %s8212_s11  ;;  %v9233_v31 = vpack.c.bf16 %v4873_v24, %v4873_v24 }
0x325a   :  { %v7223_v16 = vpop.f32.mrf.mxu1 }
0x325b   :  { %v9226_v20 = vpack.c.bf16 %v4870_v13, %v4870_v13  ;;  %v4874_v33 = vmul.f32 0.35355338, %v4870_v13 }
0x325d   :  { %4929 = vrot.lane.b32.xlu0 %v9226_v20, %s8212_s11  ;;  %v9240_v37 = vpack.c.bf16 %v4874_v33, %v4874_v33 }
0x32cb   :  { %v4881_v23 = vpop.permute.xlu1 %4880 }
0x32cc   :  { %v4886_v62 = vsel %vm682_vm4, %v4881_v23, 0 }
0x32cd   :  { %7225 = vmatpush3.bf16.xpose.msra.mxu0 %v4886_v62 }
0x32ce   :  { %7236 = vmatprep.subr.bf16.mxu0 %v8210_v0 }
0x32cf   :  { %v4930_v27 = vpop.permute.xlu0 %4929 }
0x32d0   :  { %v4935_v29 = vsel %vm682_vm4, %v4930_v27, 0 }
0x32d1   :  { %7231 = vmatpush3.bf16.xpose.msra.mxu1 %v4935_v29 }
0x32d2   :  { %7242 = vmatprep.subr.bf16.mxu1 %v8210_v0 }
0x32d4   :  { %7227 = vmatmul.mubr.msk.bf16.vlgmr.msra.gmra.mxu0 %vm682_vm4, %v9233_v31 }
0x32d5   :  { %7238 = vmatprep.mubr.msk.bf16.mxu0 %vm8211_vm0, %v8210_v0 }
0x32d8   :  { %7233 = vmatmul.mubr.msk.bf16.vlgmr.msra.gmra.mxu1 %vm682_vm4, %v9240_v37 }
0x32d9   :  { %7244 = vmatprep.mubr.msk.bf16.mxu1 %vm8211_vm0, %v8210_v0 }
0x3394   :  { %v4922_v9 = vpop.f32.mrf.mxu0 }
0x3395   :  { %v4977_v34 = vsel %vm682_vm4, %v4922_v9, -inf }
0x3396   :  { %4978 = vmax.xlane.f32.xlu1 %v4977_v34  ;;  %v7228_v10 = vpop.f32.mrf.mxu0 }
0x3398   :  { %v4925_v48 = vpop.f32.mrf.mxu0  ;;  %v4971_v39 = vpop.f32.mrf.mxu1 }
0x3399   :  { %v4980_v36 = vsel %vm682_vm4, %v4971_v39, -inf }
0x339a   :  { %4981 = vmax.xlane.f32.xlu0 %v4980_v36  ;;  %v7229_v41 = vpop.f32.mrf.mxu0  ;;  %v7234_v43 = vpop.f32.mrf.mxu1 }
0x339c   :  { %v4974_v11 = vpop.f32.mrf.mxu1 }
0x339e   :  { %v7235_v30 = vpop.f32.mrf.mxu1 }
0x33a7   :  { %5001 = vrot.lane.b32.xlu1 %v9222_v8, %s8213_s16 }
0x341f   :  { %v4979_v12 = vpop.xlane.xlu1 %4978 }
0x3420   :  { %v4983_v44 = vsub.f32 %v4922_v9, %v4979_v12 }
0x3422   :  { %v4985_v46 = vmul.f32 1.442695, %v4983_v44 }
0x3423   :  { %v4982_v17 = vpop.xlane.xlu0 %4981  ;;  %v5002_v28 = vpop.permute.xlu1 %5001 }
0x3424   :  { %7581 = vpow2.f32 %v4985_v46  ;;  %v4984_v15 = vsub.f32 %v4971_v39, %v4982_v17  ;;  %v5007_v21 = vsel %vm807_vm5, %v5002_v28, 0 }
0x3425   :  { %7237 = vmatpush3.bf16.msra.mxu0 %v5007_v21 }
0x3426   :  { %v4987_v49 = vmul.f32 1.442695, %v4984_v15  ;;  %7248 = vmatprep.subr.bf16.mxu0 %v8210_v0 }
0x3428   :  { %7583 = vpow2.f32 %v4987_v49 }
0x3431   :  { %v7582_v56 = vpop.eup %7581 }
0x3432   :  { %v4989_v50 = vsel %vm682_vm4, %v7582_v56, 0.0 }
0x3433   :  { %4990 = vadd.xlane.f32.xlu1 %v4989_v50 }
0x3435   :  { %v7584_v19 = vpop.eup %7583 }
0x3436   :  { %v4992_v60 = vsel %vm682_vm4, %v7584_v19, 0.0 }
0x3437   :  { %4993 = vadd.xlane.f32.xlu0 %v4992_v60  ;;  %v522_v60 = vld [vmem:[#allocation32 + $0x20] sm:$0xff] }
0x3444   :  { %5102 = vrot.lane.b32.xlu1 %v9222_v8, %s8214_s18 }
0x3448   :  { %5153 = vrot.lane.b32.xlu1 %v9226_v20, %s8214_s18 }
0x344c   :  { %5151 = vrot.lane.b32.xlu1 %v9240_v37, %s8215_s22 }
0x344d   :  { %5049 = vrot.lane.b32.xlu0 %v9226_v20, %s8213_s16 }
0x3451   :  { %5100 = vrot.lane.b32.xlu0 %v9233_v31, %s8215_s22 }
0x34bc   :  { %v4991_v40 = vpop.xlane.xlu1 %4990 }
0x34bd   :  { %7585 = vrcp.f32 %v4991_v40 }
0x34c0   :  { %v4994_v42 = vpop.xlane.xlu0 %4993  ;;  %v5103_v53 = vpop.permute.xlu1 %5102 }
0x34c1   :  { %7587 = vrcp.f32 %v4994_v42  ;;  %v5108_v35 = vsel %vm682_vm4, %v5103_v53, 0 }
0x34c4   :  { %v5050_v51 = vpop.permute.xlu0 %5049  ;;  %v5154_v59 = vpop.permute.xlu1 %5153 }
0x34c5   :  { %v5055_v52 = vsel %vm807_vm5, %v5050_v51, 0  ;;  %v5159_v47 = vsel %vm682_vm4, %v5154_v59, 0  ;;  %v5098_v51 = vpack.c.bf16 %v522_v60, %v522_v60  ;;  %v523_v59 = vld [vmem:[#allocation32 + $0x28] sm:$0xff] }
0x34c6   :  { %7243 = vmatpush3.bf16.msra.mxu1 %v5055_v52 }
0x34c7   :  { %7254 = vmatprep.subr.bf16.mxu1 %v8210_v0 }
0x34c8   :  { %v5101_v61 = vpop.permute.xlu0 %5100  ;;  %v5152_v63 = vpop.permute.xlu1 %5151 }
0x34ca   :  { %v7586_v18 = vpop.eup %7585 }
0x34cb   :  { %v4997_v57 = vmul.f32 %v7586_v18, %v7582_v56 }
0x34cd   :  { %v4999_v58 = vpack.c.bf16 %v4997_v57, %v4997_v57  ;;  %v5374_v57 = vsel %vm807_vm5, %v5098_v51, 0 }
0x34ce   :  { %v7588_v26 = vpop.eup %7587 }
0x34cf   :  { %v4998_v45 = vmul.f32 %v7588_v26, %v7584_v19  ;;  %7239 = vmatmul.mubr.msk.bf16.vlgmr.msra.gmra.mxu0 %vm682_vm4, %v4999_v58 }
0x34d0   :  { %7249 = vmatpush3.bf16.xpose.msra.mxu0 %v5108_v35  ;;  %7250 = vmatprep.mubr.msk.bf16.mxu0 %vm8211_vm0, %v8210_v0 }
0x34d1   :  { %v5000_v25 = vpack.c.bf16 %v4998_v45, %v4998_v45  ;;  %7260 = vmatprep.subr.bf16.mxu0 %v8210_v0 }
0x34d3   :  { %7245 = vmatmul.mubr.msk.bf16.vlgmr.msra.gmra.mxu1 %vm682_vm4, %v5000_v25  ;;  %v5322_v25 = vpack.c.bf16 %v523_v59, %v523_v59 }
0x34d4   :  { %7255 = vmatpush3.bf16.xpose.msra.mxu1 %v5159_v47  ;;  %7256 = vmatprep.mubr.msk.bf16.mxu1 %vm8211_vm0, %v8210_v0 }
0x34d5   :  { %7266 = vmatprep.subr.bf16.mxu1 %v8210_v0  ;;  %v5327_v47 = vsel %vm807_vm5, %v5322_v25, 0 }
0x34d7   :  { %7251 = vmatmul.mubr.msk.bf16.vlgmr.msra.gmra.mxu0 %vm682_vm4, %v5101_v61 }
0x34d8   :  { %7262 = vmatprep.mubr.msk.bf16.mxu0 %vm8211_vm0, %v8210_v0 }
0x34db   :  { %7257 = vmatmul.mubr.msk.bf16.vlgmr.msra.gmra.mxu1 %vm682_vm4, %v5152_v63 }
0x34dc   :  { %7268 = vmatprep.mubr.msk.bf16.mxu1 %vm8211_vm0, %v8210_v0 }
0x358f   :  { %v9282_v1 = vpop.f32.mrf.mxu0 }
0x3591   :  { %v7240_v4 = vpop.f32.mrf.mxu0 }
0x3593   :  { %v5046_v5 = vpop.f32.mrf.mxu0  ;;  %v9284_v38 = vpop.f32.mrf.mxu1 }
0x3594   :  { %v5097_v6 = vpack.c.bf16 %v9284_v38, %v9282_v1 }
0x3595   :  { %v7241_v7 = vpop.f32.mrf.mxu0  ;;  %v7246_v32 = vpop.f32.mrf.mxu1 }
0x3597   :  { %v5094_v13 = vpop.f32.mrf.mxu1  ;;  %v5144_v16 = vpop.f32.mrf.mxu0 }
0x3598   :  { %v5201_v23 = vsel %vm682_vm4, %v5144_v16, -inf }
0x3599   :  { %v7247_v62 = vpop.f32.mrf.mxu1  ;;  %5202 = vmax.xlane.f32.xlu0 %v5201_v23  ;;  %v7252_v24 = vpop.f32.mrf.mxu0 }
0x359b   :  { %v5147_v27 = vpop.f32.mrf.mxu0  ;;  %v5195_v29 = vpop.f32.mrf.mxu1 }
0x359c   :  { %v5204_v33 = vsel %vm682_vm4, %v5195_v29, -inf }
0x359d   :  { %5205 = vmax.xlane.f32.xlu1 %v5204_v33  ;;  %v7253_v9 = vpop.f32.mrf.mxu0  ;;  %v7258_v34 = vpop.f32.mrf.mxu1 }
0x359f   :  { %v5198_v10 = vpop.f32.mrf.mxu1 }
0x35a1   :  { %v7259_v48 = vpop.f32.mrf.mxu1 }
0x35ae   :  { %5225 = vrot.lane.b32.xlu1 %v9222_v8, %s8216_s21 }
0x35b2   :  { %5419 = vrot.lane.b32.xlu1 %v9222_v8, %s8218_s23 }
0x35b6   :  { %5469 = vrot.lane.b32.xlu1 %v9226_v20, %s8218_s23 }
0x35ba   :  { %5467 = vrot.lane.b32.xlu1 %v9240_v37, %s8217_s9 }
0x3622   :  { %v5203_v39 = vpop.xlane.xlu0 %5202 }
0x3623   :  { %v5207_v36 = vsub.f32 %v5144_v16, %v5203_v39 }
0x3625   :  { %v5209_v41 = vmul.f32 1.442695, %v5207_v36 }
0x3626   :  { %v5206_v43 = vpop.xlane.xlu1 %5205 }
0x3627   :  { %7589 = vpow2.f32 %v5209_v41  ;;  %v5208_v11 = vsub.f32 %v5195_v29, %v5206_v43 }
0x3629   :  { %v5211_v30 = vmul.f32 1.442695, %v5208_v11 }
0x362a   :  { %v5226_v12 = vpop.permute.xlu1 %5225 }
0x362b   :  { %7591 = vpow2.f32 %v5211_v30  ;;  %v5231_v44 = vsel %vm807_vm5, %v5226_v12, 0 }
0x362c   :  { %7261 = vmatpush3.bf16.msra.mxu0 %v5231_v44 }
0x362d   :  { %7272 = vmatprep.subr.bf16.mxu0 %v8210_v0 }
0x362e   :  { %v5420_v58 = vpop.permute.xlu1 %5419 }
0x362f   :  { %v5425_v7 = vsel %vm682_vm4, %v5420_v58, 0 }
0x3632   :  { %v5470_v26 = vpop.permute.xlu1 %5469 }
0x3633   :  { %v5475_v45 = vsel %vm682_vm4, %v5470_v26, 0 }
0x3634   :  { %v7590_v46 = vpop.eup %7589 }
0x3635   :  { %v5213_v17 = vsel %vm682_vm4, %v7590_v46, 0.0 }
0x3636   :  { %5214 = vadd.xlane.f32.xlu0 %v5213_v17  ;;  %v5468_v35 = vpop.permute.xlu1 %5467 }
0x3638   :  { %v7592_v28 = vpop.eup %7591 }
0x3639   :  { %v5216_v15 = vsel %vm682_vm4, %v7592_v28, 0.0 }
0x363a   :  { %5217 = vadd.xlane.f32.xlu0 %v5216_v15 }
0x3650   :  { %5273 = vrot.lane.b32.xlu0 %v9226_v20, %s8216_s21 }
0x3654   :  { %5417 = vrot.lane.b32.xlu0 %v9233_v31, %s8217_s9 }
0x36bf   :  { %v5215_v21 = vpop.xlane.xlu0 %5214 }
0x36c0   :  { %7593 = vrcp.f32 %v5215_v21 }
0x36c3   :  { %v5218_v49 = vpop.xlane.xlu0 %5217 }
0x36c4   :  { %7595 = vrcp.f32 %v5218_v49 }
0x36c7   :  { %v5274_v56 = vpop.permute.xlu0 %5273 }
0x36c8   :  { %v5279_v50 = vsel %vm807_vm5, %v5274_v56, 0 }
0x36c9   :  { %7267 = vmatpush3.bf16.msra.mxu1 %v5279_v50 }
0x36ca   :  { %7278 = vmatprep.subr.bf16.mxu1 %v8210_v0 }
0x36cb   :  { %v5418_v23 = vpop.permute.xlu0 %5417 }
0x36cd   :  { %v7594_v19 = vpop.eup %7593 }
0x36ce   :  { %v5221_v40 = vmul.f32 %v7594_v19, %v7590_v46 }
0x36d0   :  { %v5223_v42 = vpack.c.bf16 %v5221_v40, %v5221_v40 }
0x36d1   :  { %v7596_v52 = vpop.eup %7595 }
0x36d2   :  { %v5222_v18 = vmul.f32 %v7596_v52, %v7592_v28  ;;  %7263 = vmatmul.mubr.msk.bf16.vlgmr.msra.gmra.mxu0 %vm682_vm4, %v5223_v42 }
0x36d3   :  { %7274 = vmatprep.mubr.msk.bf16.mxu0 %vm8211_vm0, %v8210_v0  ;;  %7273 = vmatpush3.bf16.msra.mxu0 %v5327_v47  ;;  %v524_v47 = vld [vmem:[#allocation32 + $0x30] sm:$0xff] }
0x36d4   :  { %v5224_v53 = vpack.c.bf16 %v5222_v18, %v5222_v18  ;;  %7284 = vmatprep.subr.bf16.mxu0 %v8210_v0 }
0x36d6   :  { %7269 = vmatmul.mubr.msk.bf16.vlgmr.msra.gmra.mxu1 %vm682_vm4, %v5224_v53 }
0x36d7   :  { %7279 = vmatpush3.bf16.msra.mxu1 %v5374_v57  ;;  %7280 = vmatprep.mubr.msk.bf16.mxu1 %vm8211_vm0, %v8210_v0 }
0x36d8   :  { %7290 = vmatprep.subr.bf16.mxu1 %v8210_v0 }
0x36de   :  { %7281 = vmatmul.mubr.msk.bf16.vlgmr.msra.gmra.mxu1 %vm682_vm4, %v5097_v6 }
0x36df   :  { %7291 = vmatpush3.bf16.xpose.msra.mxu1 %v5475_v45  ;;  %7292 = vmatprep.mubr.msk.bf16.mxu1 %vm8211_vm0, %v8210_v0 }
0x36e0   :  { %7302 = vmatprep.subr.bf16.mxu1 %v8210_v0 }
0x36e6   :  { %7293 = vmatmul.mubr.msk.bf16.vlgmr.msra.gmra.mxu1 %vm682_vm4, %v5468_v35 }
0x36e7   :  { %7304 = vmatprep.mubr.msk.bf16.mxu1 %vm8211_vm0, %v8210_v0 }
0x3792   :  { %v5267_v61 = vpop.f32.mrf.mxu0 }
0x3794   :  { %v7264_v63 = vpop.f32.mrf.mxu0 }
0x3796   :  { %v5270_v1 = vpop.f32.mrf.mxu0  ;;  %v5315_v4 = vpop.f32.mrf.mxu1 }
0x3797   :  { %v5321_v5 = vpack.c.bf16 %v5315_v4, %v5267_v61  ;;  %v5638_v61 = vpack.c.bf16 %v524_v47, %v524_v47 }
0x3798   :  { %v7265_v38 = vpop.f32.mrf.mxu0  ;;  %v7270_v6 = vpop.f32.mrf.mxu1 }
0x3799   :  { %7275 = vmatmul.mubr.msk.bf16.vlgmr.msra.gmra.mxu0 %vm682_vm4, %v5321_v5  ;;  %v5643_v63 = vsel %vm807_vm5, %v5638_v61, 0 }
0x379a   :  { %7285 = vmatpush3.bf16.xpose.msra.mxu0 %v5425_v7  ;;  %v5318_v32 = vpop.f32.mrf.mxu1  ;;  %7286 = vmatprep.mubr.msk.bf16.mxu0 %vm8211_vm0, %v8210_v0 }
0x379b   :  { %7296 = vmatprep.subr.bf16.mxu0 %v8210_v0 }
0x379c   :  { %v7271_v13 = vpop.f32.mrf.mxu1 }
0x379e   :  { %v9334_v16 = vpop.f32.mrf.mxu1 }
0x37a0   :  { %v7282_v62 = vpop.f32.mrf.mxu1 }
0x37a1   :  { %7287 = vmatmul.mubr.msk.bf16.vlgmr.msra.gmra.mxu0 %vm682_vm4, %v5418_v23 }
0x37a2   :  { %v9337_v24 = vpop.f32.mrf.mxu1  ;;  %7298 = vmatprep.mubr.msk.bf16.mxu0 %vm8211_vm0, %v8210_v0 }
0x37a4   :  { %v7283_v27 = vpop.f32.mrf.mxu1 }
0x37a6   :  { %v5511_v29 = vpop.f32.mrf.mxu1 }
0x37a7   :  { %v5520_v33 = vsel %vm682_vm4, %v5511_v29, -inf }
0x37a8   :  { %5521 = vmax.xlane.f32.xlu1 %v5520_v33  ;;  %v7294_v9 = vpop.f32.mrf.mxu1 }
0x37aa   :  { %v5514_v34 = vpop.f32.mrf.mxu1 }
0x37ac   :  { %v7295_v10 = vpop.f32.mrf.mxu1 }
0x37b9   :  { %5541 = vrot.lane.b32.xlu1 %v9222_v8, %s8219_s26 }
0x37bd   :  { %5690 = vrot.lane.b32.xlu1 %v9222_v8, %s8220_s28 }
0x37c1   :  { %5740 = vrot.lane.b32.xlu1 %v9226_v20, %s8220_s28 }
0x37c5   :  { %5738 = vrot.lane.b32.xlu1 %v9240_v37, %s8221_s24 }
0x3831   :  { %v5522_v48 = vpop.xlane.xlu1 %5521 }
0x3832   :  { %v5524_v41 = vsub.f32 %v5511_v29, %v5522_v48 }
0x3834   :  { %v5527_v43 = vmul.f32 1.442695, %v5524_v41 }
0x3835   :  { %v5542_v39 = vpop.permute.xlu1 %5541 }
0x3836   :  { %v5547_v36 = vsel %vm807_vm5, %v5542_v39, 0  ;;  %7597 = vpow2.f32 %v5527_v43 }
0x3837   :  { %7297 = vmatpush3.bf16.msra.mxu0 %v5547_v36 }
0x3838   :  { %7308 = vmatprep.subr.bf16.mxu0 %v8210_v0 }
0x3839   :  { %v5691_v58 = vpop.permute.xlu1 %5690 }
0x383a   :  { %v5696_v45 = vsel %vm682_vm4, %v5691_v58, 0  ;;  %v525_v58 = vld [vmem:[#allocation32 + $0x38] sm:$0xff] }
0x383d   :  { %v5741_v7 = vpop.permute.xlu1 %5740 }
0x383e   :  { %v5746_v33 = vsel %vm682_vm4, %v5741_v7, 0 }
0x3841   :  { %v5739_v48 = vpop.permute.xlu1 %5738 }
0x3843   :  { %v7598_v37 = vpop.eup %7597 }
0x3844   :  { %v5532_v21 = vsel %vm682_vm4, %v7598_v37, 0.0 }
0x3859   :  { %v9352_v11 = vpop.f32.mrf.mxu0 }
0x385b   :  { %v7276_v30 = vpop.f32.mrf.mxu0 }
0x385d   :  { %v9354_v12 = vpop.f32.mrf.mxu0 }
0x385f   :  { %v7277_v44 = vpop.f32.mrf.mxu0 }
0x3860   :  { %v5411_v44 = vadd.f32 %v9334_v16, %v9352_v11 }
0x3861   :  { %v5461_v46 = vpop.f32.mrf.mxu0 }
0x3862   :  { %v5517_v17 = vsel %vm682_vm4, %v5461_v46, -inf }
0x3863   :  { %5518 = vmax.xlane.f32.xlu0 %v5517_v17  ;;  %v7288_v28 = vpop.f32.mrf.mxu0 }
0x3864   :  { %v5414_v28 = vadd.f32 %v9337_v24, %v9354_v12 }
0x3865   :  { %v5464_v15 = vpop.f32.mrf.mxu0 }
0x3867   :  { %5533 = vadd.xlane.f32.xlu0 %v5532_v21  ;;  %v7289_v49 = vpop.f32.mrf.mxu0 }
0x38ec   :  { %v5519_v56 = vpop.xlane.xlu0 %5518 }
0x38ed   :  { %v5523_v50 = vsub.f32 %v5461_v46, %v5519_v56 }
0x38ef   :  { %v5525_v19 = vmul.f32 1.442695, %v5523_v50 }
0x38f0   :  { %v5534_v42 = vpop.xlane.xlu0 %5533 }
0x38f1   :  { %7599 = vpow2.f32 %v5525_v19 }
0x38f2   :  { %7601 = vrcp.f32 %v5534_v42 }
0x38fe   :  { %v7600_v60 = vpop.eup %7599 }
0x38ff   :  { %v5529_v40 = vsel %vm682_vm4, %v7600_v60, 0.0  ;;  %v7602_v51 = vpop.eup %7601 }
0x3900   :  { %5530 = vadd.xlane.f32.xlu0 %v5529_v40  ;;  %v5538_v18 = vmul.f32 %v7602_v51, %v7598_v37 }
0x3902   :  { %v5540_v26 = vpack.c.bf16 %v5538_v18, %v5538_v18 }
0x3916   :  { %5589 = vrot.lane.b32.xlu0 %v9226_v20, %s8219_s26 }
0x391a   :  { %5688 = vrot.lane.b32.xlu0 %v9233_v31, %s8221_s24 }
0x3989   :  { %v5531_v52 = vpop.xlane.xlu0 %5530 }
0x398a   :  { %7603 = vrcp.f32 %v5531_v52 }
0x398d   :  { %v5590_v53 = vpop.permute.xlu0 %5589 }
0x398e   :  { %v5595_v57 = vsel %vm807_vm5, %v5590_v53, 0 }
0x398f   :  { %7303 = vmatpush3.bf16.msra.mxu1 %v5595_v57 }
0x3990   :  { %7314 = vmatprep.subr.bf16.mxu1 %v8210_v0 }
0x3991   :  { %v5689_v59 = vpop.permute.xlu0 %5688 }
0x3992   :  { %7305 = vmatmul.mubr.msk.bf16.vlgmr.msra.gmra.mxu1 %vm682_vm4, %v5540_v26  ;;  %v5909_v26 = vpack.c.bf16 %v525_v58, %v525_v58 }
0x3993   :  { %7315 = vmatpush3.bf16.xpose.msra.mxu1 %v5696_v45  ;;  %7316 = vmatprep.mubr.msk.bf16.mxu1 %vm8211_vm0, %v8210_v0 }
0x3994   :  { %7326 = vmatprep.subr.bf16.mxu1 %v8210_v0  ;;  %v5914_v45 = vsel %vm807_vm5, %v5909_v26, 0 }
0x3997   :  { %v7604_v31 = vpop.eup %7603 }
0x3998   :  { %v5537_v35 = vmul.f32 %v7604_v31, %v7600_v60 }
0x399a   :  { %v5539_v25 = vpack.c.bf16 %v5537_v35, %v5537_v35  ;;  %7317 = vmatmul.mubr.msk.bf16.vlgmr.msra.gmra.mxu1 %vm682_vm4, %v5689_v59 }
0x399b   :  { %7328 = vmatprep.mubr.msk.bf16.mxu1 %vm8211_vm0, %v8210_v0 }
0x399c   :  { %7299 = vmatmul.mubr.msk.bf16.vlgmr.msra.gmra.mxu0 %vm682_vm4, %v5539_v25 }
0x399d   :  { %7310 = vmatprep.mubr.msk.bf16.mxu0 %vm8211_vm0, %v8210_v0  ;;  %7309 = vmatpush3.bf16.msra.mxu0 %v5643_v63 }
0x399e   :  { %7320 = vmatprep.subr.bf16.mxu0 %v8210_v0 }
0x3a52   :  { %v5631_v1 = vpop.f32.mrf.mxu1 }
0x3a54   :  { %v7306_v4 = vpop.f32.mrf.mxu1 }
0x3a56   :  { %v5634_v5 = vpop.f32.mrf.mxu1 }
0x3a58   :  { %v7307_v38 = vpop.f32.mrf.mxu1 }
0x3a5a   :  { %v5732_v6 = vpop.f32.mrf.mxu1 }
0x3a5b   :  { %v5788_v32 = vsel %vm682_vm4, %v5732_v6, -inf }
0x3a5c   :  { %5789 = vmax.xlane.f32.xlu0 %v5788_v32  ;;  %v5583_v13 = vpop.f32.mrf.mxu0  ;;  %v7318_v23 = vpop.f32.mrf.mxu1 }
0x3a5d   :  { %v5637_v62 = vpack.c.bf16 %v5631_v1, %v5583_v13  ;;  %v6551_v13 = vld [vmem:[%s9536_s13 + $0x1] ss:$0 sm:$0xff] }
0x3a5e   :  { %v7300_v27 = vpop.f32.mrf.mxu0  ;;  %v5735_v29 = vpop.f32.mrf.mxu1 }
0x3a5f   :  { %7311 = vmatmul.mubr.msk.bf16.vlgmr.msra.gmra.mxu0 %vm682_vm4, %v5637_v62 }
0x3a60   :  { %7321 = vmatpush3.bf16.xpose.msra.mxu0 %v5746_v33  ;;  %v5586_v9 = vpop.f32.mrf.mxu0  ;;  %v7319_v34 = vpop.f32.mrf.mxu1  ;;  %7322 = vmatprep.mubr.msk.bf16.mxu0 %vm8211_vm0, %v8210_v0 }
0x3a61   :  { %7332 = vmatprep.subr.bf16.mxu0 %v8210_v0 }
0x3a62   :  { %v7301_v10 = vpop.f32.mrf.mxu0 }
0x3a67   :  { %7323 = vmatmul.mubr.msk.bf16.vlgmr.msra.gmra.mxu0 %vm682_vm4, %v5739_v48 }
0x3a68   :  { %7334 = vmatprep.mubr.msk.bf16.mxu0 %vm8211_vm0, %v8210_v0 }
0x3ae5   :  { %v5790_v39 = vpop.xlane.xlu0 %5789 }
0x3ae6   :  { %v5794_v36 = vsub.f32 %v5732_v6, %v5790_v39 }
0x3ae8   :  { %v5796_v41 = vmul.f32 1.442695, %v5794_v36 }
0x3aea   :  { %7605 = vpow2.f32 %v5796_v41 }
0x3af7   :  { %v7606_v43 = vpop.eup %7605 }
0x3af8   :  { %v5800_v30 = vsel %vm682_vm4, %v7606_v43, 0.0 }
0x3af9   :  { %5801 = vadd.xlane.f32.xlu0 %v5800_v30 }
0x3b1f   :  { %v5679_v46 = vpop.f32.mrf.mxu0 }
0x3b20   :  { %v5686_v17 = vadd.f32 %v5679_v46, %v5411_v44 }
0x3b21   :  { %v7312_v37 = vpop.f32.mrf.mxu0 }
0x3b23   :  { %v5682_v15 = vpop.f32.mrf.mxu0 }
0x3b24   :  { %v5687_v21 = vadd.f32 %v5682_v15, %v5414_v28 }
0x3b25   :  { %v7313_v49 = vpop.f32.mrf.mxu0 }
0x3b27   :  { %v5782_v56 = vpop.f32.mrf.mxu0 }
0x3b28   :  { %v5791_v50 = vsel %vm682_vm4, %v5782_v56, -inf }
0x3b29   :  { %5792 = vmax.xlane.f32.xlu1 %v5791_v50  ;;  %v7324_v19 = vpop.f32.mrf.mxu0 }
0x3b2b   :  { %v5785_v60 = vpop.f32.mrf.mxu0 }
0x3b2c   :  { %v539_v60 = vld [vmem:[#allocation35 + $0x38] sm:$0xff] }
0x3b2d   :  { %v7325_v40 = vpop.f32.mrf.mxu0 }
0x3b3a   :  { %5812 = vrot.lane.b32.xlu1 %v9222_v8, %s8222_s19 }
0x3b82   :  { %v5802_v16 = vpop.xlane.xlu0 %5801 }
0x3b83   :  { %7607 = vrcp.f32 %v5802_v16  ;;  %v536_v16 = vld [vmem:[#allocation35 + $0x20] sm:$0xff] }
0x3b90   :  { %v7608_v11 = vpop.eup %7607 }
0x3b91   :  { %v5808_v52 = vmul.f32 %v7608_v11, %v7606_v43  ;;  %v6490_v43 = vld [vmem:[#allocation20 + $0x1] ss:$0 sm:$0xff] }
0x3b92   :  { %v3291_v46 = vadd.f32 %v6490_v43, %v8984_v22  ;;  %v537_v11 = vld [vmem:[#allocation35 + $0x28] sm:$0xff] }
0x3b93   :  { %v5810_v53 = vpack.c.bf16 %v5808_v52, %v5808_v52 }
0x3bb2   :  { %v5793_v42 = vpop.xlane.xlu1 %5792 }
0x3bb3   :  { %v5795_v51 = vsub.f32 %v5782_v56, %v5793_v42 }
0x3bb5   :  { %v5798_v24 = vmul.f32 1.442695, %v5795_v51 }
0x3bb6   :  { %v5813_v12 = vpop.permute.xlu1 %5812 }
0x3bb7   :  { %7609 = vpow2.f32 %v5798_v24  ;;  %v5818_v18 = vsel %vm807_vm5, %v5813_v12, 0 }
0x3bb8   :  { %7327 = vmatpush3.bf16.msra.mxu1 %v5818_v18 }
0x3bb9   :  { %7338 = vmatprep.subr.bf16.mxu1 %v8210_v0 }
0x3bbb   :  { %7329 = vmatmul.mubr.msk.bf16.vlgmr.msra.gmra.mxu1 %vm682_vm4, %v5810_v53 }
0x3bbc   :  { %7340 = vmatprep.mubr.msk.bf16.mxu1 %vm8211_vm0, %v8210_v0  ;;  %7339 = vmatpush3.bf16.msra.mxu1 %v5914_v45 }
0x3bbd   :  { %7352 = vmatprep.subr.bf16.mxu1 %v8210_v0 }
0x3bc4   :  { %v7610_v8 = vpop.eup %7609 }
0x3bc5   :  { %v5803_v57 = vsel %vm682_vm4, %v7610_v8, 0.0 }
0x3bc6   :  { %5804 = vadd.xlane.f32.xlu0 %v5803_v57  ;;  %v6552_v57 = vld [vmem:[#allocation34 + $0x1] ss:$0 sm:$0xff] }
0x3bdc   :  { %5860 = vrot.lane.b32.xlu0 %v9226_v20, %s8222_s19 }
0x3c4f   :  { %v5805_v31 = vpop.xlane.xlu0 %5804 }
0x3c50   :  { %7611 = vrcp.f32 %v5805_v31  ;;  %v6553_v31 = vld [vmem:[%s9537_s1 + $0x1] ss:$0 sm:$0xff] }
0x3c53   :  { %v5861_v35 = vpop.permute.xlu0 %5860 }
0x3c54   :  { %v5866_v59 = vsel %vm807_vm5, %v5861_v35, 0 }
0x3c55   :  { %7333 = vmatpush3.bf16.msra.mxu0 %v5866_v59 }
0x3c56   :  { %7344 = vmatprep.subr.bf16.mxu0 %v8210_v0 }
0x3c5d   :  { %v7612_v25 = vpop.eup %7611 }
0x3c5e   :  { %v5809_v47 = vmul.f32 %v7612_v25, %v7610_v8 }
0x3c60   :  { %v5811_v61 = vpack.c.bf16 %v5809_v47, %v5809_v47 }
0x3c62   :  { %7335 = vmatmul.mubr.msk.bf16.vlgmr.msra.gmra.mxu0 %vm682_vm4, %v5811_v61  ;;  %v548_v61 = vld [vmem:[#allocation37 + $0x30] sm:$0xff] }
0x3c63   :  { %7348 = vmatprep.mubr.msk.bf16.mxu0 %vm8211_vm0, %v8210_v0 }
0x3c7b   :  { %v5854_v20 = vpop.f32.mrf.mxu1 }
0x3c7d   :  { %v7330_v63 = vpop.f32.mrf.mxu1 }
0x3c7f   :  { %v5857_v1 = vpop.f32.mrf.mxu1 }
0x3c80   :  { %v546_v1 = vld [vmem:[#allocation37 + $0x20] sm:$0xff] }
0x3c81   :  { %v7331_v4 = vpop.f32.mrf.mxu1 }
0x3c82   :  { %v547_v4 = vld [vmem:[#allocation37 + $0x28] sm:$0xff] }
0x3d22   :  { %v5902_v5 = vpop.f32.mrf.mxu0 }
0x3d23   :  { %v5908_v38 = vpack.c.bf16 %v5902_v5, %v5854_v20  ;;  %v549_v20 = vld [vmem:[#allocation37 + $0x38] sm:$0xff]  ;;  %v6083_v5 = vpack.c.bf16 %v547_v4, %v546_v1 }
0x3d24   :  { %v7336_v6 = vpop.f32.mrf.mxu0  ;;  %v6084_v63 = vpack.c.bf16 %v549_v20, %v548_v61 }
0x3d25   :  { %7341 = vmatmul.mubr.msk.bf16.vlgmr.msra.gmra.mxu1 %vm682_vm4, %v5908_v38  ;;  %v6554_v38 = vld [vmem:[%s9538_s25 + $0x1] ss:$0 sm:$0xff] }
0x3d26   :  { %v5905_v7 = vpop.f32.mrf.mxu0  ;;  %7356 = vmatprep.mubr.msk.bf16.mxu1 %vm8211_vm0, %v8210_v0  ;;  %7353 = vmatpush3.bf16.msra.mxu1 %v6084_v63 }
0x3d27   :  { %7354 = vmatprep.subr.bf16.mxu1 %v8210_v0 }
0x3d28   :  { %v7337_v32 = vpop.f32.mrf.mxu0 }
0x3d2a   :  { %7355 = vmatpush3.bf16.msra.mxu1 %v6083_v5 }
0x3d2b   :  { %7368 = vmatprep.subr.bf16.mxu1 %v8210_v0 }
0x3de5   :  { %v5950_v23 = vpop.f32.mrf.mxu1 }
0x3de6   :  { %v5957_v62 = vadd.f32 %v5950_v23, %v5686_v17 }
0x3de7   :  { %v7342_v27 = vpop.f32.mrf.mxu1 }
0x3de8   :  { %v5965_v29 = vadd.f32 %v6551_v13, %v5957_v62 }
0x3de9   :  { %v5953_v33 = vpop.f32.mrf.mxu1 }
0x3dea   :  { %v5958_v9 = vadd.f32 %v5953_v33, %v5687_v21  ;;  %v5967_v34 = vadd.f32 %v5965_v29, %v9213_v2  ;;  %v9420_v2 = vadd.f32 %v3291_v46, %v8946_v54  ;;  %v3294_v21 = vadd.f32 %v6490_v43, %v8986_v14  ;;  %v538_v14 = vld [vmem:[#allocation35 + $0x30] sm:$0xff] }
0x3deb   :  { %v7343_v10 = vpop.f32.mrf.mxu1  ;;  %v6013_v40 = vpack.c.bf16 %v539_v60, %v538_v14 }
0x3dec   :  { %v5966_v48 = vadd.f32 %v6551_v13, %v5958_v9  ;;  %v5969_v39 = vsel %vm628_vm3, %v5967_v34, 0.0  ;;  %v9425_v50 = vadd.f32 %v3294_v21, %v8948_v55  ;;  %v3299_v22 = vsel %vm628_vm3, %v9420_v2, 0.0 }
0x3ded   :  { %5970 = vadd.xlane.f32.xlu1 %v5969_v39  ;;  %7345 = vmatpush3.bf16.msra.mxu0 %v6013_v40  ;;  %v6012_v55 = vpack.c.bf16 %v537_v11, %v536_v16 }
0x3dee   :  { %v5968_v36 = vadd.f32 %v5966_v48, %v9215_v3  ;;  %v3302_v54 = vsel %vm628_vm3, %v9425_v50, 0.0  ;;  %7346 = vmatprep.subr.bf16.mxu0 %v8210_v0 }
0x3df0   :  { %v5972_v41 = vsel %vm628_vm3, %v5968_v36, 0.0 }
0x3df1   :  { %5973 = vadd.xlane.f32.xlu0 %v5972_v41  ;;  %7347 = vmatpush3.bf16.msra.mxu0 %v6012_v55 }
0x3df2   :  { %7360 = vmatprep.subr.bf16.mxu0 %v8210_v0 }
0x3e76   :  { %v5971_v30 = vpop.xlane.xlu1 %5970 }
0x3e77   :  { %v5975_v44 = vmul.f32 0.03125, %v5971_v30 }
0x3e79   :  { %v5977_v17 = vsub.f32 %v5967_v34, %v5975_v44 }
0x3e7a   :  { %v5974_v37 = vpop.xlane.xlu0 %5973 }
0x3e7b   :  { %v5976_v28 = vmul.f32 0.03125, %v5974_v37  ;;  %v5979_v15 = vmul.f32 %v5977_v17, %v5977_v17 }
0x3e7d   :  { %v5978_v49 = vsub.f32 %v5968_v36, %v5976_v28  ;;  %v5981_v3 = vsel %vm628_vm3, %v5979_v15, 0.0 }
0x3e7e   :  { %5982 = vadd.xlane.f32.xlu1 %v5981_v3 }
0x3e7f   :  { %v5980_v56 = vmul.f32 %v5978_v49, %v5978_v49 }
0x3e81   :  { %v5984_v19 = vsel %vm628_vm3, %v5980_v56, 0.0 }
0x3e82   :  { %3300 = vadd.xlane.f32.xlu1 %v3299_v22  ;;  %5985 = vadd.xlane.f32.xlu0 %v5984_v19  ;;  %v6556_v22 = vld [vmem:[%s9539_s2 + $0x1] ss:$0 sm:$0xff] }
0x3e86   :  { %3303 = vadd.xlane.f32.xlu0 %v3302_v54 }
0x3f07   :  { %v5983_v42 = vpop.xlane.xlu1 %5982 }
0x3f08   :  { %v5987_v51 = vmul.f32 0.03125, %v5983_v42 }
0x3f0a   :  { %v5989_v52 = vadd.f32 1e-05, %v5987_v51 }
0x3f0b   :  { %v5986_v24 = vpop.xlane.xlu0 %5985 }
0x3f0c   :  { %7613 = vrsqrt.f32 %v5989_v52  ;;  %v5988_v12 = vmul.f32 0.03125, %v5986_v24 }
0x3f0e   :  { %v5990_v18 = vadd.f32 1e-05, %v5988_v12 }
0x3f0f   :  { %v3304_v56 = vpop.xlane.xlu0 %3303 }
0x3f10   :  { %7615 = vrsqrt.f32 %v5990_v18  ;;  %v3306_v14 = vmul.f32 0.03125, %v3304_v56 }
0x3f12   :  { %v3308_v55 = vsub.f32 %v9425_v50, %v3306_v14 }
0x3f19   :  { %v7614_v53 = vpop.eup %7613 }
0x3f1a   :  { %v5993_v8 = vmul.f32 %v7614_v53, %v5977_v17 }
0x3f1c   :  { %v6001_v26 = vmul.f32 %v6552_v57, %v5993_v8  ;;  %v3310_v8 = vmul.f32 %v3308_v55, %v3308_v55 }
0x3f1d   :  { %v7616_v58 = vpop.eup %7615 }
0x3f1e   :  { %v5994_v45 = vmul.f32 %v7616_v58, %v5978_v49  ;;  %v6009_v59 = vadd.f32 %v6553_v31, %v6001_v26  ;;  %v3301_v49 = vpop.xlane.xlu1 %3300 }
0x3f1f   :  { %v3305_v3 = vmul.f32 0.03125, %v3301_v49 }
0x3f20   :  { %v6002_v35 = vmul.f32 %v6552_v57, %v5994_v45 }
0x3f21   :  { %v3307_v54 = vsub.f32 %v9420_v2, %v3305_v3  ;;  %v3314_v2 = vsel %vm628_vm3, %v3310_v8, 0.0 }
0x3f22   :  { %v6010_v25 = vadd.f32 %v6553_v31, %v6002_v35 }
0x3f23   :  { %v3309_v52 = vmul.f32 %v3307_v54, %v3307_v54 }
0x3f24   :  { %v6011_v47 = vpack.c.bf16 %v6010_v25, %v6009_v59 }
0x3f25   :  { %v3311_v18 = vsel %vm628_vm3, %v3309_v52, 0.0  ;;  %v6239_v52 = vld [vmem:[%s8402_s8 + $0x10] sm:$0xff] }
0x3f26   :  { %7349 = vmatmul.mubr.msk.bf16.vlgmr.msra.gmra.mxu0 %vm628_vm3, %v6011_v47 }
0x3f27   :  { %7364 = vmatprep.mubr.msk.bf16.mxu0 %vm8211_vm0, %v8210_v0 }
0x3fe6   :  { %v6057_v6 = vpop.f32.mrf.mxu0 }
0x3fe7   :  { %v6058_v7 = vadd.f32 %v6554_v38, %v6057_v6  ;;  %v6492_v6 = vld [vmem:[#allocation22 + $0x1] ss:$0 sm:$0xff] }
0x3fe8   :  { %v7350_v32 = vpop.f32.mrf.mxu0 }
0x3fe9   :  { %v6066_v13 = vmul.f32 0.044715, %v6058_v7  ;;  %v6064_v46 = vmul.f32 0.5, %v6058_v7  ;;  %v6493_v32 = vld [vmem:[#allocation23 + $0x1] ss:$0 sm:$0xff] }
0x3fea   :  { %v6060_v23 = vpop.f32.mrf.mxu0 }
0x3feb   :  { %v6068_v62 = vmul.f32 %v6066_v13, %v6058_v7  ;;  %v6061_v27 = vadd.f32 %v6554_v38, %v6060_v23 }
0x3fec   :  { %v7351_v29 = vpop.f32.mrf.mxu0 }
0x3fed   :  { %v6070_v33 = vmul.f32 %v6068_v62, %v6058_v7  ;;  %v6067_v9 = vmul.f32 0.044715, %v6061_v27  ;;  %v6065_v17 = vmul.f32 0.5, %v6061_v27 }
0x3fef   :  { %v6072_v34 = vadd.f32 %v6070_v33, %v6058_v7  ;;  %v6069_v10 = vmul.f32 %v6067_v9, %v6061_v27 }
0x3ff1   :  { %v6074_v48 = vmul.f32 0.7978846, %v6072_v34  ;;  %v6071_v39 = vmul.f32 %v6069_v10, %v6061_v27 }
0x3ff3   :  { %7617 = vtanh.f32 %v6074_v48  ;;  %v6073_v36 = vadd.f32 %v6071_v39, %v6061_v27 }
0x3ff5   :  { %v6075_v41 = vmul.f32 0.7978846, %v6073_v36 }
0x3ff7   :  { %7619 = vtanh.f32 %v6075_v41 }
0x4000   :  { %v7618_v43 = vpop.eup %7617 }
0x4001   :  { %v6078_v30 = vadd.f32 1.0, %v7618_v43 }
0x4003   :  { %v6080_v28 = vmul.f32 %v6078_v30, %v6064_v46 }
0x4004   :  { %v7620_v44 = vpop.eup %7619 }
0x4005   :  { %v6079_v37 = vadd.f32 1.0, %v7620_v44  ;;  %v6558_v44 = vld [vmem:[%s9540_s17 + $0x1] ss:$0 sm:$0xff] }
0x4007   :  { %v6081_v15 = vmul.f32 %v6079_v37, %v6065_v17  ;;  %v6559_v17 = vld [vmem:[%s9541_s7 + $0x1] ss:$0 sm:$0xff] }
0x4009   :  { %v6082_v21 = vpack.c.bf16 %v6081_v15, %v6080_v28 }
0x400b   :  { %7357 = vmatmul.mubr.msk.bf16.vlgmr.msra.gmra.mxu1 %vm628_vm3, %v6082_v21 }
0x400c   :  { %7372 = vmatprep.mubr.msk.bf16.mxu1 %vm8211_vm0, %v8210_v0 }
0x40cb   :  { %v6128_v19 = vpop.f32.mrf.mxu1 }
0x40cc   :  { %v6129_v60 = vadd.f32 %v6556_v22, %v6128_v19 }
0x40cd   :  { %v7358_v40 = vpop.f32.mrf.mxu1 }
0x40ce   :  { %v6135_v16 = vadd.f32 %v6129_v60, %v6009_v59 }
0x40cf   :  { %v6131_v11 = vpop.f32.mrf.mxu1 }
0x40d0   :  { %v6132_v42 = vadd.f32 %v6556_v22, %v6131_v11  ;;  %v6137_v51 = vsel %vm628_vm3, %v6135_v16, 0.0 }
0x40d1   :  { %6138 = vadd.xlane.f32.xlu1 %v6137_v51  ;;  %v7359_v24 = vpop.f32.mrf.mxu1 }
0x40d2   :  { %v6136_v12 = vadd.f32 %v6132_v42, %v6010_v25  ;;  %v6240_v24 = vld [vmem:[%s8402_s8 + $0x18] sm:$0xff] }
0x40d4   :  { %v6140_v53 = vsel %vm628_vm3, %v6136_v12, 0.0 }
0x40d5   :  { %3312 = vadd.xlane.f32.xlu1 %v3311_v18  ;;  %6141 = vadd.xlane.f32.xlu0 %v6140_v53  ;;  %v6248_v18 = vpack.c.bf16 %v6240_v24, %v6239_v52  ;;  %v6238_v53 = vld [vmem:[%s8402_s8 + $0x8] sm:$0xff] }
0x40d7   :  { %7369 = vmatpush3.bf16.msra.mxu1 %v6248_v18 }
0x40d8   :  { %7370 = vmatprep.subr.bf16.mxu1 %v8210_v0 }
0x40d9   :  { %3315 = vadd.xlane.f32.xlu0 %v3314_v2 }
0x415a   :  { %v6139_v57 = vpop.xlane.xlu1 %6138 }
0x415b   :  { %v6143_v58 = vmul.f32 0.03125, %v6139_v57 }
0x415d   :  { %v6145_v50 = vsub.f32 %v6135_v16, %v6143_v58 }
0x415e   :  { %v3313_v26 = vpop.xlane.xlu1 %3312  ;;  %v6142_v45 = vpop.xlane.xlu0 %6141 }
0x415f   :  { %v3317_v31 = vmul.f32 0.03125, %v3313_v26  ;;  %v6144_v35 = vmul.f32 0.03125, %v6142_v45  ;;  %v6147_v59 = vmul.f32 %v6145_v50, %v6145_v50 }
0x4161   :  { %v3319_v47 = vadd.f32 1e-05, %v3317_v31  ;;  %v6146_v25 = vsub.f32 %v6136_v12, %v6144_v35  ;;  %v6149_v61 = vsel %vm628_vm3, %v6147_v59, 0.0  ;;  %v6237_v12 = vld [vmem:[%s8402_s8] sm:$0xff] }
0x4162   :  { %6150 = vadd.xlane.f32.xlu1 %v6149_v61  ;;  %v3316_v20 = vpop.xlane.xlu0 %3315  ;;  %v6247_v8 = vpack.c.bf16 %v6238_v53, %v6237_v12  ;;  %v6560_v53 = vld [vmem:[%s9542_s29] ss:$0 sm:$0xff] }
0x4163   :  { %7621 = vrsqrt.f32 %v3319_v47  ;;  %v3318_v63 = vmul.f32 0.03125, %v3316_v20  ;;  %v6148_v1 = vmul.f32 %v6146_v25, %v6146_v25 }
0x4164   :  { %7371 = vmatpush3.bf16.msra.mxu1 %v6247_v8 }
0x4165   :  { %v3320_v4 = vadd.f32 1e-05, %v3318_v63  ;;  %v6152_v5 = vsel %vm628_vm3, %v6148_v1, 0.0 }
0x4166   :  { %6153 = vadd.xlane.f32.xlu0 %v6152_v5 }
0x4167   :  { %7623 = vrsqrt.f32 %v3320_v4 }
0x4170   :  { %v7622_v38 = vpop.eup %7621 }
0x4171   :  { %v3323_v7 = vmul.f32 %v7622_v38, %v3307_v54  ;;  %v6494_v38 = vld [vmem:[#allocation25] ss:$0 sm:$0xff] }
0x4173   :  { %v3331_v13 = vmul.f32 %v6492_v6, %v3323_v7  ;;  %v6495_v7 = vld [vmem:[#allocation26] ss:$0 sm:$0xff] }
0x4174   :  { %v7624_v23 = vpop.eup %7623 }
0x4175   :  { %v3339_v62 = vadd.f32 %v6493_v32, %v3331_v13  ;;  %v3324_v27 = vmul.f32 %v7624_v23, %v3308_v55 }
0x4177   :  { %v3341_v29 = vsel %vm628_vm3, %v3339_v62, 0.0  ;;  %v3332_v33 = vmul.f32 %v6492_v6, %v3324_v27 }
0x4178   :  { %3342 = vadd.xlane.f32.xlu1 %v3341_v29 }
0x4179   :  { %v3340_v9 = vadd.f32 %v6493_v32, %v3332_v33 }
0x417b   :  { %v3344_v34 = vsel %vm628_vm3, %v3340_v9, 0.0 }
0x417c   :  { %3345 = vadd.xlane.f32.xlu0 %v3344_v34 }
0x41eb   :  { %v6151_v10 = vpop.xlane.xlu1 %6150 }
0x41ec   :  { %v6155_v48 = vmul.f32 0.03125, %v6151_v10 }
0x41ee   :  { %v6157_v39 = vadd.f32 1e-05, %v6155_v48 }
0x41ef   :  { %v6154_v36 = vpop.xlane.xlu0 %6153 }
0x41f0   :  { %7625 = vrsqrt.f32 %v6157_v39  ;;  %v6156_v41 = vmul.f32 0.03125, %v6154_v36 }
0x41f2   :  { %v6158_v43 = vadd.f32 1e-05, %v6156_v41 }
0x41f4   :  { %7627 = vrsqrt.f32 %v6158_v43 }
0x41fd   :  { %v7626_v30 = vpop.eup %7625 }
0x41fe   :  { %v6161_v46 = vmul.f32 %v7626_v30, %v6145_v50 }
0x4200   :  { %v6169_v37 = vmul.f32 %v6558_v44, %v6161_v46 }
0x4201   :  { %v7628_v28 = vpop.eup %7627  ;;  %v3343_v15 = vpop.xlane.xlu1 %3342 }
0x4202   :  { %v3347_v21 = vmul.f32 0.03125, %v3343_v15  ;;  %v6177_v49 = vadd.f32 %v6559_v17, %v6169_v37  ;;  %v6162_v3 = vmul.f32 %v7628_v28, %v6146_v25 }
0x4204   :  { %v3349_v56 = vsub.f32 %v3339_v62, %v3347_v21  ;;  %v6179_v22 = vsel %vm628_vm3, %v6177_v49, 0.0  ;;  %v6170_v19 = vmul.f32 %v6558_v44, %v6162_v3 }
0x4205   :  { %6180 = vadd.xlane.f32.xlu1 %v6179_v22  ;;  %v3346_v54 = vpop.xlane.xlu0 %3345 }
0x4206   :  { %v3348_v14 = vmul.f32 0.03125, %v3346_v54  ;;  %v3351_v60 = vmul.f32 %v3349_v56, %v3349_v56  ;;  %v6178_v40 = vadd.f32 %v6559_v17, %v6170_v19  ;;  %v6243_v54 = vld [vmem:[%s8402_s8 + $0x30] sm:$0xff] }
0x4208   :  { %v3350_v16 = vsub.f32 %v3340_v9, %v3348_v14  ;;  %v3353_v11 = vsel %vm628_vm3, %v3351_v60, 0.0  ;;  %v6182_v55 = vsel %vm628_vm3, %v6178_v40, 0.0  ;;  %v6244_v14 = vld [vmem:[%s8402_s8 + $0x38] sm:$0xff]  ;;  %v6241_v60 = vld [vmem:[%s8402_s8 + $0x20] sm:$0xff] }
0x4209   :  { %3354 = vadd.xlane.f32.xlu1 %v3353_v11  ;;  %6183 = vadd.xlane.f32.xlu0 %v6182_v55 }
0x420a   :  { %v3352_v42 = vmul.f32 %v3350_v16, %v3350_v16 }
0x420c   :  { %v3356_v51 = vsel %vm628_vm3, %v3352_v42, 0.0 }
0x420d   :  { %3357 = vadd.xlane.f32.xlu0 %v3356_v51 }
0x428e   :  { %v6181_v2 = vpop.xlane.xlu1 %6180 }
0x428f   :  { %v6185_v57 = vmul.f32 0.03125, %v6181_v2  ;;  %v6561_v2 = vld [vmem:[%s8397_s12] ss:$0 sm:$0xff] }
0x4291   :  { %v9466_v58 = vsub.f32 %v6177_v49, %v6185_v57 }
0x4292   :  { %v3355_v50 = vpop.xlane.xlu1 %3354  ;;  %v6184_v26 = vpop.xlane.xlu0 %6183 }
0x4293   :  { %v3359_v45 = vmul.f32 0.03125, %v3355_v50  ;;  %v6186_v31 = vmul.f32 0.03125, %v6184_v26  ;;  %v6189_v35 = vmul.f32 %v9466_v58, %v9466_v58 }
0x4295   :  { %v3361_v59 = vadd.f32 1e-05, %v3359_v45  ;;  %v9470_v47 = vsub.f32 %v6178_v40, %v6186_v31  ;;  %v6191_v25 = vsel %vm628_vm3, %v6189_v35, 0.0  ;;  %v6252_v40 = vpack.c.bf16 %v6244_v14, %v6243_v54 }
0x4296   :  { %6192 = vadd.xlane.f32.xlu1 %v6191_v25  ;;  %v3358_v61 = vpop.xlane.xlu0 %3357 }
0x4297   :  { %7629 = vrsqrt.f32 %v3361_v59  ;;  %v3360_v20 = vmul.f32 0.03125, %v3358_v61  ;;  %v6190_v63 = vmul.f32 %v9470_v47, %v9470_v47  ;;  %7361 = vmatpush3.bf16.msra.mxu0 %v6252_v40 }
0x4298   :  { %7362 = vmatprep.subr.bf16.mxu0 %v8210_v0 }
0x4299   :  { %v3362_v1 = vadd.f32 1e-05, %v3360_v20  ;;  %v6194_v4 = vsel %vm628_vm3, %v6190_v63, 0.0 }
0x429a   :  { %6195 = vadd.xlane.f32.xlu0 %v6194_v4 }
0x429b   :  { %7631 = vrsqrt.f32 %v3362_v1 }
0x42a4   :  { %v7630_v5 = vpop.eup %7629 }
0x42a5   :  { %v3365_v6 = vmul.f32 %v7630_v5, %v3349_v56 }
0x42a7   :  { %v3373_v32 = vmul.f32 %v6494_v38, %v3365_v6 }
0x42a8   :  { %v7632_v13 = vpop.eup %7631 }
0x42a9   :  { %v3381_v23 = vadd.f32 %v6495_v7, %v3373_v32  ;;  %v3366_v62 = vmul.f32 %v7632_v13, %v3350_v16  ;;  %v6242_v16 = vld [vmem:[%s8402_s8 + $0x28] sm:$0xff]  ;;  %s8223_s8 = smov [#allocation38]  }
0x42aa   :  { %v6251_v11 = vpack.c.bf16 %v6242_v16, %v6241_v60  ;;  %s6374_s12 = sshll.u32 %s8223_s8, 4  ;;  %s6375_s12 = int_to_ptr.vmem [resolvable:$true] %s6374_s12 }
0x42ab   :  { %v3383_v27 = vsel %vm628_vm3, %v3381_v23, 0.0  ;;  %v3374_v29 = vmul.f32 %v6494_v38, %v3366_v62  ;;  %s8101_s0 = scalar_lea.vmem %s6375_s12, 32  ;;  %p8106_p4 = scmp.lt.s32.totalorder %s6375_s12, %s6375_s12 }
0x42ac   :  { %v3384_v33 = vrot.slane %v3383_v27, 4  ;;  %7363 = vmatpush3.bf16.msra.mxu0 %v6251_v11  ;;  %p8102_p3 = scmp.ne.s32.totalorder %s6375_s12, %s8101_s0  ;;  %p8107_p5 = scmp.lt.s32.totalorder %s8101_s0, %s8101_s0 }
0x42ad   :  { %v3382_v9 = vadd.f32 %v6495_v7, %v3374_v29 }
0x42ae   :  { %v3385_v34 = vadd.f32 %v3384_v33, %v3383_v27  ;;  %p8108_p6 = por %p8107_p5, %p8106_p4 }
0x42af   :  { %v3390_v10 = vsel %vm628_vm3, %v3382_v9, 0.0 }
0x42b0   :  { %v3386_v48 = vrot.slane %v3385_v34, 2  ;;  %v3391_v39 = vrot.slane %v3390_v10, 4  ;;  %p8109_p7 = pnand %p8108_p6, %p8102_p3 }
0x42b2   :  { %v3387_v36 = vadd.f32 %v3386_v48, %v3385_v34  ;;  %v3392_v41 = vadd.f32 %v3391_v39, %v3390_v10 }
0x42b4   :  { %v3393_v43 = vrot.slane %v3392_v41, 2  ;;  %v3388_v30 = vrot.slane %v3387_v36, 1 }
0x42b6   :  { %v3394_v44 = vadd.f32 %v3393_v43, %v3392_v41  ;;  %v3389_v46 = vadd.f32 %v3388_v30, %v3387_v36  ;;  %v6564_v41 = vld [vmem:[%s8407_s30] ss:$0 sm:$0xff] }
0x42b8   :  { %v3395_v17 = vrot.slane %v3394_v44, 1  ;;  %v3398_v37 = vmul.f32 0.125, %v3389_v46 }
0x42ba   :  { %v3396_v28 = vadd.f32 %v3395_v17, %v3394_v44  ;;  %v6245_v21 = vpack.c.bf16 %v3398_v37, %v3398_v37 }
0x42bc   :  { %v3399_v15 = vmul.f32 0.125, %v3396_v28  ;;  %v6305_v3 = vunpack.c.l.b16 %v6245_v21 }
0x42be   :  { %v6246_v49 = vpack.c.bf16 %v3399_v15, %v3399_v15 }
0x42c0   :  { %v6306_v56 = vunpack.c.l.b16 %v6246_v49 }
0x42c2   :  { %v6307_v22 = vsel %vm6257_vm8, %v6306_v56, %v6305_v3 }
0x42c3   :  { %v6308_v19 = vpack.c.b16 %v6307_v22, %v6307_v22 }
0x42c5   :  { %7373 = vmatmul.mubr.msk.bf16.vlgmr.msra.gmra.mxu1 %vm628_vm3, %v6308_v19 }
0x431f   :  { %v6193_v55 = vpop.xlane.xlu1 %6192 }
0x4320   :  { %v6197_v42 = vmul.f32 0.03125, %v6193_v55 }
0x4322   :  { %v6199_v51 = vadd.f32 1e-05, %v6197_v42 }
0x4323   :  { %v6196_v52 = vpop.xlane.xlu0 %6195 }
0x4324   :  { %7633 = vrsqrt.f32 %v6199_v51  ;;  %v6198_v24 = vmul.f32 0.03125, %v6196_v52 }
0x4326   :  { %v6200_v12 = vadd.f32 1e-05, %v6198_v24 }
0x4328   :  { %7635 = vrsqrt.f32 %v6200_v12 }
0x4331   :  { %v7634_v18 = vpop.eup %7633 }
0x4332   :  { %v6203_v8 = vmul.f32 %v7634_v18, %v9466_v58 }
0x4334   :  { %v6211_v57 = vmul.f32 %v6560_v53, %v6203_v8 }
0x4335   :  { %v7636_v50 = vpop.eup %7635 }
0x4336   :  { %v6219_v26 = vadd.f32 %v6561_v2, %v6211_v57  ;;  %v6204_v45 = vmul.f32 %v7636_v50, %v9470_v47 }
0x4338   :  { %v6221_v0 = vsel %vm628_vm3, %v6219_v26, 0.0  ;;  %v6212_v31 = vmul.f32 %v6560_v53, %v6204_v45 }
0x4339   :  { %v6222_v35 = vrot.slane %v6221_v0, 4 }
0x433a   :  { %v6220_v59 = vadd.f32 %v6561_v2, %v6212_v31 }
0x433b   :  { %v6223_v25 = vadd.f32 %v6222_v35, %v6221_v0 }
0x433c   :  { %v6228_v61 = vsel %vm628_vm3, %v6220_v59, 0.0 }
0x433d   :  { %v6224_v20 = vrot.slane %v6223_v25, 2  ;;  %v6229_v63 = vrot.slane %v6228_v61, 4 }
0x433f   :  { %v6225_v1 = vadd.f32 %v6224_v20, %v6223_v25  ;;  %v6230_v4 = vadd.f32 %v6229_v63, %v6228_v61 }
0x4341   :  { %v6231_v5 = vrot.slane %v6230_v4, 2  ;;  %v6226_v58 = vrot.slane %v6225_v1, 1 }
0x4343   :  { %v6232_v38 = vadd.f32 %v6231_v5, %v6230_v4  ;;  %v6227_v6 = vadd.f32 %v6226_v58, %v6225_v1 }
0x4345   :  { %v6233_v7 = vrot.slane %v6232_v38, 1  ;;  %v6235_v32 = vmul.f32 0.125, %v6227_v6 }
0x4347   :  { %v6234_v47 = vadd.f32 %v6233_v7, %v6232_v38  ;;  %v6249_v23 = vpack.c.bf16 %v6235_v32, %v6235_v32 }
0x4349   :  { %v6236_v13 = vmul.f32 0.125, %v6234_v47  ;;  %v6255_v27 = vunpack.c.l.b16 %v6249_v23 }
0x434b   :  { %v6250_v62 = vpack.c.bf16 %v6236_v13, %v6236_v13 }
0x434d   :  { %v6256_v29 = vunpack.c.l.b16 %v6250_v62 }
0x434f   :  { %v6258_v33 = vsel %vm6257_vm8, %v6256_v29, %v6255_v27 }
0x4350   :  { %v6259_v9 = vpack.c.b16 %v6258_v33, %v6258_v33 }
0x4352   :  { %7365 = vmatmul.mubr.msk.bf16.vlgmr.msra.gmra.mxu0 %vm628_vm3, %v6259_v9 }
0x4385   :  { %v6346_v34 = vpop.f32.mrf.mxu1 }
0x4387   :  { %v7374_v10 = vpop.f32.mrf.mxu1 }
0x4389   :  { %v6349_v48 = vpop.f32.mrf.mxu1 }
0x438b   :  { %v7375_v39 = vpop.f32.mrf.mxu1 }
0x4412   :  { %v6297_v36 = vpop.f32.mrf.mxu0 }
0x4413   :  { %v6347_v43 = vadd.f32 %v6346_v34, %v6297_v36 }
0x4414   :  { %v7366_v30 = vpop.f32.mrf.mxu0 }
0x4415   :  { %v6359_v44 = vadd.f32 %v6564_v41, %v6347_v43 }
0x4416   :  { %v6300_v46 = vpop.f32.mrf.mxu0 }
0x4417   :  { %v6565_v17 = vmul.f32 -1.442695, %v6359_v44 }
0x4418   :  { %v7367_v37 = vpop.f32.mrf.mxu0 }
0x4419   :  { %7637 = vpow2.f32 %v6565_v17 }
0x4426   :  { %v7638_v28 = vpop.eup %7637 }
0x4427   :  { %v6363_v15 = vadd.f32 1.0, %v7638_v28 }
0x4429   :  { %7639 = vrcp.f32 %v6363_v15 }
0x4436   :  { %v7640_v21 = vpop.eup %7639 }
0x4437   :  { %6367 = vst.msk [vmem:[#allocation38] sm:$0x3] %vm6366_vm9, %v7640_v21 }
0x4438   :  { %8112 = shalt.err (!%p8109_p7)
}
0x4439   :  { %6377 = dma.vmem_to_hbm [thread:$0]  %s6375_s12, 32, %s8412_s27, [#allocation4]  }
0x443a   :  { %8145 = dma.done.wait [#allocation4], 32  }
0x443b   :  { %8146 = vsyncadd [#allocation4], 4294967264 }
0x443c   :  { %6381 = vsyncpa [#allocation3], 1 }
0x443d   :  { %6382 = vsyncpa [#allocation6], 1 }
0x443e   :  { %6383 = vsyncpa [#allocation9], 1 }
0x443f   :  { %6384 = vsyncpa [#allocation12], 1 }
0x4440   :  { %6385 = vsyncpa [#allocation15], 1 }
0x4441   :  { %6386 = vsyncpa [#allocation18], 1 }
0x4442   :  { %6387 = vsyncpa [#allocation21], 1 }
0x4443   :  { %6388 = vsyncpa [#allocation24], 1 }
0x4444   :  { %6389 = vsyncpa [#allocation27], 1 }
0x4445   :  { %6390 = vsyncpa [#allocation30], 1 }
0x4446   :  { %6391 = vsyncpa [#allocation33], 1 }
0x4447   :  { %6392 = vsyncpa [#allocation36], 1 }
0x4448   :  { %6393 = vsyncpa [#allocation4], 1 }

</bundles_post_ra>
